<compile_context>
chip_gen: v6e
topology: v6e:2x2x1
jax: 0.10.0
libtpu: 0.0.40
codegen_flags: <defaults>
</compile_context>

<pallas_src>
import functools

import jax
import jax.numpy as jnp
import numpy as np
from jax.experimental import pallas as pl
from jax.experimental.pallas import tpu as pltpu

LRELU_SLOPE = 0.1
KSIZE = 3
DILATIONS = (1, 3, 5)
_HALO = sum(d + 1 for d in DILATIONS)  # 12 rows of halo on each side


def _round_up(x, m):
    return (x + m - 1) // m * m


def _vmem_capacity_bytes():
    """Physical VMEM of the local chip (64 MiB on v7x, 128 MiB on v5e/v6e)."""
    try:
        cap = getattr(pltpu.get_tpu_info(), "vmem_capacity_bytes", None)
        if cap:
            return int(cap)
    except Exception:  # noqa: BLE001 - interpret mode / unknown backend
        pass
    return 64 << 20  # conservative (v7x-sized) default


def _pick_tile_t(T, Cp, in_bytes, cd_bytes, tile_t, vmem_cap):
    """Pick a time-tile size that keeps the VMEM working set bounded."""
    if tile_t is None:
        # Resident weights (worst case: double-buffered, so the no-Buffered(1)
        # fallback still fits) + activation working set inside ~40% of VMEM.
        w_foot = 2 * (2 * len(DILATIONS)) * KSIZE * Cp * Cp * cd_bytes
        act_budget = max(4 << 20, int(0.40 * vmem_cap) - w_foot)
        # xbuf(x2) + out block(x2) + tap scratch + f32 carry + f32 temporaries.
        per_row = Cp * (4 * in_bytes + cd_bytes + 16)
        tile_t = act_budget // max(per_row, 1)
        tt_cap = 4096 if vmem_cap >= (96 << 20) else 2048
        tile_t = max(256, min(tt_cap, tile_t))  # >=256: 24-row halo is <10%
    tile_t = max(8, (int(tile_t) // 8) * 8)
    return min(tile_t, _round_up(T, 8))


def _resblock_kernel(xp_ref, w_ref, b_ref, o_ref,
                     xbuf, abuf, cbuf, sem,
                     *, seq_len, tile_t, dilations, cdtype,
                     lowp_eltwise, mask_x_taps):
    f32 = jnp.float32
    halo = sum(d + 1 for d in dilations)
    tx = tile_t + 2 * halo
    cp = o_ref.shape[-1]

    seg = pl.program_id(0)            # parallel time segment (megacore)
    b = pl.program_id(1)              # batch row        (sequential)
    t = pl.program_id(2)              # tile in segment  (sequential)
    n_b = pl.num_programs(1)
    n_ts = pl.num_programs(2)

    gt = seg * n_ts + t               # global time-tile index
    step = b * n_ts + t               # per-core step counter -> buffer parity
    slot = step % 2
    nxt = 1 - slot

    def copy_tile(bi, gti, sl):
        start = pl.multiple_of(gti * tile_t, 8)
        return pltpu.make_async_copy(
            xp_ref.at[bi, pl.ds(start, tx), :], xbuf.at[sl], sem.at[sl])

    # Prime the pipeline once per core (cores split only the parallel `seg`
    # axis, so every core's first step has b == 0 and t == 0).
    @pl.when((b == 0) & (t == 0))
    def _():
        copy_tile(b, gt, slot).start()

    # Prefetch the tile this core will process next: next tile of the same
    # batch row, or the first tile of the next batch row (same segment).  On
    # the core's final step nothing is started -> no DMA left outstanding.
    @pl.when(t + 1 < n_ts)
    def _():
        copy_tile(b, gt + 1, nxt).start()

    @pl.when((t + 1 == n_ts) & (b + 1 < n_b))
    def _():
        copy_tile(b + 1, seg * n_ts, nxt).start()

    # Wait with a descriptor identical to the one used at .start().
    copy_tile(b, gt, slot).wait()

    t0 = gt * tile_t                  # global row index of this tile's output
    # Masking is only needed on tiles whose haloed window touches a sequence
    # edge; interior tiles take an unmasked fast path.
    need_mask = (t0 < halo) | (t0 + tile_t + halo > seq_len)
    no_mask = jnp.logical_not(need_mask)

    ew_dtype = cdtype if lowp_eltwise else f32

    def lrelu(v):
        return jnp.where(v >= 0, v, LRELU_SLOPE * v)

    def row_mask(length, global_start):
        rows = jax.lax.broadcasted_iota(jnp.int32, (length, cp), 0) + global_start
        return (rows >= 0) & (rows < seq_len)

    def write_taps(length, global_start, act):
        """Store conv taps, zeroing rows outside [0, seq_len) ('same' padding)
        only when this tile actually touches a boundary."""
        @pl.when(need_mask)
        def _():
            abuf[0:length] = jnp.where(row_mask(length, global_start),
                                       act, 0.0).astype(cdtype)

        @pl.when(no_mask)
        def _():
            abuf[0:length] = act.astype(cdtype)

    # Halo still required at the *input* of each dilation pair.
    margins = []
    r = halo
    for d in dilations:
        margins.append(r)
        r -= d + 1

    x_loc = xbuf[slot].astype(f32)    # (tx, cp); pre-zero-padded outside [0,T)

    for i, d in enumerate(dilations):
        rin = margins[i]
        rout = rin - (d + 1)
        l_in = tile_t + 2 * rin       # rows of this pair's input
        l_h = tile_t + 2 * rout + 2   # rows produced by conv-1
        l_y = tile_t + 2 * rout       # rows produced by conv-2 (= pair output)

        # --- conv-1 input taps: lrelu(cur), zeroed outside [0, seq_len) -----
        if i == 0:
            cur = x_loc
            act = lrelu(cur.astype(ew_dtype))
            if mask_x_taps:           # input rows past seq_len may be dirty
                write_taps(l_in, t0 - rin, act)
            else:                     # input is pre-zero-padded
                abuf[0:l_in] = act.astype(cdtype)
        else:
            cur = cbuf[0:l_in]        # previous pair output (f32)
            write_taps(l_in, t0 - rin, lrelu(cur.astype(ew_dtype)))
        res = cur[(d + 1):(d + 1) + l_y]          # residual rows (f32)

        # --- conv-1 (kernel 3, dilation d) as 3 shifted MXU matmuls ---------
        acc = jnp.dot(abuf[0:l_h], w_ref[2 * i, 0], preferred_element_type=f32)
        for k in range(1, KSIZE):
            acc += jnp.dot(abuf[k * d:k * d + l_h], w_ref[2 * i, k],
                           preferred_element_type=f32)
        acc += b_ref[2 * i].astype(f32)

        # --- conv-2 input taps (abuf reused; conv-1 already consumed it) ----
        write_taps(l_h, t0 - rout - 1, lrelu(acc.astype(ew_dtype)))

        # --- conv-2 (kernel 3, dilation 1) -----------------------------------
        acc2 = jnp.dot(abuf[0:l_y], w_ref[2 * i + 1, 0],
                       preferred_element_type=f32)
        for k in range(1, KSIZE):
            acc2 += jnp.dot(abuf[k:k + l_y], w_ref[2 * i + 1, k],
                            preferred_element_type=f32)
        acc2 += b_ref[2 * i + 1].astype(f32)

        # --- residual ---------------------------------------------------------
        y = acc2 + res
        if i == len(dilations) - 1:
            o_ref[0] = y.astype(o_ref.dtype)
        else:
            cbuf[0:l_y] = y


def resblock_forward_btc(x_btc, params, *, seq_len=None, compute_dtype=None,
                         tile_t=None, lowp_eltwise=None, unpad_output=True):
    """Fused ResBlock on channels-last input (B, T, C).

    seq_len:       true (unpadded) sequence length; defaults to x_btc.shape[1].
                   Pass it when feeding the padded output of a previous block
                   (unpad_output=False) straight into the next one.
    compute_dtype: matmul operand dtype (e.g. jnp.bfloat16); bias, accumulation
                   and the residual stay f32.
    lowp_eltwise:  run leaky_relu / masking in compute_dtype (defaults to True
                   iff compute_dtype is bf16).  Set False on v5e (no bf16 VPU).
    unpad_output:  slice the result back to (B, seq_len, C).  Keep False when
                   stacking ResBlocks so the (B, Tpad, Cp) activation is
                   carried without an extra HBM round-trip per block.
    """
    B, T_in, C_in = x_btc.shape
    C = params[0][0].shape[1]                 # true channel count (K, Cin, Cout)
    Cp = _round_up(C, 128)                    # lane-dense channels
    if C_in not in (C, Cp):
        raise ValueError(f"x has {C_in} channels; params expect {C} (or {Cp}).")
    T = int(seq_len) if seq_len is not None else T_in
    if not 0 < T <= T_in:
        raise ValueError("seq_len must be in (0, x.shape[1]].")

    in_dtype = jnp.dtype(x_btc.dtype)
    cdtype = jnp.dtype(compute_dtype) if compute_dtype is not None else in_dtype
    if lowp_eltwise is None:
        lowp_eltwise = cdtype == jnp.dtype(jnp.bfloat16)
    in_b, cd_b = in_dtype.itemsize, cdtype.itemsize

    vmem_cap = _vmem_capacity_bytes()
    TT = _pick_tile_t(T, Cp, in_b, cd_b, tile_t, vmem_cap)
    nT = -(-T // TT)                          # tiles needed to cover seq_len
    NSEG = 2 if nT >= 4 else 1                # parallel time segments (v7x 2 TCs)
    nTs = -(-nT // NSEG)                      # tiles per segment
    Tpad = NSEG * nTs * TT
    Tx = TT + 2 * _HALO
    n_conv = 2 * len(DILATIONS)

    # Pack / pad parameters: weights (6, K, Cp, Cp), biases (6, 1, Cp);
    # conv order [c1_0, c2_0, c1_1, c2_1, c1_2, c2_2].
    w_list, b_list = [], []
    for (w1, b1, w2, b2) in params:
        w_list += [w1, w2]
        b_list += [b1, b2]
    w_all = jnp.pad(jnp.stack(w_list),
                    ((0, 0), (0, 0), (0, Cp - C), (0, Cp - C))).astype(cdtype)
    b_all = jnp.pad(jnp.stack(b_list),
                    ((0, 0), (0, 0), (0, Cp - C))).astype(jnp.float32)

    # Single zero-pad of the input: halo rows on both ends of T + channel pad.
    x_core = x_btc if T_in <= Tpad else x_btc[:, :Tpad, :]
    xp = jnp.pad(x_core, ((0, 0), (_HALO, Tpad - x_core.shape[1] + _HALO),
                          (0, Cp - C_in)))
    mask_x_taps = T_in > T     # rows past seq_len may hold prior-block values

    kernel = functools.partial(
        _resblock_kernel, seq_len=T, tile_t=TT, dilations=DILATIONS,
        cdtype=cdtype, lowp_eltwise=bool(lowp_eltwise),
        mask_x_taps=bool(mask_x_taps))

    # VMEM sizing: scratch + double-buffered output block + resident weights
    # (budgeted at 2x so the no-Buffered(1) fallback still compiles), with a
    # generation-aware cap (~48 MiB on v7x, ~96 MiB on 128 MiB chips).
    act_vmem = Cp * (Tx * (2 * in_b + cd_b + 4 + 12) + 2 * TT * in_b)
    w_vmem = w_all.size * cd_b + b_all.size * 4
    vmem_limit = int(min(max(int(1.25 * act_vmem) + 2 * w_vmem + (2 << 20),
                             32 << 20),
                         int(0.75 * vmem_cap)))

    flops = 2 * B * NSEG * nTs * TT * KSIZE * Cp * Cp * n_conv
    bytes_accessed = int(xp.size * in_b + B * Tpad * Cp * in_b
                         + w_all.size * cd_b + b_all.size * 4)

    def build(single_buffer_weights):
        wmap = lambda s, b, t: (0, 0, 0, 0)   # noqa: E731
        bmap = lambda s, b, t: (0, 0, 0)      # noqa: E731
        if single_buffer_weights:
            # Constant index map -> DMA'd once; Buffered(1) also drops the
            # (unused) second resident copy of the weights.
            w_spec = pl.BlockSpec((n_conv, KSIZE, Cp, Cp), wmap,
                                  pipeline_mode=pl.Buffered(1))
            b_spec = pl.BlockSpec((n_conv, 1, Cp), bmap,
                                  pipeline_mode=pl.Buffered(1))
        else:
            w_spec = pl.BlockSpec((n_conv, KSIZE, Cp, Cp), wmap)
            b_spec = pl.BlockSpec((n_conv, 1, Cp), bmap)
        return pl.pallas_call(
            kernel,
            out_shape=jax.ShapeDtypeStruct((B, Tpad, Cp), in_dtype),
            grid_spec=pltpu.PrefetchScalarGridSpec(
                num_scalar_prefetch=0,
                grid=(NSEG, B, nTs),
                in_specs=[
                    pl.BlockSpec(memory_space=pl.ANY),   # x stays in HBM
                    w_spec,                              # weights resident
                    b_spec,                              # biases resident
                ],
                out_specs=pl.BlockSpec((1, TT, Cp),
                                       lambda s, b, t: (b, s * nTs + t, 0)),
                scratch_shapes=[
                    pltpu.VMEM((2, Tx, Cp), in_dtype),   # double-buffered x tile
                    pltpu.VMEM((Tx, Cp), cdtype),        # shared conv-tap buffer
                    pltpu.VMEM((Tx, Cp), jnp.float32),   # carried pair output
                    pltpu.SemaphoreType.DMA((2,)),
                ],
            ),
            compiler_params=pltpu.CompilerParams(
                # `seg` is split across TensorCores; `b` and `t` stay
                # sequential so the manual DMA prefetch chain (which crosses
                # the batch boundary) remains valid on every core.
                dimension_semantics=("parallel", "arbitrary", "arbitrary"),
                vmem_limit_bytes=vmem_limit,
            ),
            cost_estimate=pl.CostEstimate(
                flops=flops, transcendentals=0, bytes_accessed=bytes_accessed),
        )

    try:
        out = build(True)(xp, w_all, b_all)
    except Exception:  # noqa: BLE001 - pl.Buffered(1) unsupported -> default
        out = build(False)(xp, w_all, b_all)

    if unpad_output:
        return out[:, :T, :C]
    return out


def resblock_forward(x_nct, params, *, compute_dtype=None, tile_t=None,
                     lowp_eltwise=None):
    """PyTorch-layout entry point: x_nct is (B, C, T), like nn.Conv1d input.

    When stacking many ResBlocks, prefer resblock_forward_btc with
    unpad_output=False so the layout transpose and the un-pad slice happen
    once per model rather than once per block.
    """
    x_btc = jnp.transpose(x_nct, (0, 2, 1))
    y = resblock_forward_btc(x_btc, params, compute_dtype=compute_dtype,
                             tile_t=tile_t, lowp_eltwise=lowp_eltwise)
    return jnp.transpose(y, (0, 2, 1))


def make_params(key, channels):
    """Deterministic params mirroring weight_norm(Conv1d) + init_weights.

    weight_norm initializes g = ||v||, so the effective weight equals the raw
    N(0, 0.01) tensor; we generate the effective weights directly.
    """
    params = []
    for _ in DILATIONS:
        layer = []
        for _ in range(2):  # convs1[i], convs2[i]
            key, kw, kb = jax.random.split(key, 3)
            w_torch = 0.01 * jax.random.normal(
                kw, (channels, channels, KSIZE), jnp.float32)  # (Cout, Cin, K)
            bound = 1.0 / np.sqrt(channels * KSIZE)
            b = jax.random.uniform(kb, (1, channels), jnp.float32,
                                   minval=-bound, maxval=bound)
            w = jnp.transpose(w_torch, (2, 1, 0))              # (K, Cin, Cout)
            layer += [w, b]
        params.append(tuple(layer))
    return params


def _reference_forward(x_nct, params):
    """Pure-JAX reference (lax conv) for verification."""
    x = x_nct
    for d, (w1, b1, w2, b2) in zip(DILATIONS, params):
        def conv(inp, w_kcc, b_c, dil):
            w_oik = jnp.transpose(w_kcc, (2, 1, 0))            # (Cout, Cin, K)
            pad = (KSIZE * dil - dil) // 2
            y = jax.lax.conv_general_dilated(
                inp, w_oik, window_strides=(1,), padding=[(pad, pad)],
                rhs_dilation=(dil,),
                dimension_numbers=("NCH", "OIH", "NCH"))
            return y + b_c[0][None, :, None]
        xt = jnp.where(x >= 0, x, LRELU_SLOPE * x)
        xt = conv(xt, w1, b1, d)
        xt = jnp.where(xt >= 0, xt, LRELU_SLOPE * xt)
        xt = conv(xt, w2, b2, 1)
        x = xt + x
    return x


if __name__ == "__main__":
    key = jax.random.PRNGKey(0)
    key, kx = jax.random.split(key)
    B, C, T = 2, 8, 16
    x = jax.random.normal(kx, (B, C, T), jnp.float32)      # NCW, like PyTorch
    params = make_params(key, C)
    ref = _reference_forward(x, params)

    # 1) single-tile path (nT=1), f32 MXU -- exact vs. reference.
    out = jax.block_until_ready(resblock_forward(x, params))
    np.testing.assert_allclose(np.asarray(out), np.asarray(ref),
                               rtol=1e-4, atol=1e-4)

    # 2) multi-tile, single segment (nT=3): halos, boundary-mask gating,
    #    within-batch DMA prefetch chain.
    key, kx2 = jax.random.split(key)
    x2 = jax.random.normal(kx2, (1, C, 72), jnp.float32)
    out2 = jax.block_until_ready(resblock_forward(x2, params, tile_t=24))
    np.testing.assert_allclose(np.asarray(out2),
                               np.asarray(_reference_forward(x2, params)),
                               rtol=1e-4, atol=1e-4)

    # 3) multi-tile, two parallel time segments (nT=9 -> NSEG=2) with the
    #    cross-batch prefetch chain; interior tiles take the unmasked path.
    key, kx3 = jax.random.split(key)
    T3 = 200
    x3 = jax.random.normal(kx3, (2, C, T3), jnp.float32)
    ref3 = _reference_forward(x3, params)
    out3 = jax.block_until_ready(resblock_forward(x3, params, tile_t=24))
    np.testing.assert_allclose(np.asarray(out3), np.asarray(ref3),
                               rtol=1e-4, atol=1e-4)

    # 4) two chained ResBlocks keeping the padded activation between blocks
    #    (no inter-block slice; second block re-masks dirty time padding).
    x3_btc = jnp.transpose(x3, (0, 2, 1))
    y1 = resblock_forward_btc(x3_btc, params, tile_t=24, unpad_output=False)
    y2 = jax.block_until_ready(
        resblock_forward_btc(y1, params, seq_len=T3, tile_t=24))
    ref_chain = _reference_forward(ref3, params)
    np.testing.assert_allclose(np.asarray(y2),
                               np.asarray(jnp.transpose(ref_chain, (0, 2, 1))),
                               rtol=1e-4, atol=1e-4)

    # 5) bf16 MXU + bf16 element-wise (f32 accumulation/bias/residual).
    out_bf = jax.block_until_ready(
        resblock_forward(x, params, compute_dtype=jnp.bfloat16))
    np.testing.assert_allclose(np.asarray(out_bf), np.asarray(ref),
                               rtol=2e-2, atol=2e-2)

    print("KERNEL_OK")
</pallas_src>

<mosaic_0001>
module attributes {stable_mosaic.version = 11 : i64} {
  func.func @_resblock_kernel(%arg0: i32, %arg1: i32, %arg2: i32, %arg3: memref<2x40x128xf32, #tpu.memory_space<any>>, %arg4: memref<6x3x128x128xf32, #tpu.memory_space<vmem>>, %arg5: memref<6x1x128xf32, #tpu.memory_space<vmem>>, %arg6: memref<1x16x128xf32, #tpu.memory_space<vmem>>, %arg7: memref<2x40x128xf32, #tpu.memory_space<vmem>>, %arg8: memref<40x128xf32, #tpu.memory_space<vmem>>, %arg9: memref<40x128xf32, #tpu.memory_space<vmem>>, %arg10: memref<2x!tpu.dma_semaphore, #tpu.memory_space<semaphore_mem>>) attributes {dimension_semantics = [#tpu.dimension_semantics<parallel>, #tpu.dimension_semantics<arbitrary>, #tpu.dimension_semantics<arbitrary>], iteration_bounds = array<i64: 1, 2, 1>, scalar_prefetch = 0 : i64, scratch_operands = 4 : i64, tpu.core_type = #tpu.core_type<tc>, window_params = [{}, {pipeline_mode = #tpu.pipeline_mode<synchronous>, transform_indices = @transform_1, window_bounds = array<i64: 6, 3, 128, 128>}, {pipeline_mode = #tpu.pipeline_mode<synchronous>, transform_indices = @transform_2, window_bounds = array<i64: 6, 1, 128>}, {transform_indices = @transform_3, window_bounds = array<i64: 1, 16, 128>}]} {
    %c1_i32 = arith.constant 1 : i32
    %0 = arith.muli %arg0, %c1_i32 : i32
    %1 = arith.addi %0, %arg2 : i32
    %c1_i32_0 = arith.constant 1 : i32
    %2 = arith.muli %arg1, %c1_i32_0 : i32
    %3 = arith.addi %2, %arg2 : i32
    %c2_i32 = arith.constant 2 : i32
    %c0_i32 = arith.constant 0 : i32
    %4 = arith.cmpi eq, %c2_i32, %c0_i32 : i32
    %c1_i32_1 = arith.constant 1 : i32
    %5 = arith.select %4, %c1_i32_1, %c2_i32 : i32
    %6 = arith.remsi %3, %5 : i32
    %c0_i32_2 = arith.constant 0 : i32
    %7 = arith.cmpi ne, %6, %c0_i32_2 : i32
    %c0_i32_3 = arith.constant 0 : i32
    %8 = arith.cmpi slt, %6, %c0_i32_3 : i32
    %c0_i32_4 = arith.constant 0 : i32
    %9 = arith.cmpi slt, %5, %c0_i32_4 : i32
    %10 = arith.xori %8, %9 : i1
    %11 = arith.andi %10, %7 : i1
    %12 = arith.addi %6, %5 : i32
    %13 = arith.select %11, %12, %6 : i32
    %c1_i32_5 = arith.constant 1 : i32
    %14 = arith.subi %c1_i32_5, %13 : i32
    %c0_i32_6 = arith.constant 0 : i32
    %15 = arith.cmpi eq, %arg1, %c0_i32_6 : i32
    %c0_i32_7 = arith.constant 0 : i32
    %16 = arith.cmpi eq, %arg2, %c0_i32_7 : i32
    %17 = arith.andi %15, %16 : i1
    %18 = arith.extui %17 : i1 to i32
    %c0_i32_8 = arith.constant 0 : i32
    %19 = arith.cmpi ne, %18, %c0_i32_8 : i32
    scf.if %19 {
      %c16_i32_202 = arith.constant 16 : i32
      %229 = arith.muli %1, %c16_i32_202 : i32
      %230 = tpu.assume_multiple %229, 8 : i32
      %c0_i32_203 = arith.constant 0 : i32
      %231 = tpu.memref_slice %arg3[%arg1, %230, %c0_i32_203] : memref<2x40x128xf32, #tpu.memory_space<any>> -> memref<1x40x128xf32, #tpu.memory_space<any>>
      %232 = tpu.memref_squeeze %231 : memref<1x40x128xf32, #tpu.memory_space<any>> -> memref<40x128xf32, #tpu.memory_space<any>>
      %c0_i32_204 = arith.constant 0 : i32
      %c0_i32_205 = arith.constant 0 : i32
      %233 = tpu.memref_slice %arg7[%13, %c0_i32_204, %c0_i32_205] : memref<2x40x128xf32, #tpu.memory_space<vmem>> -> memref<1x40x128xf32, #tpu.memory_space<vmem>>
      %234 = tpu.memref_squeeze %233 : memref<1x40x128xf32, #tpu.memory_space<vmem>> -> memref<40x128xf32, #tpu.memory_space<vmem>>
      %235 = tpu.memref_slice %arg10[%13] : memref<2x!tpu.dma_semaphore, #tpu.memory_space<semaphore_mem>> -> memref<1x!tpu.dma_semaphore, #tpu.memory_space<semaphore_mem>>
      %236 = tpu.memref_squeeze %235 : memref<1x!tpu.dma_semaphore, #tpu.memory_space<semaphore_mem>> -> memref<!tpu.dma_semaphore, #tpu.memory_space<semaphore_mem>>
      tpu.enqueue_dma source(%232 : memref<40x128xf32, #tpu.memory_space<any>>) target(%234 : memref<40x128xf32, #tpu.memory_space<vmem>>) target_semaphore(%236 : memref<!tpu.dma_semaphore, #tpu.memory_space<semaphore_mem>>)
    } else {
    }
    %c1_i32_9 = arith.constant 1 : i32
    %20 = arith.addi %arg2, %c1_i32_9 : i32
    %c1_i32_10 = arith.constant 1 : i32
    %21 = arith.cmpi slt, %20, %c1_i32_10 : i32
    %22 = arith.extui %21 : i1 to i32
    %c0_i32_11 = arith.constant 0 : i32
    %23 = arith.cmpi ne, %22, %c0_i32_11 : i32
    scf.if %23 {
      %c1_i32_202 = arith.constant 1 : i32
      %229 = arith.addi %1, %c1_i32_202 : i32
      %c16_i32_203 = arith.constant 16 : i32
      %230 = arith.muli %229, %c16_i32_203 : i32
      %231 = tpu.assume_multiple %230, 8 : i32
      %c0_i32_204 = arith.constant 0 : i32
      %232 = tpu.memref_slice %arg3[%arg1, %231, %c0_i32_204] : memref<2x40x128xf32, #tpu.memory_space<any>> -> memref<1x40x128xf32, #tpu.memory_space<any>>
      %233 = tpu.memref_squeeze %232 : memref<1x40x128xf32, #tpu.memory_space<any>> -> memref<40x128xf32, #tpu.memory_space<any>>
      %c0_i32_205 = arith.constant 0 : i32
      %c0_i32_206 = arith.constant 0 : i32
      %234 = tpu.memref_slice %arg7[%14, %c0_i32_205, %c0_i32_206] : memref<2x40x128xf32, #tpu.memory_space<vmem>> -> memref<1x40x128xf32, #tpu.memory_space<vmem>>
      %235 = tpu.memref_squeeze %234 : memref<1x40x128xf32, #tpu.memory_space<vmem>> -> memref<40x128xf32, #tpu.memory_space<vmem>>
      %236 = tpu.memref_slice %arg10[%14] : memref<2x!tpu.dma_semaphore, #tpu.memory_space<semaphore_mem>> -> memref<1x!tpu.dma_semaphore, #tpu.memory_space<semaphore_mem>>
      %237 = tpu.memref_squeeze %236 : memref<1x!tpu.dma_semaphore, #tpu.memory_space<semaphore_mem>> -> memref<!tpu.dma_semaphore, #tpu.memory_space<semaphore_mem>>
      tpu.enqueue_dma source(%233 : memref<40x128xf32, #tpu.memory_space<any>>) target(%235 : memref<40x128xf32, #tpu.memory_space<vmem>>) target_semaphore(%237 : memref<!tpu.dma_semaphore, #tpu.memory_space<semaphore_mem>>)
    } else {
    }
    %c1_i32_12 = arith.constant 1 : i32
    %24 = arith.addi %arg2, %c1_i32_12 : i32
    %c1_i32_13 = arith.constant 1 : i32
    %25 = arith.cmpi eq, %24, %c1_i32_13 : i32
    %c1_i32_14 = arith.constant 1 : i32
    %26 = arith.addi %arg1, %c1_i32_14 : i32
    %c2_i32_15 = arith.constant 2 : i32
    %27 = arith.cmpi slt, %26, %c2_i32_15 : i32
    %28 = arith.andi %25, %27 : i1
    %29 = arith.extui %28 : i1 to i32
    %c0_i32_16 = arith.constant 0 : i32
    %30 = arith.cmpi ne, %29, %c0_i32_16 : i32
    scf.if %30 {
      %c1_i32_202 = arith.constant 1 : i32
      %229 = arith.addi %arg1, %c1_i32_202 : i32
      %c1_i32_203 = arith.constant 1 : i32
      %230 = arith.muli %arg0, %c1_i32_203 : i32
      %c16_i32_204 = arith.constant 16 : i32
      %231 = arith.muli %230, %c16_i32_204 : i32
      %232 = tpu.assume_multiple %231, 8 : i32
      %c0_i32_205 = arith.constant 0 : i32
      %233 = tpu.memref_slice %arg3[%229, %232, %c0_i32_205] : memref<2x40x128xf32, #tpu.memory_space<any>> -> memref<1x40x128xf32, #tpu.memory_space<any>>
      %234 = tpu.memref_squeeze %233 : memref<1x40x128xf32, #tpu.memory_space<any>> -> memref<40x128xf32, #tpu.memory_space<any>>
      %c0_i32_206 = arith.constant 0 : i32
      %c0_i32_207 = arith.constant 0 : i32
      %235 = tpu.memref_slice %arg7[%14, %c0_i32_206, %c0_i32_207] : memref<2x40x128xf32, #tpu.memory_space<vmem>> -> memref<1x40x128xf32, #tpu.memory_space<vmem>>
      %236 = tpu.memref_squeeze %235 : memref<1x40x128xf32, #tpu.memory_space<vmem>> -> memref<40x128xf32, #tpu.memory_space<vmem>>
      %237 = tpu.memref_slice %arg10[%14] : memref<2x!tpu.dma_semaphore, #tpu.memory_space<semaphore_mem>> -> memref<1x!tpu.dma_semaphore, #tpu.memory_space<semaphore_mem>>
      %238 = tpu.memref_squeeze %237 : memref<1x!tpu.dma_semaphore, #tpu.memory_space<semaphore_mem>> -> memref<!tpu.dma_semaphore, #tpu.memory_space<semaphore_mem>>
      tpu.enqueue_dma source(%234 : memref<40x128xf32, #tpu.memory_space<any>>) target(%236 : memref<40x128xf32, #tpu.memory_space<vmem>>) target_semaphore(%238 : memref<!tpu.dma_semaphore, #tpu.memory_space<semaphore_mem>>)
    } else {
    }
    %c16_i32 = arith.constant 16 : i32
    %31 = arith.muli %1, %c16_i32 : i32
    %32 = tpu.assume_multiple %31, 8 : i32
    %c0_i32_17 = arith.constant 0 : i32
    %33 = tpu.memref_slice %arg3[%arg1, %32, %c0_i32_17] : memref<2x40x128xf32, #tpu.memory_space<any>> -> memref<1x40x128xf32, #tpu.memory_space<any>>
    %34 = tpu.memref_squeeze %33 : memref<1x40x128xf32, #tpu.memory_space<any>> -> memref<40x128xf32, #tpu.memory_space<any>>
    %c0_i32_18 = arith.constant 0 : i32
    %c0_i32_19 = arith.constant 0 : i32
    %35 = tpu.memref_slice %arg7[%13, %c0_i32_18, %c0_i32_19] : memref<2x40x128xf32, #tpu.memory_space<vmem>> -> memref<1x40x128xf32, #tpu.memory_space<vmem>>
    %36 = tpu.memref_squeeze %35 : memref<1x40x128xf32, #tpu.memory_space<vmem>> -> memref<40x128xf32, #tpu.memory_space<vmem>>
    %37 = tpu.memref_slice %arg10[%13] : memref<2x!tpu.dma_semaphore, #tpu.memory_space<semaphore_mem>> -> memref<1x!tpu.dma_semaphore, #tpu.memory_space<semaphore_mem>>
    %38 = tpu.memref_squeeze %37 : memref<1x!tpu.dma_semaphore, #tpu.memory_space<semaphore_mem>> -> memref<!tpu.dma_semaphore, #tpu.memory_space<semaphore_mem>>
    tpu.wait_dma2 semaphore(%38 : memref<!tpu.dma_semaphore, #tpu.memory_space<semaphore_mem>>) src(%34 : memref<40x128xf32, #tpu.memory_space<any>>) dst(%36 : memref<40x128xf32, #tpu.memory_space<vmem>>)
    %c16_i32_20 = arith.constant 16 : i32
    %39 = arith.muli %1, %c16_i32_20 : i32
    %c12_i32 = arith.constant 12 : i32
    %40 = arith.cmpi slt, %39, %c12_i32 : i32
    %c16_i32_21 = arith.constant 16 : i32
    %41 = arith.addi %39, %c16_i32_21 : i32
    %c12_i32_22 = arith.constant 12 : i32
    %42 = arith.addi %41, %c12_i32_22 : i32
    %c16_i32_23 = arith.constant 16 : i32
    %43 = arith.cmpi sgt, %42, %c16_i32_23 : i32
    %44 = arith.ori %40, %43 : i1
    %true = arith.constant true
    %45 = arith.xori %44, %true : i1
    %46 = arith.index_cast %13 : i32 to index
    %c0 = arith.constant 0 : index
    %c0_24 = arith.constant 0 : index
    %47 = vector.load %arg7[%46, %c0, %c0_24] : memref<2x40x128xf32, #tpu.memory_space<vmem>>, vector<1x40x128xf32>
    %48 = vector.shape_cast %47 : vector<1x40x128xf32> to vector<40x128xf32>
    %cst = arith.constant 0.000000e+00 : f32
    %49 = vector.broadcast %cst : f32 to vector<40x128xf32>
    %50 = arith.cmpf oge, %48, %49 : vector<40x128xf32>
    %cst_25 = arith.constant 1.000000e-01 : f32
    %51 = vector.broadcast %cst_25 : f32 to vector<40x128xf32>
    %52 = arith.mulf %51, %48 : vector<40x128xf32>
    %53 = arith.select %50, %48, %52 : vector<40x128xi1>, vector<40x128xf32>
    %c0_26 = arith.constant 0 : index
    %c0_27 = arith.constant 0 : index
    %54 = vector.load %arg8[%c0_26, %c0_27] : memref<40x128xf32, #tpu.memory_space<vmem>>, vector<40x128xf32>
    tpu.vector_store %arg8[%c0_26, %c0_27], %53 {strides = array<i32>} : memref<40x128xf32, #tpu.memory_space<vmem>>, vector<40x128xf32>,
    %55 = vector.extract_strided_slice %48 {offsets = [2, 0], sizes = [36, 128], strides = [1, 1]} : vector<40x128xf32> to vector<36x128xf32>
    %c0_28 = arith.constant 0 : index
    %c0_29 = arith.constant 0 : index
    %56 = vector.load %arg8[%c0_28, %c0_29] : memref<40x128xf32, #tpu.memory_space<vmem>>, vector<38x128xf32>
    %c0_30 = arith.constant 0 : index
    %c0_31 = arith.constant 0 : index
    %c0_32 = arith.constant 0 : index
    %c0_33 = arith.constant 0 : index
    %57 = vector.load %arg4[%c0_30, %c0_31, %c0_32, %c0_33] : memref<6x3x128x128xf32, #tpu.memory_space<vmem>>, vector<1x1x128x128xf32>
    %58 = vector.shape_cast %57 : vector<1x1x128x128xf32> to vector<128x128xf32>
    %cst_34 = arith.constant dense<0.000000e+00> : vector<38x128xf32>
    %59 = tpu.matmul %56, %58, %cst_34 {dimension_numbers = #tpu.dot_dimension_numbers<[1], [0], [0], [1], [0, 0, 1, 1], [], []>} : vector<38x128xf32>, vector<128x128xf32>, vector<38x128xf32> -> vector<38x128xf32>
    %c1 = arith.constant 1 : index
    %c0_35 = arith.constant 0 : index
    %60 = vector.load %arg8[%c1, %c0_35] : memref<40x128xf32, #tpu.memory_space<vmem>>, vector<38x128xf32>
    %c0_36 = arith.constant 0 : index
    %c1_37 = arith.constant 1 : index
    %c0_38 = arith.constant 0 : index
    %c0_39 = arith.constant 0 : index
    %61 = vector.load %arg4[%c0_36, %c1_37, %c0_38, %c0_39] : memref<6x3x128x128xf32, #tpu.memory_space<vmem>>, vector<1x1x128x128xf32>
    %62 = vector.shape_cast %61 : vector<1x1x128x128xf32> to vector<128x128xf32>
    %cst_40 = arith.constant dense<0.000000e+00> : vector<38x128xf32>
    %63 = tpu.matmul %60, %62, %cst_40 {dimension_numbers = #tpu.dot_dimension_numbers<[1], [0], [0], [1], [0, 0, 1, 1], [], []>} : vector<38x128xf32>, vector<128x128xf32>, vector<38x128xf32> -> vector<38x128xf32>
    %64 = arith.addf %59, %63 : vector<38x128xf32>
    %c2 = arith.constant 2 : index
    %c0_41 = arith.constant 0 : index
    %65 = vector.load %arg8[%c2, %c0_41] : memref<40x128xf32, #tpu.memory_space<vmem>>, vector<38x128xf32>
    %c0_42 = arith.constant 0 : index
    %c2_43 = arith.constant 2 : index
    %c0_44 = arith.constant 0 : index
    %c0_45 = arith.constant 0 : index
    %66 = vector.load %arg4[%c0_42, %c2_43, %c0_44, %c0_45] : memref<6x3x128x128xf32, #tpu.memory_space<vmem>>, vector<1x1x128x128xf32>
    %67 = vector.shape_cast %66 : vector<1x1x128x128xf32> to vector<128x128xf32>
    %cst_46 = arith.constant dense<0.000000e+00> : vector<38x128xf32>
    %68 = tpu.matmul %65, %67, %cst_46 {dimension_numbers = #tpu.dot_dimension_numbers<[1], [0], [0], [1], [0, 0, 1, 1], [], []>} : vector<38x128xf32>, vector<128x128xf32>, vector<38x128xf32> -> vector<38x128xf32>
    %69 = arith.addf %64, %68 : vector<38x128xf32>
    %c0_47 = arith.constant 0 : index
    %c0_48 = arith.constant 0 : index
    %c0_49 = arith.constant 0 : index
    %70 = vector.load %arg5[%c0_47, %c0_48, %c0_49] : memref<6x1x128xf32, #tpu.memory_space<vmem>>, vector<1x1x128xf32>
    %71 = vector.shape_cast %70 : vector<1x1x128xf32> to vector<1x128xf32>
    %72 = vector.broadcast %71 : vector<1x128xf32> to vector<38x128xf32>
    %73 = arith.addf %69, %72 : vector<38x128xf32>
    %c10_i32 = arith.constant 10 : i32
    %74 = arith.subi %39, %c10_i32 : i32
    %c1_i32_50 = arith.constant 1 : i32
    %75 = arith.subi %74, %c1_i32_50 : i32
    %cst_51 = arith.constant 0.000000e+00 : f32
    %76 = vector.broadcast %cst_51 : f32 to vector<38x128xf32>
    %77 = arith.cmpf oge, %73, %76 : vector<38x128xf32>
    %cst_52 = arith.constant 1.000000e-01 : f32
    %78 = vector.broadcast %cst_52 : f32 to vector<38x128xf32>
    %79 = arith.mulf %78, %73 : vector<38x128xf32>
    %80 = arith.select %77, %73, %79 : vector<38x128xi1>, vector<38x128xf32>
    %81 = arith.extui %44 : i1 to i32
    %c0_i32_53 = arith.constant 0 : i32
    %82 = arith.cmpi ne, %81, %c0_i32_53 : i32
    scf.if %82 {
      %229 = tpu.iota {dimensions = array<i32: 0>} : vector<38x128xi32>
      %230 = vector.broadcast %75 : i32 to vector<38x128xi32>
      %231 = arith.addi %229, %230 : vector<38x128xi32>
      %c0_i32_202 = arith.constant 0 : i32
      %232 = vector.broadcast %c0_i32_202 : i32 to vector<38x128xi32>
      %233 = arith.cmpi sge, %231, %232 : vector<38x128xi32>
      %c16_i32_203 = arith.constant 16 : i32
      %234 = vector.broadcast %c16_i32_203 : i32 to vector<38x128xi32>
      %235 = arith.cmpi slt, %231, %234 : vector<38x128xi32>
      %236 = arith.andi %233, %235 : vector<38x128xi1>
      %cst_204 = arith.constant 0.000000e+00 : f32
      %237 = vector.broadcast %cst_204 : f32 to vector<38x128xf32>
      %238 = arith.select %236, %80, %237 : vector<38x128xi1>, vector<38x128xf32>
      %c0_205 = arith.constant 0 : index
      %c0_206 = arith.constant 0 : index
      %239 = vector.load %arg8[%c0_205, %c0_206] : memref<40x128xf32, #tpu.memory_space<vmem>>, vector<38x128xf32>
      tpu.vector_store %arg8[%c0_205, %c0_206], %238 {strides = array<i32>} : memref<40x128xf32, #tpu.memory_space<vmem>>, vector<38x128xf32>,
    } else {
    }
    %83 = arith.extui %45 : i1 to i32
    %c0_i32_54 = arith.constant 0 : i32
    %84 = arith.cmpi ne, %83, %c0_i32_54 : i32
    scf.if %84 {
      %c0_202 = arith.constant 0 : index
      %c0_203 = arith.constant 0 : index
      %229 = vector.load %arg8[%c0_202, %c0_203] : memref<40x128xf32, #tpu.memory_space<vmem>>, vector<38x128xf32>
      tpu.vector_store %arg8[%c0_202, %c0_203], %80 {strides = array<i32>} : memref<40x128xf32, #tpu.memory_space<vmem>>, vector<38x128xf32>,
    } else {
    }
    %c0_55 = arith.constant 0 : index
    %c0_56 = arith.constant 0 : index
    %85 = vector.load %arg8[%c0_55, %c0_56] : memref<40x128xf32, #tpu.memory_space<vmem>>, vector<36x128xf32>
    %c1_57 = arith.constant 1 : index
    %c0_58 = arith.constant 0 : index
    %c0_59 = arith.constant 0 : index
    %c0_60 = arith.constant 0 : index
    %86 = vector.load %arg4[%c1_57, %c0_58, %c0_59, %c0_60] : memref<6x3x128x128xf32, #tpu.memory_space<vmem>>, vector<1x1x128x128xf32>
    %87 = vector.shape_cast %86 : vector<1x1x128x128xf32> to vector<128x128xf32>
    %cst_61 = arith.constant dense<0.000000e+00> : vector<36x128xf32>
    %88 = tpu.matmul %85, %87, %cst_61 {dimension_numbers = #tpu.dot_dimension_numbers<[1], [0], [0], [1], [0, 0, 1, 1], [], []>} : vector<36x128xf32>, vector<128x128xf32>, vector<36x128xf32> -> vector<36x128xf32>
    %c1_62 = arith.constant 1 : index
    %c0_63 = arith.constant 0 : index
    %89 = vector.load %arg8[%c1_62, %c0_63] : memref<40x128xf32, #tpu.memory_space<vmem>>, vector<36x128xf32>
    %c1_64 = arith.constant 1 : index
    %c1_65 = arith.constant 1 : index
    %c0_66 = arith.constant 0 : index
    %c0_67 = arith.constant 0 : index
    %90 = vector.load %arg4[%c1_64, %c1_65, %c0_66, %c0_67] : memref<6x3x128x128xf32, #tpu.memory_space<vmem>>, vector<1x1x128x128xf32>
    %91 = vector.shape_cast %90 : vector<1x1x128x128xf32> to vector<128x128xf32>
    %cst_68 = arith.constant dense<0.000000e+00> : vector<36x128xf32>
    %92 = tpu.matmul %89, %91, %cst_68 {dimension_numbers = #tpu.dot_dimension_numbers<[1], [0], [0], [1], [0, 0, 1, 1], [], []>} : vector<36x128xf32>, vector<128x128xf32>, vector<36x128xf32> -> vector<36x128xf32>
    %93 = arith.addf %88, %92 : vector<36x128xf32>
    %c2_69 = arith.constant 2 : index
    %c0_70 = arith.constant 0 : index
    %94 = vector.load %arg8[%c2_69, %c0_70] : memref<40x128xf32, #tpu.memory_space<vmem>>, vector<36x128xf32>
    %c1_71 = arith.constant 1 : index
    %c2_72 = arith.constant 2 : index
    %c0_73 = arith.constant 0 : index
    %c0_74 = arith.constant 0 : index
    %95 = vector.load %arg4[%c1_71, %c2_72, %c0_73, %c0_74] : memref<6x3x128x128xf32, #tpu.memory_space<vmem>>, vector<1x1x128x128xf32>
    %96 = vector.shape_cast %95 : vector<1x1x128x128xf32> to vector<128x128xf32>
    %cst_75 = arith.constant dense<0.000000e+00> : vector<36x128xf32>
    %97 = tpu.matmul %94, %96, %cst_75 {dimension_numbers = #tpu.dot_dimension_numbers<[1], [0], [0], [1], [0, 0, 1, 1], [], []>} : vector<36x128xf32>, vector<128x128xf32>, vector<36x128xf32> -> vector<36x128xf32>
    %98 = arith.addf %93, %97 : vector<36x128xf32>
    %c1_76 = arith.constant 1 : index
    %c0_77 = arith.constant 0 : index
    %c0_78 = arith.constant 0 : index
    %99 = vector.load %arg5[%c1_76, %c0_77, %c0_78] : memref<6x1x128xf32, #tpu.memory_space<vmem>>, vector<1x1x128xf32>
    %100 = vector.shape_cast %99 : vector<1x1x128xf32> to vector<1x128xf32>
    %101 = vector.broadcast %100 : vector<1x128xf32> to vector<36x128xf32>
    %102 = arith.addf %98, %101 : vector<36x128xf32>
    %103 = arith.addf %102, %55 : vector<36x128xf32>
    %c0_79 = arith.constant 0 : index
    %c0_80 = arith.constant 0 : index
    %104 = vector.load %arg9[%c0_79, %c0_80] : memref<40x128xf32, #tpu.memory_space<vmem>>, vector<36x128xf32>
    tpu.vector_store %arg9[%c0_79, %c0_80], %103 {strides = array<i32>} : memref<40x128xf32, #tpu.memory_space<vmem>>, vector<36x128xf32>,
    %c0_81 = arith.constant 0 : index
    %c0_82 = arith.constant 0 : index
    %105 = vector.load %arg9[%c0_81, %c0_82] : memref<40x128xf32, #tpu.memory_space<vmem>>, vector<36x128xf32>
    %c10_i32_83 = arith.constant 10 : i32
    %106 = arith.subi %39, %c10_i32_83 : i32
    %cst_84 = arith.constant 0.000000e+00 : f32
    %107 = vector.broadcast %cst_84 : f32 to vector<36x128xf32>
    %108 = arith.cmpf oge, %105, %107 : vector<36x128xf32>
    %cst_85 = arith.constant 1.000000e-01 : f32
    %109 = vector.broadcast %cst_85 : f32 to vector<36x128xf32>
    %110 = arith.mulf %109, %105 : vector<36x128xf32>
    %111 = arith.select %108, %105, %110 : vector<36x128xi1>, vector<36x128xf32>
    %112 = arith.extui %44 : i1 to i32
    %c0_i32_86 = arith.constant 0 : i32
    %113 = arith.cmpi ne, %112, %c0_i32_86 : i32
    scf.if %113 {
      %229 = tpu.iota {dimensions = array<i32: 0>} : vector<36x128xi32>
      %230 = vector.broadcast %106 : i32 to vector<36x128xi32>
      %231 = arith.addi %229, %230 : vector<36x128xi32>
      %c0_i32_202 = arith.constant 0 : i32
      %232 = vector.broadcast %c0_i32_202 : i32 to vector<36x128xi32>
      %233 = arith.cmpi sge, %231, %232 : vector<36x128xi32>
      %c16_i32_203 = arith.constant 16 : i32
      %234 = vector.broadcast %c16_i32_203 : i32 to vector<36x128xi32>
      %235 = arith.cmpi slt, %231, %234 : vector<36x128xi32>
      %236 = arith.andi %233, %235 : vector<36x128xi1>
      %cst_204 = arith.constant 0.000000e+00 : f32
      %237 = vector.broadcast %cst_204 : f32 to vector<36x128xf32>
      %238 = arith.select %236, %111, %237 : vector<36x128xi1>, vector<36x128xf32>
      %c0_205 = arith.constant 0 : index
      %c0_206 = arith.constant 0 : index
      %239 = vector.load %arg8[%c0_205, %c0_206] : memref<40x128xf32, #tpu.memory_space<vmem>>, vector<36x128xf32>
      tpu.vector_store %arg8[%c0_205, %c0_206], %238 {strides = array<i32>} : memref<40x128xf32, #tpu.memory_space<vmem>>, vector<36x128xf32>,
    } else {
    }
    %114 = arith.extui %45 : i1 to i32
    %c0_i32_87 = arith.constant 0 : i32
    %115 = arith.cmpi ne, %114, %c0_i32_87 : i32
    scf.if %115 {
      %c0_202 = arith.constant 0 : index
      %c0_203 = arith.constant 0 : index
      %229 = vector.load %arg8[%c0_202, %c0_203] : memref<40x128xf32, #tpu.memory_space<vmem>>, vector<36x128xf32>
      tpu.vector_store %arg8[%c0_202, %c0_203], %111 {strides = array<i32>} : memref<40x128xf32, #tpu.memory_space<vmem>>, vector<36x128xf32>,
    } else {
    }
    %116 = vector.extract_strided_slice %105 {offsets = [4, 0], sizes = [28, 128], strides = [1, 1]} : vector<36x128xf32> to vector<28x128xf32>
    %c0_88 = arith.constant 0 : index
    %c0_89 = arith.constant 0 : index
    %117 = vector.load %arg8[%c0_88, %c0_89] : memref<40x128xf32, #tpu.memory_space<vmem>>, vector<30x128xf32>
    %c2_90 = arith.constant 2 : index
    %c0_91 = arith.constant 0 : index
    %c0_92 = arith.constant 0 : index
    %c0_93 = arith.constant 0 : index
    %118 = vector.load %arg4[%c2_90, %c0_91, %c0_92, %c0_93] : memref<6x3x128x128xf32, #tpu.memory_space<vmem>>, vector<1x1x128x128xf32>
    %119 = vector.shape_cast %118 : vector<1x1x128x128xf32> to vector<128x128xf32>
    %cst_94 = arith.constant dense<0.000000e+00> : vector<30x128xf32>
    %120 = tpu.matmul %117, %119, %cst_94 {dimension_numbers = #tpu.dot_dimension_numbers<[1], [0], [0], [1], [0, 0, 1, 1], [], []>} : vector<30x128xf32>, vector<128x128xf32>, vector<30x128xf32> -> vector<30x128xf32>
    %c3 = arith.constant 3 : index
    %c0_95 = arith.constant 0 : index
    %121 = vector.load %arg8[%c3, %c0_95] : memref<40x128xf32, #tpu.memory_space<vmem>>, vector<30x128xf32>
    %c2_96 = arith.constant 2 : index
    %c1_97 = arith.constant 1 : index
    %c0_98 = arith.constant 0 : index
    %c0_99 = arith.constant 0 : index
    %122 = vector.load %arg4[%c2_96, %c1_97, %c0_98, %c0_99] : memref<6x3x128x128xf32, #tpu.memory_space<vmem>>, vector<1x1x128x128xf32>
    %123 = vector.shape_cast %122 : vector<1x1x128x128xf32> to vector<128x128xf32>
    %cst_100 = arith.constant dense<0.000000e+00> : vector<30x128xf32>
    %124 = tpu.matmul %121, %123, %cst_100 {dimension_numbers = #tpu.dot_dimension_numbers<[1], [0], [0], [1], [0, 0, 1, 1], [], []>} : vector<30x128xf32>, vector<128x128xf32>, vector<30x128xf32> -> vector<30x128xf32>
    %125 = arith.addf %120, %124 : vector<30x128xf32>
    %c6 = arith.constant 6 : index
    %c0_101 = arith.constant 0 : index
    %126 = vector.load %arg8[%c6, %c0_101] : memref<40x128xf32, #tpu.memory_space<vmem>>, vector<30x128xf32>
    %c2_102 = arith.constant 2 : index
    %c2_103 = arith.constant 2 : index
    %c0_104 = arith.constant 0 : index
    %c0_105 = arith.constant 0 : index
    %127 = vector.load %arg4[%c2_102, %c2_103, %c0_104, %c0_105] : memref<6x3x128x128xf32, #tpu.memory_space<vmem>>, vector<1x1x128x128xf32>
    %128 = vector.shape_cast %127 : vector<1x1x128x128xf32> to vector<128x128xf32>
    %cst_106 = arith.constant dense<0.000000e+00> : vector<30x128xf32>
    %129 = tpu.matmul %126, %128, %cst_106 {dimension_numbers = #tpu.dot_dimension_numbers<[1], [0], [0], [1], [0, 0, 1, 1], [], []>} : vector<30x128xf32>, vector<128x128xf32>, vector<30x128xf32> -> vector<30x128xf32>
    %130 = arith.addf %125, %129 : vector<30x128xf32>
    %c2_107 = arith.constant 2 : index
    %c0_108 = arith.constant 0 : index
    %c0_109 = arith.constant 0 : index
    %131 = vector.load %arg5[%c2_107, %c0_108, %c0_109] : memref<6x1x128xf32, #tpu.memory_space<vmem>>, vector<1x1x128xf32>
    %132 = vector.shape_cast %131 : vector<1x1x128xf32> to vector<1x128xf32>
    %133 = vector.broadcast %132 : vector<1x128xf32> to vector<30x128xf32>
    %134 = arith.addf %130, %133 : vector<30x128xf32>
    %c6_i32 = arith.constant 6 : i32
    %135 = arith.subi %39, %c6_i32 : i32
    %c1_i32_110 = arith.constant 1 : i32
    %136 = arith.subi %135, %c1_i32_110 : i32
    %cst_111 = arith.constant 0.000000e+00 : f32
    %137 = vector.broadcast %cst_111 : f32 to vector<30x128xf32>
    %138 = arith.cmpf oge, %134, %137 : vector<30x128xf32>
    %cst_112 = arith.constant 1.000000e-01 : f32
    %139 = vector.broadcast %cst_112 : f32 to vector<30x128xf32>
    %140 = arith.mulf %139, %134 : vector<30x128xf32>
    %141 = arith.select %138, %134, %140 : vector<30x128xi1>, vector<30x128xf32>
    %142 = arith.extui %44 : i1 to i32
    %c0_i32_113 = arith.constant 0 : i32
    %143 = arith.cmpi ne, %142, %c0_i32_113 : i32
    scf.if %143 {
      %229 = tpu.iota {dimensions = array<i32: 0>} : vector<30x128xi32>
      %230 = vector.broadcast %136 : i32 to vector<30x128xi32>
      %231 = arith.addi %229, %230 : vector<30x128xi32>
      %c0_i32_202 = arith.constant 0 : i32
      %232 = vector.broadcast %c0_i32_202 : i32 to vector<30x128xi32>
      %233 = arith.cmpi sge, %231, %232 : vector<30x128xi32>
      %c16_i32_203 = arith.constant 16 : i32
      %234 = vector.broadcast %c16_i32_203 : i32 to vector<30x128xi32>
      %235 = arith.cmpi slt, %231, %234 : vector<30x128xi32>
      %236 = arith.andi %233, %235 : vector<30x128xi1>
      %cst_204 = arith.constant 0.000000e+00 : f32
      %237 = vector.broadcast %cst_204 : f32 to vector<30x128xf32>
      %238 = arith.select %236, %141, %237 : vector<30x128xi1>, vector<30x128xf32>
      %c0_205 = arith.constant 0 : index
      %c0_206 = arith.constant 0 : index
      %239 = vector.load %arg8[%c0_205, %c0_206] : memref<40x128xf32, #tpu.memory_space<vmem>>, vector<30x128xf32>
      tpu.vector_store %arg8[%c0_205, %c0_206], %238 {strides = array<i32>} : memref<40x128xf32, #tpu.memory_space<vmem>>, vector<30x128xf32>,
    } else {
    }
    %144 = arith.extui %45 : i1 to i32
    %c0_i32_114 = arith.constant 0 : i32
    %145 = arith.cmpi ne, %144, %c0_i32_114 : i32
    scf.if %145 {
      %c0_202 = arith.constant 0 : index
      %c0_203 = arith.constant 0 : index
      %229 = vector.load %arg8[%c0_202, %c0_203] : memref<40x128xf32, #tpu.memory_space<vmem>>, vector<30x128xf32>
      tpu.vector_store %arg8[%c0_202, %c0_203], %141 {strides = array<i32>} : memref<40x128xf32, #tpu.memory_space<vmem>>, vector<30x128xf32>,
    } else {
    }
    %c0_115 = arith.constant 0 : index
    %c0_116 = arith.constant 0 : index
    %146 = vector.load %arg8[%c0_115, %c0_116] : memref<40x128xf32, #tpu.memory_space<vmem>>, vector<28x128xf32>
    %c3_117 = arith.constant 3 : index
    %c0_118 = arith.constant 0 : index
    %c0_119 = arith.constant 0 : index
    %c0_120 = arith.constant 0 : index
    %147 = vector.load %arg4[%c3_117, %c0_118, %c0_119, %c0_120] : memref<6x3x128x128xf32, #tpu.memory_space<vmem>>, vector<1x1x128x128xf32>
    %148 = vector.shape_cast %147 : vector<1x1x128x128xf32> to vector<128x128xf32>
    %cst_121 = arith.constant dense<0.000000e+00> : vector<28x128xf32>
    %149 = tpu.matmul %146, %148, %cst_121 {dimension_numbers = #tpu.dot_dimension_numbers<[1], [0], [0], [1], [0, 0, 1, 1], [], []>} : vector<28x128xf32>, vector<128x128xf32>, vector<28x128xf32> -> vector<28x128xf32>
    %c1_122 = arith.constant 1 : index
    %c0_123 = arith.constant 0 : index
    %150 = vector.load %arg8[%c1_122, %c0_123] : memref<40x128xf32, #tpu.memory_space<vmem>>, vector<28x128xf32>
    %c3_124 = arith.constant 3 : index
    %c1_125 = arith.constant 1 : index
    %c0_126 = arith.constant 0 : index
    %c0_127 = arith.constant 0 : index
    %151 = vector.load %arg4[%c3_124, %c1_125, %c0_126, %c0_127] : memref<6x3x128x128xf32, #tpu.memory_space<vmem>>, vector<1x1x128x128xf32>
    %152 = vector.shape_cast %151 : vector<1x1x128x128xf32> to vector<128x128xf32>
    %cst_128 = arith.constant dense<0.000000e+00> : vector<28x128xf32>
    %153 = tpu.matmul %150, %152, %cst_128 {dimension_numbers = #tpu.dot_dimension_numbers<[1], [0], [0], [1], [0, 0, 1, 1], [], []>} : vector<28x128xf32>, vector<128x128xf32>, vector<28x128xf32> -> vector<28x128xf32>
    %154 = arith.addf %149, %153 : vector<28x128xf32>
    %c2_129 = arith.constant 2 : index
    %c0_130 = arith.constant 0 : index
    %155 = vector.load %arg8[%c2_129, %c0_130] : memref<40x128xf32, #tpu.memory_space<vmem>>, vector<28x128xf32>
    %c3_131 = arith.constant 3 : index
    %c2_132 = arith.constant 2 : index
    %c0_133 = arith.constant 0 : index
    %c0_134 = arith.constant 0 : index
    %156 = vector.load %arg4[%c3_131, %c2_132, %c0_133, %c0_134] : memref<6x3x128x128xf32, #tpu.memory_space<vmem>>, vector<1x1x128x128xf32>
    %157 = vector.shape_cast %156 : vector<1x1x128x128xf32> to vector<128x128xf32>
    %cst_135 = arith.constant dense<0.000000e+00> : vector<28x128xf32>
    %158 = tpu.matmul %155, %157, %cst_135 {dimension_numbers = #tpu.dot_dimension_numbers<[1], [0], [0], [1], [0, 0, 1, 1], [], []>} : vector<28x128xf32>, vector<128x128xf32>, vector<28x128xf32> -> vector<28x128xf32>
    %159 = arith.addf %154, %158 : vector<28x128xf32>
    %c3_136 = arith.constant 3 : index
    %c0_137 = arith.constant 0 : index
    %c0_138 = arith.constant 0 : index
    %160 = vector.load %arg5[%c3_136, %c0_137, %c0_138] : memref<6x1x128xf32, #tpu.memory_space<vmem>>, vector<1x1x128xf32>
    %161 = vector.shape_cast %160 : vector<1x1x128xf32> to vector<1x128xf32>
    %162 = vector.broadcast %161 : vector<1x128xf32> to vector<28x128xf32>
    %163 = arith.addf %159, %162 : vector<28x128xf32>
    %164 = arith.addf %163, %116 : vector<28x128xf32>
    %c0_139 = arith.constant 0 : index
    %c0_140 = arith.constant 0 : index
    %165 = vector.load %arg9[%c0_139, %c0_140] : memref<40x128xf32, #tpu.memory_space<vmem>>, vector<28x128xf32>
    tpu.vector_store %arg9[%c0_139, %c0_140], %164 {strides = array<i32>} : memref<40x128xf32, #tpu.memory_space<vmem>>, vector<28x128xf32>,
    %c0_141 = arith.constant 0 : index
    %c0_142 = arith.constant 0 : index
    %166 = vector.load %arg9[%c0_141, %c0_142] : memref<40x128xf32, #tpu.memory_space<vmem>>, vector<28x128xf32>
    %c6_i32_143 = arith.constant 6 : i32
    %167 = arith.subi %39, %c6_i32_143 : i32
    %cst_144 = arith.constant 0.000000e+00 : f32
    %168 = vector.broadcast %cst_144 : f32 to vector<28x128xf32>
    %169 = arith.cmpf oge, %166, %168 : vector<28x128xf32>
    %cst_145 = arith.constant 1.000000e-01 : f32
    %170 = vector.broadcast %cst_145 : f32 to vector<28x128xf32>
    %171 = arith.mulf %170, %166 : vector<28x128xf32>
    %172 = arith.select %169, %166, %171 : vector<28x128xi1>, vector<28x128xf32>
    %173 = arith.extui %44 : i1 to i32
    %c0_i32_146 = arith.constant 0 : i32
    %174 = arith.cmpi ne, %173, %c0_i32_146 : i32
    scf.if %174 {
      %229 = tpu.iota {dimensions = array<i32: 0>} : vector<28x128xi32>
      %230 = vector.broadcast %167 : i32 to vector<28x128xi32>
      %231 = arith.addi %229, %230 : vector<28x128xi32>
      %c0_i32_202 = arith.constant 0 : i32
      %232 = vector.broadcast %c0_i32_202 : i32 to vector<28x128xi32>
      %233 = arith.cmpi sge, %231, %232 : vector<28x128xi32>
      %c16_i32_203 = arith.constant 16 : i32
      %234 = vector.broadcast %c16_i32_203 : i32 to vector<28x128xi32>
      %235 = arith.cmpi slt, %231, %234 : vector<28x128xi32>
      %236 = arith.andi %233, %235 : vector<28x128xi1>
      %cst_204 = arith.constant 0.000000e+00 : f32
      %237 = vector.broadcast %cst_204 : f32 to vector<28x128xf32>
      %238 = arith.select %236, %172, %237 : vector<28x128xi1>, vector<28x128xf32>
      %c0_205 = arith.constant 0 : index
      %c0_206 = arith.constant 0 : index
      %239 = vector.load %arg8[%c0_205, %c0_206] : memref<40x128xf32, #tpu.memory_space<vmem>>, vector<28x128xf32>
      tpu.vector_store %arg8[%c0_205, %c0_206], %238 {strides = array<i32>} : memref<40x128xf32, #tpu.memory_space<vmem>>, vector<28x128xf32>,
    } else {
    }
    %175 = arith.extui %45 : i1 to i32
    %c0_i32_147 = arith.constant 0 : i32
    %176 = arith.cmpi ne, %175, %c0_i32_147 : i32
    scf.if %176 {
      %c0_202 = arith.constant 0 : index
      %c0_203 = arith.constant 0 : index
      %229 = vector.load %arg8[%c0_202, %c0_203] : memref<40x128xf32, #tpu.memory_space<vmem>>, vector<28x128xf32>
      tpu.vector_store %arg8[%c0_202, %c0_203], %172 {strides = array<i32>} : memref<40x128xf32, #tpu.memory_space<vmem>>, vector<28x128xf32>,
    } else {
    }
    %177 = vector.extract_strided_slice %166 {offsets = [6, 0], sizes = [16, 128], strides = [1, 1]} : vector<28x128xf32> to vector<16x128xf32>
    %c0_148 = arith.constant 0 : index
    %c0_149 = arith.constant 0 : index
    %178 = vector.load %arg8[%c0_148, %c0_149] : memref<40x128xf32, #tpu.memory_space<vmem>>, vector<18x128xf32>
    %c4 = arith.constant 4 : index
    %c0_150 = arith.constant 0 : index
    %c0_151 = arith.constant 0 : index
    %c0_152 = arith.constant 0 : index
    %179 = vector.load %arg4[%c4, %c0_150, %c0_151, %c0_152] : memref<6x3x128x128xf32, #tpu.memory_space<vmem>>, vector<1x1x128x128xf32>
    %180 = vector.shape_cast %179 : vector<1x1x128x128xf32> to vector<128x128xf32>
    %cst_153 = arith.constant dense<0.000000e+00> : vector<18x128xf32>
    %181 = tpu.matmul %178, %180, %cst_153 {dimension_numbers = #tpu.dot_dimension_numbers<[1], [0], [0], [1], [0, 0, 1, 1], [], []>} : vector<18x128xf32>, vector<128x128xf32>, vector<18x128xf32> -> vector<18x128xf32>
    %c5 = arith.constant 5 : index
    %c0_154 = arith.constant 0 : index
    %182 = vector.load %arg8[%c5, %c0_154] : memref<40x128xf32, #tpu.memory_space<vmem>>, vector<18x128xf32>
    %c4_155 = arith.constant 4 : index
    %c1_156 = arith.constant 1 : index
    %c0_157 = arith.constant 0 : index
    %c0_158 = arith.constant 0 : index
    %183 = vector.load %arg4[%c4_155, %c1_156, %c0_157, %c0_158] : memref<6x3x128x128xf32, #tpu.memory_space<vmem>>, vector<1x1x128x128xf32>
    %184 = vector.shape_cast %183 : vector<1x1x128x128xf32> to vector<128x128xf32>
    %cst_159 = arith.constant dense<0.000000e+00> : vector<18x128xf32>
    %185 = tpu.matmul %182, %184, %cst_159 {dimension_numbers = #tpu.dot_dimension_numbers<[1], [0], [0], [1], [0, 0, 1, 1], [], []>} : vector<18x128xf32>, vector<128x128xf32>, vector<18x128xf32> -> vector<18x128xf32>
    %186 = arith.addf %181, %185 : vector<18x128xf32>
    %c10 = arith.constant 10 : index
    %c0_160 = arith.constant 0 : index
    %187 = vector.load %arg8[%c10, %c0_160] : memref<40x128xf32, #tpu.memory_space<vmem>>, vector<18x128xf32>
    %c4_161 = arith.constant 4 : index
    %c2_162 = arith.constant 2 : index
    %c0_163 = arith.constant 0 : index
    %c0_164 = arith.constant 0 : index
    %188 = vector.load %arg4[%c4_161, %c2_162, %c0_163, %c0_164] : memref<6x3x128x128xf32, #tpu.memory_space<vmem>>, vector<1x1x128x128xf32>
    %189 = vector.shape_cast %188 : vector<1x1x128x128xf32> to vector<128x128xf32>
    %cst_165 = arith.constant dense<0.000000e+00> : vector<18x128xf32>
    %190 = tpu.matmul %187, %189, %cst_165 {dimension_numbers = #tpu.dot_dimension_numbers<[1], [0], [0], [1], [0, 0, 1, 1], [], []>} : vector<18x128xf32>, vector<128x128xf32>, vector<18x128xf32> -> vector<18x128xf32>
    %191 = arith.addf %186, %190 : vector<18x128xf32>
    %c4_166 = arith.constant 4 : index
    %c0_167 = arith.constant 0 : index
    %c0_168 = arith.constant 0 : index
    %192 = vector.load %arg5[%c4_166, %c0_167, %c0_168] : memref<6x1x128xf32, #tpu.memory_space<vmem>>, vector<1x1x128xf32>
    %193 = vector.shape_cast %192 : vector<1x1x128xf32> to vector<1x128xf32>
    %194 = vector.broadcast %193 : vector<1x128xf32> to vector<18x128xf32>
    %195 = arith.addf %191, %194 : vector<18x128xf32>
    %c0_i32_169 = arith.constant 0 : i32
    %196 = arith.subi %39, %c0_i32_169 : i32
    %c1_i32_170 = arith.constant 1 : i32
    %197 = arith.subi %196, %c1_i32_170 : i32
    %cst_171 = arith.constant 0.000000e+00 : f32
    %198 = vector.broadcast %cst_171 : f32 to vector<18x128xf32>
    %199 = arith.cmpf oge, %195, %198 : vector<18x128xf32>
    %cst_172 = arith.constant 1.000000e-01 : f32
    %200 = vector.broadcast %cst_172 : f32 to vector<18x128xf32>
    %201 = arith.mulf %200, %195 : vector<18x128xf32>
    %202 = arith.select %199, %195, %201 : vector<18x128xi1>, vector<18x128xf32>
    %203 = arith.extui %44 : i1 to i32
    %c0_i32_173 = arith.constant 0 : i32
    %204 = arith.cmpi ne, %203, %c0_i32_173 : i32
    scf.if %204 {
      %229 = tpu.iota {dimensions = array<i32: 0>} : vector<18x128xi32>
      %230 = vector.broadcast %197 : i32 to vector<18x128xi32>
      %231 = arith.addi %229, %230 : vector<18x128xi32>
      %c0_i32_202 = arith.constant 0 : i32
      %232 = vector.broadcast %c0_i32_202 : i32 to vector<18x128xi32>
      %233 = arith.cmpi sge, %231, %232 : vector<18x128xi32>
      %c16_i32_203 = arith.constant 16 : i32
      %234 = vector.broadcast %c16_i32_203 : i32 to vector<18x128xi32>
      %235 = arith.cmpi slt, %231, %234 : vector<18x128xi32>
      %236 = arith.andi %233, %235 : vector<18x128xi1>
      %cst_204 = arith.constant 0.000000e+00 : f32
      %237 = vector.broadcast %cst_204 : f32 to vector<18x128xf32>
      %238 = arith.select %236, %202, %237 : vector<18x128xi1>, vector<18x128xf32>
      %c0_205 = arith.constant 0 : index
      %c0_206 = arith.constant 0 : index
      %239 = vector.load %arg8[%c0_205, %c0_206] : memref<40x128xf32, #tpu.memory_space<vmem>>, vector<18x128xf32>
      tpu.vector_store %arg8[%c0_205, %c0_206], %238 {strides = array<i32>} : memref<40x128xf32, #tpu.memory_space<vmem>>, vector<18x128xf32>,
    } else {
    }
    %205 = arith.extui %45 : i1 to i32
    %c0_i32_174 = arith.constant 0 : i32
    %206 = arith.cmpi ne, %205, %c0_i32_174 : i32
    scf.if %206 {
      %c0_202 = arith.constant 0 : index
      %c0_203 = arith.constant 0 : index
      %229 = vector.load %arg8[%c0_202, %c0_203] : memref<40x128xf32, #tpu.memory_space<vmem>>, vector<18x128xf32>
      tpu.vector_store %arg8[%c0_202, %c0_203], %202 {strides = array<i32>} : memref<40x128xf32, #tpu.memory_space<vmem>>, vector<18x128xf32>,
    } else {
    }
    %c0_175 = arith.constant 0 : index
    %c0_176 = arith.constant 0 : index
    %207 = vector.load %arg8[%c0_175, %c0_176] : memref<40x128xf32, #tpu.memory_space<vmem>>, vector<16x128xf32>
    %c5_177 = arith.constant 5 : index
    %c0_178 = arith.constant 0 : index
    %c0_179 = arith.constant 0 : index
    %c0_180 = arith.constant 0 : index
    %208 = vector.load %arg4[%c5_177, %c0_178, %c0_179, %c0_180] : memref<6x3x128x128xf32, #tpu.memory_space<vmem>>, vector<1x1x128x128xf32>
    %209 = vector.shape_cast %208 : vector<1x1x128x128xf32> to vector<128x128xf32>
    %cst_181 = arith.constant dense<0.000000e+00> : vector<16x128xf32>
    %210 = tpu.matmul %207, %209, %cst_181 {dimension_numbers = #tpu.dot_dimension_numbers<[1], [0], [0], [1], [0, 0, 1, 1], [], []>} : vector<16x128xf32>, vector<128x128xf32>, vector<16x128xf32> -> vector<16x128xf32>
    %c1_182 = arith.constant 1 : index
    %c0_183 = arith.constant 0 : index
    %211 = vector.load %arg8[%c1_182, %c0_183] : memref<40x128xf32, #tpu.memory_space<vmem>>, vector<16x128xf32>
    %c5_184 = arith.constant 5 : index
    %c1_185 = arith.constant 1 : index
    %c0_186 = arith.constant 0 : index
    %c0_187 = arith.constant 0 : index
    %212 = vector.load %arg4[%c5_184, %c1_185, %c0_186, %c0_187] : memref<6x3x128x128xf32, #tpu.memory_space<vmem>>, vector<1x1x128x128xf32>
    %213 = vector.shape_cast %212 : vector<1x1x128x128xf32> to vector<128x128xf32>
    %cst_188 = arith.constant dense<0.000000e+00> : vector<16x128xf32>
    %214 = tpu.matmul %211, %213, %cst_188 {dimension_numbers = #tpu.dot_dimension_numbers<[1], [0], [0], [1], [0, 0, 1, 1], [], []>} : vector<16x128xf32>, vector<128x128xf32>, vector<16x128xf32> -> vector<16x128xf32>
    %215 = arith.addf %210, %214 : vector<16x128xf32>
    %c2_189 = arith.constant 2 : index
    %c0_190 = arith.constant 0 : index
    %216 = vector.load %arg8[%c2_189, %c0_190] : memref<40x128xf32, #tpu.memory_space<vmem>>, vector<16x128xf32>
    %c5_191 = arith.constant 5 : index
    %c2_192 = arith.constant 2 : index
    %c0_193 = arith.constant 0 : index
    %c0_194 = arith.constant 0 : index
    %217 = vector.load %arg4[%c5_191, %c2_192, %c0_193, %c0_194] : memref<6x3x128x128xf32, #tpu.memory_space<vmem>>, vector<1x1x128x128xf32>
    %218 = vector.shape_cast %217 : vector<1x1x128x128xf32> to vector<128x128xf32>
    %cst_195 = arith.constant dense<0.000000e+00> : vector<16x128xf32>
    %219 = tpu.matmul %216, %218, %cst_195 {dimension_numbers = #tpu.dot_dimension_numbers<[1], [0], [0], [1], [0, 0, 1, 1], [], []>} : vector<16x128xf32>, vector<128x128xf32>, vector<16x128xf32> -> vector<16x128xf32>
    %220 = arith.addf %215, %219 : vector<16x128xf32>
    %c5_196 = arith.constant 5 : index
    %c0_197 = arith.constant 0 : index
    %c0_198 = arith.constant 0 : index
    %221 = vector.load %arg5[%c5_196, %c0_197, %c0_198] : memref<6x1x128xf32, #tpu.memory_space<vmem>>, vector<1x1x128xf32>
    %222 = vector.shape_cast %221 : vector<1x1x128xf32> to vector<1x128xf32>
    %223 = vector.broadcast %222 : vector<1x128xf32> to vector<16x128xf32>
    %224 = arith.addf %220, %223 : vector<16x128xf32>
    %225 = arith.addf %224, %177 : vector<16x128xf32>
    %c0_199 = arith.constant 0 : index
    %c0_200 = arith.constant 0 : index
    %c0_201 = arith.constant 0 : index
    %226 = vector.load %arg6[%c0_199, %c0_200, %c0_201] : memref<1x16x128xf32, #tpu.memory_space<vmem>>, vector<1x16x128xf32>
    %227 = vector.shape_cast %226 : vector<1x16x128xf32> to vector<16x128xf32>
    %228 = vector.shape_cast %225 : vector<16x128xf32> to vector<1x16x128xf32>
    tpu.vector_store %arg6[%c0_199, %c0_200, %c0_201], %228 {strides = array<i32>} : memref<1x16x128xf32, #tpu.memory_space<vmem>>, vector<1x16x128xf32>,
    return
  }
  func.func @transform_1(%arg0: i32, %arg1: i32, %arg2: i32) -> (i32, i32, i32, i32) {
    %c0_i32 = arith.constant 0 : i32
    %c0_i32_0 = arith.constant 0 : i32
    %c0_i32_1 = arith.constant 0 : i32
    %c0_i32_2 = arith.constant 0 : i32
    %c0_i32_3 = arith.constant 0 : i32
    return %c0_i32, %c0_i32_0, %c0_i32_1, %c0_i32_2 : i32, i32, i32, i32
  }
  func.func @transform_2(%arg0: i32, %arg1: i32, %arg2: i32) -> (i32, i32, i32) {
    %c0_i32 = arith.constant 0 : i32
    %c0_i32_0 = arith.constant 0 : i32
    %c0_i32_1 = arith.constant 0 : i32
    %c0_i32_2 = arith.constant 0 : i32
    return %c0_i32, %c0_i32_0, %c0_i32_1 : i32, i32, i32
  }
  func.func @transform_3(%arg0: i32, %arg1: i32, %arg2: i32) -> (i32, i32, i32) {
    %c1_i32 = arith.constant 1 : i32
    %0 = arith.muli %arg0, %c1_i32 : i32
    %1 = arith.addi %0, %arg2 : i32
    %c0_i32 = arith.constant 0 : i32
    %c0_i32_0 = arith.constant 0 : i32
    return %arg1, %1, %c0_i32 : i32, i32, i32
  }
}

module attributes {stable_mosaic.version = 11 : i64} {
  func.func @_resblock_kernel(%arg0: i32, %arg1: i32, %arg2: i32, %arg3: memref<2x40x128xf32, #tpu.memory_space<any>>, %arg4: memref<6x3x128x128xf32, #tpu.memory_space<vmem>>, %arg5: memref<6x1x128xf32, #tpu.memory_space<vmem>>, %arg6: memref<1x16x128xf32, #tpu.memory_space<vmem>>, %arg7: memref<2x40x128xf32, #tpu.memory_space<vmem>>, %arg8: memref<40x128xf32, #tpu.memory_space<vmem>>, %arg9: memref<40x128xf32, #tpu.memory_space<vmem>>, %arg10: memref<2x!tpu.dma_semaphore, #tpu.memory_space<semaphore_mem>>) attributes {dimension_semantics = [#tpu.dimension_semantics<parallel>, #tpu.dimension_semantics<arbitrary>, #tpu.dimension_semantics<arbitrary>], iteration_bounds = array<i64: 1, 2, 1>, scalar_prefetch = 0 : i64, scratch_operands = 4 : i64, tpu.core_type = #tpu.core_type<tc>, window_params = [{}, {pipeline_mode = #tpu.pipeline_mode<synchronous>, transform_indices = @transform_1, window_bounds = array<i64: 6, 3, 128, 128>}, {pipeline_mode = #tpu.pipeline_mode<synchronous>, transform_indices = @transform_2, window_bounds = array<i64: 6, 1, 128>}, {transform_indices = @transform_3, window_bounds = array<i64: 1, 16, 128>}]} {
    %c1_i32 = arith.constant 1 : i32
    %0 = arith.muli %arg0, %c1_i32 : i32
    %1 = arith.addi %0, %arg2 : i32
    %c1_i32_0 = arith.constant 1 : i32
    %2 = arith.muli %arg1, %c1_i32_0 : i32
    %3 = arith.addi %2, %arg2 : i32
    %c2_i32 = arith.constant 2 : i32
    %c0_i32 = arith.constant 0 : i32
    %4 = arith.cmpi eq, %c2_i32, %c0_i32 : i32
    %c1_i32_1 = arith.constant 1 : i32
    %5 = arith.select %4, %c1_i32_1, %c2_i32 : i32
    %6 = arith.remsi %3, %5 : i32
    %c0_i32_2 = arith.constant 0 : i32
    %7 = arith.cmpi ne, %6, %c0_i32_2 : i32
    %c0_i32_3 = arith.constant 0 : i32
    %8 = arith.cmpi slt, %6, %c0_i32_3 : i32
    %c0_i32_4 = arith.constant 0 : i32
    %9 = arith.cmpi slt, %5, %c0_i32_4 : i32
    %10 = arith.xori %8, %9 : i1
    %11 = arith.andi %10, %7 : i1
    %12 = arith.addi %6, %5 : i32
    %13 = arith.select %11, %12, %6 : i32
    %c1_i32_5 = arith.constant 1 : i32
    %14 = arith.subi %c1_i32_5, %13 : i32
    %c0_i32_6 = arith.constant 0 : i32
    %15 = arith.cmpi eq, %arg1, %c0_i32_6 : i32
    %c0_i32_7 = arith.constant 0 : i32
    %16 = arith.cmpi eq, %arg2, %c0_i32_7 : i32
    %17 = arith.andi %15, %16 : i1
    %18 = arith.extui %17 : i1 to i32
    %c0_i32_8 = arith.constant 0 : i32
    %19 = arith.cmpi ne, %18, %c0_i32_8 : i32
    scf.if %19 {
      %c16_i32_202 = arith.constant 16 : i32
      %229 = arith.muli %1, %c16_i32_202 : i32
      %230 = tpu.assume_multiple %229, 8 : i32
      %c0_i32_203 = arith.constant 0 : i32
      %231 = tpu.memref_slice %arg3[%arg1, %230, %c0_i32_203] : memref<2x40x128xf32, #tpu.memory_space<any>> -> memref<1x40x128xf32, #tpu.memory_space<any>>
      %232 = tpu.memref_squeeze %231 : memref<1x40x128xf32, #tpu.memory_space<any>> -> memref<40x128xf32, #tpu.memory_space<any>>
      %c0_i32_204 = arith.constant 0 : i32
      %c0_i32_205 = arith.constant 0 : i32
      %233 = tpu.memref_slice %arg7[%13, %c0_i32_204, %c0_i32_205] : memref<2x40x128xf32, #tpu.memory_space<vmem>> -> memref<1x40x128xf32, #tpu.memory_space<vmem>>
      %234 = tpu.memref_squeeze %233 : memref<1x40x128xf32, #tpu.memory_space<vmem>> -> memref<40x128xf32, #tpu.memory_space<vmem>>
      %235 = tpu.memref_slice %arg10[%13] : memref<2x!tpu.dma_semaphore, #tpu.memory_space<semaphore_mem>> -> memref<1x!tpu.dma_semaphore, #tpu.memory_space<semaphore_mem>>
      %236 = tpu.memref_squeeze %235 : memref<1x!tpu.dma_semaphore, #tpu.memory_space<semaphore_mem>> -> memref<!tpu.dma_semaphore, #tpu.memory_space<semaphore_mem>>
      tpu.enqueue_dma source(%232 : memref<40x128xf32, #tpu.memory_space<any>>) target(%234 : memref<40x128xf32, #tpu.memory_space<vmem>>) target_semaphore(%236 : memref<!tpu.dma_semaphore, #tpu.memory_space<semaphore_mem>>)
    } else {
    }
    %c1_i32_9 = arith.constant 1 : i32
    %20 = arith.addi %arg2, %c1_i32_9 : i32
    %c1_i32_10 = arith.constant 1 : i32
    %21 = arith.cmpi slt, %20, %c1_i32_10 : i32
    %22 = arith.extui %21 : i1 to i32
    %c0_i32_11 = arith.constant 0 : i32
    %23 = arith.cmpi ne, %22, %c0_i32_11 : i32
    scf.if %23 {
      %c1_i32_202 = arith.constant 1 : i32
      %229 = arith.addi %1, %c1_i32_202 : i32
      %c16_i32_203 = arith.constant 16 : i32
      %230 = arith.muli %229, %c16_i32_203 : i32
      %231 = tpu.assume_multiple %230, 8 : i32
      %c0_i32_204 = arith.constant 0 : i32
      %232 = tpu.memref_slice %arg3[%arg1, %231, %c0_i32_204] : memref<2x40x128xf32, #tpu.memory_space<any>> -> memref<1x40x128xf32, #tpu.memory_space<any>>
      %233 = tpu.memref_squeeze %232 : memref<1x40x128xf32, #tpu.memory_space<any>> -> memref<40x128xf32, #tpu.memory_space<any>>
      %c0_i32_205 = arith.constant 0 : i32
      %c0_i32_206 = arith.constant 0 : i32
      %234 = tpu.memref_slice %arg7[%14, %c0_i32_205, %c0_i32_206] : memref<2x40x128xf32, #tpu.memory_space<vmem>> -> memref<1x40x128xf32, #tpu.memory_space<vmem>>
      %235 = tpu.memref_squeeze %234 : memref<1x40x128xf32, #tpu.memory_space<vmem>> -> memref<40x128xf32, #tpu.memory_space<vmem>>
      %236 = tpu.memref_slice %arg10[%14] : memref<2x!tpu.dma_semaphore, #tpu.memory_space<semaphore_mem>> -> memref<1x!tpu.dma_semaphore, #tpu.memory_space<semaphore_mem>>
      %237 = tpu.memref_squeeze %236 : memref<1x!tpu.dma_semaphore, #tpu.memory_space<semaphore_mem>> -> memref<!tpu.dma_semaphore, #tpu.memory_space<semaphore_mem>>
      tpu.enqueue_dma source(%233 : memref<40x128xf32, #tpu.memory_space<any>>) target(%235 : memref<40x128xf32, #tpu.memory_space<vmem>>) target_semaphore(%237 : memref<!tpu.dma_semaphore, #tpu.memory_space<semaphore_mem>>)
    } else {
    }
    %c1_i32_12 = arith.constant 1 : i32
    %24 = arith.addi %arg2, %c1_i32_12 : i32
    %c1_i32_13 = arith.constant 1 : i32
    %25 = arith.cmpi eq, %24, %c1_i32_13 : i32
    %c1_i32_14 = arith.constant 1 : i32
    %26 = arith.addi %arg1, %c1_i32_14 : i32
    %c2_i32_15 = arith.constant 2 : i32
    %27 = arith.cmpi slt, %26, %c2_i32_15 : i32
    %28 = arith.andi %25, %27 : i1
    %29 = arith.extui %28 : i1 to i32
    %c0_i32_16 = arith.constant 0 : i32
    %30 = arith.cmpi ne, %29, %c0_i32_16 : i32
    scf.if %30 {
      %c1_i32_202 = arith.constant 1 : i32
      %229 = arith.addi %arg1, %c1_i32_202 : i32
      %c1_i32_203 = arith.constant 1 : i32
      %230 = arith.muli %arg0, %c1_i32_203 : i32
      %c16_i32_204 = arith.constant 16 : i32
      %231 = arith.muli %230, %c16_i32_204 : i32
      %232 = tpu.assume_multiple %231, 8 : i32
      %c0_i32_205 = arith.constant 0 : i32
      %233 = tpu.memref_slice %arg3[%229, %232, %c0_i32_205] : memref<2x40x128xf32, #tpu.memory_space<any>> -> memref<1x40x128xf32, #tpu.memory_space<any>>
      %234 = tpu.memref_squeeze %233 : memref<1x40x128xf32, #tpu.memory_space<any>> -> memref<40x128xf32, #tpu.memory_space<any>>
      %c0_i32_206 = arith.constant 0 : i32
      %c0_i32_207 = arith.constant 0 : i32
      %235 = tpu.memref_slice %arg7[%14, %c0_i32_206, %c0_i32_207] : memref<2x40x128xf32, #tpu.memory_space<vmem>> -> memref<1x40x128xf32, #tpu.memory_space<vmem>>
      %236 = tpu.memref_squeeze %235 : memref<1x40x128xf32, #tpu.memory_space<vmem>> -> memref<40x128xf32, #tpu.memory_space<vmem>>
      %237 = tpu.memref_slice %arg10[%14] : memref<2x!tpu.dma_semaphore, #tpu.memory_space<semaphore_mem>> -> memref<1x!tpu.dma_semaphore, #tpu.memory_space<semaphore_mem>>
      %238 = tpu.memref_squeeze %237 : memref<1x!tpu.dma_semaphore, #tpu.memory_space<semaphore_mem>> -> memref<!tpu.dma_semaphore, #tpu.memory_space<semaphore_mem>>
      tpu.enqueue_dma source(%234 : memref<40x128xf32, #tpu.memory_space<any>>) target(%236 : memref<40x128xf32, #tpu.memory_space<vmem>>) target_semaphore(%238 : memref<!tpu.dma_semaphore, #tpu.memory_space<semaphore_mem>>)
    } else {
    }
    %c16_i32 = arith.constant 16 : i32
    %31 = arith.muli %1, %c16_i32 : i32
    %32 = tpu.assume_multiple %31, 8 : i32
    %c0_i32_17 = arith.constant 0 : i32
    %33 = tpu.memref_slice %arg3[%arg1, %32, %c0_i32_17] : memref<2x40x128xf32, #tpu.memory_space<any>> -> memref<1x40x128xf32, #tpu.memory_space<any>>
    %34 = tpu.memref_squeeze %33 : memref<1x40x128xf32, #tpu.memory_space<any>> -> memref<40x128xf32, #tpu.memory_space<any>>
    %c0_i32_18 = arith.constant 0 : i32
    %c0_i32_19 = arith.constant 0 : i32
    %35 = tpu.memref_slice %arg7[%13, %c0_i32_18, %c0_i32_19] : memref<2x40x128xf32, #tpu.memory_space<vmem>> -> memref<1x40x128xf32, #tpu.memory_space<vmem>>
    %36 = tpu.memref_squeeze %35 : memref<1x40x128xf32, #tpu.memory_space<vmem>> -> memref<40x128xf32, #tpu.memory_space<vmem>>
    %37 = tpu.memref_slice %arg10[%13] : memref<2x!tpu.dma_semaphore, #tpu.memory_space<semaphore_mem>> -> memref<1x!tpu.dma_semaphore, #tpu.memory_space<semaphore_mem>>
    %38 = tpu.memref_squeeze %37 : memref<1x!tpu.dma_semaphore, #tpu.memory_space<semaphore_mem>> -> memref<!tpu.dma_semaphore, #tpu.memory_space<semaphore_mem>>
    tpu.wait_dma2 semaphore(%38 : memref<!tpu.dma_semaphore, #tpu.memory_space<semaphore_mem>>) src(%34 : memref<40x128xf32, #tpu.memory_space<any>>) dst(%36 : memref<40x128xf32, #tpu.memory_space<vmem>>)
    %c16_i32_20 = arith.constant 16 : i32
    %39 = arith.muli %1, %c16_i32_20 : i32
    %c12_i32 = arith.constant 12 : i32
    %40 = arith.cmpi slt, %39, %c12_i32 : i32
    %c16_i32_21 = arith.constant 16 : i32
    %41 = arith.addi %39, %c16_i32_21 : i32
    %c12_i32_22 = arith.constant 12 : i32
    %42 = arith.addi %41, %c12_i32_22 : i32
    %c16_i32_23 = arith.constant 16 : i32
    %43 = arith.cmpi sgt, %42, %c16_i32_23 : i32
    %44 = arith.ori %40, %43 : i1
    %true = arith.constant true
    %45 = arith.xori %44, %true : i1
    %46 = arith.index_cast %13 : i32 to index
    %c0 = arith.constant 0 : index
    %c0_24 = arith.constant 0 : index
    %47 = vector.load %arg7[%46, %c0, %c0_24] : memref<2x40x128xf32, #tpu.memory_space<vmem>>, vector<1x40x128xf32>
    %48 = vector.shape_cast %47 : vector<1x40x128xf32> to vector<40x128xf32>
    %cst = arith.constant 0.000000e+00 : f32
    %49 = vector.broadcast %cst : f32 to vector<40x128xf32>
    %50 = arith.cmpf oge, %48, %49 : vector<40x128xf32>
    %cst_25 = arith.constant 1.000000e-01 : f32
    %51 = vector.broadcast %cst_25 : f32 to vector<40x128xf32>
    %52 = arith.mulf %51, %48 : vector<40x128xf32>
    %53 = arith.select %50, %48, %52 : vector<40x128xi1>, vector<40x128xf32>
    %c0_26 = arith.constant 0 : index
    %c0_27 = arith.constant 0 : index
    %54 = vector.load %arg8[%c0_26, %c0_27] : memref<40x128xf32, #tpu.memory_space<vmem>>, vector<40x128xf32>
    tpu.vector_store %arg8[%c0_26, %c0_27], %53 {strides = array<i32>} : memref<40x128xf32, #tpu.memory_space<vmem>>, vector<40x128xf32>,
    %55 = vector.extract_strided_slice %48 {offsets = [2, 0], sizes = [36, 128], strides = [1, 1]} : vector<40x128xf32> to vector<36x128xf32>
    %c0_28 = arith.constant 0 : index
    %c0_29 = arith.constant 0 : index
    %56 = vector.load %arg8[%c0_28, %c0_29] : memref<40x128xf32, #tpu.memory_space<vmem>>, vector<38x128xf32>
    %c0_30 = arith.constant 0 : index
    %c0_31 = arith.constant 0 : index
    %c0_32 = arith.constant 0 : index
    %c0_33 = arith.constant 0 : index
    %57 = vector.load %arg4[%c0_30, %c0_31, %c0_32, %c0_33] : memref<6x3x128x128xf32, #tpu.memory_space<vmem>>, vector<1x1x128x128xf32>
    %58 = vector.shape_cast %57 : vector<1x1x128x128xf32> to vector<128x128xf32>
    %cst_34 = arith.constant dense<0.000000e+00> : vector<38x128xf32>
    %59 = tpu.matmul %56, %58, %cst_34 {dimension_numbers = #tpu.dot_dimension_numbers<[1], [0], [0], [1], [0, 0, 1, 1], [], []>} : vector<38x128xf32>, vector<128x128xf32>, vector<38x128xf32> -> vector<38x128xf32>
    %c1 = arith.constant 1 : index
    %c0_35 = arith.constant 0 : index
    %60 = vector.load %arg8[%c1, %c0_35] : memref<40x128xf32, #tpu.memory_space<vmem>>, vector<38x128xf32>
    %c0_36 = arith.constant 0 : index
    %c1_37 = arith.constant 1 : index
    %c0_38 = arith.constant 0 : index
    %c0_39 = arith.constant 0 : index
    %61 = vector.load %arg4[%c0_36, %c1_37, %c0_38, %c0_39] : memref<6x3x128x128xf32, #tpu.memory_space<vmem>>, vector<1x1x128x128xf32>
    %62 = vector.shape_cast %61 : vector<1x1x128x128xf32> to vector<128x128xf32>
    %cst_40 = arith.constant dense<0.000000e+00> : vector<38x128xf32>
    %63 = tpu.matmul %60, %62, %cst_40 {dimension_numbers = #tpu.dot_dimension_numbers<[1], [0], [0], [1], [0, 0, 1, 1], [], []>} : vector<38x128xf32>, vector<128x128xf32>, vector<38x128xf32> -> vector<38x128xf32>
    %64 = arith.addf %59, %63 : vector<38x128xf32>
    %c2 = arith.constant 2 : index
    %c0_41 = arith.constant 0 : index
    %65 = vector.load %arg8[%c2, %c0_41] : memref<40x128xf32, #tpu.memory_space<vmem>>, vector<38x128xf32>
    %c0_42 = arith.constant 0 : index
    %c2_43 = arith.constant 2 : index
    %c0_44 = arith.constant 0 : index
    %c0_45 = arith.constant 0 : index
    %66 = vector.load %arg4[%c0_42, %c2_43, %c0_44, %c0_45] : memref<6x3x128x128xf32, #tpu.memory_space<vmem>>, vector<1x1x128x128xf32>
    %67 = vector.shape_cast %66 : vector<1x1x128x128xf32> to vector<128x128xf32>
    %cst_46 = arith.constant dense<0.000000e+00> : vector<38x128xf32>
    %68 = tpu.matmul %65, %67, %cst_46 {dimension_numbers = #tpu.dot_dimension_numbers<[1], [0], [0], [1], [0, 0, 1, 1], [], []>} : vector<38x128xf32>, vector<128x128xf32>, vector<38x128xf32> -> vector<38x128xf32>
    %69 = arith.addf %64, %68 : vector<38x128xf32>
    %c0_47 = arith.constant 0 : index
    %c0_48 = arith.constant 0 : index
    %c0_49 = arith.constant 0 : index
    %70 = vector.load %arg5[%c0_47, %c0_48, %c0_49] : memref<6x1x128xf32, #tpu.memory_space<vmem>>, vector<1x1x128xf32>
    %71 = vector.shape_cast %70 : vector<1x1x128xf32> to vector<1x128xf32>
    %72 = vector.broadcast %71 : vector<1x128xf32> to vector<38x128xf32>
    %73 = arith.addf %69, %72 : vector<38x128xf32>
    %c10_i32 = arith.constant 10 : i32
    %74 = arith.subi %39, %c10_i32 : i32
    %c1_i32_50 = arith.constant 1 : i32
    %75 = arith.subi %74, %c1_i32_50 : i32
    %cst_51 = arith.constant 0.000000e+00 : f32
    %76 = vector.broadcast %cst_51 : f32 to vector<38x128xf32>
    %77 = arith.cmpf oge, %73, %76 : vector<38x128xf32>
    %cst_52 = arith.constant 1.000000e-01 : f32
    %78 = vector.broadcast %cst_52 : f32 to vector<38x128xf32>
    %79 = arith.mulf %78, %73 : vector<38x128xf32>
    %80 = arith.select %77, %73, %79 : vector<38x128xi1>, vector<38x128xf32>
    %81 = arith.extui %44 : i1 to i32
    %c0_i32_53 = arith.constant 0 : i32
    %82 = arith.cmpi ne, %81, %c0_i32_53 : i32
    scf.if %82 {
      %229 = tpu.iota {dimensions = array<i32: 0>} : vector<38x128xi32>
      %230 = vector.broadcast %75 : i32 to vector<38x128xi32>
      %231 = arith.addi %229, %230 : vector<38x128xi32>
      %c0_i32_202 = arith.constant 0 : i32
      %232 = vector.broadcast %c0_i32_202 : i32 to vector<38x128xi32>
      %233 = arith.cmpi sge, %231, %232 : vector<38x128xi32>
      %c16_i32_203 = arith.constant 16 : i32
      %234 = vector.broadcast %c16_i32_203 : i32 to vector<38x128xi32>
      %235 = arith.cmpi slt, %231, %234 : vector<38x128xi32>
      %236 = arith.andi %233, %235 : vector<38x128xi1>
      %cst_204 = arith.constant 0.000000e+00 : f32
      %237 = vector.broadcast %cst_204 : f32 to vector<38x128xf32>
      %238 = arith.select %236, %80, %237 : vector<38x128xi1>, vector<38x128xf32>
      %c0_205 = arith.constant 0 : index
      %c0_206 = arith.constant 0 : index
      %239 = vector.load %arg8[%c0_205, %c0_206] : memref<40x128xf32, #tpu.memory_space<vmem>>, vector<38x128xf32>
      tpu.vector_store %arg8[%c0_205, %c0_206], %238 {strides = array<i32>} : memref<40x128xf32, #tpu.memory_space<vmem>>, vector<38x128xf32>,
    } else {
    }
    %83 = arith.extui %45 : i1 to i32
    %c0_i32_54 = arith.constant 0 : i32
    %84 = arith.cmpi ne, %83, %c0_i32_54 : i32
    scf.if %84 {
      %c0_202 = arith.constant 0 : index
      %c0_203 = arith.constant 0 : index
      %229 = vector.load %arg8[%c0_202, %c0_203] : memref<40x128xf32, #tpu.memory_space<vmem>>, vector<38x128xf32>
      tpu.vector_store %arg8[%c0_202, %c0_203], %80 {strides = array<i32>} : memref<40x128xf32, #tpu.memory_space<vmem>>, vector<38x128xf32>,
    } else {
    }
    %c0_55 = arith.constant 0 : index
    %c0_56 = arith.constant 0 : index
    %85 = vector.load %arg8[%c0_55, %c0_56] : memref<40x128xf32, #tpu.memory_space<vmem>>, vector<36x128xf32>
    %c1_57 = arith.constant 1 : index
    %c0_58 = arith.constant 0 : index
    %c0_59 = arith.constant 0 : index
    %c0_60 = arith.constant 0 : index
    %86 = vector.load %arg4[%c1_57, %c0_58, %c0_59, %c0_60] : memref<6x3x128x128xf32, #tpu.memory_space<vmem>>, vector<1x1x128x128xf32>
    %87 = vector.shape_cast %86 : vector<1x1x128x128xf32> to vector<128x128xf32>
    %cst_61 = arith.constant dense<0.000000e+00> : vector<36x128xf32>
    %88 = tpu.matmul %85, %87, %cst_61 {dimension_numbers = #tpu.dot_dimension_numbers<[1], [0], [0], [1], [0, 0, 1, 1], [], []>} : vector<36x128xf32>, vector<128x128xf32>, vector<36x128xf32> -> vector<36x128xf32>
    %c1_62 = arith.constant 1 : index
    %c0_63 = arith.constant 0 : index
    %89 = vector.load %arg8[%c1_62, %c0_63] : memref<40x128xf32, #tpu.memory_space<vmem>>, vector<36x128xf32>
    %c1_64 = arith.constant 1 : index
    %c1_65 = arith.constant 1 : index
    %c0_66 = arith.constant 0 : index
    %c0_67 = arith.constant 0 : index
    %90 = vector.load %arg4[%c1_64, %c1_65, %c0_66, %c0_67] : memref<6x3x128x128xf32, #tpu.memory_space<vmem>>, vector<1x1x128x128xf32>
    %91 = vector.shape_cast %90 : vector<1x1x128x128xf32> to vector<128x128xf32>
    %cst_68 = arith.constant dense<0.000000e+00> : vector<36x128xf32>
    %92 = tpu.matmul %89, %91, %cst_68 {dimension_numbers = #tpu.dot_dimension_numbers<[1], [0], [0], [1], [0, 0, 1, 1], [], []>} : vector<36x128xf32>, vector<128x128xf32>, vector<36x128xf32> -> vector<36x128xf32>
    %93 = arith.addf %88, %92 : vector<36x128xf32>
    %c2_69 = arith.constant 2 : index
    %c0_70 = arith.constant 0 : index
    %94 = vector.load %arg8[%c2_69, %c0_70] : memref<40x128xf32, #tpu.memory_space<vmem>>, vector<36x128xf32>
    %c1_71 = arith.constant 1 : index
    %c2_72 = arith.constant 2 : index
    %c0_73 = arith.constant 0 : index
    %c0_74 = arith.constant 0 : index
    %95 = vector.load %arg4[%c1_71, %c2_72, %c0_73, %c0_74] : memref<6x3x128x128xf32, #tpu.memory_space<vmem>>, vector<1x1x128x128xf32>
    %96 = vector.shape_cast %95 : vector<1x1x128x128xf32> to vector<128x128xf32>
    %cst_75 = arith.constant dense<0.000000e+00> : vector<36x128xf32>
    %97 = tpu.matmul %94, %96, %cst_75 {dimension_numbers = #tpu.dot_dimension_numbers<[1], [0], [0], [1], [0, 0, 1, 1], [], []>} : vector<36x128xf32>, vector<128x128xf32>, vector<36x128xf32> -> vector<36x128xf32>
    %98 = arith.addf %93, %97 : vector<36x128xf32>
    %c1_76 = arith.constant 1 : index
    %c0_77 = arith.constant 0 : index
    %c0_78 = arith.constant 0 : index
    %99 = vector.load %arg5[%c1_76, %c0_77, %c0_78] : memref<6x1x128xf32, #tpu.memory_space<vmem>>, vector<1x1x128xf32>
    %100 = vector.shape_cast %99 : vector<1x1x128xf32> to vector<1x128xf32>
    %101 = vector.broadcast %100 : vector<1x128xf32> to vector<36x128xf32>
    %102 = arith.addf %98, %101 : vector<36x128xf32>
    %103 = arith.addf %102, %55 : vector<36x128xf32>
    %c0_79 = arith.constant 0 : index
    %c0_80 = arith.constant 0 : index
    %104 = vector.load %arg9[%c0_79, %c0_80] : memref<40x128xf32, #tpu.memory_space<vmem>>, vector<36x128xf32>
    tpu.vector_store %arg9[%c0_79, %c0_80], %103 {strides = array<i32>} : memref<40x128xf32, #tpu.memory_space<vmem>>, vector<36x128xf32>,
    %c0_81 = arith.constant 0 : index
    %c0_82 = arith.constant 0 : index
    %105 = vector.load %arg9[%c0_81, %c0_82] : memref<40x128xf32, #tpu.memory_space<vmem>>, vector<36x128xf32>
    %c10_i32_83 = arith.constant 10 : i32
    %106 = arith.subi %39, %c10_i32_83 : i32
    %cst_84 = arith.constant 0.000000e+00 : f32
    %107 = vector.broadcast %cst_84 : f32 to vector<36x128xf32>
    %108 = arith.cmpf oge, %105, %107 : vector<36x128xf32>
    %cst_85 = arith.constant 1.000000e-01 : f32
    %109 = vector.broadcast %cst_85 : f32 to vector<36x128xf32>
    %110 = arith.mulf %109, %105 : vector<36x128xf32>
    %111 = arith.select %108, %105, %110 : vector<36x128xi1>, vector<36x128xf32>
    %112 = arith.extui %44 : i1 to i32
    %c0_i32_86 = arith.constant 0 : i32
    %113 = arith.cmpi ne, %112, %c0_i32_86 : i32
    scf.if %113 {
      %229 = tpu.iota {dimensions = array<i32: 0>} : vector<36x128xi32>
      %230 = vector.broadcast %106 : i32 to vector<36x128xi32>
      %231 = arith.addi %229, %230 : vector<36x128xi32>
      %c0_i32_202 = arith.constant 0 : i32
      %232 = vector.broadcast %c0_i32_202 : i32 to vector<36x128xi32>
      %233 = arith.cmpi sge, %231, %232 : vector<36x128xi32>
      %c16_i32_203 = arith.constant 16 : i32
      %234 = vector.broadcast %c16_i32_203 : i32 to vector<36x128xi32>
      %235 = arith.cmpi slt, %231, %234 : vector<36x128xi32>
      %236 = arith.andi %233, %235 : vector<36x128xi1>
      %cst_204 = arith.constant 0.000000e+00 : f32
      %237 = vector.broadcast %cst_204 : f32 to vector<36x128xf32>
      %238 = arith.select %236, %111, %237 : vector<36x128xi1>, vector<36x128xf32>
      %c0_205 = arith.constant 0 : index
      %c0_206 = arith.constant 0 : index
      %239 = vector.load %arg8[%c0_205, %c0_206] : memref<40x128xf32, #tpu.memory_space<vmem>>, vector<36x128xf32>
      tpu.vector_store %arg8[%c0_205, %c0_206], %238 {strides = array<i32>} : memref<40x128xf32, #tpu.memory_space<vmem>>, vector<36x128xf32>,
    } else {
    }
    %114 = arith.extui %45 : i1 to i32
    %c0_i32_87 = arith.constant 0 : i32
    %115 = arith.cmpi ne, %114, %c0_i32_87 : i32
    scf.if %115 {
      %c0_202 = arith.constant 0 : index
      %c0_203 = arith.constant 0 : index
      %229 = vector.load %arg8[%c0_202, %c0_203] : memref<40x128xf32, #tpu.memory_space<vmem>>, vector<36x128xf32>
      tpu.vector_store %arg8[%c0_202, %c0_203], %111 {strides = array<i32>} : memref<40x128xf32, #tpu.memory_space<vmem>>, vector<36x128xf32>,
    } else {
    }
    %116 = vector.extract_strided_slice %105 {offsets = [4, 0], sizes = [28, 128], strides = [1, 1]} : vector<36x128xf32> to vector<28x128xf32>
    %c0_88 = arith.constant 0 : index
    %c0_89 = arith.constant 0 : index
    %117 = vector.load %arg8[%c0_88, %c0_89] : memref<40x128xf32, #tpu.memory_space<vmem>>, vector<30x128xf32>
    %c2_90 = arith.constant 2 : index
    %c0_91 = arith.constant 0 : index
    %c0_92 = arith.constant 0 : index
    %c0_93 = arith.constant 0 : index
    %118 = vector.load %arg4[%c2_90, %c0_91, %c0_92, %c0_93] : memref<6x3x128x128xf32, #tpu.memory_space<vmem>>, vector<1x1x128x128xf32>
    %119 = vector.shape_cast %118 : vector<1x1x128x128xf32> to vector<128x128xf32>
    %cst_94 = arith.constant dense<0.000000e+00> : vector<30x128xf32>
    %120 = tpu.matmul %117, %119, %cst_94 {dimension_numbers = #tpu.dot_dimension_numbers<[1], [0], [0], [1], [0, 0, 1, 1], [], []>} : vector<30x128xf32>, vector<128x128xf32>, vector<30x128xf32> -> vector<30x128xf32>
    %c3 = arith.constant 3 : index
    %c0_95 = arith.constant 0 : index
    %121 = vector.load %arg8[%c3, %c0_95] : memref<40x128xf32, #tpu.memory_space<vmem>>, vector<30x128xf32>
    %c2_96 = arith.constant 2 : index
    %c1_97 = arith.constant 1 : index
    %c0_98 = arith.constant 0 : index
    %c0_99 = arith.constant 0 : index
    %122 = vector.load %arg4[%c2_96, %c1_97, %c0_98, %c0_99] : memref<6x3x128x128xf32, #tpu.memory_space<vmem>>, vector<1x1x128x128xf32>
    %123 = vector.shape_cast %122 : vector<1x1x128x128xf32> to vector<128x128xf32>
    %cst_100 = arith.constant dense<0.000000e+00> : vector<30x128xf32>
    %124 = tpu.matmul %121, %123, %cst_100 {dimension_numbers = #tpu.dot_dimension_numbers<[1], [0], [0], [1], [0, 0, 1, 1], [], []>} : vector<30x128xf32>, vector<128x128xf32>, vector<30x128xf32> -> vector<30x128xf32>
    %125 = arith.addf %120, %124 : vector<30x128xf32>
    %c6 = arith.constant 6 : index
    %c0_101 = arith.constant 0 : index
    %126 = vector.load %arg8[%c6, %c0_101] : memref<40x128xf32, #tpu.memory_space<vmem>>, vector<30x128xf32>
    %c2_102 = arith.constant 2 : index
    %c2_103 = arith.constant 2 : index
    %c0_104 = arith.constant 0 : index
    %c0_105 = arith.constant 0 : index
    %127 = vector.load %arg4[%c2_102, %c2_103, %c0_104, %c0_105] : memref<6x3x128x128xf32, #tpu.memory_space<vmem>>, vector<1x1x128x128xf32>
    %128 = vector.shape_cast %127 : vector<1x1x128x128xf32> to vector<128x128xf32>
    %cst_106 = arith.constant dense<0.000000e+00> : vector<30x128xf32>
    %129 = tpu.matmul %126, %128, %cst_106 {dimension_numbers = #tpu.dot_dimension_numbers<[1], [0], [0], [1], [0, 0, 1, 1], [], []>} : vector<30x128xf32>, vector<128x128xf32>, vector<30x128xf32> -> vector<30x128xf32>
    %130 = arith.addf %125, %129 : vector<30x128xf32>
    %c2_107 = arith.constant 2 : index
    %c0_108 = arith.constant 0 : index
    %c0_109 = arith.constant 0 : index
    %131 = vector.load %arg5[%c2_107, %c0_108, %c0_109] : memref<6x1x128xf32, #tpu.memory_space<vmem>>, vector<1x1x128xf32>
    %132 = vector.shape_cast %131 : vector<1x1x128xf32> to vector<1x128xf32>
    %133 = vector.broadcast %132 : vector<1x128xf32> to vector<30x128xf32>
    %134 = arith.addf %130, %133 : vector<30x128xf32>
    %c6_i32 = arith.constant 6 : i32
    %135 = arith.subi %39, %c6_i32 : i32
    %c1_i32_110 = arith.constant 1 : i32
    %136 = arith.subi %135, %c1_i32_110 : i32
    %cst_111 = arith.constant 0.000000e+00 : f32
    %137 = vector.broadcast %cst_111 : f32 to vector<30x128xf32>
    %138 = arith.cmpf oge, %134, %137 : vector<30x128xf32>
    %cst_112 = arith.constant 1.000000e-01 : f32
    %139 = vector.broadcast %cst_112 : f32 to vector<30x128xf32>
    %140 = arith.mulf %139, %134 : vector<30x128xf32>
    %141 = arith.select %138, %134, %140 : vector<30x128xi1>, vector<30x128xf32>
    %142 = arith.extui %44 : i1 to i32
    %c0_i32_113 = arith.constant 0 : i32
    %143 = arith.cmpi ne, %142, %c0_i32_113 : i32
    scf.if %143 {
      %229 = tpu.iota {dimensions = array<i32: 0>} : vector<30x128xi32>
      %230 = vector.broadcast %136 : i32 to vector<30x128xi32>
      %231 = arith.addi %229, %230 : vector<30x128xi32>
      %c0_i32_202 = arith.constant 0 : i32
      %232 = vector.broadcast %c0_i32_202 : i32 to vector<30x128xi32>
      %233 = arith.cmpi sge, %231, %232 : vector<30x128xi32>
      %c16_i32_203 = arith.constant 16 : i32
      %234 = vector.broadcast %c16_i32_203 : i32 to vector<30x128xi32>
      %235 = arith.cmpi slt, %231, %234 : vector<30x128xi32>
      %236 = arith.andi %233, %235 : vector<30x128xi1>
      %cst_204 = arith.constant 0.000000e+00 : f32
      %237 = vector.broadcast %cst_204 : f32 to vector<30x128xf32>
      %238 = arith.select %236, %141, %237 : vector<30x128xi1>, vector<30x128xf32>
      %c0_205 = arith.constant 0 : index
      %c0_206 = arith.constant 0 : index
      %239 = vector.load %arg8[%c0_205, %c0_206] : memref<40x128xf32, #tpu.memory_space<vmem>>, vector<30x128xf32>
      tpu.vector_store %arg8[%c0_205, %c0_206], %238 {strides = array<i32>} : memref<40x128xf32, #tpu.memory_space<vmem>>, vector<30x128xf32>,
    } else {
    }
    %144 = arith.extui %45 : i1 to i32
    %c0_i32_114 = arith.constant 0 : i32
    %145 = arith.cmpi ne, %144, %c0_i32_114 : i32
    scf.if %145 {
      %c0_202 = arith.constant 0 : index
      %c0_203 = arith.constant 0 : index
      %229 = vector.load %arg8[%c0_202, %c0_203] : memref<40x128xf32, #tpu.memory_space<vmem>>, vector<30x128xf32>
      tpu.vector_store %arg8[%c0_202, %c0_203], %141 {strides = array<i32>} : memref<40x128xf32, #tpu.memory_space<vmem>>, vector<30x128xf32>,
    } else {
    }
    %c0_115 = arith.constant 0 : index
    %c0_116 = arith.constant 0 : index
    %146 = vector.load %arg8[%c0_115, %c0_116] : memref<40x128xf32, #tpu.memory_space<vmem>>, vector<28x128xf32>
    %c3_117 = arith.constant 3 : index
    %c0_118 = arith.constant 0 : index
    %c0_119 = arith.constant 0 : index
    %c0_120 = arith.constant 0 : index
    %147 = vector.load %arg4[%c3_117, %c0_118, %c0_119, %c0_120] : memref<6x3x128x128xf32, #tpu.memory_space<vmem>>, vector<1x1x128x128xf32>
    %148 = vector.shape_cast %147 : vector<1x1x128x128xf32> to vector<128x128xf32>
    %cst_121 = arith.constant dense<0.000000e+00> : vector<28x128xf32>
    %149 = tpu.matmul %146, %148, %cst_121 {dimension_numbers = #tpu.dot_dimension_numbers<[1], [0], [0], [1], [0, 0, 1, 1], [], []>} : vector<28x128xf32>, vector<128x128xf32>, vector<28x128xf32> -> vector<28x128xf32>
    %c1_122 = arith.constant 1 : index
    %c0_123 = arith.constant 0 : index
    %150 = vector.load %arg8[%c1_122, %c0_123] : memref<40x128xf32, #tpu.memory_space<vmem>>, vector<28x128xf32>
    %c3_124 = arith.constant 3 : index
    %c1_125 = arith.constant 1 : index
    %c0_126 = arith.constant 0 : index
    %c0_127 = arith.constant 0 : index
    %151 = vector.load %arg4[%c3_124, %c1_125, %c0_126, %c0_127] : memref<6x3x128x128xf32, #tpu.memory_space<vmem>>, vector<1x1x128x128xf32>
    %152 = vector.shape_cast %151 : vector<1x1x128x128xf32> to vector<128x128xf32>
    %cst_128 = arith.constant dense<0.000000e+00> : vector<28x128xf32>
    %153 = tpu.matmul %150, %152, %cst_128 {dimension_numbers = #tpu.dot_dimension_numbers<[1], [0], [0], [1], [0, 0, 1, 1], [], []>} : vector<28x128xf32>, vector<128x128xf32>, vector<28x128xf32> -> vector<28x128xf32>
    %154 = arith.addf %149, %153 : vector<28x128xf32>
    %c2_129 = arith.constant 2 : index
    %c0_130 = arith.constant 0 : index
    %155 = vector.load %arg8[%c2_129, %c0_130] : memref<40x128xf32, #tpu.memory_space<vmem>>, vector<28x128xf32>
    %c3_131 = arith.constant 3 : index
    %c2_132 = arith.constant 2 : index
    %c0_133 = arith.constant 0 : index
    %c0_134 = arith.constant 0 : index
    %156 = vector.load %arg4[%c3_131, %c2_132, %c0_133, %c0_134] : memref<6x3x128x128xf32, #tpu.memory_space<vmem>>, vector<1x1x128x128xf32>
    %157 = vector.shape_cast %156 : vector<1x1x128x128xf32> to vector<128x128xf32>
    %cst_135 = arith.constant dense<0.000000e+00> : vector<28x128xf32>
    %158 = tpu.matmul %155, %157, %cst_135 {dimension_numbers = #tpu.dot_dimension_numbers<[1], [0], [0], [1], [0, 0, 1, 1], [], []>} : vector<28x128xf32>, vector<128x128xf32>, vector<28x128xf32> -> vector<28x128xf32>
    %159 = arith.addf %154, %158 : vector<28x128xf32>
    %c3_136 = arith.constant 3 : index
    %c0_137 = arith.constant 0 : index
    %c0_138 = arith.constant 0 : index
    %160 = vector.load %arg5[%c3_136, %c0_137, %c0_138] : memref<6x1x128xf32, #tpu.memory_space<vmem>>, vector<1x1x128xf32>
    %161 = vector.shape_cast %160 : vector<1x1x128xf32> to vector<1x128xf32>
    %162 = vector.broadcast %161 : vector<1x128xf32> to vector<28x128xf32>
    %163 = arith.addf %159, %162 : vector<28x128xf32>
    %164 = arith.addf %163, %116 : vector<28x128xf32>
    %c0_139 = arith.constant 0 : index
    %c0_140 = arith.constant 0 : index
    %165 = vector.load %arg9[%c0_139, %c0_140] : memref<40x128xf32, #tpu.memory_space<vmem>>, vector<28x128xf32>
    tpu.vector_store %arg9[%c0_139, %c0_140], %164 {strides = array<i32>} : memref<40x128xf32, #tpu.memory_space<vmem>>, vector<28x128xf32>,
    %c0_141 = arith.constant 0 : index
    %c0_142 = arith.constant 0 : index
    %166 = vector.load %arg9[%c0_141, %c0_142] : memref<40x128xf32, #tpu.memory_space<vmem>>, vector<28x128xf32>
    %c6_i32_143 = arith.constant 6 : i32
    %167 = arith.subi %39, %c6_i32_143 : i32
    %cst_144 = arith.constant 0.000000e+00 : f32
    %168 = vector.broadcast %cst_144 : f32 to vector<28x128xf32>
    %169 = arith.cmpf oge, %166, %168 : vector<28x128xf32>
    %cst_145 = arith.constant 1.000000e-01 : f32
    %170 = vector.broadcast %cst_145 : f32 to vector<28x128xf32>
    %171 = arith.mulf %170, %166 : vector<28x128xf32>
    %172 = arith.select %169, %166, %171 : vector<28x128xi1>, vector<28x128xf32>
    %173 = arith.extui %44 : i1 to i32
    %c0_i32_146 = arith.constant 0 : i32
    %174 = arith.cmpi ne, %173, %c0_i32_146 : i32
    scf.if %174 {
      %229 = tpu.iota {dimensions = array<i32: 0>} : vector<28x128xi32>
      %230 = vector.broadcast %167 : i32 to vector<28x128xi32>
      %231 = arith.addi %229, %230 : vector<28x128xi32>
      %c0_i32_202 = arith.constant 0 : i32
      %232 = vector.broadcast %c0_i32_202 : i32 to vector<28x128xi32>
      %233 = arith.cmpi sge, %231, %232 : vector<28x128xi32>
      %c16_i32_203 = arith.constant 16 : i32
      %234 = vector.broadcast %c16_i32_203 : i32 to vector<28x128xi32>
      %235 = arith.cmpi slt, %231, %234 : vector<28x128xi32>
      %236 = arith.andi %233, %235 : vector<28x128xi1>
      %cst_204 = arith.constant 0.000000e+00 : f32
      %237 = vector.broadcast %cst_204 : f32 to vector<28x128xf32>
      %238 = arith.select %236, %172, %237 : vector<28x128xi1>, vector<28x128xf32>
      %c0_205 = arith.constant 0 : index
      %c0_206 = arith.constant 0 : index
      %239 = vector.load %arg8[%c0_205, %c0_206] : memref<40x128xf32, #tpu.memory_space<vmem>>, vector<28x128xf32>
      tpu.vector_store %arg8[%c0_205, %c0_206], %238 {strides = array<i32>} : memref<40x128xf32, #tpu.memory_space<vmem>>, vector<28x128xf32>,
    } else {
    }
    %175 = arith.extui %45 : i1 to i32
    %c0_i32_147 = arith.constant 0 : i32
    %176 = arith.cmpi ne, %175, %c0_i32_147 : i32
    scf.if %176 {
      %c0_202 = arith.constant 0 : index
      %c0_203 = arith.constant 0 : index
      %229 = vector.load %arg8[%c0_202, %c0_203] : memref<40x128xf32, #tpu.memory_space<vmem>>, vector<28x128xf32>
      tpu.vector_store %arg8[%c0_202, %c0_203], %172 {strides = array<i32>} : memref<40x128xf32, #tpu.memory_space<vmem>>, vector<28x128xf32>,
    } else {
    }
    %177 = vector.extract_strided_slice %166 {offsets = [6, 0], sizes = [16, 128], strides = [1, 1]} : vector<28x128xf32> to vector<16x128xf32>
    %c0_148 = arith.constant 0 : index
    %c0_149 = arith.constant 0 : index
    %178 = vector.load %arg8[%c0_148, %c0_149] : memref<40x128xf32, #tpu.memory_space<vmem>>, vector<18x128xf32>
    %c4 = arith.constant 4 : index
    %c0_150 = arith.constant 0 : index
    %c0_151 = arith.constant 0 : index
    %c0_152 = arith.constant 0 : index
    %179 = vector.load %arg4[%c4, %c0_150, %c0_151, %c0_152] : memref<6x3x128x128xf32, #tpu.memory_space<vmem>>, vector<1x1x128x128xf32>
    %180 = vector.shape_cast %179 : vector<1x1x128x128xf32> to vector<128x128xf32>
    %cst_153 = arith.constant dense<0.000000e+00> : vector<18x128xf32>
    %181 = tpu.matmul %178, %180, %cst_153 {dimension_numbers = #tpu.dot_dimension_numbers<[1], [0], [0], [1], [0, 0, 1, 1], [], []>} : vector<18x128xf32>, vector<128x128xf32>, vector<18x128xf32> -> vector<18x128xf32>
    %c5 = arith.constant 5 : index
    %c0_154 = arith.constant 0 : index
    %182 = vector.load %arg8[%c5, %c0_154] : memref<40x128xf32, #tpu.memory_space<vmem>>, vector<18x128xf32>
    %c4_155 = arith.constant 4 : index
    %c1_156 = arith.constant 1 : index
    %c0_157 = arith.constant 0 : index
    %c0_158 = arith.constant 0 : index
    %183 = vector.load %arg4[%c4_155, %c1_156, %c0_157, %c0_158] : memref<6x3x128x128xf32, #tpu.memory_space<vmem>>, vector<1x1x128x128xf32>
    %184 = vector.shape_cast %183 : vector<1x1x128x128xf32> to vector<128x128xf32>
    %cst_159 = arith.constant dense<0.000000e+00> : vector<18x128xf32>
    %185 = tpu.matmul %182, %184, %cst_159 {dimension_numbers = #tpu.dot_dimension_numbers<[1], [0], [0], [1], [0, 0, 1, 1], [], []>} : vector<18x128xf32>, vector<128x128xf32>, vector<18x128xf32> -> vector<18x128xf32>
    %186 = arith.addf %181, %185 : vector<18x128xf32>
    %c10 = arith.constant 10 : index
    %c0_160 = arith.constant 0 : index
    %187 = vector.load %arg8[%c10, %c0_160] : memref<40x128xf32, #tpu.memory_space<vmem>>, vector<18x128xf32>
    %c4_161 = arith.constant 4 : index
    %c2_162 = arith.constant 2 : index
    %c0_163 = arith.constant 0 : index
    %c0_164 = arith.constant 0 : index
    %188 = vector.load %arg4[%c4_161, %c2_162, %c0_163, %c0_164] : memref<6x3x128x128xf32, #tpu.memory_space<vmem>>, vector<1x1x128x128xf32>
    %189 = vector.shape_cast %188 : vector<1x1x128x128xf32> to vector<128x128xf32>
    %cst_165 = arith.constant dense<0.000000e+00> : vector<18x128xf32>
    %190 = tpu.matmul %187, %189, %cst_165 {dimension_numbers = #tpu.dot_dimension_numbers<[1], [0], [0], [1], [0, 0, 1, 1], [], []>} : vector<18x128xf32>, vector<128x128xf32>, vector<18x128xf32> -> vector<18x128xf32>
    %191 = arith.addf %186, %190 : vector<18x128xf32>
    %c4_166 = arith.constant 4 : index
    %c0_167 = arith.constant 0 : index
    %c0_168 = arith.constant 0 : index
    %192 = vector.load %arg5[%c4_166, %c0_167, %c0_168] : memref<6x1x128xf32, #tpu.memory_space<vmem>>, vector<1x1x128xf32>
    %193 = vector.shape_cast %192 : vector<1x1x128xf32> to vector<1x128xf32>
    %194 = vector.broadcast %193 : vector<1x128xf32> to vector<18x128xf32>
    %195 = arith.addf %191, %194 : vector<18x128xf32>
    %c0_i32_169 = arith.constant 0 : i32
    %196 = arith.subi %39, %c0_i32_169 : i32
    %c1_i32_170 = arith.constant 1 : i32
    %197 = arith.subi %196, %c1_i32_170 : i32
    %cst_171 = arith.constant 0.000000e+00 : f32
    %198 = vector.broadcast %cst_171 : f32 to vector<18x128xf32>
    %199 = arith.cmpf oge, %195, %198 : vector<18x128xf32>
    %cst_172 = arith.constant 1.000000e-01 : f32
    %200 = vector.broadcast %cst_172 : f32 to vector<18x128xf32>
    %201 = arith.mulf %200, %195 : vector<18x128xf32>
    %202 = arith.select %199, %195, %201 : vector<18x128xi1>, vector<18x128xf32>
    %203 = arith.extui %44 : i1 to i32
    %c0_i32_173 = arith.constant 0 : i32
    %204 = arith.cmpi ne, %203, %c0_i32_173 : i32
    scf.if %204 {
      %229 = tpu.iota {dimensions = array<i32: 0>} : vector<18x128xi32>
      %230 = vector.broadcast %197 : i32 to vector<18x128xi32>
      %231 = arith.addi %229, %230 : vector<18x128xi32>
      %c0_i32_202 = arith.constant 0 : i32
      %232 = vector.broadcast %c0_i32_202 : i32 to vector<18x128xi32>
      %233 = arith.cmpi sge, %231, %232 : vector<18x128xi32>
      %c16_i32_203 = arith.constant 16 : i32
      %234 = vector.broadcast %c16_i32_203 : i32 to vector<18x128xi32>
      %235 = arith.cmpi slt, %231, %234 : vector<18x128xi32>
      %236 = arith.andi %233, %235 : vector<18x128xi1>
      %cst_204 = arith.constant 0.000000e+00 : f32
      %237 = vector.broadcast %cst_204 : f32 to vector<18x128xf32>
      %238 = arith.select %236, %202, %237 : vector<18x128xi1>, vector<18x128xf32>
      %c0_205 = arith.constant 0 : index
      %c0_206 = arith.constant 0 : index
      %239 = vector.load %arg8[%c0_205, %c0_206] : memref<40x128xf32, #tpu.memory_space<vmem>>, vector<18x128xf32>
      tpu.vector_store %arg8[%c0_205, %c0_206], %238 {strides = array<i32>} : memref<40x128xf32, #tpu.memory_space<vmem>>, vector<18x128xf32>,
    } else {
    }
    %205 = arith.extui %45 : i1 to i32
    %c0_i32_174 = arith.constant 0 : i32
    %206 = arith.cmpi ne, %205, %c0_i32_174 : i32
    scf.if %206 {
      %c0_202 = arith.constant 0 : index
      %c0_203 = arith.constant 0 : index
      %229 = vector.load %arg8[%c0_202, %c0_203] : memref<40x128xf32, #tpu.memory_space<vmem>>, vector<18x128xf32>
      tpu.vector_store %arg8[%c0_202, %c0_203], %202 {strides = array<i32>} : memref<40x128xf32, #tpu.memory_space<vmem>>, vector<18x128xf32>,
    } else {
    }
    %c0_175 = arith.constant 0 : index
    %c0_176 = arith.constant 0 : index
    %207 = vector.load %arg8[%c0_175, %c0_176] : memref<40x128xf32, #tpu.memory_space<vmem>>, vector<16x128xf32>
    %c5_177 = arith.constant 5 : index
    %c0_178 = arith.constant 0 : index
    %c0_179 = arith.constant 0 : index
    %c0_180 = arith.constant 0 : index
    %208 = vector.load %arg4[%c5_177, %c0_178, %c0_179, %c0_180] : memref<6x3x128x128xf32, #tpu.memory_space<vmem>>, vector<1x1x128x128xf32>
    %209 = vector.shape_cast %208 : vector<1x1x128x128xf32> to vector<128x128xf32>
    %cst_181 = arith.constant dense<0.000000e+00> : vector<16x128xf32>
    %210 = tpu.matmul %207, %209, %cst_181 {dimension_numbers = #tpu.dot_dimension_numbers<[1], [0], [0], [1], [0, 0, 1, 1], [], []>} : vector<16x128xf32>, vector<128x128xf32>, vector<16x128xf32> -> vector<16x128xf32>
    %c1_182 = arith.constant 1 : index
    %c0_183 = arith.constant 0 : index
    %211 = vector.load %arg8[%c1_182, %c0_183] : memref<40x128xf32, #tpu.memory_space<vmem>>, vector<16x128xf32>
    %c5_184 = arith.constant 5 : index
    %c1_185 = arith.constant 1 : index
    %c0_186 = arith.constant 0 : index
    %c0_187 = arith.constant 0 : index
    %212 = vector.load %arg4[%c5_184, %c1_185, %c0_186, %c0_187] : memref<6x3x128x128xf32, #tpu.memory_space<vmem>>, vector<1x1x128x128xf32>
    %213 = vector.shape_cast %212 : vector<1x1x128x128xf32> to vector<128x128xf32>
    %cst_188 = arith.constant dense<0.000000e+00> : vector<16x128xf32>
    %214 = tpu.matmul %211, %213, %cst_188 {dimension_numbers = #tpu.dot_dimension_numbers<[1], [0], [0], [1], [0, 0, 1, 1], [], []>} : vector<16x128xf32>, vector<128x128xf32>, vector<16x128xf32> -> vector<16x128xf32>
    %215 = arith.addf %210, %214 : vector<16x128xf32>
    %c2_189 = arith.constant 2 : index
    %c0_190 = arith.constant 0 : index
    %216 = vector.load %arg8[%c2_189, %c0_190] : memref<40x128xf32, #tpu.memory_space<vmem>>, vector<16x128xf32>
    %c5_191 = arith.constant 5 : index
    %c2_192 = arith.constant 2 : index
    %c0_193 = arith.constant 0 : index
    %c0_194 = arith.constant 0 : index
    %217 = vector.load %arg4[%c5_191, %c2_192, %c0_193, %c0_194] : memref<6x3x128x128xf32, #tpu.memory_space<vmem>>, vector<1x1x128x128xf32>
    %218 = vector.shape_cast %217 : vector<1x1x128x128xf32> to vector<128x128xf32>
    %cst_195 = arith.constant dense<0.000000e+00> : vector<16x128xf32>
    %219 = tpu.matmul %216, %218, %cst_195 {dimension_numbers = #tpu.dot_dimension_numbers<[1], [0], [0], [1], [0, 0, 1, 1], [], []>} : vector<16x128xf32>, vector<128x128xf32>, vector<16x128xf32> -> vector<16x128xf32>
    %220 = arith.addf %215, %219 : vector<16x128xf32>
    %c5_196 = arith.constant 5 : index
    %c0_197 = arith.constant 0 : index
    %c0_198 = arith.constant 0 : index
    %221 = vector.load %arg5[%c5_196, %c0_197, %c0_198] : memref<6x1x128xf32, #tpu.memory_space<vmem>>, vector<1x1x128xf32>
    %222 = vector.shape_cast %221 : vector<1x1x128xf32> to vector<1x128xf32>
    %223 = vector.broadcast %222 : vector<1x128xf32> to vector<16x128xf32>
    %224 = arith.addf %220, %223 : vector<16x128xf32>
    %225 = arith.addf %224, %177 : vector<16x128xf32>
    %c0_199 = arith.constant 0 : index
    %c0_200 = arith.constant 0 : index
    %c0_201 = arith.constant 0 : index
    %226 = vector.load %arg6[%c0_199, %c0_200, %c0_201] : memref<1x16x128xf32, #tpu.memory_space<vmem>>, vector<1x16x128xf32>
    %227 = vector.shape_cast %226 : vector<1x16x128xf32> to vector<16x128xf32>
    %228 = vector.shape_cast %225 : vector<16x128xf32> to vector<1x16x128xf32>
    tpu.vector_store %arg6[%c0_199, %c0_200, %c0_201], %228 {strides = array<i32>} : memref<1x16x128xf32, #tpu.memory_space<vmem>>, vector<1x16x128xf32>,
    return
  }
  func.func @transform_1(%arg0: i32, %arg1: i32, %arg2: i32) -> (i32, i32, i32, i32) {
    %c0_i32 = arith.constant 0 : i32
    %c0_i32_0 = arith.constant 0 : i32
    %c0_i32_1 = arith.constant 0 : i32
    %c0_i32_2 = arith.constant 0 : i32
    %c0_i32_3 = arith.constant 0 : i32
    return %c0_i32, %c0_i32_0, %c0_i32_1, %c0_i32_2 : i32, i32, i32, i32
  }
  func.func @transform_2(%arg0: i32, %arg1: i32, %arg2: i32) -> (i32, i32, i32) {
    %c0_i32 = arith.constant 0 : i32
    %c0_i32_0 = arith.constant 0 : i32
    %c0_i32_1 = arith.constant 0 : i32
    %c0_i32_2 = arith.constant 0 : i32
    return %c0_i32, %c0_i32_0, %c0_i32_1 : i32, i32, i32
  }
  func.func @transform_3(%arg0: i32, %arg1: i32, %arg2: i32) -> (i32, i32, i32) {
    %c1_i32 = arith.constant 1 : i32
    %0 = arith.muli %arg0, %c1_i32 : i32
    %1 = arith.addi %0, %arg2 : i32
    %c0_i32 = arith.constant 0 : i32
    %c0_i32_0 = arith.constant 0 : i32
    return %arg1, %1, %c0_i32 : i32, i32, i32
  }
}

</mosaic_0001>

<bundles_post_ra>
// kernel: tpu_custom_call.1
= control target key start
LH: loop header
LB: loop body
LE: loop exit
PB: predicated region body
PF: predicated region fallthrough
CT: control target
= control target key end

     0   :  { %s4817_s0 = inlined_call_operand.hbm [shape: f32[2,40,128], index: 0, kind: input, shape index: {}]   ;;  %s4818_s1 = inlined_call_operand.hbm [shape: f32[6,3,128,128], index: 1, kind: input, shape index: {}]   ;;  %s4819_s2 = inlined_call_operand.hbm [shape: f32[6,1,128], index: 2, kind: input, shape index: {}]   ;;  %s4820_s3 = inlined_call_operand.hbm [shape: f32[2,16,128], index: 3, kind: output, shape index: {}]  }
   0x1   :  { %4827 = sst [smem:[#allocation26_spill]] %s4818_s1 }
   0x2   :  { %4828 = sst [smem:[#allocation27_spill]] %s4819_s2 }
   0x3   :  { %8 = vsyncpa [#allocation7], 0 }
   0x4   :  { %9 = vsyncpa [#allocation10], 0 }
   0x5   :  { %10 = vsyncpa [#allocation8], 0 }
   0x6   :  { %12 = vsyncpa [#allocation8 + $0x1], 0  ;;  %s4239_s12 = smov 0   ;;  %s4241_s13 = smov 0  }
   0x7   :  { %s4243_s14 = smov 0   ;;  %s4245_s15 = smov 0  }
   0x8   :  { %s4247_s16 = smov 0   ;;  %s4249_s17 = smov 0  }
   0x9 LB: > { %4829 = sst [smem:[#allocation24_spill]] %s4201_s16  ;;  %s2789_s18 = sadd.s32 4294967295, %s4205_s17   ;;  %s4205_s17 = sphi %s4249_s17, %s18_s17   ;;  %s4201_s16 = sphi %s4247_s16, %s4845_s16   ;;  %s4197_s15 = sphi %s4245_s15, %s4844_s15   ;;  %s4193_s14 = sphi %s4243_s14, %s4848_s14   ;;  %s4189_s13 = sphi %s4241_s13, %s4847_s13   ;;  %s4185_s12 = sphi %s4239_s12, %s4846_s12  }
   0xa   : > { %s2790_s19 = sadd.s32 4294967294, %s4205_s17   ;;  %s33_s20 = sadd.s32 1, %s4201_s16 }
   0xb   : > { %s90_s21 = sadd.s32 1, %s4193_s14  ;;  %p35_p0 = scmp.ge.s32.totalorder %s33_s20, 2 }
   0xc   : > { %p100_p1 = scmp.ne.s32.totalorder %s4193_s14, %s4189_s13  ;;  %p101_p2 = scmp.eq.s32.totalorder %s2789_s18, 1 }
   0xd   : > { %p106_p3 = scmp.ne.s32.totalorder %s4189_s13, %s4185_s12  ;;  %s4850_s20 = smov (%p35_p0, %s33_s20), 0 }
   0xe   : > { %4830 = sst [smem:[#allocation25_spill]] %s4850_s20  ;;  %p4279_p4 = por %p101_p2, %p100_p1 }
   0xf   : > { %p107_p5 = scmp.eq.s32.totalorder %s2790_s19, 1  ;;  %s85_s23 = ssub.s32 %s4201_s16, %s4850_s20 }
  0x10   : > { %s4831_s22 = scalar_select %p4279_p4, 1, 0 }
  0x11   : > { %p2791_p6 = scmp.ge.s32.totalorder %s4205_s17, 1  ;;  %p88_p7 = scmp.eq.s32.totalorder %s85_s23, 0 }
  0x12   : > { %p4286_p8 = por %p107_p5, %p106_p3  ;;  %p114_p9 = scmp.lt.s32.totalorder %s4205_s17, 3 }
  0x13   : > { %s4292_s25 = scalar_select %p88_p7, %s4193_s14, %s90_s21  }
  0x14   : > { %s4832_s24 = scalar_select %p4286_p8, 1, 0 }
  0x15   : > { %p4294_p10 = pnand %p2791_p6, %p114_p9  ;;  %p4298_p11 = scmp.eq.s32.totalorder %s2789_s18, 0 }
  0x16   : > { %s4207_s28 = smov [#allocation6]   ;;  %s4208_s4 = smov [#allocation9]  }
  0x17   : > { %p3930_p12 = pneg %p4294_p10  ;;  %s126_s29 = sshll.u32 %s4207_s28, 4  ;;  %s127_s29 = int_to_ptr.vmem [resolvable:$true] %s126_s29 }
  0x18   : > { %s139_s5 = sshll.u32 %s4208_s4, 4  ;;  %s4025_s6 = scalar_lea.vmem %s127_s29, 36864  ;;  %s140_s5 = int_to_ptr.vmem [resolvable:$true] %s139_s5 }
  0x19   : > { %p4306_p13 = pnand %p4298_p11, %p3930_p12  ;;  %p4026_p1 = scmp.ne.s32.totalorder %s127_s29, %s4025_s6 }
  0x1a   : > { %p4033_p5 = scmp.lt.s32.totalorder %s127_s29, %s127_s29  ;;  %p4034_p6 = scmp.lt.s32.totalorder %s4025_s6, %s4025_s6 }
  0x1b   : > { %p4016_p0 = pneg %p4306_p13 }
  0x1c   : > { %p4035_p7 = por %p4034_p6, %p4033_p5 }
  0x1d   : > { %p4028_p2 = pnand %p4026_p1, %p4016_p0 }
  0x1f   : > { %p4029_p3 = pneg %p4028_p2 }
  0x21   : > { %p4036_p9 = pnand %p4035_p7, %p4029_p3 }
  0x23   : > { %4039 = shalt.err (!%p4036_p9)
}
  0x24   : > { %s4209_s7 = smov 128   ;;  %s4210_s8 = smov 8  }
  0x25   : > { %s4836_s1 = sld [smem:[#allocation26_spill]]  ;;  %s4051_s11 = scalar_lea.vmem %s140_s5, 96 }
  0x26   : > { %p4052_p12 = scmp.ne.s32.totalorder %s140_s5, %s4051_s11  ;;  %p4059_p8 = scmp.lt.s32.totalorder %s140_s5, %s140_s5 }
  0x27   : > { %p4060_p4 = scmp.lt.s32.totalorder %s4051_s11, %s4051_s11 }
  0x28   : > { %p4054_p1 = pnand %p4052_p12, %p4016_p0 }
  0x29   : > { %p4061_p5 = por %p4060_p4, %p4059_p8 }
  0x2a   : > { %p4055_p2 = pneg %p4054_p1 }
  0x2b   : > { %3933 = dma.hbm_to_vmem [thread:$0]  (!%p4306_p13), %s4836_s1, 36864, %s127_s29, [#allocation7], %s4209_s7, %s4209_s7, %s4210_s8  }
  0x2c   : > { %p4062_p3 = pnand %p4061_p5, %p4055_p2 }
  0x2e   : > { %4065 = shalt.err (!%p4062_p3)
}
  0x2f   : > { %s4211_s18 = smov 16   ;;  %s4212_s19 = smov 1  }
  0x30   : > { %s4837_s2 = sld [smem:[#allocation27_spill]] }
  0x32   : > { %155 = sbr.rel (%p4294_p10) target bundleno = 1633 (0x661), region = 28 }
  0x36   : > { %3936 = dma.hbm_to_vmem [thread:$0]  (!%p4306_p13), %s4837_s2, 96, %s140_s5, [#allocation10], %s4211_s18, %s4211_s18, %s4212_s19  }
  0x37   : > { %4170 = dma.done.wait (%p4298_p11), [#allocation7], 36864  }
  0x38   : > { %4172 = vsyncadd (%p4298_p11), [#allocation7], 4294930432 }
  0x39   : > { %4174 = dma.done.wait (%p4298_p11), [#allocation10], 96  }
  0x3a   : > { %4176 = vsyncadd (%p4298_p11), [#allocation10], 4294967200  ;;  %s4822_s26 = sand.u32 1, %s4189_s13   ;;  %p180_p4 = scmp.lt.s32.totalorder %s4197_s15, 0 }
  0x3b   : > { %s4342_s28 = sshll.u32 %s4822_s26, 4  ;;  %s181_s29 = ssub.s32 0, %s4197_s15 }
  0x3c   : > { %s2798_s30 = smin.u32 %s4197_s15, %s181_s29  ;;  %s2820_s6 = smul.u32 640, %s4197_s15 }
  0x3d   : > { %s183_s4 = sand.u32 1, %s2798_s30   ;;  %s244_s10 = sadd.s32 1, %s4197_s15 }
  0x3e   : > { %s184_s5 = ssub.s32 0, %s183_s4  ;;  %s4350_s8 = scalar_lea.hbm %s4817_s0, %s2820_s6 }
  0x3f   : > { %s4852_s5 = smov (!%p180_p4, %s184_s5), %s183_s4  ;;  %p193_p10 = scmp.eq.s32.totalorder %s4197_s15, 0 }
  0x40   : > { %p2800_p8 = scmp.lt.s32.totalorder %s4852_s5, 0  ;;  %s190_s9 = sadd.s32 2, %s4852_s5 }
  0x41   : > { %s4357_s11 = scalar_lea.hbm %s4350_s8, 640  ;;  %p4360_p11 = scmp.lt.s32.totalorder %s244_s10, 2 }
  0x42   : > { %s4854_s9 = smov (!%p2800_p8, %s190_s9), %s4852_s5  ;;  %p4067_p13 = scmp.ne.s32.totalorder %s4350_s8, %s4357_s11 }
  0x43   : > { %s204_s18 = smul.u32 40, %s4854_s9  ;;  %s4823_s21 = ssub.s32 1, %s4854_s9 }
  0x44   : > { %s4367_s23 = smul.u32 40, %s4823_s21  ;;  %s4373_s4 = scalar_lea.sflag [#allocation5], %s4854_s9 }
  0x45   : > { %s4369_s29 = scalar_lea.vmem [#allocation2], %s204_s18  ;;  %p4068_p0 = pnand %p4067_p13, %p193_p10 }
  0x46   : > { %s214_s30 = sshll.u32 %s4369_s29, 4  ;;  %s4824_s27 = scalar_lea.hbm %s4817_s0, 1280  ;;  %s215_s30 = int_to_ptr.vmem [resolvable:$true] %s214_s30 }
  0x47   : > { %p4069_p6 = pneg %p4068_p0  ;;  %p4071_p7 = scmp.lt.s32.totalorder %s4350_s8, %s4817_s0 }
  0x48   : > { %p4072_p9 = scmp.lt.s32.totalorder %s4824_s27, %s4357_s11 }
  0x4a   : > { %p4073_p12 = por %p4072_p9, %p4071_p7 }
  0x4c   : > { %p4074_p1 = pnand %p4073_p12, %p4069_p6 }
  0x4e   : > { %4077 = shalt.err (!%p4074_p1)  }
  0x4f   : > { %s4078_s21 = scalar_lea.vmem %s215_s30, 640  ;;  %s4213_s5 = smov [#allocation2]  }
  0x50   : > { %p4079_p2 = scmp.ne.s32.totalorder %s215_s30, %s4078_s21  ;;  %s4082_s6 = sshll.u32 %s4213_s5, 4  ;;  %s4083_s6 = int_to_ptr.vmem [resolvable:$false] %s4082_s6 }
  0x51   : > { %s4084_s1 = scalar_lea.vmem %s4083_s6, 1280  ;;  %p4085_p4 = scmp.lt.s32.totalorder %s215_s30, %s4083_s6 }
  0x52   : > { %p4080_p5 = pnand %p4079_p2, %p193_p10  ;;  %p4086_p8 = scmp.lt.s32.totalorder %s4084_s1, %s4078_s21 }
  0x54   : > { %p4081_p3 = pneg %p4080_p5  ;;  %p4087_p13 = por %p4086_p8, %p4085_p4 }
  0x56   : > { %p4088_p0 = pnand %p4087_p13, %p4081_p3 }
  0x58   : > { %4091 = shalt.err (!%p4088_p0)  }
  0x59   : > { %3926 = dma.hbm_to_vmem [thread:$0]  (%p193_p10), %s4350_s8, 640, %s215_s30, %s4373_s4 }
  0x5a   : > { %s256_s26 = scalar_lea.vmem [#allocation2], %s4367_s23  ;;  %s4839_s10 = ssub.s32 1, %s4854_s9 }
  0x5b   : > { %s265_s7 = sshll.u32 %s256_s26, 4  ;;  %s257_s18 = scalar_lea.sflag [#allocation5], %s4839_s10  ;;  %s266_s7 = int_to_ptr.vmem [resolvable:$true] %s265_s7 }
  0x5c   : > { %s4118_s21 = scalar_lea.hbm %s4350_s8, 1280  ;;  %p4097_p12 = scmp.lt.s32.totalorder %s4357_s11, %s4817_s0 }
  0x5d   : > { %p4093_p6 = scmp.ne.s32.totalorder %s4357_s11, %s4118_s21  ;;  %s4840_s16 = scalar_lea.hbm %s4817_s0, 1280 }
  0x5e   : > { %p4098_p1 = scmp.lt.s32.totalorder %s4840_s16, %s4118_s21 }
  0x5f   : > { %p4094_p7 = pnand %p4093_p6, %p4360_p11 }
  0x60   : > { %p4099_p10 = por %p4098_p1, %p4097_p12 }
  0x61   : > { %p4095_p9 = pneg %p4094_p7 }
  0x63   : > { %p4100_p2 = pnand %p4099_p10, %p4095_p9 }
  0x65   : > { %4103 = shalt.err (!%p4100_p2)  }
  0x66   : > { %s4104_s23 = scalar_lea.vmem %s266_s7, 640  ;;  %p4111_p8 = scmp.lt.s32.totalorder %s266_s7, %s4083_s6 }
  0x67   : > { %p4105_p5 = scmp.ne.s32.totalorder %s266_s7, %s4104_s23  ;;  %p4112_p13 = scmp.lt.s32.totalorder %s4084_s1, %s4104_s23 }
  0x69   : > { %p4106_p3 = pnand %p4105_p5, %p4360_p11  ;;  %p4113_p0 = por %p4112_p13, %p4111_p8 }
  0x6b   : > { %p4107_p4 = pneg %p4106_p3 }
  0x6d   : > { %p4114_p6 = pnand %p4113_p0, %p4107_p4 }
  0x6f   : > { %4117 = shalt.err (!%p4114_p6)  }
  0x70   : > { %3927 = dma.hbm_to_vmem [thread:$0]  (%p4360_p11), %s4357_s11, 640, %s266_s7, %s257_s18 }
  0x71   : > { %s4418_s2 = scalar_lea.vmem [#allocation11], %s4342_s28 }
  0x72   : > { %4177 = dma.done.wait %s4373_s4, 640 }
  0x73   : > { %4178 = vsyncadd %s4373_s4, 4294966656  ;;  %v4214_v0 = vmov 0.0   ;;  %vm4215_vm0 = vmmov 0   ;;  %v347_v1 = vld [vmem:[#allocation6 + $0xf8] sm:$0xff]  ;;  %v346_v2 = vld [vmem:[#allocation6 + $0xf0] sm:$0xff]  ;;  %vm1080_vm11 = vcmask 1045504  }
  0x74   : > { %3180 = vmatprep.subr.mxu0 %v4214_v0  ;;  %3227 = vmatprep.subr.mxu1 %v4214_v0  ;;  %v345_v3 = vld [vmem:[#allocation6 + $0xe8] sm:$0xff]  ;;  %v325_v4 = vld [vmem:[#allocation6 + $0x78] sm:$0xff]  ;;  %v324_v5 = vld [vmem:[#allocation6 + $0x70] sm:$0xff]  ;;  %vm1899_vm13 = vcmask 1043456   ;;  %s2822_s1 = sshll.u32 %s4197_s15, 8  ;;  %s2658_s16 = sshll.u32 %s4418_s2, 4  ;;  %s4765_s16 = int_to_ptr.vmem [resolvable:$true] %s2658_s16 }
  0x75   : > { %3212 = vmatprep.mubr.msk.f32.mxu0 %vm4215_vm0, %v4214_v0  ;;  %3259 = vmatprep.mubr.msk.f32.mxu1 %vm4215_vm0, %v4214_v0  ;;  %v344_v6 = vld [vmem:[#allocation6 + $0xe0] sm:$0xff]  ;;  %v323_v7 = vld [vmem:[#allocation6 + $0x68] sm:$0xff]  ;;  %v343_v8 = vld [vmem:[#allocation6 + $0xd8] sm:$0xff]  ;;  %s4763_s8 = scalar_lea.hbm %s4820_s3, %s2822_s1  ;;  %s4841_s9 = sand.u32 1, %s4189_s13  }
  0x76   : > { %3181 = vmatpush3.msra.mxu0 %v347_v1  ;;  %3228 = vmatpush3.msra.mxu1 %v325_v4  ;;  %v322_v9 = vld [vmem:[#allocation6 + $0x60] sm:$0xff]  ;;  %v342_v10 = vld [vmem:[#allocation6 + $0xd0] sm:$0xff]  ;;  %v321_v11 = vld [vmem:[#allocation6 + $0x58] sm:$0xff]  ;;  %s4772_s15 = scalar_lea.sflag [#allocation8], %s4841_s9  ;;  %s4119_s11 = scalar_lea.vmem %s4765_s16, 256 }
  0x77   : > { %3182 = vmatprep.subr.mxu0 %v4214_v0  ;;  %3229 = vmatprep.subr.mxu1 %v4214_v0  ;;  %v4436_v12 = vld [vmem:[%s4369_s29] sm:$0xff]  ;;  %v4439_v13 = vld [vmem:[%s4369_s29 + $0x8] sm:$0xff]  ;;  %v340_v19 = vld [vmem:[#allocation6 + $0xc0] sm:$0xff]  ;;  %p4120_p11 = scmp.ne.s32.totalorder %s4765_s16, %s4119_s11  ;;  %p4842_p7 = scmp.ne.s32.totalorder %s4831_s22, 0 }
  0x78   : > { %3183 = vmatpush3.msra.mxu0 %v346_v2  ;;  %3230 = vmatpush3.msra.mxu1 %v324_v5  ;;  %vm285_vm1 = vcmp.ge.f32.partialorder %v4436_v12, 0.0  ;;  %v290_v14 = vmul.f32 0.1, %v4436_v12  ;;  %v341_v15 = vld [vmem:[#allocation6 + $0xc8] sm:$0xff]  ;;  %v320_v16 = vld [vmem:[#allocation6 + $0x50] sm:$0xff]  ;;  %vm286_vm2 = vcmp.ge.f32.partialorder %v4439_v13, 0.0 }
  0x79   : > { %3184 = vmatprep.subr.mxu0 %v4214_v0  ;;  %3231 = vmatprep.subr.mxu1 %v4214_v0  ;;  %v291_v17 = vmul.f32 0.1, %v4439_v13  ;;  %v319_v20 = vld [vmem:[#allocation6 + $0x48] sm:$0xff]  ;;  %v282_v22 = vld [vmem:[%s4369_s29 + $0x10] sm:$0xff]  ;;  %v338_v29 = vld [vmem:[#allocation6 + $0xb0] sm:$0xff]  ;;  %p4121_p9 = pnand %p4120_p11, %p4842_p7  ;;  %s4216_s19 = smov [#allocation11]  }
  0x7a   : > { %3185 = vmatpush3.msra.mxu0 %v345_v3  ;;  %3232 = vmatpush3.msra.mxu1 %v323_v7  ;;  %v4448_v18 = vsel %vm285_vm1, %v4436_v12, %v290_v14  ;;  %v339_v23 = vld [vmem:[#allocation6 + $0xb8] sm:$0xff]  ;;  %v318_v24 = vld [vmem:[#allocation6 + $0x40] sm:$0xff]  ;;  %vm287_vm3 = vcmp.ge.f32.partialorder %v282_v22, 0.0  ;;  %v292_v25 = vmul.f32 0.1, %v282_v22  ;;  %v284_v28 = vld [vmem:[%s4369_s29 + $0x20] sm:$0xff] }
  0x7b   : > { %3186 = vmatprep.subr.mxu0 %v4214_v0  ;;  %3233 = vmatprep.subr.mxu1 %v4214_v0  ;;  %v4453_v21 = vsel %vm286_vm2, %v4439_v13, %v291_v17  ;;  %300 = vst [vmem:[#allocation3] sm:$0xff] %v4448_v18  ;;  %v283_v26 = vld [vmem:[%s4369_s29 + $0x18] sm:$0xff]  ;;  %v317_v30 = vld [vmem:[#allocation6 + $0x38] sm:$0xff]  ;;  %vm289_vm5 = vcmp.ge.f32.partialorder %v284_v28, 0.0  ;;  %v294_v32 = vmul.f32 0.1, %v284_v28  ;;  %p4122_p12 = pneg %p4121_p9 }
  0x7c   : > { %3187 = vmatpush3.msra.mxu0 %v344_v6  ;;  %3234 = vmatpush3.msra.mxu1 %v322_v9  ;;  %301 = vst [vmem:[#allocation3 + $0x8] sm:$0xff] %v4453_v21  ;;  %vm288_vm4 = vcmp.ge.f32.partialorder %v283_v26, 0.0  ;;  %v293_v27 = vmul.f32 0.1, %v283_v26  ;;  %v4464_v31 = vsel %vm287_vm3, %v282_v22, %v292_v25  ;;  %v337_v34 = vld [vmem:[#allocation6 + $0xa8] sm:$0xff]  ;;  %v316_v35 = vld [vmem:[#allocation6 + $0x30] sm:$0xff] }
  0x7d   : > { %3188 = vmatprep.subr.mxu0 %v4214_v0  ;;  %3235 = vmatprep.subr.mxu1 %v4214_v0  ;;  %302 = vst [vmem:[#allocation3 + $0x10] sm:$0xff] %v4464_v31  ;;  %v299_v36 = vsel %vm289_vm5, %v284_v28, %v294_v32  ;;  %v336_v37 = vld [vmem:[#allocation6 + $0xa0] sm:$0xff]  ;;  %v315_v39 = vld [vmem:[#allocation6 + $0x28] sm:$0xff]  ;;  %v335_v41 = vld [vmem:[#allocation6 + $0x98] sm:$0xff] }
  0x7e   : > { %3189 = vmatpush3.msra.mxu0 %v343_v8  ;;  %3236 = vmatpush3.msra.mxu1 %v321_v11  ;;  %v4467_v33 = vsel %vm288_vm4, %v283_v26, %v293_v27  ;;  %304 = vst [vmem:[#allocation3 + $0x20] sm:$0xff] %v299_v36  ;;  %v314_v42 = vld [vmem:[#allocation6 + $0x20] sm:$0xff]  ;;  %v334_v43 = vld [vmem:[#allocation6 + $0x90] sm:$0xff]  ;;  %v313_v44 = vld [vmem:[#allocation6 + $0x18] sm:$0xff] }
  0x7f   : > { %3190 = vmatprep.subr.mxu0 %v4214_v0  ;;  %3237 = vmatprep.subr.mxu1 %v4214_v0  ;;  %303 = vst [vmem:[#allocation3 + $0x18] sm:$0xff] %v4467_v33  ;;  %v333_v45 = vld [vmem:[#allocation6 + $0x88] sm:$0xff]  ;;  %v312_v46 = vld [vmem:[#allocation6 + $0x10] sm:$0xff]  ;;  %v332_v47 = vld [vmem:[#allocation6 + $0x80] sm:$0xff] }
  0x80   : > { %3191 = vmatpush3.msra.mxu0 %v342_v10  ;;  %3238 = vmatpush3.msra.mxu1 %v320_v16  ;;  %v311_v48 = vld [vmem:[#allocation6 + $0x8] sm:$0xff]  ;;  %v549_v49 = vld [vmem:[#allocation6 + $0x178] sm:$0xff]  ;;  %v310_v50 = vld [vmem:[#allocation6] sm:$0xff] }
  0x81   : > { %3192 = vmatprep.subr.mxu0 %v4214_v0  ;;  %3239 = vmatprep.subr.mxu1 %v4214_v0  ;;  %v548_v51 = vld [vmem:[#allocation6 + $0x170] sm:$0xff]  ;;  %v547_v52 = vld [vmem:[#allocation6 + $0x168] sm:$0xff]  ;;  %v546_v54 = vld [vmem:[#allocation6 + $0x160] sm:$0xff] }
  0x82   : > { %3193 = vmatpush3.msra.mxu0 %v341_v15  ;;  %3240 = vmatpush3.msra.mxu1 %v319_v20  ;;  %v545_v55 = vld [vmem:[#allocation6 + $0x158] sm:$0xff]  ;;  %v544_v57 = vld [vmem:[#allocation6 + $0x150] sm:$0xff]  ;;  %v543_v58 = vld [vmem:[#allocation6 + $0x148] sm:$0xff] }
  0x83   : > { %3194 = vmatprep.subr.mxu0 %v4214_v0  ;;  %3241 = vmatprep.subr.mxu1 %v4214_v0  ;;  %v326_v38 = vld [vmem:[#allocation3 + $0x1] sm:$0xff]  ;;  %v540_v63 = vld [vmem:[#allocation6 + $0x130] sm:$0xff]  ;;  %v539_v1 = vld [vmem:[#allocation6 + $0x128] sm:$0xff] }
  0x84   : > { %3195 = vmatpush3.msra.mxu0 %v340_v19  ;;  %3242 = vmatpush3.msra.mxu1 %v318_v24  ;;  %v4474_v40 = vld [vmem:[#allocation3 + $0x2] sm:$0xff]  ;;  %v536_v4 = vld [vmem:[#allocation6 + $0x110] sm:$0xff]  ;;  %v535_v5 = vld [vmem:[#allocation6 + $0x108] sm:$0xff] }
  0x85   : > { %3196 = vmatprep.subr.mxu0 %v4214_v0  ;;  %3243 = vmatprep.subr.mxu1 %v4214_v0  ;;  %708 = vst [vmem:[#allocation3] sm:$0xff] %v4214_v0  ;;  %v327_v53 = vld [vmem:[#allocation3 + $0x9] sm:$0xff]  ;;  %v541_v61 = vld [vmem:[#allocation6 + $0x138] sm:$0xff]  ;;  %v741_v11 = vld [vmem:[#allocation6 + $0x1f0] sm:$0xff] }
  0x86   : > { %3197 = vmatpush3.msra.mxu0 %v339_v23  ;;  %3244 = vmatpush3.msra.mxu1 %v317_v30  ;;  %v328_v56 = vld [vmem:[#allocation3 + $0x11] sm:$0xff]  ;;  %v329_v59 = vld [vmem:[#allocation3 + $0x19] sm:$0xff]  ;;  %v542_v60 = vld [vmem:[#allocation6 + $0x140] sm:$0xff] }
  0x87   : > { %3198 = vmatprep.subr.mxu0 %v4214_v0  ;;  %3245 = vmatprep.subr.mxu1 %v4214_v0  ;;  %v330_v62 = vld [vmem:[#allocation3 + $0x21] sm:$0x3f]  ;;  %v538_v2 = vld [vmem:[#allocation6 + $0x120] sm:$0xff]  ;;  %v530_v8 = vld [vmem:[#allocation3 + $0x12] sm:$0xff] }
  0x88   : > { %3199 = vmatpush3.msra.mxu0 %v338_v29  ;;  %3246 = vmatpush3.msra.mxu1 %v316_v35  ;;  %v537_v3 = vld [vmem:[#allocation6 + $0x118] sm:$0xff]  ;;  %v534_v6 = vld [vmem:[#allocation6 + $0x100] sm:$0xff]  ;;  %v740_v15 = vld [vmem:[#allocation6 + $0x1e8] sm:$0xff] }
  0x89   : > { %3200 = vmatprep.subr.mxu0 %v4214_v0  ;;  %3247 = vmatprep.subr.mxu1 %v4214_v0  ;;  %v529_v7 = vld [vmem:[#allocation3 + $0xa] sm:$0xff]  ;;  %v531_v9 = vld [vmem:[#allocation3 + $0x1a] sm:$0xff]  ;;  %v532_v35 = vld [vmem:[#allocation3 + $0x22] sm:$0x3f] }
  0x8a   : > { %3201 = vmatpush3.msra.mxu0 %v337_v34  ;;  %3248 = vmatpush3.msra.mxu1 %v315_v39  ;;  %v742_v10 = vld [vmem:[#allocation6 + $0x1f8] sm:$0xff]  ;;  %v763_v16 = vld [vmem:[#allocation6 + $0x270] sm:$0xff]  ;;  %v739_v17 = vld [vmem:[#allocation6 + $0x1e0] sm:$0xff] }
  0x8b   : > { %3202 = vmatprep.subr.mxu0 %v4214_v0  ;;  %3249 = vmatprep.subr.mxu1 %v4214_v0  ;;  %v764_v14 = vld [vmem:[#allocation6 + $0x278] sm:$0xff]  ;;  %v761_v20 = vld [vmem:[#allocation6 + $0x260] sm:$0xff]  ;;  %v736_v23 = vld [vmem:[#allocation6 + $0x1c8] sm:$0xff] }
  0x8c   : > { %3203 = vmatpush3.msra.mxu0 %v336_v37  ;;  %3250 = vmatpush3.msra.mxu1 %v314_v42  ;;  %v738_v19 = vld [vmem:[#allocation6 + $0x1d8] sm:$0xff]  ;;  %v759_v24 = vld [vmem:[#allocation6 + $0x250] sm:$0xff]  ;;  %v735_v25 = vld [vmem:[#allocation6 + $0x1c0] sm:$0xff] }
  0x8d   : > { %3204 = vmatprep.subr.mxu0 %v4214_v0  ;;  %3251 = vmatprep.subr.mxu1 %v4214_v0  ;;  %v760_v22 = vld [vmem:[#allocation6 + $0x258] sm:$0xff]  ;;  %v733_v27 = vld [vmem:[#allocation6 + $0x1b0] sm:$0xff]  ;;  %v732_v28 = vld [vmem:[#allocation6 + $0x1a8] sm:$0xff] }
  0x8e   : > { %3205 = vmatpush3.msra.mxu0 %v335_v41  ;;  %3252 = vmatpush3.msra.mxu1 %v313_v44  ;;  %v734_v26 = vld [vmem:[#allocation6 + $0x1b8] sm:$0xff]  ;;  %v731_v29 = vld [vmem:[#allocation6 + $0x1a0] sm:$0xff]  ;;  %v758_v30 = vld [vmem:[#allocation6 + $0x248] sm:$0xff] }
  0x8f   : > { %3206 = vmatprep.subr.mxu0 %v4214_v0  ;;  %3253 = vmatprep.subr.mxu1 %v4214_v0  ;;  %v757_v32 = vld [vmem:[#allocation6 + $0x240] sm:$0xff]  ;;  %v756_v34 = vld [vmem:[#allocation6 + $0x238] sm:$0xff]  ;;  %v728_v36 = vld [vmem:[#allocation6 + $0x188] sm:$0xff] }
  0x90   : > { %3207 = vmatpush3.msra.mxu0 %v334_v43  ;;  %3254 = vmatpush3.msra.mxu1 %v312_v46  ;;  %v755_v37 = vld [vmem:[#allocation6 + $0x230] sm:$0xff]  ;;  %v754_v39 = vld [vmem:[#allocation6 + $0x228] sm:$0xff]  ;;  %v752_v41 = vld [vmem:[#allocation6 + $0x218] sm:$0xff] }
  0x91   : > { %3208 = vmatprep.subr.mxu0 %v4214_v0  ;;  %3255 = vmatprep.subr.mxu1 %v4214_v0  ;;  %v309_v42 = vld [vmem:[#allocation3 + $0x20] sm:$0x3f]  ;;  %v751_v43 = vld [vmem:[#allocation6 + $0x210] sm:$0xff]  ;;  %v750_v44 = vld [vmem:[#allocation6 + $0x208] sm:$0xff] }
  0x92   : > { %3209 = vmatpush3.msra.mxu0 %v333_v45  ;;  %3256 = vmatpush3.msra.mxu1 %v311_v48  ;;  %712 = vst [vmem:[#allocation3 + $0x20] sm:$0x3f] %v4214_v0  ;;  %v749_v45 = vld [vmem:[#allocation6 + $0x200] sm:$0xff] }
  0x93   : > { %3210 = vmatprep.subr.mxu0 %v4214_v0  ;;  %3257 = vmatprep.subr.mxu1 %v4214_v0 }
  0x94   : > { %3211 = vmatpush3.msra.mxu0 %v332_v47  ;;  %3258 = vmatpush3.msra.mxu1 %v310_v50 }
  0x95   : > { %3213 = vmatmul.mubr.f32.vlgmr.msra.gmra.mxu0 %v326_v38  ;;  %3274 = vmatprep.subr.mxu0 %v4214_v0  ;;  %v727_v38 = vld [vmem:[#allocation6 + $0x180] sm:$0xff] }
  0x96   : > { %3275 = vmatpush3.msra.mxu0 %v549_v49  ;;  %3260 = vmatmul.mubr.f32.vlgmr.msra.gmra.mxu1 %v4448_v18  ;;  %v762_v18 = vld [vmem:[#allocation6 + $0x268] sm:$0xff] }
  0x97   : > { %3276 = vmatprep.subr.mxu0 %v4214_v0  ;;  %3215 = vmatprep.mubr.msk.f32.mxu0 %vm4215_vm0, %v4214_v0 }
  0x98   : > { %3277 = vmatpush3.msra.mxu0 %v548_v51  ;;  %3262 = vmatprep.mubr.msk.f32.mxu1 %vm4215_vm0, %v4214_v0 }
  0x99   : > { %3278 = vmatprep.subr.mxu0 %v4214_v0  ;;  %3216 = vmatmul.mubr.f32.gmra.mxu0 %v327_v53 }
  0x9a   : > { %3279 = vmatpush3.msra.mxu0 %v547_v52  ;;  %3263 = vmatmul.mubr.f32.gmra.mxu1 %v4453_v21  ;;  %v737_v21 = vld [vmem:[#allocation6 + $0x1d0] sm:$0xff] }
  0x9b   : > { %3280 = vmatprep.subr.mxu0 %v4214_v0  ;;  %3218 = vmatprep.mubr.msk.f32.mxu0 %vm4215_vm0, %v4214_v0 }
  0x9c   : > { %3281 = vmatpush3.msra.mxu0 %v546_v54  ;;  %3265 = vmatprep.mubr.msk.f32.mxu1 %vm4215_vm0, %v4214_v0 }
  0x9d   : > { %3282 = vmatprep.subr.mxu0 %v4214_v0  ;;  %3219 = vmatmul.mubr.f32.gmra.mxu0 %v328_v56 }
  0x9e   : > { %3283 = vmatpush3.msra.mxu0 %v545_v55  ;;  %3266 = vmatmul.mubr.f32.gmra.mxu1 %v4464_v31  ;;  %v730_v31 = vld [vmem:[#allocation6 + $0x198] sm:$0xff] }
  0x9f   : > { %3284 = vmatprep.subr.mxu0 %v4214_v0  ;;  %3221 = vmatprep.mubr.msk.f32.mxu0 %vm4215_vm0, %v4214_v0 }
  0xa0   : > { %3285 = vmatpush3.msra.mxu0 %v544_v57  ;;  %3268 = vmatprep.mubr.msk.f32.mxu1 %vm4215_vm0, %v4214_v0 }
  0xa1   : > { %3286 = vmatprep.subr.mxu0 %v4214_v0  ;;  %3222 = vmatmul.mubr.f32.gmra.mxu0 %v329_v59 }
  0xa2   : > { %3287 = vmatpush3.msra.mxu0 %v543_v58  ;;  %3269 = vmatmul.mubr.f32.gmra.mxu1 %v4467_v33  ;;  %v729_v33 = vld [vmem:[#allocation6 + $0x190] sm:$0xff] }
  0xa3   : > { %3288 = vmatprep.subr.mxu0 %v4214_v0  ;;  %3224 = vmatprep.mubr.msk.f32.mxu0 %vm4215_vm0, %v4214_v0 }
  0xa4   : > { %3289 = vmatpush3.msra.mxu0 %v542_v60  ;;  %3321 = vmatprep.subr.mxu1 %v4214_v0 }
  0xa5   : > { %3290 = vmatprep.subr.mxu0 %v4214_v0  ;;  %3225 = vmatmul.mubr.f32.gmra.mxu0 %v330_v62 }
  0xa6   : > { %3291 = vmatpush3.msra.mxu0 %v541_v61  ;;  %3306 = vmatprep.mubr.msk.f32.mxu0 %vm4215_vm0, %v4214_v0 }
  0xa7   : > { %3292 = vmatprep.subr.mxu0 %v4214_v0  ;;  %3271 = vmatprep.mubr.msk.f32.mxu1 %vm4215_vm0, %v4214_v0 }
  0xa8   : > { %3293 = vmatpush3.msra.mxu0 %v540_v63  ;;  %3322 = vmatpush3.msra.mxu1 %v764_v14 }
  0xa9   : > { %3294 = vmatprep.subr.mxu0 %v4214_v0  ;;  %3323 = vmatprep.subr.mxu1 %v4214_v0 }
  0xaa   : > { %3295 = vmatpush3.msra.mxu0 %v539_v1  ;;  %3324 = vmatpush3.msra.mxu1 %v763_v16  ;;  %v676_v1 = vlaneseq }
  0xab   : > { %3296 = vmatprep.subr.mxu0 %v4214_v0  ;;  %3325 = vmatprep.subr.mxu1 %v4214_v0 }
  0xac   : > { %3297 = vmatpush3.msra.mxu0 %v538_v2  ;;  %3326 = vmatpush3.msra.mxu1 %v762_v18  ;;  %v4576_v2 = vshrl.u32 %v676_v1, 7 }
  0xad   : > { %3298 = vmatprep.subr.mxu0 %v4214_v0  ;;  %3327 = vmatprep.subr.mxu1 %v4214_v0 }
  0xae   : > { %3299 = vmatpush3.msra.mxu0 %v537_v3  ;;  %3328 = vmatpush3.msra.mxu1 %v761_v20 }
  0xaf   : > { %3300 = vmatprep.subr.mxu0 %v4214_v0  ;;  %3329 = vmatprep.subr.mxu1 %v4214_v0 }
  0xb0   : > { %3301 = vmatpush3.msra.mxu0 %v536_v4  ;;  %3330 = vmatpush3.msra.mxu1 %v760_v22  ;;  %v4579_v4 = vadd.s32 8, %v4576_v2 }
  0xb1   : > { %3302 = vmatprep.subr.mxu0 %v4214_v0  ;;  %3331 = vmatprep.subr.mxu1 %v4214_v0 }
  0xb2   : > { %3303 = vmatpush3.msra.mxu0 %v535_v5  ;;  %3332 = vmatpush3.msra.mxu1 %v759_v24 }
  0xb3   : > { %3304 = vmatprep.subr.mxu0 %v4214_v0  ;;  %3333 = vmatprep.subr.mxu1 %v4214_v0 }
  0xb4   : > { %3305 = vmatpush3.msra.mxu0 %v534_v6  ;;  %3334 = vmatpush3.msra.mxu1 %v758_v30 }
  0xb5   : > { %3307 = vmatmul.mubr.f32.vlgmr.msra.gmra.mxu0 %v4474_v40  ;;  %3368 = vmatprep.subr.mxu0 %v4214_v0  ;;  %v753_v40 = vld [vmem:[#allocation6 + $0x220] sm:$0xff] }
  0xb6   : > { %3309 = vmatprep.mubr.msk.f32.mxu0 %vm4215_vm0, %v4214_v0  ;;  %3369 = vmatpush3.msra.mxu0 %v742_v10 }
  0xb7   : > { %3370 = vmatprep.subr.mxu0 %v4214_v0  ;;  %3335 = vmatprep.subr.mxu1 %v4214_v0 }
  0xb8   : > { %3371 = vmatpush3.msra.mxu0 %v741_v11  ;;  %3336 = vmatpush3.msra.mxu1 %v757_v32 }
  0xb9   : > { %3310 = vmatmul.mubr.f32.gmra.mxu0 %v529_v7  ;;  %3372 = vmatprep.subr.mxu0 %v4214_v0 }
  0xba   : > { %3312 = vmatprep.mubr.msk.f32.mxu0 %vm4215_vm0, %v4214_v0  ;;  %3373 = vmatpush3.msra.mxu0 %v740_v15 }
  0xbb   : > { %3374 = vmatprep.subr.mxu0 %v4214_v0  ;;  %3337 = vmatprep.subr.mxu1 %v4214_v0 }
  0xbc   : > { %3375 = vmatpush3.msra.mxu0 %v739_v17  ;;  %3338 = vmatpush3.msra.mxu1 %v756_v34  ;;  %v966_v34 = vld [vmem:[#allocation6 + $0x2f8] sm:$0xff] }
  0xbd   : > { %3313 = vmatmul.mubr.f32.gmra.mxu0 %v530_v8  ;;  %3376 = vmatprep.subr.mxu0 %v4214_v0  ;;  %v2806_v8 = vld [vmem:[#allocation9] ss:$0 sm:$0xff] }
  0xbe   : > { %3315 = vmatprep.mubr.msk.f32.mxu0 %vm4215_vm0, %v4214_v0  ;;  %3377 = vmatpush3.msra.mxu0 %v738_v19  ;;  %v4583_v19 = vadd.s32 24, %v4576_v2 }
  0xbf   : > { %3378 = vmatprep.subr.mxu0 %v4214_v0  ;;  %3339 = vmatprep.subr.mxu1 %v4214_v0 }
  0xc0   : > { %3379 = vmatpush3.msra.mxu0 %v737_v21  ;;  %3340 = vmatpush3.msra.mxu1 %v755_v37 }
  0xc1   : > { %3316 = vmatmul.mubr.f32.gmra.mxu0 %v531_v9  ;;  %3380 = vmatprep.subr.mxu0 %v4214_v0  ;;  %v684_v9 = vadd.s32 4294967285, %v4579_v4 }
  0xc2   : > { %3318 = vmatprep.mubr.msk.f32.mxu0 %vm4215_vm0, %v4214_v0  ;;  %3381 = vmatpush3.msra.mxu0 %v736_v23 }
  0xc3   : > { %3382 = vmatprep.subr.mxu0 %v4214_v0  ;;  %3341 = vmatprep.subr.mxu1 %v4214_v0  ;;  %vm689_vm6 = vcmp.ge.s32.totalorder %v684_v9, 0  ;;  %v1192_v9 = vld [vmem:[#allocation6 + $0x368] sm:$0xff] }
  0xc4   : > { %3383 = vmatpush3.msra.mxu0 %v735_v25  ;;  %3342 = vmatpush3.msra.mxu1 %v754_v39 }
  0xc5   : > { %3384 = vmatprep.subr.mxu0 %v4214_v0  ;;  %3319 = vmatmul.mubr.f32.gmra.mxu0 %v532_v35 }
  0xc6   : > { %3385 = vmatpush3.msra.mxu0 %v734_v26  ;;  %3343 = vmatprep.subr.mxu1 %v4214_v0 }
  0xc7   : > { %3386 = vmatprep.subr.mxu0 %v4214_v0  ;;  %3400 = vmatprep.mubr.msk.f32.mxu0 %vm4215_vm0, %v4214_v0 }
  0xc8   : > { %3387 = vmatpush3.msra.mxu0 %v733_v27  ;;  %3344 = vmatpush3.msra.mxu1 %v753_v40  ;;  %v964_v40 = vld [vmem:[#allocation6 + $0x2e8] sm:$0xff] }
  0xc9   : > { %3388 = vmatprep.subr.mxu0 %v4214_v0  ;;  %3345 = vmatprep.subr.mxu1 %v4214_v0 }
  0xca   : > { %3389 = vmatpush3.msra.mxu0 %v732_v28  ;;  %3346 = vmatpush3.msra.mxu1 %v752_v41  ;;  %v686_v28 = vadd.s32 4294967285, %v4583_v19  ;;  %v725_v41 = vld [vmem:[#allocation3 + $0x20] sm:$0xf] }
  0xcb   : > { %3390 = vmatprep.subr.mxu0 %v4214_v0  ;;  %3347 = vmatprep.subr.mxu1 %v4214_v0 }
  0xcc   : > { %3391 = vmatpush3.msra.mxu0 %v731_v29  ;;  %3272 = vmatmul.mubr.f32.gmra.mxu1 %v309_v42  ;;  %vm696_vm10 = vcmp.lt.s32.totalorder %v686_v28, 16  ;;  %v963_v42 = vld [vmem:[#allocation6 + $0x2e0] sm:$0xff]  ;;  %v1184_v28 = vld [vmem:[#allocation6 + $0x328] sm:$0xff] }
  0xcd   : > { %3392 = vmatprep.subr.mxu0 %v4214_v0  ;;  %3348 = vmatpush3.msra.mxu1 %v751_v43  ;;  %v962_v43 = vld [vmem:[#allocation6 + $0x2d8] sm:$0xff] }
  0xce   : > { %3393 = vmatpush3.msra.mxu0 %v730_v31  ;;  %3353 = vmatprep.mubr.msk.f32.mxu1 %vm4215_vm0, %v4214_v0 }
  0xcf   : > { %3394 = vmatprep.subr.mxu0 %v4214_v0  ;;  %3349 = vmatprep.subr.mxu1 %v4214_v0 }
  0xd0   : > { %3395 = vmatpush3.msra.mxu0 %v729_v33  ;;  %3350 = vmatpush3.msra.mxu1 %v750_v44 }
  0xd1   : > { %3396 = vmatprep.subr.mxu0 %v4214_v0  ;;  %3351 = vmatprep.subr.mxu1 %v4214_v0 }
  0xd2   : > { %3397 = vmatpush3.msra.mxu0 %v728_v36  ;;  %3352 = vmatpush3.msra.mxu1 %v749_v45  ;;  %v961_v45 = vld [vmem:[#allocation6 + $0x2d0] sm:$0xff] }
  0xd3   : > { %3398 = vmatprep.subr.mxu0 %v4214_v0  ;;  %3415 = vmatprep.subr.mxu1 %v4214_v0 }
  0xd4   : > { %3399 = vmatpush3.msra.mxu0 %v727_v38  ;;  %v965_v38 = vld [vmem:[#allocation6 + $0x2f0] sm:$0xff] }
  0xd5   : > { %3401 = vmatmul.mubr.f32.vlgmr.msra.gmra.mxu0 %v4214_v0 }
  0xd6   : > { %3403 = vmatprep.mubr.msk.f32.mxu0 %vm4215_vm0, %v4214_v0 }
 0x155   : > { %v414_v46 = vpop.f32.mrf.mxu0 }
 0x156   : > { %v504_v48 = vpop.f32.mrf.mxu1  ;;  %v747_v46 = vld [vmem:[#allocation3 + $0x21] sm:$0xf] }
 0x157   : > { %v3214_v47 = vpop.f32.mrf.mxu0 }
 0x158   : > { %v3261_v49 = vpop.f32.mrf.mxu1 }
 0x159   : > { %v419_v50 = vpop.f32.mrf.mxu0  ;;  %v949_v49 = vld [vmem:[#allocation3 + $0x22] sm:$0xf] }
 0x15a   : > { %v509_v51 = vpop.f32.mrf.mxu1 }
 0x15b   : > { %v3217_v52 = vpop.f32.mrf.mxu0  ;;  %v510_v6 = vadd.f32 %v509_v51, %v419_v50  ;;  %v960_v50 = vld [vmem:[#allocation6 + $0x2c8] sm:$0xff]  ;;  %v959_v51 = vld [vmem:[#allocation6 + $0x2c0] sm:$0xff] }
 0x15c   : > { %v3264_v53 = vpop.f32.mrf.mxu1  ;;  %v958_v52 = vld [vmem:[#allocation6 + $0x2b8] sm:$0xff] }
 0x15d   : > { %v424_v54 = vpop.f32.mrf.mxu0  ;;  %v957_v53 = vld [vmem:[#allocation6 + $0x2b0] sm:$0xff] }
 0x15e   : > { %v514_v55 = vpop.f32.mrf.mxu1 }
 0x15f   : > { %v3220_v56 = vpop.f32.mrf.mxu0  ;;  %v515_v14 = vadd.f32 %v514_v55, %v424_v54  ;;  %v956_v54 = vld [vmem:[#allocation6 + $0x2a8] sm:$0xff]  ;;  %v955_v55 = vld [vmem:[#allocation6 + $0x2a0] sm:$0xff] }
 0x160   : > { %v3267_v57 = vpop.f32.mrf.mxu1  ;;  %v954_v56 = vld [vmem:[#allocation6 + $0x298] sm:$0xff] }
 0x161   : > { %v429_v58 = vpop.f32.mrf.mxu0  ;;  %v953_v57 = vld [vmem:[#allocation6 + $0x290] sm:$0xff] }
 0x162   : > { %v519_v59 = vpop.f32.mrf.mxu1 }
 0x163   : > { %v3223_v60 = vpop.f32.mrf.mxu0  ;;  %v520_v21 = vadd.f32 %v519_v59, %v429_v58  ;;  %v952_v58 = vld [vmem:[#allocation6 + $0x288] sm:$0xff]  ;;  %v951_v59 = vld [vmem:[#allocation6 + $0x280] sm:$0xff] }
 0x164   : > { %v3270_v61 = vpop.f32.mrf.mxu1 }
 0x165   : > { %v434_v62 = vpop.f32.mrf.mxu0 }
 0x167   : > { %v3226_v63 = vpop.f32.mrf.mxu0 }
 0x175   : > { %v616_v3 = vpop.f32.mrf.mxu0 }
 0x177   : > { %v3308_v5 = vpop.f32.mrf.mxu0 }
 0x179   : > { %v621_v7 = vpop.f32.mrf.mxu0 }
 0x17a   : > { %v641_v10 = vadd.f32 %v621_v7, %v510_v6  ;;  %v1194_v7 = vld [vmem:[#allocation6 + $0x378] sm:$0xff] }
 0x17b   : > { %v3311_v11 = vpop.f32.mrf.mxu0 }
 0x17c   : > { %v653_v15 = vadd.f32 %v2806_v8, %v641_v10  ;;  %v1191_v10 = vld [vmem:[#allocation6 + $0x360] sm:$0xff]  ;;  %v1190_v11 = vld [vmem:[#allocation6 + $0x358] sm:$0xff] }
 0x17d   : > { %v626_v16 = vpop.f32.mrf.mxu0 }
 0x17e   : > { %vm659_vm7 = vcmp.ge.f32.partialorder %v653_v15, 0.0  ;;  %v664_v17 = vmul.f32 0.1, %v653_v15  ;;  %v642_v18 = vadd.f32 %v626_v16, %v515_v14  ;;  %v1215_v14 = vld [vmem:[#allocation6 + $0x3f8] sm:$0xff]  ;;  %v1214_v16 = vld [vmem:[#allocation6 + $0x3f0] sm:$0xff] }
 0x17f   : > { %v3314_v20 = vpop.f32.mrf.mxu0  ;;  %3462 = vmatprep.subr.mxu0 %v1215_v14 }
 0x180   : > { %v669_v22 = vsel %vm659_vm7, %v653_v15, %v664_v17  ;;  %v654_v23 = vadd.f32 %v2806_v8, %v642_v18  ;;  %v1189_v15 = vld [vmem:[#allocation6 + $0x350] sm:$0xff]  ;;  %3463 = vmatpush3.msra.mxu0 %v1215_v14  ;;  %v1188_v17 = vld [vmem:[#allocation6 + $0x348] sm:$0xff]  ;;  %v1187_v20 = vld [vmem:[#allocation6 + $0x340] sm:$0xff] }
 0x181   : > { %v704_v24 = vsel %vm689_vm6, %v669_v22, 0.0  ;;  %v631_v25 = vpop.f32.mrf.mxu0  ;;  %4007 = vmatmul.mubr.msk.f32.gmra.mxu0 %vm689_vm6, %v669_v22  ;;  %3464 = vmatprep.subr.mxu0 %v1214_v16  ;;  %v1213_v18 = vld [vmem:[#allocation6 + $0x3e8] sm:$0xff]  ;;  %v1186_v22 = vld [vmem:[#allocation6 + $0x338] sm:$0xff] }
 0x182   : > { %709 = vst [vmem:[#allocation3 + $0x8] sm:$0xff] %v704_v24  ;;  %vm660_vm8 = vcmp.ge.f32.partialorder %v654_v23, 0.0  ;;  %v665_v26 = vmul.f32 0.1, %v654_v23  ;;  %v643_v27 = vadd.f32 %v631_v25, %v520_v21  ;;  %3406 = vmatprep.mubr.msk.f32.mxu0 %vm4215_vm0, %v4214_v0  ;;  %3465 = vmatpush3.msra.mxu0 %v1214_v16  ;;  %v1212_v21 = vld [vmem:[#allocation6 + $0x3e0] sm:$0xff]  ;;  %v1185_v24 = vld [vmem:[#allocation6 + $0x330] sm:$0xff] }
 0x183   : > { %v3317_v29 = vpop.f32.mrf.mxu0  ;;  %3466 = vmatprep.subr.mxu0 %v1213_v18  ;;  %v1081_v25 = vrot.slane %v4436_v12, 2  ;;  %v1208_v12 = vld [vmem:[#allocation6 + $0x3c0] sm:$0xff] }
 0x184   : > { %v670_v30 = vsel %vm660_vm8, %v654_v23, %v665_v26  ;;  %v655_v31 = vadd.f32 %v2806_v8, %v643_v27  ;;  %v1193_v8 = vld [vmem:[#allocation6 + $0x370] sm:$0xff]  ;;  %3467 = vmatpush3.msra.mxu0 %v1213_v18  ;;  %v1211_v23 = vld [vmem:[#allocation6 + $0x3d8] sm:$0xff]  ;;  %v1082_v26 = vrot.slane %v4439_v13, 2  ;;  %v4005_v18 = vld [vmem:[%s4369_s29 + $0x18] sm:$0xff] }
 0x185   : > { %710 = vst [vmem:[#allocation3 + $0x10] sm:$0xff] %v670_v30  ;;  %3407 = vmatmul.mubr.f32.gmra.mxu0 %v670_v30  ;;  %v636_v62 = vpop.f32.mrf.mxu0  ;;  %3468 = vmatprep.subr.mxu0 %v1212_v21  ;;  %v1210_v27 = vld [vmem:[#allocation6 + $0x3d0] sm:$0xff]  ;;  %v1209_v30 = vld [vmem:[#allocation6 + $0x3c8] sm:$0xff] }
 0x186   : > { %vm661_vm9 = vcmp.ge.f32.partialorder %v655_v31, 0.0  ;;  %v666_v32 = vmul.f32 0.1, %v655_v31  ;;  %3409 = vmatprep.mubr.msk.f32.mxu0 %vm4215_vm0, %v4214_v0  ;;  %3469 = vmatpush3.msra.mxu0 %v1212_v21  ;;  %v4640_v29 = vsel %vm1080_vm11, %v1081_v25, %v1082_v26 }
 0x187   : > { %v3320_v63 = vpop.f32.mrf.mxu0  ;;  %3470 = vmatprep.subr.mxu0 %v1211_v23 }
 0x188   : > { %v671_v33 = vsel %vm661_vm9, %v655_v31, %v666_v32  ;;  %3471 = vmatpush3.msra.mxu0 %v1211_v23  ;;  %v1183_v31 = vld [vmem:[#allocation6 + $0x320] sm:$0xff]  ;;  %v1182_v32 = vld [vmem:[#allocation6 + $0x318] sm:$0xff] }
 0x189   : > { %v706_v35 = vsel %vm696_vm10, %v671_v33, 0.0  ;;  %v743_v36 = vld [vmem:[#allocation3 + $0x1] sm:$0xff]  ;;  %4008 = vmatmul.mubr.msk.f32.gmra.mxu0 %vm696_vm10, %v671_v33  ;;  %3472 = vmatprep.subr.mxu0 %v1210_v27  ;;  %vm2629_vm10 = vcmask 1041408  }
 0x18a   : > { %v4592_v37 = vld [vmem:[#allocation3 + $0x2] sm:$0xff]  ;;  %711 = vst [vmem:[#allocation3 + $0x18] sm:$0xff] %v706_v35  ;;  %3354 = vmatmul.mubr.f32.vlgmr.msra.gmra.mxu1 %v743_v36  ;;  %3412 = vmatprep.mubr.msk.f32.mxu0 %vm4215_vm0, %v4214_v0  ;;  %v1206_v35 = vld [vmem:[#allocation6 + $0x3b0] sm:$0xff]  ;;  %v1180_v36 = vld [vmem:[#allocation6 + $0x308] sm:$0xff] }
 0x18b   : > { %1161 = vst [vmem:[#allocation3] sm:$0xff] %v4214_v0  ;;  %3416 = vmatpush3.msra.mxu1 %v966_v34  ;;  %3356 = vmatprep.mubr.msk.f32.mxu1 %vm4215_vm0, %v4214_v0  ;;  %v1207_v33 = vld [vmem:[#allocation6 + $0x3b8] sm:$0xff]  ;;  %v1181_v34 = vld [vmem:[#allocation6 + $0x310] sm:$0xff] }
 0x18c   : > { %3417 = vmatprep.subr.mxu1 %v4214_v0  ;;  %v744_v39 = vld [vmem:[#allocation3 + $0x9] sm:$0xff]  ;;  %v524_v5 = vpop.f32.mrf.mxu1  ;;  %3473 = vmatpush3.msra.mxu0 %v1210_v27 }
 0x18d   : > { %3418 = vmatpush3.msra.mxu1 %v965_v38  ;;  %3413 = vmatmul.mubr.f32.gmra.mxu0 %v725_v41  ;;  %v946_v60 = vld [vmem:[#allocation3 + $0xa] sm:$0xff]  ;;  %v1202_v41 = vld [vmem:[#allocation6 + $0x390] sm:$0xff]  ;;  %v2807_v5 = vld [vmem:[#allocation9 + $0x1] ss:$0 sm:$0xff] }
 0x18e   : > { %3419 = vmatprep.subr.mxu1 %v4214_v0  ;;  %3357 = vmatmul.mubr.f32.gmra.mxu1 %v744_v39  ;;  %v3273_v6 = vpop.f32.mrf.mxu1  ;;  %v1179_v38 = vld [vmem:[#allocation6 + $0x300] sm:$0xff] }
 0x18f   : > { %3420 = vmatpush3.msra.mxu1 %v964_v40  ;;  %3359 = vmatprep.mubr.msk.f32.mxu1 %vm4215_vm0, %v4214_v0  ;;  %v1204_v39 = vld [vmem:[#allocation6 + $0x3a0] sm:$0xff]  ;;  %v1203_v40 = vld [vmem:[#allocation6 + $0x398] sm:$0xff] }
 0x190   : > { %3421 = vmatprep.subr.mxu1 %v4214_v0  ;;  %3474 = vmatprep.subr.mxu0 %v1209_v30 }
 0x191   : > { %3422 = vmatpush3.msra.mxu1 %v963_v42  ;;  %v745_v44 = vld [vmem:[#allocation3 + $0x11] sm:$0xff]  ;;  %v746_v47 = vld [vmem:[#allocation3 + $0x19] sm:$0xff]  ;;  %3475 = vmatpush3.msra.mxu0 %v1209_v30 }
 0x192   : > { %3423 = vmatprep.subr.mxu1 %v4214_v0  ;;  %3360 = vmatmul.mubr.f32.gmra.mxu1 %v745_v44  ;;  %v948_v48 = vld [vmem:[#allocation3 + $0x1a] sm:$0xff]  ;;  %v947_v61 = vld [vmem:[#allocation3 + $0x12] sm:$0xff] }
 0x193   : > { %3424 = vmatpush3.msra.mxu1 %v962_v43  ;;  %3362 = vmatprep.mubr.msk.f32.mxu1 %vm4215_vm0, %v4214_v0  ;;  %1165 = vst [vmem:[#allocation3 + $0x20] sm:$0xf] %v4214_v0  ;;  %v1201_v42 = vld [vmem:[#allocation6 + $0x388] sm:$0xff]  ;;  %v1200_v43 = vld [vmem:[#allocation6 + $0x380] sm:$0xff]  ;;  %v4642_v44 = vld [vmem:[#allocation6 + $0x478] sm:$0xff] }
 0x194   : > { %3425 = vmatprep.subr.mxu1 %v4214_v0  ;;  %3476 = vmatprep.subr.mxu0 %v1208_v12 }
 0x195   : > { %3426 = vmatpush3.msra.mxu1 %v961_v45  ;;  %v4633_v1 = vpop.f32.mrf.mxu0  ;;  %3477 = vmatpush3.msra.mxu0 %v1208_v12 }
 0x196   : > { %3427 = vmatprep.subr.mxu1 %v4214_v0  ;;  %3363 = vmatmul.mubr.f32.gmra.mxu1 %v746_v47 }
 0x197   : > { %3428 = vmatpush3.msra.mxu1 %v960_v50  ;;  %3365 = vmatprep.mubr.msk.f32.mxu1 %vm4215_vm0, %v4214_v0  ;;  %v3402_v3 = vpop.f32.mrf.mxu0 }
 0x198   : > { %3429 = vmatprep.subr.mxu1 %v4214_v0  ;;  %3478 = vmatprep.subr.mxu0 %v1207_v33 }
 0x199   : > { %3430 = vmatpush3.msra.mxu1 %v959_v51  ;;  %3479 = vmatpush3.msra.mxu0 %v1207_v33 }
 0x19a   : > { %3431 = vmatprep.subr.mxu1 %v4214_v0  ;;  %3366 = vmatmul.mubr.f32.gmra.mxu1 %v747_v46 }
 0x19b   : > { %3432 = vmatpush3.msra.mxu1 %v958_v52  ;;  %3447 = vmatprep.mubr.msk.f32.mxu1 %vm4215_vm0, %v4214_v0 }
 0x19c   : > { %3433 = vmatprep.subr.mxu1 %v4214_v0  ;;  %3480 = vmatprep.subr.mxu0 %v1206_v35 }
 0x19d   : > { %3434 = vmatpush3.msra.mxu1 %v957_v53  ;;  %3481 = vmatpush3.msra.mxu0 %v1206_v35 }
 0x19e   : > { %3435 = vmatprep.subr.mxu1 %v4214_v0 }
 0x19f   : > { %3436 = vmatpush3.msra.mxu1 %v956_v54 }
 0x1a0   : > { %3437 = vmatprep.subr.mxu1 %v4214_v0 }
 0x1a1   : > { %3438 = vmatpush3.msra.mxu1 %v955_v55 }
 0x1a2   : > { %3439 = vmatprep.subr.mxu1 %v4214_v0 }
 0x1a3   : > { %3440 = vmatpush3.msra.mxu1 %v954_v56 }
 0x1a4   : > { %3441 = vmatprep.subr.mxu1 %v4214_v0 }
 0x1a5   : > { %3442 = vmatpush3.msra.mxu1 %v953_v57 }
 0x1a6   : > { %3443 = vmatprep.subr.mxu1 %v4214_v0 }
 0x1a7   : > { %3444 = vmatpush3.msra.mxu1 %v952_v58 }
 0x1a8   : > { %3445 = vmatprep.subr.mxu1 %v4214_v0 }
 0x1a9   : > { %3446 = vmatpush3.msra.mxu1 %v951_v59 }
 0x1aa   : > { %3448 = vmatmul.mubr.f32.vlgmr.msra.gmra.mxu1 %v4592_v37  ;;  %3500 = vmatprep.subr.mxu1 %v1194_v7  ;;  %v1205_v37 = vld [vmem:[#allocation6 + $0x3a8] sm:$0xff] }
 0x1ab   : > { %3450 = vmatprep.mubr.msk.f32.mxu1 %vm4215_vm0, %v4214_v0  ;;  %3501 = vmatpush3.msra.mxu1 %v1194_v7 }
 0x1ac   : > { %3502 = vmatprep.subr.mxu1 %v1193_v8  ;;  %3482 = vmatprep.subr.mxu0 %v1205_v37 }
 0x1ad   : > { %3503 = vmatpush3.msra.mxu1 %v1193_v8  ;;  %3483 = vmatpush3.msra.mxu0 %v1205_v37  ;;  %v4004_v8 = vld [vmem:[%s4369_s29 + $0x10] sm:$0xff] }
 0x1ae   : > { %3451 = vmatmul.mubr.f32.gmra.mxu1 %v946_v60  ;;  %3504 = vmatprep.subr.mxu1 %v1192_v9 }
 0x1af   : > { %3453 = vmatprep.mubr.msk.f32.mxu1 %vm4215_vm0, %v4214_v0  ;;  %3505 = vmatpush3.msra.mxu1 %v1192_v9  ;;  %v1084_v9 = vrot.slane %v4004_v8, 2  ;;  %v1398_v8 = vld [vmem:[#allocation6 + $0x438] sm:$0xff] }
 0x1b0   : > { %3506 = vmatprep.subr.mxu1 %v1191_v10  ;;  %3484 = vmatprep.subr.mxu0 %v1204_v39 }
 0x1b1   : > { %3507 = vmatpush3.msra.mxu1 %v1191_v10  ;;  %3485 = vmatpush3.msra.mxu0 %v1204_v39 }
 0x1b2   : > { %3454 = vmatmul.mubr.f32.gmra.mxu1 %v947_v61  ;;  %3508 = vmatprep.subr.mxu1 %v1190_v11 }
 0x1b3   : > { %3456 = vmatprep.mubr.msk.f32.mxu1 %vm4215_vm0, %v4214_v0  ;;  %3509 = vmatpush3.msra.mxu1 %v1190_v11 }
 0x1b4   : > { %3510 = vmatprep.subr.mxu1 %v1189_v15  ;;  %3486 = vmatprep.subr.mxu0 %v1203_v40 }
 0x1b5   : > { %3511 = vmatpush3.msra.mxu1 %v1189_v15  ;;  %3487 = vmatpush3.msra.mxu0 %v1203_v40  ;;  %v1137_v15 = vadd.s32 4294967286, %v4579_v4 }
 0x1b6   : > { %3457 = vmatmul.mubr.f32.gmra.mxu1 %v948_v48  ;;  %3512 = vmatprep.subr.mxu1 %v1188_v17 }
 0x1b7   : > { %3459 = vmatprep.mubr.msk.f32.mxu1 %vm4215_vm0, %v4214_v0  ;;  %3513 = vmatpush3.msra.mxu1 %v1188_v17  ;;  %vm1142_vm12 = vcmp.ge.s32.totalorder %v1137_v15, 0  ;;  %v1393_v15 = vld [vmem:[#allocation6 + $0x410] sm:$0xff] }
 0x1b8   : > { %3514 = vmatprep.subr.mxu1 %v1187_v20  ;;  %3488 = vmatprep.subr.mxu0 %v1202_v41 }
 0x1b9   : > { %3515 = vmatpush3.msra.mxu1 %v1187_v20  ;;  %3489 = vmatpush3.msra.mxu0 %v1202_v41  ;;  %v1086_v20 = vrot.slane %v4005_v18, 2 }
 0x1ba   : > { %3460 = vmatmul.mubr.f32.gmra.mxu1 %v949_v49  ;;  %3516 = vmatprep.subr.mxu1 %v1186_v22 }
 0x1bb   : > { %3532 = vmatprep.mubr.f32.mxu1 %v4214_v0  ;;  %3517 = vmatpush3.msra.mxu1 %v1186_v22 }
 0x1bc   : > { %3518 = vmatprep.subr.mxu1 %v1185_v24  ;;  %3490 = vmatprep.subr.mxu0 %v1201_v42 }
 0x1bd   : > { %3519 = vmatpush3.msra.mxu1 %v1185_v24  ;;  %3491 = vmatpush3.msra.mxu0 %v1201_v42 }
 0x1be   : > { %3520 = vmatprep.subr.mxu1 %v1184_v28  ;;  %3492 = vmatprep.subr.mxu0 %v1200_v43 }
 0x1bf   : > { %3521 = vmatpush3.msra.mxu1 %v1184_v28  ;;  %3493 = vmatpush3.msra.mxu0 %v1200_v43  ;;  %v1087_v28 = vsel %vm1080_vm11, %v1084_v9, %v1086_v20 }
 0x1c0   : > { %3522 = vmatprep.subr.mxu1 %v1183_v31  ;;  %3538 = vmatprep.subr.mxu0 %v4642_v44 }
 0x1c1   : > { %3523 = vmatpush3.msra.mxu1 %v1183_v31  ;;  %v4006_v31 = vld [vmem:[%s4369_s29 + $0x20] sm:$0xff]  ;;  %s4123_s29 = sshll.u32 %s4216_s19, 4  ;;  %s4124_s29 = int_to_ptr.vmem [resolvable:$false] %s4123_s29 }
 0x1c2   : > { %3524 = vmatprep.subr.mxu1 %v1182_v32  ;;  %s4125_s30 = scalar_lea.vmem %s4124_s29, 512  ;;  %p4126_p1 = scmp.lt.s32.totalorder %s4765_s16, %s4124_s29 }
 0x1c3   : > { %3525 = vmatpush3.msra.mxu1 %v1182_v32  ;;  %p4127_p10 = scmp.lt.s32.totalorder %s4125_s30, %s4119_s11 }
 0x1c4   : > { %3526 = vmatprep.subr.mxu1 %v1181_v34 }
 0x1c5   : > { %3527 = vmatpush3.msra.mxu1 %v1181_v34  ;;  %p4128_p2 = por %p4127_p10, %p4126_p1 }
 0x1c6   : > { %3528 = vmatprep.subr.mxu1 %v1180_v36 }
 0x1c7   : > { %3529 = vmatpush3.msra.mxu1 %v1180_v36  ;;  %p4129_p5 = pnand %p4128_p2, %p4122_p12 }
 0x1c8   : > { %3530 = vmatprep.subr.mxu1 %v1179_v38 }
 0x1c9   : > { %3531 = vmatpush3.msra.mxu1 %v1179_v38  ;;  %v1139_v38 = vadd.s32 4294967286, %v4583_v19 }
 0x1cb   : > { %vm1149_vm1 = vcmp.lt.s32.totalorder %v1139_v38, 16  ;;  %v1569_v38 = vld [vmem:[#allocation6 + $0x498] sm:$0xff] }
 0x241   : > { %v926_v45 = vpop.f32.mrf.mxu0 }
 0x243   : > { %v3405_v46 = vpop.f32.mrf.mxu0 }
 0x245   : > { %v931_v47 = vpop.f32.mrf.mxu0 }
 0x247   : > { %v3408_v48 = vpop.f32.mrf.mxu0 }
 0x249   : > { %v936_v50 = vpop.f32.mrf.mxu0 }
 0x24a   : > { %v831_v49 = vpop.f32.mrf.mxu1 }
 0x24b   : > { %v3411_v52 = vpop.f32.mrf.mxu0  ;;  %v922_v63 = vadd.f32 %v4633_v1, %v831_v49  ;;  %v1085_v1 = vsel %vm1080_vm11, %v1082_v26, %v1084_v9  ;;  %v1397_v9 = vld [vmem:[#allocation6 + $0x430] sm:$0xff] }
 0x24c   : > { %v3355_v51 = vpop.f32.mrf.mxu1 }
 0x24d   : > { %v941_v55 = vpop.f32.mrf.mxu0 }
 0x24e   : > { %v836_v53 = vpop.f32.mrf.mxu1 }
 0x24f   : > { %v3414_v57 = vpop.f32.mrf.mxu0  ;;  %v927_v10 = vadd.f32 %v926_v45, %v836_v53 }
 0x250   : > { %v3358_v54 = vpop.f32.mrf.mxu1  ;;  %v1405_v57 = vld [vmem:[#allocation6 + $0x470] sm:$0xff] }
 0x252   : > { %v841_v56 = vpop.f32.mrf.mxu1 }
 0x253   : > { %v932_v22 = vadd.f32 %v931_v47, %v841_v56 }
 0x254   : > { %v3361_v58 = vpop.f32.mrf.mxu1 }
 0x255   : > { %v1404_v58 = vld [vmem:[#allocation6 + $0x468] sm:$0xff] }
 0x256   : > { %v846_v59 = vpop.f32.mrf.mxu1 }
 0x257   : > { %v937_v4 = vadd.f32 %v936_v50, %v846_v59  ;;  %v1403_v59 = vld [vmem:[#allocation6 + $0x460] sm:$0xff] }
 0x258   : > { %v3364_v60 = vpop.f32.mrf.mxu1 }
 0x25a   : > { %v851_v61 = vpop.f32.mrf.mxu1 }
 0x25c   : > { %v3367_v62 = vpop.f32.mrf.mxu1 }
 0x26a   : > { %v1033_v3 = vpop.f32.mrf.mxu1 }
 0x26b   : > { %v1057_v6 = vadd.f32 %v1033_v3, %v922_v63  ;;  %v1402_v3 = vld [vmem:[#allocation6 + $0x458] sm:$0xff] }
 0x26c   : > { %v3449_v7 = vpop.f32.mrf.mxu1 }
 0x26d   : > { %v1070_v11 = vadd.f32 %v2807_v5, %v1057_v6  ;;  %v1400_v6 = vld [vmem:[#allocation6 + $0x448] sm:$0xff]  ;;  %v1399_v7 = vld [vmem:[#allocation6 + $0x440] sm:$0xff] }
 0x26e   : > { %v1038_v14 = vpop.f32.mrf.mxu1 }
 0x26f   : > { %v1095_v16 = vadd.f32 %v4640_v29, %v1070_v11  ;;  %v1058_v17 = vadd.f32 %v1038_v14, %v927_v10  ;;  %v1088_v29 = vrot.slane %v4006_v31, 2  ;;  %v1396_v10 = vld [vmem:[#allocation6 + $0x428] sm:$0xff]  ;;  %v1395_v11 = vld [vmem:[#allocation6 + $0x420] sm:$0xff]  ;;  %v1394_v14 = vld [vmem:[#allocation6 + $0x418] sm:$0xff] }
 0x270   : > { %v3452_v21 = vpop.f32.mrf.mxu1  ;;  %v1576_v31 = vld [vmem:[#allocation6 + $0x4d0] sm:$0xff] }
 0x271   : > { %v1071_v23 = vadd.f32 %v2807_v5, %v1058_v17  ;;  %v1900_v12 = vrot.slane %v1095_v16, 4  ;;  %v1089_v40 = vsel %vm1080_vm11, %v1086_v20, %v1088_v29  ;;  %v1392_v16 = vld [vmem:[#allocation6 + $0x408] sm:$0xff]  ;;  %v1391_v17 = vld [vmem:[#allocation6 + $0x400] sm:$0xff]  ;;  %v1602_v21 = vld [vmem:[#allocation6 + $0x578] sm:$0xff] }
 0x272   : > { %v1043_v24 = vpop.f32.mrf.mxu1  ;;  %3576 = vmatprep.subr.mxu1 %v1602_v21  ;;  %v1575_v29 = vld [vmem:[#allocation6 + $0x4c8] sm:$0xff] }
 0x273   : > { %v1096_v25 = vadd.f32 %v1085_v1, %v1071_v23  ;;  %v1059_v27 = vadd.f32 %v1043_v24, %v932_v22  ;;  %v1581_v1 = vld [vmem:[#allocation6 + $0x4f8] sm:$0xff]  ;;  %v1580_v22 = vld [vmem:[#allocation6 + $0x4f0] sm:$0xff]  ;;  %v1579_v24 = vld [vmem:[#allocation6 + $0x4e8] sm:$0xff] }
 0x274   : > { %v3455_v30 = vpop.f32.mrf.mxu1  ;;  %v1601_v23 = vld [vmem:[#allocation6 + $0x570] sm:$0xff] }
 0x275   : > { %vm1112_vm14 = vcmp.ge.f32.partialorder %v1096_v25, 0.0  ;;  %v1117_v32 = vmul.f32 0.1, %v1096_v25  ;;  %v1072_v13 = vadd.f32 %v2807_v5, %v1059_v27  ;;  %v1901_v33 = vrot.slane %v1096_v25, 4  ;;  %v1578_v27 = vld [vmem:[#allocation6 + $0x4e0] sm:$0xff]  ;;  %v1598_v30 = vld [vmem:[#allocation6 + $0x558] sm:$0xff] }
 0x276   : > { %v1048_v26 = vpop.f32.mrf.mxu1 }
 0x277   : > { %v1122_v34 = vsel %vm1112_vm14, %v1096_v25, %v1117_v32  ;;  %v1097_v35 = vadd.f32 %v1087_v28, %v1072_v13  ;;  %v1060_v36 = vadd.f32 %v1048_v26, %v937_v4  ;;  %v4656_v37 = vsel %vm1899_vm13, %v1900_v12, %v1901_v33  ;;  %v1600_v25 = vld [vmem:[#allocation6 + $0x568] sm:$0xff]  ;;  %v1599_v28 = vld [vmem:[#allocation6 + $0x560] sm:$0xff]  ;;  %v1577_v4 = vld [vmem:[#allocation6 + $0x4d8] sm:$0xff] }
 0x278   : > { %v1157_v39 = vsel %vm1142_vm12, %v1122_v34, 0.0  ;;  %v3458_v41 = vpop.f32.mrf.mxu1  ;;  %4009 = vmatmul.mubr.msk.f32.vlgmr.msra.gmra.mxu1 %vm1142_vm12, %v1122_v34  ;;  %v1574_v12 = vld [vmem:[#allocation6 + $0x4c0] sm:$0xff]  ;;  %v1573_v32 = vld [vmem:[#allocation6 + $0x4b8] sm:$0xff]  ;;  %v1572_v13 = vld [vmem:[#allocation6 + $0x4b0] sm:$0xff] }
 0x279   : > { %1162 = vst [vmem:[#allocation3 + $0x8] sm:$0xff] %v1157_v39  ;;  %vm1113_vm15 = vcmp.ge.f32.partialorder %v1097_v35, 0.0  ;;  %v1118_v42 = vmul.f32 0.1, %v1097_v35  ;;  %v1073_v43 = vadd.f32 %v2807_v5, %v1060_v36  ;;  %v1903_v45 = vrot.slane %v1097_v35, 4  ;;  %3577 = vmatpush3.msra.mxu1 %v1602_v21  ;;  %v1571_v26 = vld [vmem:[#allocation6 + $0x4a8] sm:$0xff] }
 0x27a   : > { %v1053_v46 = vpop.f32.mrf.mxu1  ;;  %3578 = vmatprep.subr.mxu1 %v1601_v23  ;;  %v1596_v34 = vld [vmem:[#allocation6 + $0x548] sm:$0xff]  ;;  %v1595_v36 = vld [vmem:[#allocation6 + $0x540] sm:$0xff]  ;;  %v1594_v39 = vld [vmem:[#allocation6 + $0x538] sm:$0xff] }
 0x27b   : > { %v1123_v47 = vsel %vm1113_vm15, %v1097_v35, %v1118_v42  ;;  %v1098_v48 = vadd.f32 %v1089_v40, %v1073_v43  ;;  %v4663_v49 = vsel %vm1899_vm13, %v1901_v33, %v1903_v45  ;;  %3579 = vmatpush3.msra.mxu1 %v1601_v23  ;;  %v1597_v33 = vld [vmem:[#allocation6 + $0x550] sm:$0xff]  ;;  %v1570_v35 = vld [vmem:[#allocation6 + $0x4a0] sm:$0xff]  ;;  %v1567_v42 = vld [vmem:[#allocation6 + $0x488] sm:$0xff] }
 0x27c   : > { %1163 = vst [vmem:[#allocation3 + $0x10] sm:$0xff] %v1123_v47  ;;  %3535 = vmatprep.mubr.f32.mxu1 %v1123_v47  ;;  %v3461_v19 = vpop.f32.mrf.mxu1  ;;  %3580 = vmatprep.subr.mxu1 %v1600_v25  ;;  %v1568_v40 = vld [vmem:[#allocation6 + $0x490] sm:$0xff]  ;;  %v1592_v43 = vld [vmem:[#allocation6 + $0x528] sm:$0xff]  ;;  %v1591_v46 = vld [vmem:[#allocation6 + $0x520] sm:$0xff] }
 0x27d   : > { %vm1114_vm2 = vcmp.ge.f32.partialorder %v1098_v48, 0.0  ;;  %v1119_v50 = vmul.f32 0.1, %v1098_v48  ;;  %v1905_v51 = vrot.slane %v1098_v48, 4  ;;  %3581 = vmatpush3.msra.mxu1 %v1600_v25  ;;  %v1593_v41 = vld [vmem:[#allocation6 + $0x530] sm:$0xff]  ;;  %v1590_v47 = vld [vmem:[#allocation6 + $0x518] sm:$0xff] }
 0x27e   : > { %3582 = vmatprep.subr.mxu1 %v1599_v28  ;;  %v1588_v19 = vld [vmem:[#allocation6 + $0x508] sm:$0xff] }
 0x27f   : > { %v1124_v52 = vsel %vm1114_vm2, %v1098_v48, %v1119_v50  ;;  %v4666_v53 = vsel %vm1899_vm13, %v1903_v45, %v1905_v51  ;;  %3583 = vmatpush3.msra.mxu1 %v1599_v28  ;;  %v1566_v45 = vld [vmem:[#allocation6 + $0x480] sm:$0xff]  ;;  %v1589_v48 = vld [vmem:[#allocation6 + $0x510] sm:$0xff]  ;;  %v1793_v51 = vld [vmem:[#allocation6 + $0x5f8] sm:$0xff] }
 0x280   : > { %v1159_v54 = vsel %vm1149_vm1, %v1124_v52, 0.0  ;;  %v1195_v55 = vld [vmem:[#allocation3 + $0x3] sm:$0xff]  ;;  %3584 = vmatprep.subr.mxu1 %v1598_v30 }
 0x281   : > { %1164 = vst [vmem:[#allocation3 + $0x18] sm:$0xff] %v1159_v54  ;;  %3494 = vmatprep.mubr.f32.mxu0 %v1195_v55  ;;  %v1386_v5 = vld [vmem:[#allocation3 + $0x6] sm:$0xff]  ;;  %3585 = vmatpush3.msra.mxu1 %v1598_v30 }
 0x282   : > { %3586 = vmatprep.subr.mxu1 %v1597_v33  ;;  %v1587_v50 = vld [vmem:[#allocation6 + $0x500] sm:$0xff] }
 0x283   : > { %v1196_v56 = vld [vmem:[#allocation3 + $0xb] sm:$0xff]  ;;  %3587 = vmatpush3.msra.mxu1 %v1597_v33 }
 0x284   : > { %3495 = vmatmul.mubr.f32.vlgmr.msra.gmra.mxu0 %v1196_v56  ;;  %v1387_v18 = vld [vmem:[#allocation3 + $0xe] sm:$0xff]  ;;  %3588 = vmatprep.subr.mxu1 %v1596_v34 }
 0x285   : > { %3539 = vmatpush3.msra.mxu0 %v4642_v44  ;;  %v1401_v44 = vld [vmem:[#allocation6 + $0x450] sm:$0xff]  ;;  %3589 = vmatpush3.msra.mxu1 %v1596_v34  ;;  %v1791_v33 = vld [vmem:[#allocation6 + $0x5e8] sm:$0xff] }
 0x286   : > { %3540 = vmatprep.subr.mxu0 %v1405_v57  ;;  %3590 = vmatprep.subr.mxu1 %v1595_v36 }
 0x287   : > { %3541 = vmatpush3.msra.mxu0 %v1405_v57  ;;  %3591 = vmatpush3.msra.mxu1 %v1595_v36  ;;  %v1788_v36 = vld [vmem:[#allocation6 + $0x5d0] sm:$0xff] }
 0x288   : > { %3542 = vmatprep.subr.mxu0 %v1404_v58  ;;  %v1197_v60 = vld [vmem:[#allocation3 + $0x13] sm:$0xff]  ;;  %v1198_v62 = vld [vmem:[#allocation3 + $0x1b] sm:$0x3f]  ;;  %3592 = vmatprep.subr.mxu1 %v1594_v39 }
 0x289   : > { %v1177_v61 = vld [vmem:[#allocation3 + $0x18] sm:$0x3f]  ;;  %3543 = vmatpush3.msra.mxu0 %v1404_v58  ;;  %3497 = vmatprep.mubr.f32.mxu0 %v1197_v60  ;;  %v1389_v20 = vld [vmem:[#allocation3 + $0x1e] sm:$0x3f] }
 0x28a   : > { %v1388_v63 = vld [vmem:[#allocation3 + $0x16] sm:$0xff]  ;;  %3536 = vmatmul.mubr.f32.gmra.mxu1 %v1177_v61  ;;  %3544 = vmatprep.subr.mxu0 %v1403_v59 }
 0x28b   : > { %1553 = vst [vmem:[#allocation3 + $0x18] sm:$0x3f] %v4214_v0  ;;  %3498 = vmatmul.mubr.f32.gmra.mxu0 %v1198_v62  ;;  %3593 = vmatpush3.msra.mxu1 %v1594_v39  ;;  %v2808_v62 = vld [vmem:[#allocation9 + $0x2] ss:$0 sm:$0xff] }
 0x28c   : > { %3545 = vmatpush3.msra.mxu0 %v1403_v59  ;;  %3570 = vmatprep.mubr.f32.mxu0 %v1386_v5  ;;  %v1786_v39 = vld [vmem:[#allocation6 + $0x5c0] sm:$0xff] }
 0x28d   : > { %3546 = vmatprep.subr.mxu0 %v1402_v3  ;;  %3594 = vmatprep.subr.mxu1 %v1593_v41 }
 0x28e   : > { %3547 = vmatpush3.msra.mxu0 %v1402_v3  ;;  %3595 = vmatpush3.msra.mxu1 %v1593_v41  ;;  %v1784_v41 = vld [vmem:[#allocation6 + $0x5b0] sm:$0xff] }
 0x28f   : > { %3548 = vmatprep.subr.mxu0 %v1401_v44  ;;  %3596 = vmatprep.subr.mxu1 %v1592_v43 }
 0x290   : > { %3549 = vmatpush3.msra.mxu0 %v1401_v44  ;;  %3597 = vmatpush3.msra.mxu1 %v1592_v43  ;;  %v1782_v43 = vld [vmem:[#allocation6 + $0x5a0] sm:$0xff] }
 0x291   : > { %3550 = vmatprep.subr.mxu0 %v1400_v6  ;;  %3598 = vmatprep.subr.mxu1 %v1591_v46 }
 0x292   : > { %3551 = vmatpush3.msra.mxu0 %v1400_v6  ;;  %3599 = vmatpush3.msra.mxu1 %v1591_v46  ;;  %v1530_v6 = vadd.s32 4294967289, %v4576_v2  ;;  %v1780_v46 = vld [vmem:[#allocation6 + $0x590] sm:$0xff] }
 0x293   : > { %3552 = vmatprep.subr.mxu0 %v1399_v7  ;;  %3600 = vmatprep.subr.mxu1 %v1590_v47 }
 0x294   : > { %3553 = vmatpush3.msra.mxu0 %v1399_v7  ;;  %3601 = vmatpush3.msra.mxu1 %v1590_v47  ;;  %v4673_v7 = vadd.s32 16, %v4576_v2  ;;  %vm1534_vm4 = vcmp.ge.s32.totalorder %v1530_v6, 0  ;;  %v1779_v47 = vld [vmem:[#allocation6 + $0x588] sm:$0xff] }
 0x295   : > { %3554 = vmatprep.subr.mxu0 %v1398_v8  ;;  %3602 = vmatprep.subr.mxu1 %v1589_v48  ;;  %v2009_v6 = vld [vmem:[#allocation6 + $0x6c8] sm:$0xff] }
 0x296   : > { %3555 = vmatpush3.msra.mxu0 %v1398_v8  ;;  %3603 = vmatpush3.msra.mxu1 %v1589_v48  ;;  %v1778_v48 = vld [vmem:[#allocation6 + $0x580] sm:$0xff] }
 0x297   : > { %3556 = vmatprep.subr.mxu0 %v1397_v9  ;;  %3604 = vmatprep.subr.mxu1 %v1588_v19 }
 0x298   : > { %3557 = vmatpush3.msra.mxu0 %v1397_v9  ;;  %3605 = vmatpush3.msra.mxu1 %v1588_v19 }
 0x299   : > { %3558 = vmatprep.subr.mxu0 %v1396_v10  ;;  %3606 = vmatprep.subr.mxu1 %v1587_v50 }
 0x29a   : > { %3559 = vmatpush3.msra.mxu0 %v1396_v10  ;;  %3607 = vmatpush3.msra.mxu1 %v1587_v50  ;;  %v2015_v50 = vld [vmem:[#allocation6 + $0x6f8] sm:$0xff] }
 0x29b   : > { %3560 = vmatprep.subr.mxu0 %v1395_v11  ;;  %3652 = vmatprep.subr.mxu1 %v1793_v51 }
 0x29c   : > { %3561 = vmatpush3.msra.mxu0 %v1395_v11 }
 0x29d   : > { %3562 = vmatprep.subr.mxu0 %v1394_v14 }
 0x29e   : > { %3563 = vmatpush3.msra.mxu0 %v1394_v14 }
 0x29f   : > { %3564 = vmatprep.subr.mxu0 %v1393_v15 }
 0x2a0   : > { %3565 = vmatpush3.msra.mxu0 %v1393_v15 }
 0x2a1   : > { %3566 = vmatprep.subr.mxu0 %v1392_v16 }
 0x2a2   : > { %3567 = vmatpush3.msra.mxu0 %v1392_v16 }
 0x2a3   : > { %3568 = vmatprep.subr.mxu0 %v1391_v17 }
 0x2a4   : > { %3569 = vmatpush3.msra.mxu0 %v1391_v17  ;;  %v1532_v17 = vadd.s32 4294967289, %v4673_v7 }
 0x2a5   : > { %3571 = vmatmul.mubr.f32.vlgmr.msra.gmra.mxu0 %v1387_v18  ;;  %3614 = vmatprep.subr.mxu0 %v1581_v1 }
 0x2a6   : > { %3573 = vmatprep.mubr.f32.mxu0 %v1388_v63  ;;  %3615 = vmatpush3.msra.mxu0 %v1581_v1  ;;  %vm1540_vm7 = vcmp.lt.s32.totalorder %v1532_v17, 16  ;;  %v2005_v17 = vld [vmem:[#allocation6 + $0x6a8] sm:$0xff] }
 0x2a7   : > { %3616 = vmatprep.subr.mxu0 %v1580_v22 }
 0x2a8   : > { %3617 = vmatpush3.msra.mxu0 %v1580_v22 }
 0x2a9   : > { %3574 = vmatmul.mubr.f32.gmra.mxu0 %v1389_v20  ;;  %3618 = vmatprep.subr.mxu0 %v1579_v24 }
 0x2aa   : > { %3619 = vmatpush3.msra.mxu0 %v1579_v24 }
 0x2ab   : > { %3620 = vmatprep.subr.mxu0 %v1578_v27 }
 0x2ac   : > { %3621 = vmatpush3.msra.mxu0 %v1578_v27  ;;  %v1564_v27 = vld [vmem:[#allocation3 + $0x18] sm:$0xf] }
 0x2ad   : > { %3622 = vmatprep.subr.mxu0 %v1577_v4 }
 0x2ae   : > { %3623 = vmatpush3.msra.mxu0 %v1577_v4 }
 0x2af   : > { %3624 = vmatprep.subr.mxu0 %v1576_v31 }
 0x2b0   : > { %3625 = vmatpush3.msra.mxu0 %v1576_v31 }
 0x2b1   : > { %3626 = vmatprep.subr.mxu0 %v1575_v29 }
 0x2b2   : > { %3627 = vmatpush3.msra.mxu0 %v1575_v29  ;;  %v1792_v29 = vld [vmem:[#allocation6 + $0x5f0] sm:$0xff] }
 0x2b3   : > { %3628 = vmatprep.subr.mxu0 %v1574_v12 }
 0x2b4   : > { %3629 = vmatpush3.msra.mxu0 %v1574_v12  ;;  %v1585_v12 = vld [vmem:[#allocation3 + $0x19] sm:$0xf] }
 0x2b5   : > { %3630 = vmatprep.subr.mxu0 %v1573_v32 }
 0x2b6   : > { %3631 = vmatpush3.msra.mxu0 %v1573_v32 }
 0x2b7   : > { %3632 = vmatprep.subr.mxu0 %v1572_v13 }
 0x2b8   : > { %3633 = vmatpush3.msra.mxu0 %v1572_v13  ;;  %v1776_v13 = vld [vmem:[#allocation3 + $0x1a] sm:$0xf] }
 0x2b9   : > { %3634 = vmatprep.subr.mxu0 %v1571_v26 }
 0x2ba   : > { %3635 = vmatpush3.msra.mxu0 %v1571_v26  ;;  %v1790_v26 = vld [vmem:[#allocation6 + $0x5e0] sm:$0xff] }
 0x2bb   : > { %3636 = vmatprep.subr.mxu0 %v1570_v35 }
 0x2bc   : > { %3637 = vmatpush3.msra.mxu0 %v1570_v35  ;;  %v1789_v35 = vld [vmem:[#allocation6 + $0x5d8] sm:$0xff] }
 0x2bd   : > { %3638 = vmatprep.subr.mxu0 %v1569_v38 }
 0x2be   : > { %3639 = vmatpush3.msra.mxu0 %v1569_v38  ;;  %v1787_v38 = vld [vmem:[#allocation6 + $0x5c8] sm:$0xff] }
 0x2bf   : > { %3640 = vmatprep.subr.mxu0 %v1568_v40 }
 0x2c0   : > { %3641 = vmatpush3.msra.mxu0 %v1568_v40  ;;  %v1785_v40 = vld [vmem:[#allocation6 + $0x5b8] sm:$0xff] }
 0x2c1   : > { %3642 = vmatprep.subr.mxu0 %v1567_v42 }
 0x2c2   : > { %3643 = vmatpush3.msra.mxu0 %v1567_v42  ;;  %v1783_v42 = vld [vmem:[#allocation6 + $0x5a8] sm:$0xff] }
 0x2c3   : > { %3644 = vmatprep.subr.mxu0 %v1566_v45 }
 0x2c4   : > { %3645 = vmatpush3.msra.mxu0 %v1566_v45  ;;  %v1781_v45 = vld [vmem:[#allocation6 + $0x598] sm:$0xff] }
 0x2c5   : > { %3690 = vmatprep.subr.mxu0 %v4214_v0 }
 0x338   : > { %v3534_v52 = vpop.f32.mrf.mxu1 }
 0x33a   : > { %v1367_v55 = vpop.f32.mrf.mxu1 }
 0x344   : > { %v3496_v54 = vpop.f32.mrf.mxu0 }
 0x345   : > { %v1373_v60 = vadd.f32 %v3534_v52, %v3496_v54  ;;  %v2014_v52 = vld [vmem:[#allocation6 + $0x6f0] sm:$0xff] }
 0x346   : > { %v1282_v56 = vpop.f32.mrf.mxu0  ;;  %v1994_v54 = vld [vmem:[#allocation6 + $0x670] sm:$0xff] }
 0x347   : > { %v1368_v63 = vadd.f32 %v1367_v55, %v1282_v56  ;;  %v1993_v55 = vld [vmem:[#allocation6 + $0x668] sm:$0xff]  ;;  %v1992_v56 = vld [vmem:[#allocation6 + $0x660] sm:$0xff] }
 0x34a   : > { %v3537_v57 = vpop.f32.mrf.mxu1 }
 0x34b   : > { %v3499_v58 = vpop.f32.mrf.mxu0  ;;  %v1991_v57 = vld [vmem:[#allocation6 + $0x658] sm:$0xff] }
 0x34c   : > { %v1377_v5 = vpop.f32.mrf.mxu1  ;;  %v2013_v58 = vld [vmem:[#allocation6 + $0x6e8] sm:$0xff] }
 0x34d   : > { %v1292_v59 = vpop.f32.mrf.mxu0 }
 0x34e   : > { %v1378_v11 = vadd.f32 %v1377_v5, %v1292_v59  ;;  %v1990_v59 = vld [vmem:[#allocation6 + $0x650] sm:$0xff] }
 0x34f   : > { %v2010_v5 = vld [vmem:[#allocation6 + $0x6d0] sm:$0xff] }
 0x365   : > { %v3572_v61 = vpop.f32.mrf.mxu0 }
 0x366   : > { %v1493_v3 = vadd.f32 %v3572_v61, %v1373_v60  ;;  %v2012_v60 = vld [vmem:[#allocation6 + $0x6e0] sm:$0xff]  ;;  %v1989_v61 = vld [vmem:[#allocation6 + $0x648] sm:$0xff] }
 0x367   : > { %v1473_v44 = vpop.f32.mrf.mxu0 }
 0x368   : > { %v1505_v8 = vadd.f32 %v2808_v62, %v1493_v3  ;;  %v1492_v9 = vadd.f32 %v1473_v44, %v1368_v63  ;;  %v1988_v63 = vld [vmem:[#allocation6 + $0x640] sm:$0xff]  ;;  %v1987_v3 = vld [vmem:[#allocation6 + $0x638] sm:$0xff]  ;;  %v1986_v44 = vld [vmem:[#allocation6 + $0x630] sm:$0xff] }
 0x369   : > { %v3575_v10 = vpop.f32.mrf.mxu0 }
 0x36a   : > { %vm1510_vm3 = vcmp.ge.f32.partialorder %v1505_v8, 0.0  ;;  %v1514_v14 = vmul.f32 0.1, %v1505_v8  ;;  %v1504_v15 = vadd.f32 %v2808_v62, %v1492_v9  ;;  %v2008_v9 = vld [vmem:[#allocation6 + $0x6c0] sm:$0xff] }
 0x36b   : > { %v1483_v16 = vpop.f32.mrf.mxu0  ;;  %v1984_v10 = vld [vmem:[#allocation6 + $0x620] sm:$0xff] }
 0x36c   : > { %v1518_v18 = vsel %vm1510_vm3, %v1505_v8, %v1514_v14  ;;  %vm1509_vm5 = vcmp.ge.f32.partialorder %v1504_v15, 0.0  ;;  %v1513_v20 = vmul.f32 0.1, %v1504_v15  ;;  %v1494_v1 = vadd.f32 %v1483_v16, %v1378_v11  ;;  %v1985_v8 = vld [vmem:[#allocation6 + $0x628] sm:$0xff]  ;;  %v2007_v11 = vld [vmem:[#allocation6 + $0x6b8] sm:$0xff]  ;;  %v1982_v16 = vld [vmem:[#allocation6 + $0x610] sm:$0xff] }
 0x36d   : > { %1551 = vst [vmem:[#allocation3 + $0x8] sm:$0xff] %v1518_v18  ;;  %v1983_v14 = vld [vmem:[#allocation6 + $0x618] sm:$0xff] }
 0x36e   : > { %v1517_v21 = vsel %vm1509_vm5, %v1504_v15, %v1513_v20  ;;  %v1506_v22 = vadd.f32 %v2808_v62, %v1494_v1  ;;  %v2011_v62 = vld [vmem:[#allocation6 + $0x6d8] sm:$0xff]  ;;  %v2006_v15 = vld [vmem:[#allocation6 + $0x6b0] sm:$0xff]  ;;  %v2004_v20 = vld [vmem:[#allocation6 + $0x6a0] sm:$0xff] }
 0x36f   : > { %v1546_v23 = vsel %vm1534_vm4, %v1517_v21, 0.0  ;;  %4010 = vmatprep.mubr.msk.f32.mxu0 %vm1534_vm4, %v1517_v21  ;;  %v1980_v1 = vld [vmem:[#allocation6 + $0x600] sm:$0xff]  ;;  %v2003_v21 = vld [vmem:[#allocation6 + $0x698] sm:$0xff] }
 0x370   : > { %1550 = vst [vmem:[#allocation3] sm:$0xff] %v1546_v23  ;;  %vm1511_vm6 = vcmp.ge.f32.partialorder %v1506_v22, 0.0  ;;  %v1515_v24 = vmul.f32 0.1, %v1506_v22  ;;  %3647 = vmatmul.mubr.f32.vlgmr.msra.gmra.mxu0 %v1518_v18  ;;  %v1981_v18 = vld [vmem:[#allocation6 + $0x608] sm:$0xff] }
 0x371   : > { %3691 = vmatpush3.msra.mxu0 %v2015_v50  ;;  %v2001_v23 = vld [vmem:[#allocation6 + $0x688] sm:$0xff] }
 0x372   : > { %v1519_v25 = vsel %vm1511_vm6, %v1506_v22, %v1515_v24  ;;  %3692 = vmatprep.subr.mxu0 %v4214_v0  ;;  %v2002_v22 = vld [vmem:[#allocation6 + $0x690] sm:$0xff]  ;;  %v2000_v24 = vld [vmem:[#allocation6 + $0x680] sm:$0xff] }
 0x373   : > { %v1548_v28 = vsel %vm1540_vm7, %v1519_v25, 0.0  ;;  %4011 = vmatprep.mubr.msk.f32.mxu0 %vm1540_vm7, %v1519_v25  ;;  %3693 = vmatpush3.msra.mxu0 %v2014_v52 }
 0x374   : > { %1552 = vst [vmem:[#allocation3 + $0x10] sm:$0xff] %v1548_v28  ;;  %3650 = vmatmul.mubr.f32.gmra.mxu0 %v1564_v27  ;;  %3694 = vmatprep.subr.mxu0 %v4214_v0 }
 0x375   : > { %3722 = vmatprep.mubr.msk.f32.mxu0 %vm4215_vm0, %v4214_v0  ;;  %3695 = vmatpush3.msra.mxu0 %v2013_v58 }
 0x376   : > { %3696 = vmatprep.subr.mxu0 %v4214_v0 }
 0x377   : > { %v1582_v4 = vld [vmem:[#allocation3 + $0x1] sm:$0xff]  ;;  %3697 = vmatpush3.msra.mxu0 %v2012_v60 }
 0x378   : > { %3608 = vmatprep.mubr.f32.mxu1 %v1582_v4  ;;  %v1773_v34 = vld [vmem:[#allocation3 + $0x2] sm:$0xff]  ;;  %3698 = vmatprep.subr.mxu0 %v4214_v0 }
 0x379   : > { %3699 = vmatpush3.msra.mxu0 %v2011_v62 }
 0x37a   : > { %3700 = vmatprep.subr.mxu0 %v4214_v0 }
 0x37b   : > { %v1583_v30 = vld [vmem:[#allocation3 + $0x9] sm:$0xff]  ;;  %v1584_v31 = vld [vmem:[#allocation3 + $0x11] sm:$0xff]  ;;  %3701 = vmatpush3.msra.mxu0 %v2010_v5 }
 0x37c   : > { %3609 = vmatmul.mubr.f32.vlgmr.msra.gmra.mxu1 %v1583_v30  ;;  %v1775_v32 = vld [vmem:[#allocation3 + $0x12] sm:$0xff]  ;;  %v1774_v19 = vld [vmem:[#allocation3 + $0xa] sm:$0xff]  ;;  %3702 = vmatprep.subr.mxu0 %v4214_v0 }
 0x37d   : > { %3653 = vmatpush3.msra.mxu1 %v1793_v51  ;;  %3611 = vmatprep.mubr.f32.mxu1 %v1584_v31  ;;  %1968 = vst [vmem:[#allocation3 + $0x18] sm:$0xf] %v4214_v0  ;;  %v1995_v51 = vld [vmem:[#allocation6 + $0x678] sm:$0xff]  ;;  %v2193_v5 = vld [vmem:[#allocation6 + $0x768] sm:$0xff] }
 0x37e   : > { %3654 = vmatprep.subr.mxu1 %v1792_v29  ;;  %3703 = vmatpush3.msra.mxu0 %v2009_v6 }
 0x37f   : > { %3655 = vmatpush3.msra.mxu1 %v1792_v29  ;;  %3704 = vmatprep.subr.mxu0 %v4214_v0 }
 0x380   : > { %3656 = vmatprep.subr.mxu1 %v1791_v33  ;;  %3612 = vmatmul.mubr.f32.gmra.mxu1 %v1585_v12 }
 0x381   : > { %3657 = vmatpush3.msra.mxu1 %v1791_v33  ;;  %3684 = vmatprep.mubr.f32.mxu1 %v1773_v34 }
 0x382   : > { %3658 = vmatprep.subr.mxu1 %v1790_v26  ;;  %3705 = vmatpush3.msra.mxu0 %v2008_v9  ;;  %v2191_v9 = vld [vmem:[#allocation6 + $0x758] sm:$0xff] }
 0x383   : > { %3659 = vmatpush3.msra.mxu1 %v1790_v26  ;;  %3706 = vmatprep.subr.mxu0 %v4214_v0 }
 0x384   : > { %3660 = vmatprep.subr.mxu1 %v1789_v35  ;;  %3707 = vmatpush3.msra.mxu0 %v2007_v11  ;;  %v2190_v11 = vld [vmem:[#allocation6 + $0x750] sm:$0xff] }
 0x385   : > { %3661 = vmatpush3.msra.mxu1 %v1789_v35  ;;  %3708 = vmatprep.subr.mxu0 %v4214_v0 }
 0x386   : > { %3662 = vmatprep.subr.mxu1 %v1788_v36  ;;  %3709 = vmatpush3.msra.mxu0 %v2006_v15  ;;  %v2188_v15 = vld [vmem:[#allocation6 + $0x740] sm:$0xff] }
 0x387   : > { %3663 = vmatpush3.msra.mxu1 %v1788_v36  ;;  %3710 = vmatprep.subr.mxu0 %v4214_v0 }
 0x388   : > { %3664 = vmatprep.subr.mxu1 %v1787_v38  ;;  %3711 = vmatpush3.msra.mxu0 %v2005_v17  ;;  %v2186_v17 = vld [vmem:[#allocation6 + $0x730] sm:$0xff] }
 0x389   : > { %3665 = vmatpush3.msra.mxu1 %v1787_v38  ;;  %3712 = vmatprep.subr.mxu0 %v4214_v0 }
 0x38a   : > { %3666 = vmatprep.subr.mxu1 %v1786_v39  ;;  %3713 = vmatpush3.msra.mxu0 %v2004_v20  ;;  %v2184_v20 = vld [vmem:[#allocation6 + $0x720] sm:$0xff] }
 0x38b   : > { %3667 = vmatpush3.msra.mxu1 %v1786_v39  ;;  %3714 = vmatprep.subr.mxu0 %v4214_v0  ;;  %v1945_v39 = vadd.s32 4294967290, %v4576_v2 }
 0x38c   : > { %3668 = vmatprep.subr.mxu1 %v1785_v40  ;;  %3715 = vmatpush3.msra.mxu0 %v2003_v21  ;;  %v2182_v21 = vld [vmem:[#allocation6 + $0x710] sm:$0xff] }
 0x38d   : > { %3669 = vmatpush3.msra.mxu1 %v1785_v40  ;;  %3716 = vmatprep.subr.mxu0 %v4214_v0  ;;  %vm1949_vm9 = vcmp.ge.s32.totalorder %v1945_v39, 0  ;;  %v2340_v39 = vld [vmem:[#allocation6 + $0x7a8] sm:$0xff] }
 0x38e   : > { %3670 = vmatprep.subr.mxu1 %v1784_v41  ;;  %3717 = vmatpush3.msra.mxu0 %v2002_v22  ;;  %v2181_v22 = vld [vmem:[#allocation6 + $0x708] sm:$0xff] }
 0x38f   : > { %3671 = vmatpush3.msra.mxu1 %v1784_v41  ;;  %3718 = vmatprep.subr.mxu0 %v4214_v0 }
 0x390   : > { %3672 = vmatprep.subr.mxu1 %v1783_v42  ;;  %3719 = vmatpush3.msra.mxu0 %v2001_v23  ;;  %v2180_v23 = vld [vmem:[#allocation6 + $0x700] sm:$0xff] }
 0x391   : > { %3673 = vmatpush3.msra.mxu1 %v1783_v42  ;;  %3720 = vmatprep.subr.mxu0 %v4214_v0 }
 0x392   : > { %3674 = vmatprep.subr.mxu1 %v1782_v43  ;;  %3721 = vmatpush3.msra.mxu0 %v2000_v24 }
 0x393   : > { %3675 = vmatpush3.msra.mxu1 %v1782_v43  ;;  %3772 = vmatprep.subr.mxu0 %v4214_v0 }
 0x394   : > { %3676 = vmatprep.subr.mxu1 %v1781_v45 }
 0x395   : > { %3677 = vmatpush3.msra.mxu1 %v1781_v45 }
 0x396   : > { %3678 = vmatprep.subr.mxu1 %v1780_v46 }
 0x397   : > { %3679 = vmatpush3.msra.mxu1 %v1780_v46 }
 0x398   : > { %3680 = vmatprep.subr.mxu1 %v1779_v47 }
 0x399   : > { %3681 = vmatpush3.msra.mxu1 %v1779_v47 }
 0x39a   : > { %3682 = vmatprep.subr.mxu1 %v1778_v48 }
 0x39b   : > { %3683 = vmatpush3.msra.mxu1 %v1778_v48 }
 0x39c   : > { %3685 = vmatmul.mubr.f32.vlgmr.msra.gmra.mxu1 %v1774_v19  ;;  %3731 = vmatprep.subr.mxu1 %v4214_v0 }
 0x39d   : > { %3687 = vmatprep.mubr.f32.mxu1 %v1775_v32  ;;  %3732 = vmatpush3.msra.mxu1 %v1995_v51  ;;  %v1947_v51 = vadd.s32 4294967290, %v4673_v7 }
 0x39e   : > { %3733 = vmatprep.subr.mxu1 %v4214_v0 }
 0x39f   : > { %3734 = vmatpush3.msra.mxu1 %v1994_v54  ;;  %vm1955_vm12 = vcmp.lt.s32.totalorder %v1947_v51, 16  ;;  %v2359_v51 = vld [vmem:[#allocation6 + $0x828] sm:$0xff] }
 0x3a0   : > { %3688 = vmatmul.mubr.f32.gmra.mxu1 %v1776_v13  ;;  %3735 = vmatprep.subr.mxu1 %v4214_v0  ;;  %v2809_v13 = vld [vmem:[#allocation9 + $0x3] ss:$0 sm:$0xff] }
 0x3a1   : > { %3763 = vmatprep.mubr.msk.f32.mxu1 %vm4215_vm0, %v4214_v0  ;;  %3736 = vmatpush3.msra.mxu1 %v1993_v55 }
 0x3a2   : > { %3737 = vmatprep.subr.mxu1 %v4214_v0 }
 0x3a3   : > { %3738 = vmatpush3.msra.mxu1 %v1992_v56 }
 0x3a4   : > { %3739 = vmatprep.subr.mxu1 %v4214_v0 }
 0x3a5   : > { %3740 = vmatpush3.msra.mxu1 %v1991_v57 }
 0x3a6   : > { %3741 = vmatprep.subr.mxu1 %v4214_v0 }
 0x3a7   : > { %3742 = vmatpush3.msra.mxu1 %v1990_v59 }
 0x3a8   : > { %3743 = vmatprep.subr.mxu1 %v4214_v0 }
 0x3a9   : > { %3744 = vmatpush3.msra.mxu1 %v1989_v61 }
 0x3aa   : > { %3745 = vmatprep.subr.mxu1 %v4214_v0 }
 0x3ab   : > { %3746 = vmatpush3.msra.mxu1 %v1988_v63 }
 0x3ac   : > { %3747 = vmatprep.subr.mxu1 %v4214_v0 }
 0x3ad   : > { %3748 = vmatpush3.msra.mxu1 %v1987_v3  ;;  %v2194_v3 = vld [vmem:[#allocation6 + $0x770] sm:$0xff] }
 0x3ae   : > { %3749 = vmatprep.subr.mxu1 %v4214_v0 }
 0x3af   : > { %3750 = vmatpush3.msra.mxu1 %v1986_v44 }
 0x3b0   : > { %3751 = vmatprep.subr.mxu1 %v4214_v0 }
 0x3b1   : > { %3752 = vmatpush3.msra.mxu1 %v1985_v8  ;;  %v2192_v8 = vld [vmem:[#allocation6 + $0x760] sm:$0xff] }
 0x3b2   : > { %3753 = vmatprep.subr.mxu1 %v4214_v0 }
 0x3b3   : > { %3754 = vmatpush3.msra.mxu1 %v1984_v10 }
 0x3b4   : > { %3755 = vmatprep.subr.mxu1 %v4214_v0 }
 0x3b5   : > { %3756 = vmatpush3.msra.mxu1 %v1983_v14  ;;  %v2189_v14 = vld [vmem:[#allocation6 + $0x748] sm:$0xff] }
 0x3b6   : > { %3757 = vmatprep.subr.mxu1 %v4214_v0 }
 0x3b7   : > { %3758 = vmatpush3.msra.mxu1 %v1982_v16  ;;  %v2187_v16 = vld [vmem:[#allocation6 + $0x738] sm:$0xff] }
 0x3b8   : > { %3759 = vmatprep.subr.mxu1 %v4214_v0 }
 0x3b9   : > { %3760 = vmatpush3.msra.mxu1 %v1981_v18  ;;  %v2185_v18 = vld [vmem:[#allocation6 + $0x728] sm:$0xff] }
 0x3ba   : > { %3761 = vmatprep.subr.mxu1 %v4214_v0 }
 0x3bb   : > { %3762 = vmatpush3.msra.mxu1 %v1980_v1  ;;  %v2183_v1 = vld [vmem:[#allocation6 + $0x718] sm:$0xff] }
 0x430   : > { %v3648_v28 = vpop.f32.mrf.mxu0 }
 0x432   : > { %v1754_v30 = vpop.f32.mrf.mxu0 }
 0x434   : > { %v3651_v12 = vpop.f32.mrf.mxu0 }
 0x435   : > { %v2367_v12 = vld [vmem:[#allocation6 + $0x868] sm:$0xff] }
 0x436   : > { %v1764_v35 = vpop.f32.mrf.mxu0 }
 0x43c   : > { %v3610_v25 = vpop.f32.mrf.mxu1 }
 0x43d   : > { %v1760_v29 = vadd.f32 %v3648_v28, %v3610_v25  ;;  %v2350_v28 = vld [vmem:[#allocation6 + $0x7f8] sm:$0xff] }
 0x43e   : > { %v1669_v27 = vpop.f32.mrf.mxu1 }
 0x43f   : > { %v1755_v33 = vadd.f32 %v1754_v30, %v1669_v27  ;;  %v2178_v27 = vld [vmem:[#allocation3 + $0x1a] sm:$0x3]  ;;  %v2369_v30 = vld [vmem:[#allocation6 + $0x878] sm:$0xff] }
 0x440   : > { %v3613_v4 = vpop.f32.mrf.mxu1  ;;  %3813 = vmatprep.subr.mxu1 %v2369_v30 }
 0x441   : > { %v2349_v4 = vld [vmem:[#allocation6 + $0x7f0] sm:$0xff] }
 0x442   : > { %v1679_v31 = vpop.f32.mrf.mxu1 }
 0x443   : > { %v1765_v43 = vadd.f32 %v1764_v35, %v1679_v31  ;;  %v2368_v31 = vld [vmem:[#allocation6 + $0x870] sm:$0xff]  ;;  %v2342_v35 = vld [vmem:[#allocation6 + $0x7b8] sm:$0xff] }
 0x45c   : > { %v3686_v32 = vpop.f32.mrf.mxu1 }
 0x45d   : > { %v1880_v26 = vadd.f32 %v3686_v32, %v1760_v29  ;;  %v2348_v29 = vld [vmem:[#allocation6 + $0x7e8] sm:$0xff]  ;;  %v2347_v32 = vld [vmem:[#allocation6 + $0x7e0] sm:$0xff] }
 0x45e   : > { %v1860_v34 = vpop.f32.mrf.mxu1 }
 0x45f   : > { %v1892_v36 = vadd.f32 %v2809_v13, %v1880_v26  ;;  %v1879_v38 = vadd.f32 %v1860_v34, %v1755_v33  ;;  %v2345_v33 = vld [vmem:[#allocation6 + $0x7d0] sm:$0xff]  ;;  %v2344_v26 = vld [vmem:[#allocation6 + $0x7c8] sm:$0xff]  ;;  %v2343_v34 = vld [vmem:[#allocation6 + $0x7c0] sm:$0xff] }
 0x460   : > { %v3689_v40 = vpop.f32.mrf.mxu1 }
 0x461   : > { %v1912_v41 = vadd.f32 %v4663_v49, %v1892_v36  ;;  %v1891_v42 = vadd.f32 %v2809_v13, %v1879_v38  ;;  %v2341_v36 = vld [vmem:[#allocation6 + $0x7b0] sm:$0xff]  ;;  %v2365_v38 = vld [vmem:[#allocation6 + $0x858] sm:$0xff] }
 0x462   : > { %v1870_v45 = vpop.f32.mrf.mxu1  ;;  %v2364_v40 = vld [vmem:[#allocation6 + $0x850] sm:$0xff] }
 0x463   : > { %vm1925_vm8 = vcmp.ge.f32.partialorder %v1912_v41, 0.0  ;;  %v1929_v46 = vmul.f32 0.1, %v1912_v41  ;;  %v1911_v47 = vadd.f32 %v4656_v37, %v1891_v42  ;;  %v1881_v48 = vadd.f32 %v1870_v45, %v1765_v43  ;;  %v2363_v42 = vld [vmem:[#allocation6 + $0x848] sm:$0xff]  ;;  %v2338_v43 = vld [vmem:[#allocation6 + $0x798] sm:$0xff]  ;;  %v2362_v45 = vld [vmem:[#allocation6 + $0x840] sm:$0xff] }
 0x464   : > { %v2631_v54 = vrot.slane %v1912_v41, 6 }
 0x465   : > { %v1933_v19 = vsel %vm1925_vm8, %v1912_v41, %v1929_v46  ;;  %vm1924_vm11 = vcmp.ge.f32.partialorder %v1911_v47, 0.0  ;;  %v1928_v50 = vmul.f32 0.1, %v1911_v47  ;;  %v1893_v52 = vadd.f32 %v2809_v13, %v1881_v48  ;;  %v2366_v13 = vld [vmem:[#allocation6 + $0x860] sm:$0xff]  ;;  %v2337_v46 = vld [vmem:[#allocation6 + $0x790] sm:$0xff]  ;;  %v2336_v48 = vld [vmem:[#allocation6 + $0x788] sm:$0xff] }
 0x466   : > { %1966 = vst [vmem:[#allocation3 + $0x8] sm:$0xff] %v1933_v19  ;;  %v2630_v55 = vrot.slane %v1911_v47, 6  ;;  %v2339_v41 = vld [vmem:[#allocation6 + $0x7a0] sm:$0xff] }
 0x467   : > { %v1932_v49 = vsel %vm1924_vm11, %v1911_v47, %v1928_v50  ;;  %v1913_v57 = vadd.f32 %v4666_v53, %v1893_v52  ;;  %v2195_v53 = vld [vmem:[#allocation6 + $0x778] sm:$0xff]  ;;  %v2335_v50 = vld [vmem:[#allocation6 + $0x780] sm:$0xff] }
 0x468   : > { %v1961_v56 = vsel %vm1949_vm9, %v1932_v49, 0.0  ;;  %v4720_v58 = vsel %vm2629_vm10, %v2630_v55, %v2631_v54  ;;  %4012 = vmatmul.mubr.msk.f32.vlgmr.msra.gmra.mxu1 %vm1949_vm9, %v1932_v49  ;;  %v2361_v47 = vld [vmem:[#allocation6 + $0x838] sm:$0xff]  ;;  %v2358_v52 = vld [vmem:[#allocation6 + $0x820] sm:$0xff]  ;;  %v2356_v55 = vld [vmem:[#allocation6 + $0x810] sm:$0xff] }
 0x469   : > { %1965 = vst [vmem:[#allocation3] sm:$0xff] %v1961_v56  ;;  %vm1926_vm13 = vcmp.ge.f32.partialorder %v1913_v57, 0.0  ;;  %v1930_v37 = vmul.f32 0.1, %v1913_v57  ;;  %3766 = vmatprep.mubr.msk.f32.mxu1 %vm4215_vm0, %v4214_v0  ;;  %v2633_v59 = vrot.slane %v1913_v57, 6  ;;  %3814 = vmatpush3.msra.mxu1 %v2369_v30  ;;  %v2355_v49 = vld [vmem:[#allocation6 + $0x808] sm:$0xff] }
 0x46a   : > { %3815 = vmatprep.subr.mxu1 %v2368_v31  ;;  %v2354_v56 = vld [vmem:[#allocation6 + $0x800] sm:$0xff] }
 0x46b   : > { %v1934_v60 = vsel %vm1926_vm13, %v1913_v57, %v1930_v37  ;;  %v4726_v61 = vsel %vm2629_vm10, %v2631_v54, %v2633_v59  ;;  %3816 = vmatpush3.msra.mxu1 %v2368_v31  ;;  %v2357_v54 = vld [vmem:[#allocation6 + $0x818] sm:$0xff] }
 0x46c   : > { %v1963_v62 = vsel %vm1955_vm12, %v1934_v60, 0.0  ;;  %3767 = vmatmul.mubr.f32.gmra.mxu1 %v1933_v19  ;;  %3817 = vmatprep.subr.mxu1 %v2367_v12  ;;  %v2360_v19 = vld [vmem:[#allocation6 + $0x830] sm:$0xff]  ;;  %v2538_v57 = vld [vmem:[#allocation6 + $0x8f8] sm:$0xff] }
 0x46d   : > { %1967 = vst [vmem:[#allocation3 + $0x10] sm:$0xff] %v1963_v62  ;;  %3769 = vmatprep.mubr.msk.f32.mxu1 %vm4215_vm0, %v4214_v0  ;;  %3818 = vmatpush3.msra.mxu1 %v2367_v12 }
 0x46e   : > { %3819 = vmatprep.subr.mxu1 %v2366_v13 }
 0x46f   : > { %3820 = vmatpush3.msra.mxu1 %v2366_v13 }
 0x470   : > { %v1996_v63 = vld [vmem:[#allocation3 + $0x5] sm:$0xff]  ;;  %3821 = vmatprep.subr.mxu1 %v2365_v38 }
 0x471   : > { %3723 = vmatmul.mubr.f32.vlgmr.msra.gmra.mxu0 %v1996_v63  ;;  %3822 = vmatpush3.msra.mxu1 %v2365_v38  ;;  %v2535_v38 = vld [vmem:[#allocation6 + $0x8e0] sm:$0xff] }
 0x472   : > { %3773 = vmatpush3.msra.mxu0 %v2195_v53  ;;  %3725 = vmatprep.mubr.msk.f32.mxu0 %vm4215_vm0, %v4214_v0 }
 0x473   : > { %3774 = vmatprep.subr.mxu0 %v4214_v0  ;;  %3823 = vmatprep.subr.mxu1 %v2364_v40 }
 0x474   : > { %3775 = vmatpush3.msra.mxu0 %v2194_v3  ;;  %v1997_v44 = vld [vmem:[#allocation3 + $0xd] sm:$0xff]  ;;  %v1998_v10 = vld [vmem:[#allocation3 + $0x15] sm:$0x3]  ;;  %3824 = vmatpush3.msra.mxu1 %v2364_v40  ;;  %v2533_v40 = vld [vmem:[#allocation6 + $0x8d0] sm:$0xff] }
 0x475   : > { %3776 = vmatprep.subr.mxu0 %v4214_v0  ;;  %v1978_v6 = vld [vmem:[#allocation3 + $0x10] sm:$0x3]  ;;  %3726 = vmatmul.mubr.f32.gmra.mxu0 %v1997_v44  ;;  %v2177_v25 = vld [vmem:[#allocation3 + $0x12] sm:$0xff] }
 0x476   : > { %3770 = vmatmul.mubr.f32.gmra.mxu1 %v1978_v6  ;;  %3777 = vmatpush3.msra.mxu0 %v2193_v5  ;;  %v2176_v24 = vld [vmem:[#allocation3 + $0xa] sm:$0xff] }
 0x477   : > { %3728 = vmatprep.mubr.msk.f32.mxu0 %vm4215_vm0, %v4214_v0  ;;  %3778 = vmatprep.subr.mxu0 %v4214_v0 }
 0x478   : > { %3779 = vmatpush3.msra.mxu0 %v2192_v8  ;;  %3825 = vmatprep.subr.mxu1 %v2363_v42 }
 0x479   : > { %3780 = vmatprep.subr.mxu0 %v4214_v0  ;;  %3729 = vmatmul.mubr.f32.gmra.mxu0 %v1998_v10 }
 0x47a   : > { %3781 = vmatpush3.msra.mxu0 %v2191_v9  ;;  %3804 = vmatprep.mubr.msk.f32.mxu0 %vm4215_vm0, %v4214_v0 }
 0x47b   : > { %3782 = vmatprep.subr.mxu0 %v4214_v0  ;;  %3826 = vmatpush3.msra.mxu1 %v2363_v42  ;;  %v2531_v42 = vld [vmem:[#allocation6 + $0x8c0] sm:$0xff] }
 0x47c   : > { %3783 = vmatpush3.msra.mxu0 %v2190_v11  ;;  %3827 = vmatprep.subr.mxu1 %v2362_v45 }
 0x47d   : > { %3784 = vmatprep.subr.mxu0 %v4214_v0  ;;  %3828 = vmatpush3.msra.mxu1 %v2362_v45  ;;  %v2529_v45 = vld [vmem:[#allocation6 + $0x8b0] sm:$0xff] }
 0x47e   : > { %3785 = vmatpush3.msra.mxu0 %v2189_v14  ;;  %3829 = vmatprep.subr.mxu1 %v2361_v47  ;;  %v2810_v14 = vld [vmem:[#allocation9 + $0x4] ss:$0 sm:$0xff] }
 0x47f   : > { %3786 = vmatprep.subr.mxu0 %v4214_v0  ;;  %3830 = vmatpush3.msra.mxu1 %v2361_v47  ;;  %v2527_v47 = vld [vmem:[#allocation6 + $0x8a0] sm:$0xff] }
 0x480   : > { %3787 = vmatpush3.msra.mxu0 %v2188_v15  ;;  %3831 = vmatprep.subr.mxu1 %v2360_v19 }
 0x481   : > { %3788 = vmatprep.subr.mxu0 %v4214_v0  ;;  %3832 = vmatpush3.msra.mxu1 %v2360_v19  ;;  %v2525_v19 = vld [vmem:[#allocation6 + $0x890] sm:$0xff] }
 0x482   : > { %3789 = vmatpush3.msra.mxu0 %v2187_v16  ;;  %3833 = vmatprep.subr.mxu1 %v2359_v51  ;;  %v2308_v16 = vadd.s32 4294967295, %v4576_v2  ;;  %v2310_v2 = vadd.s32 4294967295, %v4673_v7  ;;  %v2536_v7 = vld [vmem:[#allocation6 + $0x8e8] sm:$0xff] }
 0x483   : > { %3790 = vmatprep.subr.mxu0 %v4214_v0  ;;  %3834 = vmatpush3.msra.mxu1 %v2359_v51  ;;  %v2523_v51 = vld [vmem:[#allocation6 + $0x880] sm:$0xff] }
 0x484   : > { %3791 = vmatpush3.msra.mxu0 %v2186_v17  ;;  %3835 = vmatprep.subr.mxu1 %v2358_v52  ;;  %vm2311_vm14 = vcmp.ge.s32.totalorder %v2308_v16, 0  ;;  %vm2316_vm2 = vcmp.lt.s32.totalorder %v2310_v2, 16 }
 0x485   : > { %3792 = vmatprep.subr.mxu0 %v4214_v0  ;;  %3836 = vmatpush3.msra.mxu1 %v2358_v52 }
 0x486   : > { %3793 = vmatpush3.msra.mxu0 %v2185_v18  ;;  %3837 = vmatprep.subr.mxu1 %v2357_v54 }
 0x487   : > { %3794 = vmatprep.subr.mxu0 %v4214_v0  ;;  %3838 = vmatpush3.msra.mxu1 %v2357_v54 }
 0x488   : > { %3795 = vmatpush3.msra.mxu0 %v2184_v20  ;;  %3839 = vmatprep.subr.mxu1 %v2356_v55 }
 0x489   : > { %3796 = vmatprep.subr.mxu0 %v4214_v0  ;;  %3840 = vmatpush3.msra.mxu1 %v2356_v55 }
 0x48a   : > { %3797 = vmatpush3.msra.mxu0 %v2183_v1  ;;  %3841 = vmatprep.subr.mxu1 %v2355_v49 }
 0x48b   : > { %3798 = vmatprep.subr.mxu0 %v4214_v0  ;;  %3842 = vmatpush3.msra.mxu1 %v2355_v49 }
 0x48c   : > { %3799 = vmatpush3.msra.mxu0 %v2182_v21  ;;  %3843 = vmatprep.subr.mxu1 %v2354_v56 }
 0x48d   : > { %3800 = vmatprep.subr.mxu0 %v4214_v0  ;;  %3844 = vmatpush3.msra.mxu1 %v2354_v56 }
 0x48e   : > { %3801 = vmatpush3.msra.mxu0 %v2181_v22  ;;  %3883 = vmatprep.subr.mxu1 %v2538_v57 }
 0x48f   : > { %3802 = vmatprep.subr.mxu0 %v4214_v0 }
 0x490   : > { %3803 = vmatpush3.msra.mxu0 %v2180_v23 }
 0x491   : > { %3805 = vmatmul.mubr.f32.vlgmr.msra.gmra.mxu0 %v2176_v24  ;;  %3848 = vmatprep.subr.mxu0 %v2350_v28 }
 0x492   : > { %3807 = vmatprep.mubr.msk.f32.mxu0 %vm4215_vm0, %v4214_v0  ;;  %3849 = vmatpush3.msra.mxu0 %v2350_v28 }
 0x493   : > { %3850 = vmatprep.subr.mxu0 %v2349_v4 }
 0x494   : > { %3851 = vmatpush3.msra.mxu0 %v2349_v4 }
 0x495   : > { %3808 = vmatmul.mubr.f32.gmra.mxu0 %v2177_v25  ;;  %3852 = vmatprep.subr.mxu0 %v2348_v29 }
 0x496   : > { %3810 = vmatprep.mubr.msk.f32.mxu0 %vm4215_vm0, %v4214_v0  ;;  %3853 = vmatpush3.msra.mxu0 %v2348_v29  ;;  %v2346_v0 = vld [vmem:[#allocation6 + $0x7d8] sm:$0xff] }
 0x497   : > { %3854 = vmatprep.subr.mxu0 %v2347_v32 }
 0x498   : > { %3855 = vmatpush3.msra.mxu0 %v2347_v32 }
 0x499   : > { %3811 = vmatmul.mubr.f32.gmra.mxu0 %v2178_v27  ;;  %3856 = vmatprep.subr.mxu0 %v2346_v0 }
 0x49a   : > { %3857 = vmatpush3.msra.mxu0 %v2346_v0 }
 0x49b   : > { %3858 = vmatprep.subr.mxu0 %v2345_v33 }
 0x49c   : > { %3859 = vmatpush3.msra.mxu0 %v2345_v33 }
 0x49d   : > { %3860 = vmatprep.subr.mxu0 %v2344_v26 }
 0x49e   : > { %3861 = vmatpush3.msra.mxu0 %v2344_v26 }
 0x49f   : > { %3862 = vmatprep.subr.mxu0 %v2343_v34 }
 0x4a0   : > { %3863 = vmatpush3.msra.mxu0 %v2343_v34 }
 0x4a1   : > { %3864 = vmatprep.subr.mxu0 %v2342_v35 }
 0x4a2   : > { %3865 = vmatpush3.msra.mxu0 %v2342_v35  ;;  %v2537_v35 = vld [vmem:[#allocation6 + $0x8f0] sm:$0xff] }
 0x4a3   : > { %3866 = vmatprep.subr.mxu0 %v2341_v36 }
 0x4a4   : > { %3867 = vmatpush3.msra.mxu0 %v2341_v36 }
 0x4a5   : > { %3868 = vmatprep.subr.mxu0 %v2340_v39 }
 0x4a6   : > { %3869 = vmatpush3.msra.mxu0 %v2340_v39  ;;  %v2534_v39 = vld [vmem:[#allocation6 + $0x8d8] sm:$0xff] }
 0x4a7   : > { %3870 = vmatprep.subr.mxu0 %v2339_v41 }
 0x4a8   : > { %3871 = vmatpush3.msra.mxu0 %v2339_v41  ;;  %v2532_v41 = vld [vmem:[#allocation6 + $0x8c8] sm:$0xff] }
 0x4a9   : > { %3872 = vmatprep.subr.mxu0 %v2338_v43 }
 0x4aa   : > { %3873 = vmatpush3.msra.mxu0 %v2338_v43  ;;  %v2530_v43 = vld [vmem:[#allocation6 + $0x8b8] sm:$0xff] }
 0x4ab   : > { %3874 = vmatprep.subr.mxu0 %v2337_v46 }
 0x4ac   : > { %3875 = vmatpush3.msra.mxu0 %v2337_v46  ;;  %v2528_v46 = vld [vmem:[#allocation6 + $0x8a8] sm:$0xff] }
 0x4ad   : > { %3876 = vmatprep.subr.mxu0 %v2336_v48 }
 0x4ae   : > { %3877 = vmatpush3.msra.mxu0 %v2336_v48  ;;  %v2526_v48 = vld [vmem:[#allocation6 + $0x898] sm:$0xff] }
 0x4af   : > { %3878 = vmatprep.subr.mxu0 %v2335_v50 }
 0x4b0   : > { %3879 = vmatpush3.msra.mxu0 %v2335_v50  ;;  %v2524_v50 = vld [vmem:[#allocation6 + $0x888] sm:$0xff] }
 0x528   : > { %v2162_v37 = vpop.f32.mrf.mxu1 }
 0x52a   : > { %v3765_v59 = vpop.f32.mrf.mxu1 }
 0x52b   : > { %v2811_v59 = vld [vmem:[#allocation9 + $0x5] ss:$0 sm:$0xff] }
 0x52c   : > { %v2167_v60 = vpop.f32.mrf.mxu1 }
 0x52e   : > { %v3768_v62 = vpop.f32.mrf.mxu1 }
 0x531   : > { %v2082_v53 = vpop.f32.mrf.mxu0 }
 0x532   : > { %v2163_v10 = vadd.f32 %v2162_v37, %v2082_v53 }
 0x533   : > { %v3724_v63 = vpop.f32.mrf.mxu0 }
 0x535   : > { %v2087_v3 = vpop.f32.mrf.mxu0 }
 0x536   : > { %v2172_v5 = vpop.f32.mrf.mxu1  ;;  %v2168_v18 = vadd.f32 %v2167_v60, %v2087_v3 }
 0x537   : > { %v3727_v44 = vpop.f32.mrf.mxu0 }
 0x538   : > { %v3771_v6 = vpop.f32.mrf.mxu1 }
 0x539   : > { %v2092_v8 = vpop.f32.mrf.mxu0 }
 0x53a   : > { %v2173_v24 = vadd.f32 %v2172_v5, %v2092_v8 }
 0x53b   : > { %v3730_v9 = vpop.f32.mrf.mxu0 }
 0x551   : > { %v2262_v11 = vpop.f32.mrf.mxu0 }
 0x552   : > { %v2276_v15 = vadd.f32 %v2262_v11, %v2163_v10 }
 0x553   : > { %v3806_v17 = vpop.f32.mrf.mxu0 }
 0x554   : > { %v2287_v20 = vadd.f32 %v2810_v14, %v2276_v15 }
 0x555   : > { %v2267_v1 = vpop.f32.mrf.mxu0 }
 0x556   : > { %vm2291_vm0 = vcmp.ge.f32.partialorder %v2287_v20, 0.0  ;;  %v2294_v21 = vmul.f32 0.1, %v2287_v20  ;;  %v2277_v22 = vadd.f32 %v2267_v1, %v2168_v18 }
 0x557   : > { %v3809_v23 = vpop.f32.mrf.mxu0 }
 0x558   : > { %v2297_v25 = vsel %vm2291_vm0, %v2287_v20, %v2294_v21  ;;  %v2288_v27 = vadd.f32 %v2810_v14, %v2277_v22 }
 0x559   : > { %v2320_v28 = vsel %vm2311_vm14, %v2297_v25, 0.0  ;;  %v2272_v4 = vpop.f32.mrf.mxu0  ;;  %4013 = vmatprep.mubr.msk.f32.mxu0 %vm2311_vm14, %v2297_v25 }
 0x55a   : > { %2323 = vst [vmem:[#allocation3] sm:$0xff] %v2320_v28  ;;  %vm2292_vm15 = vcmp.ge.f32.partialorder %v2288_v27, 0.0  ;;  %v2295_v30 = vmul.f32 0.1, %v2288_v27  ;;  %v2278_v31 = vadd.f32 %v2272_v4, %v2173_v24 }
 0x55b   : > { %v3812_v29 = vpop.f32.mrf.mxu0 }
 0x55c   : > { %v2298_v12 = vsel %vm2292_vm15, %v2288_v27, %v2295_v30  ;;  %v2289_v32 = vadd.f32 %v2810_v14, %v2278_v31 }
 0x55d   : > { %2324 = vst [vmem:[#allocation3 + $0x8] sm:$0xff] %v2298_v12  ;;  %3881 = vmatmul.mubr.f32.vlgmr.msra.gmra.mxu0 %v2298_v12 }
 0x55e   : > { %vm2293_vm1 = vcmp.ge.f32.partialorder %v2289_v32, 0.0  ;;  %v2296_v13 = vmul.f32 0.1, %v2289_v32 }
 0x560   : > { %v2299_v0 = vsel %vm2293_vm1, %v2289_v32, %v2296_v13 }
 0x561   : > { %v2322_v33 = vsel %vm2316_vm2, %v2299_v0, 0.0 }
 0x562   : > { %2325 = vst [vmem:[#allocation3 + $0x10] sm:$0x3] %v2322_v33 }
 0x564   : > { %v2351_v26 = vld [vmem:[#allocation3 + $0x1] sm:$0xff] }
 0x565   : > { %3845 = vmatprep.mubr.f32.mxu1 %v2351_v26  ;;  %v2520_v36 = vld [vmem:[#allocation3 + $0x2] sm:$0xff] }
 0x569   : > { %v2352_v34 = vld [vmem:[#allocation3 + $0x9] sm:$0xff] }
 0x56a   : > { %3846 = vmatmul.mubr.f32.vlgmr.msra.gmra.mxu1 %v2352_v34  ;;  %v2521_v52 = vld [vmem:[#allocation3 + $0xa] sm:$0xff] }
 0x56b   : > { %3884 = vmatpush3.msra.mxu1 %v2538_v57  ;;  %3915 = vmatprep.mubr.f32.mxu1 %v2520_v36 }
 0x56c   : > { %3885 = vmatprep.subr.mxu1 %v2537_v35 }
 0x56d   : > { %3886 = vmatpush3.msra.mxu1 %v2537_v35 }
 0x56e   : > { %3887 = vmatprep.subr.mxu1 %v2536_v7 }
 0x56f   : > { %3888 = vmatpush3.msra.mxu1 %v2536_v7 }
 0x570   : > { %3889 = vmatprep.subr.mxu1 %v2535_v38 }
 0x571   : > { %3890 = vmatpush3.msra.mxu1 %v2535_v38 }
 0x572   : > { %3891 = vmatprep.subr.mxu1 %v2534_v39 }
 0x573   : > { %3892 = vmatpush3.msra.mxu1 %v2534_v39 }
 0x574   : > { %3893 = vmatprep.subr.mxu1 %v2533_v40 }
 0x575   : > { %3894 = vmatpush3.msra.mxu1 %v2533_v40 }
 0x576   : > { %3895 = vmatprep.subr.mxu1 %v2532_v41 }
 0x577   : > { %3896 = vmatpush3.msra.mxu1 %v2532_v41 }
 0x578   : > { %3897 = vmatprep.subr.mxu1 %v2531_v42 }
 0x579   : > { %3898 = vmatpush3.msra.mxu1 %v2531_v42 }
 0x57a   : > { %3899 = vmatprep.subr.mxu1 %v2530_v43 }
 0x57b   : > { %3900 = vmatpush3.msra.mxu1 %v2530_v43 }
 0x57c   : > { %3901 = vmatprep.subr.mxu1 %v2529_v45 }
 0x57d   : > { %3902 = vmatpush3.msra.mxu1 %v2529_v45 }
 0x57e   : > { %3903 = vmatprep.subr.mxu1 %v2528_v46 }
 0x57f   : > { %3904 = vmatpush3.msra.mxu1 %v2528_v46 }
 0x580   : > { %3905 = vmatprep.subr.mxu1 %v2527_v47 }
 0x581   : > { %3906 = vmatpush3.msra.mxu1 %v2527_v47 }
 0x582   : > { %3907 = vmatprep.subr.mxu1 %v2526_v48 }
 0x583   : > { %3908 = vmatpush3.msra.mxu1 %v2526_v48 }
 0x584   : > { %3909 = vmatprep.subr.mxu1 %v2525_v19 }
 0x585   : > { %3910 = vmatpush3.msra.mxu1 %v2525_v19 }
 0x586   : > { %3911 = vmatprep.subr.mxu1 %v2524_v50 }
 0x587   : > { %3912 = vmatpush3.msra.mxu1 %v2524_v50 }
 0x588   : > { %3913 = vmatprep.subr.mxu1 %v2523_v51 }
 0x589   : > { %3914 = vmatpush3.msra.mxu1 %v2523_v51 }
 0x58a   : > { %3916 = vmatmul.mubr.f32.vlgmr.msra.gmra.mxu1 %v2521_v52 }
 0x61d   : > { %v3882_v55 = vpop.f32.mrf.mxu0 }
 0x61f   : > { %v2511_v57 = vpop.f32.mrf.mxu0 }
 0x62a   : > { %v3847_v54 = vpop.f32.mrf.mxu1 }
 0x62b   : > { %v2517_v56 = vadd.f32 %v3882_v55, %v3847_v54 }
 0x62c   : > { %v2436_v49 = vpop.f32.mrf.mxu1 }
 0x62d   : > { %v2512_v60 = vadd.f32 %v2511_v57, %v2436_v49 }
 0x64a   : > { %v3917_v37 = vpop.f32.mrf.mxu1 }
 0x64b   : > { %v2615_v62 = vadd.f32 %v3917_v37, %v2517_v56 }
 0x64c   : > { %v2605_v53 = vpop.f32.mrf.mxu1 }
 0x64d   : > { %v2625_v63 = vadd.f32 %v2811_v59, %v2615_v62  ;;  %v2614_v3 = vadd.f32 %v2605_v53, %v2512_v60 }
 0x64f   : > { %v2638_v5 = vadd.f32 %v4726_v61, %v2625_v63  ;;  %v2624_v44 = vadd.f32 %v2811_v59, %v2614_v3 }
 0x651   : > { %2640 = vst [vmem:[%s4418_s2 + $0x8] sm:$0xff] %v2638_v5  ;;  %v2637_v6 = vadd.f32 %v4720_v58, %v2624_v44 }
 0x653   : > { %2639 = vst [vmem:[%s4418_s2] sm:$0xff] %v2637_v6 }
 0x654   : > { %4132 = shalt.err (!%p4129_p5)
}
 0x655   : > { %s4133_s4 = scalar_lea.hbm %s4763_s8, 256  ;;  %s4137_s26 = scalar_lea.hbm %s4820_s3, 512 }
 0x656   : > { %p4134_p3 = scmp.ne.s32.totalorder %s4763_s8, %s4133_s4  ;;  %p4138_p13 = scmp.lt.s32.totalorder %s4763_s8, %s4820_s3 }
 0x657   : > { %p4139_p0 = scmp.lt.s32.totalorder %s4137_s26, %s4133_s4 }
 0x658   : > { %p4135_p4 = pnand %p4134_p3, %p4842_p7 }
 0x659   : > { %p4140_p6 = por %p4139_p0, %p4138_p13 }
 0x65a   : > { %p4136_p8 = pneg %p4135_p4 }
 0x65c   : > { %p4141_p11 = pnand %p4140_p6, %p4136_p8 }
 0x65e   : > { %4144 = shalt.err (!%p4141_p11)
}
 0x65f   : > { %s4217_s18 = smov 128   ;;  %s4218_s21 = smov 8  }
 0x660   : > { %3928 = dma.vmem_to_hbm [thread:$0]  (%p4842_p7), %s4765_s16, 256, %s4763_s8, %s4772_s15, %s4217_s18, %s4217_s18, %s4218_s21  }
 0x661 PF: > { %p3945_p9 = scmp.ge.s32.totalorder %s4205_s17, 2  ;;  %s2673_s5 = sand.u32 1, %s4185_s12  }
 0x662   : > { %p4843_p12 = scmp.ne.s32.totalorder %s4832_s24, 0  ;;  %s2674_s23 = scalar_lea.sflag [#allocation8], %s2673_s5 }
 0x664   : > { %p3938_p1 = pnand %p3945_p9, %p4843_p12 }
 0x666   : > { %p3939_p10 = pneg %p3938_p1 }
 0x668   : > { %4180 = dma.done.wait (%p3939_p10), %s2674_s23, 256  }
 0x669   : > { %4182 = vsyncadd (%p3939_p10), %s2674_s23, 4294967040  ;;  %s18_s17 = sadd.s32 1, %s4205_s17   ;;  %s4844_s15 = sld [smem:[#allocation24_spill]] }
 0x66a   : > { %p15_p2 = scmp.ge.s32.totalorder %s18_s17, 4   ;;  %s4845_s16 = sld [smem:[#allocation25_spill]] }
 0x66b   : > { %s4846_s12 = smov %s4189_s13  ;;  %s4847_s13 = smov %s4193_s14 }
 0x66c   : > { %s4848_s14 = smov %s4292_s25  ;;  %17 = sbr.rel (!%p15_p2) target bundleno = 9 (0x9), region = 167 }
 0x671   :  { %2679 = vsyncpa [#allocation7], 1 }
 0x672   :  { %2681 = vsyncpa [#allocation7 + $0x1], 1 }
 0x673   :  { %2682 = vsyncpa [#allocation10], 1 }
 0x674   :  { %2683 = vsyncpa [#allocation8], 1 }
 0x675   :  { %2685 = vsyncpa [#allocation8 + $0x1], 1 }
 0x676   :  { %2686 = vsyncmov [#allocation5] }
 0x679   :  { %s2687_s22 = vpop.sfrf %2686 }
 0x67a   :  { %p2817_p7 = scmp.ne.s32.totalorder %s2687_s22, 0 }
 0x67c   :  { %2691 = shalt.err (%p2817_p7)  }
 0x67d   :  { %2693 = vsyncmov [#allocation5 + $0x1] }
 0x680   :  { %s2694_s24 = vpop.sfrf %2693 }
 0x681   :  { %p2818_p5 = scmp.ne.s32.totalorder %s2694_s24, 0 }
 0x683   :  { %2698 = shalt.err (%p2818_p5)  }

// kernel: tpu_custom_call.1
= control target key start
LH: loop header
LB: loop body
LE: loop exit
PB: predicated region body
PF: predicated region fallthrough
CT: control target
= control target key end

     0   :  { %s4817_s0 = inlined_call_operand.hbm [shape: f32[2,40,128], index: 0, kind: input, shape index: {}]   ;;  %s4818_s1 = inlined_call_operand.hbm [shape: f32[6,3,128,128], index: 1, kind: input, shape index: {}]   ;;  %s4819_s2 = inlined_call_operand.hbm [shape: f32[6,1,128], index: 2, kind: input, shape index: {}]   ;;  %s4820_s3 = inlined_call_operand.hbm [shape: f32[2,16,128], index: 3, kind: output, shape index: {}]  }
   0x1   :  { %4827 = sst [smem:[#allocation26_spill]] %s4818_s1 }
   0x2   :  { %4828 = sst [smem:[#allocation27_spill]] %s4819_s2 }
   0x3   :  { %8 = vsyncpa [#allocation7], 0 }
   0x4   :  { %9 = vsyncpa [#allocation10], 0 }
   0x5   :  { %10 = vsyncpa [#allocation8], 0 }
   0x6   :  { %12 = vsyncpa [#allocation8 + $0x1], 0  ;;  %s4239_s12 = smov 0   ;;  %s4241_s13 = smov 0  }
   0x7   :  { %s4243_s14 = smov 0   ;;  %s4245_s15 = smov 0  }
   0x8   :  { %s4247_s16 = smov 0   ;;  %s4249_s17 = smov 0  }
   0x9 LB: > { %4829 = sst [smem:[#allocation24_spill]] %s4201_s16  ;;  %s2789_s18 = sadd.s32 4294967295, %s4205_s17   ;;  %s4205_s17 = sphi %s4249_s17, %s18_s17   ;;  %s4201_s16 = sphi %s4247_s16, %s4845_s16   ;;  %s4197_s15 = sphi %s4245_s15, %s4844_s15   ;;  %s4193_s14 = sphi %s4243_s14, %s4848_s14   ;;  %s4189_s13 = sphi %s4241_s13, %s4847_s13   ;;  %s4185_s12 = sphi %s4239_s12, %s4846_s12  }
   0xa   : > { %s2790_s19 = sadd.s32 4294967294, %s4205_s17   ;;  %s33_s20 = sadd.s32 1, %s4201_s16 }
   0xb   : > { %s90_s21 = sadd.s32 1, %s4193_s14  ;;  %p35_p0 = scmp.ge.s32.totalorder %s33_s20, 2 }
   0xc   : > { %p100_p1 = scmp.ne.s32.totalorder %s4193_s14, %s4189_s13  ;;  %p101_p2 = scmp.eq.s32.totalorder %s2789_s18, 1 }
   0xd   : > { %p106_p3 = scmp.ne.s32.totalorder %s4189_s13, %s4185_s12  ;;  %s4850_s20 = smov (%p35_p0, %s33_s20), 0 }
   0xe   : > { %4830 = sst [smem:[#allocation25_spill]] %s4850_s20  ;;  %p4279_p4 = por %p101_p2, %p100_p1 }
   0xf   : > { %p107_p5 = scmp.eq.s32.totalorder %s2790_s19, 1  ;;  %s85_s23 = ssub.s32 %s4201_s16, %s4850_s20 }
  0x10   : > { %s4831_s22 = scalar_select %p4279_p4, 1, 0 }
  0x11   : > { %p2791_p6 = scmp.ge.s32.totalorder %s4205_s17, 1  ;;  %p88_p7 = scmp.eq.s32.totalorder %s85_s23, 0 }
  0x12   : > { %p4286_p8 = por %p107_p5, %p106_p3  ;;  %p114_p9 = scmp.lt.s32.totalorder %s4205_s17, 3 }
  0x13   : > { %s4292_s25 = scalar_select %p88_p7, %s4193_s14, %s90_s21  }
  0x14   : > { %s4832_s24 = scalar_select %p4286_p8, 1, 0 }
  0x15   : > { %p4294_p10 = pnand %p2791_p6, %p114_p9  ;;  %p4298_p11 = scmp.eq.s32.totalorder %s2789_s18, 0 }
  0x16   : > { %s4207_s28 = smov [#allocation6]   ;;  %s4208_s4 = smov [#allocation9]  }
  0x17   : > { %p3930_p12 = pneg %p4294_p10  ;;  %s126_s29 = sshll.u32 %s4207_s28, 4  ;;  %s127_s29 = int_to_ptr.vmem [resolvable:$true] %s126_s29 }
  0x18   : > { %s139_s5 = sshll.u32 %s4208_s4, 4  ;;  %s4025_s6 = scalar_lea.vmem %s127_s29, 36864  ;;  %s140_s5 = int_to_ptr.vmem [resolvable:$true] %s139_s5 }
  0x19   : > { %p4306_p13 = pnand %p4298_p11, %p3930_p12  ;;  %p4026_p1 = scmp.ne.s32.totalorder %s127_s29, %s4025_s6 }
  0x1a   : > { %p4033_p5 = scmp.lt.s32.totalorder %s127_s29, %s127_s29  ;;  %p4034_p6 = scmp.lt.s32.totalorder %s4025_s6, %s4025_s6 }
  0x1b   : > { %p4016_p0 = pneg %p4306_p13 }
  0x1c   : > { %p4035_p7 = por %p4034_p6, %p4033_p5 }
  0x1d   : > { %p4028_p2 = pnand %p4026_p1, %p4016_p0 }
  0x1f   : > { %p4029_p3 = pneg %p4028_p2 }
  0x21   : > { %p4036_p9 = pnand %p4035_p7, %p4029_p3 }
  0x23   : > { %4039 = shalt.err (!%p4036_p9)
}
  0x24   : > { %s4209_s7 = smov 128   ;;  %s4210_s8 = smov 8  }
  0x25   : > { %s4836_s1 = sld [smem:[#allocation26_spill]]  ;;  %s4051_s11 = scalar_lea.vmem %s140_s5, 96 }
  0x26   : > { %p4052_p12 = scmp.ne.s32.totalorder %s140_s5, %s4051_s11  ;;  %p4059_p8 = scmp.lt.s32.totalorder %s140_s5, %s140_s5 }
  0x27   : > { %p4060_p4 = scmp.lt.s32.totalorder %s4051_s11, %s4051_s11 }
  0x28   : > { %p4054_p1 = pnand %p4052_p12, %p4016_p0 }
  0x29   : > { %p4061_p5 = por %p4060_p4, %p4059_p8 }
  0x2a   : > { %p4055_p2 = pneg %p4054_p1 }
  0x2b   : > { %3933 = dma.hbm_to_vmem [thread:$0]  (!%p4306_p13), %s4836_s1, 36864, %s127_s29, [#allocation7], %s4209_s7, %s4209_s7, %s4210_s8  }
  0x2c   : > { %p4062_p3 = pnand %p4061_p5, %p4055_p2 }
  0x2e   : > { %4065 = shalt.err (!%p4062_p3)
}
  0x2f   : > { %s4211_s18 = smov 16   ;;  %s4212_s19 = smov 1  }
  0x30   : > { %s4837_s2 = sld [smem:[#allocation27_spill]] }
  0x32   : > { %155 = sbr.rel (%p4294_p10) target bundleno = 1633 (0x661), region = 28 }
  0x36   : > { %3936 = dma.hbm_to_vmem [thread:$0]  (!%p4306_p13), %s4837_s2, 96, %s140_s5, [#allocation10], %s4211_s18, %s4211_s18, %s4212_s19  }
  0x37   : > { %4170 = dma.done.wait (%p4298_p11), [#allocation7], 36864  }
  0x38   : > { %4172 = vsyncadd (%p4298_p11), [#allocation7], 4294930432 }
  0x39   : > { %4174 = dma.done.wait (%p4298_p11), [#allocation10], 96  }
  0x3a   : > { %4176 = vsyncadd (%p4298_p11), [#allocation10], 4294967200  ;;  %s4822_s26 = sand.u32 1, %s4189_s13   ;;  %p180_p4 = scmp.lt.s32.totalorder %s4197_s15, 0 }
  0x3b   : > { %s4342_s28 = sshll.u32 %s4822_s26, 4  ;;  %s181_s29 = ssub.s32 0, %s4197_s15 }
  0x3c   : > { %s2798_s30 = smin.u32 %s4197_s15, %s181_s29  ;;  %s2820_s6 = smul.u32 640, %s4197_s15 }
  0x3d   : > { %s183_s4 = sand.u32 1, %s2798_s30   ;;  %s244_s10 = sadd.s32 1, %s4197_s15 }
  0x3e   : > { %s184_s5 = ssub.s32 0, %s183_s4  ;;  %s4350_s8 = scalar_lea.hbm %s4817_s0, %s2820_s6 }
  0x3f   : > { %s4852_s5 = smov (!%p180_p4, %s184_s5), %s183_s4  ;;  %p193_p10 = scmp.eq.s32.totalorder %s4197_s15, 0 }
  0x40   : > { %p2800_p8 = scmp.lt.s32.totalorder %s4852_s5, 0  ;;  %s190_s9 = sadd.s32 2, %s4852_s5 }
  0x41   : > { %s4357_s11 = scalar_lea.hbm %s4350_s8, 640  ;;  %p4360_p11 = scmp.lt.s32.totalorder %s244_s10, 2 }
  0x42   : > { %s4854_s9 = smov (!%p2800_p8, %s190_s9), %s4852_s5  ;;  %p4067_p13 = scmp.ne.s32.totalorder %s4350_s8, %s4357_s11 }
  0x43   : > { %s204_s18 = smul.u32 40, %s4854_s9  ;;  %s4823_s21 = ssub.s32 1, %s4854_s9 }
  0x44   : > { %s4367_s23 = smul.u32 40, %s4823_s21  ;;  %s4373_s4 = scalar_lea.sflag [#allocation5], %s4854_s9 }
  0x45   : > { %s4369_s29 = scalar_lea.vmem [#allocation2], %s204_s18  ;;  %p4068_p0 = pnand %p4067_p13, %p193_p10 }
  0x46   : > { %s214_s30 = sshll.u32 %s4369_s29, 4  ;;  %s4824_s27 = scalar_lea.hbm %s4817_s0, 1280  ;;  %s215_s30 = int_to_ptr.vmem [resolvable:$true] %s214_s30 }
  0x47   : > { %p4069_p6 = pneg %p4068_p0  ;;  %p4071_p7 = scmp.lt.s32.totalorder %s4350_s8, %s4817_s0 }
  0x48   : > { %p4072_p9 = scmp.lt.s32.totalorder %s4824_s27, %s4357_s11 }
  0x4a   : > { %p4073_p12 = por %p4072_p9, %p4071_p7 }
  0x4c   : > { %p4074_p1 = pnand %p4073_p12, %p4069_p6 }
  0x4e   : > { %4077 = shalt.err (!%p4074_p1)  }
  0x4f   : > { %s4078_s21 = scalar_lea.vmem %s215_s30, 640  ;;  %s4213_s5 = smov [#allocation2]  }
  0x50   : > { %p4079_p2 = scmp.ne.s32.totalorder %s215_s30, %s4078_s21  ;;  %s4082_s6 = sshll.u32 %s4213_s5, 4  ;;  %s4083_s6 = int_to_ptr.vmem [resolvable:$false] %s4082_s6 }
  0x51   : > { %s4084_s1 = scalar_lea.vmem %s4083_s6, 1280  ;;  %p4085_p4 = scmp.lt.s32.totalorder %s215_s30, %s4083_s6 }
  0x52   : > { %p4080_p5 = pnand %p4079_p2, %p193_p10  ;;  %p4086_p8 = scmp.lt.s32.totalorder %s4084_s1, %s4078_s21 }
  0x54   : > { %p4081_p3 = pneg %p4080_p5  ;;  %p4087_p13 = por %p4086_p8, %p4085_p4 }
  0x56   : > { %p4088_p0 = pnand %p4087_p13, %p4081_p3 }
  0x58   : > { %4091 = shalt.err (!%p4088_p0)  }
  0x59   : > { %3926 = dma.hbm_to_vmem [thread:$0]  (%p193_p10), %s4350_s8, 640, %s215_s30, %s4373_s4 }
  0x5a   : > { %s256_s26 = scalar_lea.vmem [#allocation2], %s4367_s23  ;;  %s4839_s10 = ssub.s32 1, %s4854_s9 }
  0x5b   : > { %s265_s7 = sshll.u32 %s256_s26, 4  ;;  %s257_s18 = scalar_lea.sflag [#allocation5], %s4839_s10  ;;  %s266_s7 = int_to_ptr.vmem [resolvable:$true] %s265_s7 }
  0x5c   : > { %s4118_s21 = scalar_lea.hbm %s4350_s8, 1280  ;;  %p4097_p12 = scmp.lt.s32.totalorder %s4357_s11, %s4817_s0 }
  0x5d   : > { %p4093_p6 = scmp.ne.s32.totalorder %s4357_s11, %s4118_s21  ;;  %s4840_s16 = scalar_lea.hbm %s4817_s0, 1280 }
  0x5e   : > { %p4098_p1 = scmp.lt.s32.totalorder %s4840_s16, %s4118_s21 }
  0x5f   : > { %p4094_p7 = pnand %p4093_p6, %p4360_p11 }
  0x60   : > { %p4099_p10 = por %p4098_p1, %p4097_p12 }
  0x61   : > { %p4095_p9 = pneg %p4094_p7 }
  0x63   : > { %p4100_p2 = pnand %p4099_p10, %p4095_p9 }
  0x65   : > { %4103 = shalt.err (!%p4100_p2)  }
  0x66   : > { %s4104_s23 = scalar_lea.vmem %s266_s7, 640  ;;  %p4111_p8 = scmp.lt.s32.totalorder %s266_s7, %s4083_s6 }
  0x67   : > { %p4105_p5 = scmp.ne.s32.totalorder %s266_s7, %s4104_s23  ;;  %p4112_p13 = scmp.lt.s32.totalorder %s4084_s1, %s4104_s23 }
  0x69   : > { %p4106_p3 = pnand %p4105_p5, %p4360_p11  ;;  %p4113_p0 = por %p4112_p13, %p4111_p8 }
  0x6b   : > { %p4107_p4 = pneg %p4106_p3 }
  0x6d   : > { %p4114_p6 = pnand %p4113_p0, %p4107_p4 }
  0x6f   : > { %4117 = shalt.err (!%p4114_p6)  }
  0x70   : > { %3927 = dma.hbm_to_vmem [thread:$0]  (%p4360_p11), %s4357_s11, 640, %s266_s7, %s257_s18 }
  0x71   : > { %s4418_s2 = scalar_lea.vmem [#allocation11], %s4342_s28 }
  0x72   : > { %4177 = dma.done.wait %s4373_s4, 640 }
  0x73   : > { %4178 = vsyncadd %s4373_s4, 4294966656  ;;  %v4214_v0 = vmov 0.0   ;;  %vm4215_vm0 = vmmov 0   ;;  %v347_v1 = vld [vmem:[#allocation6 + $0xf8] sm:$0xff]  ;;  %v346_v2 = vld [vmem:[#allocation6 + $0xf0] sm:$0xff]  ;;  %vm1080_vm11 = vcmask 1045504  }
  0x74   : > { %3180 = vmatprep.subr.mxu0 %v4214_v0  ;;  %3227 = vmatprep.subr.mxu1 %v4214_v0  ;;  %v345_v3 = vld [vmem:[#allocation6 + $0xe8] sm:$0xff]  ;;  %v325_v4 = vld [vmem:[#allocation6 + $0x78] sm:$0xff]  ;;  %v324_v5 = vld [vmem:[#allocation6 + $0x70] sm:$0xff]  ;;  %vm1899_vm13 = vcmask 1043456   ;;  %s2822_s1 = sshll.u32 %s4197_s15, 8  ;;  %s2658_s16 = sshll.u32 %s4418_s2, 4  ;;  %s4765_s16 = int_to_ptr.vmem [resolvable:$true] %s2658_s16 }
  0x75   : > { %3212 = vmatprep.mubr.msk.f32.mxu0 %vm4215_vm0, %v4214_v0  ;;  %3259 = vmatprep.mubr.msk.f32.mxu1 %vm4215_vm0, %v4214_v0  ;;  %v344_v6 = vld [vmem:[#allocation6 + $0xe0] sm:$0xff]  ;;  %v323_v7 = vld [vmem:[#allocation6 + $0x68] sm:$0xff]  ;;  %v343_v8 = vld [vmem:[#allocation6 + $0xd8] sm:$0xff]  ;;  %s4763_s8 = scalar_lea.hbm %s4820_s3, %s2822_s1  ;;  %s4841_s9 = sand.u32 1, %s4189_s13  }
  0x76   : > { %3181 = vmatpush3.msra.mxu0 %v347_v1  ;;  %3228 = vmatpush3.msra.mxu1 %v325_v4  ;;  %v322_v9 = vld [vmem:[#allocation6 + $0x60] sm:$0xff]  ;;  %v342_v10 = vld [vmem:[#allocation6 + $0xd0] sm:$0xff]  ;;  %v321_v11 = vld [vmem:[#allocation6 + $0x58] sm:$0xff]  ;;  %s4772_s15 = scalar_lea.sflag [#allocation8], %s4841_s9  ;;  %s4119_s11 = scalar_lea.vmem %s4765_s16, 256 }
  0x77   : > { %3182 = vmatprep.subr.mxu0 %v4214_v0  ;;  %3229 = vmatprep.subr.mxu1 %v4214_v0  ;;  %v4436_v12 = vld [vmem:[%s4369_s29] sm:$0xff]  ;;  %v4439_v13 = vld [vmem:[%s4369_s29 + $0x8] sm:$0xff]  ;;  %v340_v19 = vld [vmem:[#allocation6 + $0xc0] sm:$0xff]  ;;  %p4120_p11 = scmp.ne.s32.totalorder %s4765_s16, %s4119_s11  ;;  %p4842_p7 = scmp.ne.s32.totalorder %s4831_s22, 0 }
  0x78   : > { %3183 = vmatpush3.msra.mxu0 %v346_v2  ;;  %3230 = vmatpush3.msra.mxu1 %v324_v5  ;;  %vm285_vm1 = vcmp.ge.f32.partialorder %v4436_v12, 0.0  ;;  %v290_v14 = vmul.f32 0.1, %v4436_v12  ;;  %v341_v15 = vld [vmem:[#allocation6 + $0xc8] sm:$0xff]  ;;  %v320_v16 = vld [vmem:[#allocation6 + $0x50] sm:$0xff]  ;;  %vm286_vm2 = vcmp.ge.f32.partialorder %v4439_v13, 0.0 }
  0x79   : > { %3184 = vmatprep.subr.mxu0 %v4214_v0  ;;  %3231 = vmatprep.subr.mxu1 %v4214_v0  ;;  %v291_v17 = vmul.f32 0.1, %v4439_v13  ;;  %v319_v20 = vld [vmem:[#allocation6 + $0x48] sm:$0xff]  ;;  %v282_v22 = vld [vmem:[%s4369_s29 + $0x10] sm:$0xff]  ;;  %v338_v29 = vld [vmem:[#allocation6 + $0xb0] sm:$0xff]  ;;  %p4121_p9 = pnand %p4120_p11, %p4842_p7  ;;  %s4216_s19 = smov [#allocation11]  }
  0x7a   : > { %3185 = vmatpush3.msra.mxu0 %v345_v3  ;;  %3232 = vmatpush3.msra.mxu1 %v323_v7  ;;  %v4448_v18 = vsel %vm285_vm1, %v4436_v12, %v290_v14  ;;  %v339_v23 = vld [vmem:[#allocation6 + $0xb8] sm:$0xff]  ;;  %v318_v24 = vld [vmem:[#allocation6 + $0x40] sm:$0xff]  ;;  %vm287_vm3 = vcmp.ge.f32.partialorder %v282_v22, 0.0  ;;  %v292_v25 = vmul.f32 0.1, %v282_v22  ;;  %v284_v28 = vld [vmem:[%s4369_s29 + $0x20] sm:$0xff] }
  0x7b   : > { %3186 = vmatprep.subr.mxu0 %v4214_v0  ;;  %3233 = vmatprep.subr.mxu1 %v4214_v0  ;;  %v4453_v21 = vsel %vm286_vm2, %v4439_v13, %v291_v17  ;;  %300 = vst [vmem:[#allocation3] sm:$0xff] %v4448_v18  ;;  %v283_v26 = vld [vmem:[%s4369_s29 + $0x18] sm:$0xff]  ;;  %v317_v30 = vld [vmem:[#allocation6 + $0x38] sm:$0xff]  ;;  %vm289_vm5 = vcmp.ge.f32.partialorder %v284_v28, 0.0  ;;  %v294_v32 = vmul.f32 0.1, %v284_v28  ;;  %p4122_p12 = pneg %p4121_p9 }
  0x7c   : > { %3187 = vmatpush3.msra.mxu0 %v344_v6  ;;  %3234 = vmatpush3.msra.mxu1 %v322_v9  ;;  %301 = vst [vmem:[#allocation3 + $0x8] sm:$0xff] %v4453_v21  ;;  %vm288_vm4 = vcmp.ge.f32.partialorder %v283_v26, 0.0  ;;  %v293_v27 = vmul.f32 0.1, %v283_v26  ;;  %v4464_v31 = vsel %vm287_vm3, %v282_v22, %v292_v25  ;;  %v337_v34 = vld [vmem:[#allocation6 + $0xa8] sm:$0xff]  ;;  %v316_v35 = vld [vmem:[#allocation6 + $0x30] sm:$0xff] }
  0x7d   : > { %3188 = vmatprep.subr.mxu0 %v4214_v0  ;;  %3235 = vmatprep.subr.mxu1 %v4214_v0  ;;  %302 = vst [vmem:[#allocation3 + $0x10] sm:$0xff] %v4464_v31  ;;  %v299_v36 = vsel %vm289_vm5, %v284_v28, %v294_v32  ;;  %v336_v37 = vld [vmem:[#allocation6 + $0xa0] sm:$0xff]  ;;  %v315_v39 = vld [vmem:[#allocation6 + $0x28] sm:$0xff]  ;;  %v335_v41 = vld [vmem:[#allocation6 + $0x98] sm:$0xff] }
  0x7e   : > { %3189 = vmatpush3.msra.mxu0 %v343_v8  ;;  %3236 = vmatpush3.msra.mxu1 %v321_v11  ;;  %v4467_v33 = vsel %vm288_vm4, %v283_v26, %v293_v27  ;;  %304 = vst [vmem:[#allocation3 + $0x20] sm:$0xff] %v299_v36  ;;  %v314_v42 = vld [vmem:[#allocation6 + $0x20] sm:$0xff]  ;;  %v334_v43 = vld [vmem:[#allocation6 + $0x90] sm:$0xff]  ;;  %v313_v44 = vld [vmem:[#allocation6 + $0x18] sm:$0xff] }
  0x7f   : > { %3190 = vmatprep.subr.mxu0 %v4214_v0  ;;  %3237 = vmatprep.subr.mxu1 %v4214_v0  ;;  %303 = vst [vmem:[#allocation3 + $0x18] sm:$0xff] %v4467_v33  ;;  %v333_v45 = vld [vmem:[#allocation6 + $0x88] sm:$0xff]  ;;  %v312_v46 = vld [vmem:[#allocation6 + $0x10] sm:$0xff]  ;;  %v332_v47 = vld [vmem:[#allocation6 + $0x80] sm:$0xff] }
  0x80   : > { %3191 = vmatpush3.msra.mxu0 %v342_v10  ;;  %3238 = vmatpush3.msra.mxu1 %v320_v16  ;;  %v311_v48 = vld [vmem:[#allocation6 + $0x8] sm:$0xff]  ;;  %v549_v49 = vld [vmem:[#allocation6 + $0x178] sm:$0xff]  ;;  %v310_v50 = vld [vmem:[#allocation6] sm:$0xff] }
  0x81   : > { %3192 = vmatprep.subr.mxu0 %v4214_v0  ;;  %3239 = vmatprep.subr.mxu1 %v4214_v0  ;;  %v548_v51 = vld [vmem:[#allocation6 + $0x170] sm:$0xff]  ;;  %v547_v52 = vld [vmem:[#allocation6 + $0x168] sm:$0xff]  ;;  %v546_v54 = vld [vmem:[#allocation6 + $0x160] sm:$0xff] }
  0x82   : > { %3193 = vmatpush3.msra.mxu0 %v341_v15  ;;  %3240 = vmatpush3.msra.mxu1 %v319_v20  ;;  %v545_v55 = vld [vmem:[#allocation6 + $0x158] sm:$0xff]  ;;  %v544_v57 = vld [vmem:[#allocation6 + $0x150] sm:$0xff]  ;;  %v543_v58 = vld [vmem:[#allocation6 + $0x148] sm:$0xff] }
  0x83   : > { %3194 = vmatprep.subr.mxu0 %v4214_v0  ;;  %3241 = vmatprep.subr.mxu1 %v4214_v0  ;;  %v326_v38 = vld [vmem:[#allocation3 + $0x1] sm:$0xff]  ;;  %v540_v63 = vld [vmem:[#allocation6 + $0x130] sm:$0xff]  ;;  %v539_v1 = vld [vmem:[#allocation6 + $0x128] sm:$0xff] }
  0x84   : > { %3195 = vmatpush3.msra.mxu0 %v340_v19  ;;  %3242 = vmatpush3.msra.mxu1 %v318_v24  ;;  %v4474_v40 = vld [vmem:[#allocation3 + $0x2] sm:$0xff]  ;;  %v536_v4 = vld [vmem:[#allocation6 + $0x110] sm:$0xff]  ;;  %v535_v5 = vld [vmem:[#allocation6 + $0x108] sm:$0xff] }
  0x85   : > { %3196 = vmatprep.subr.mxu0 %v4214_v0  ;;  %3243 = vmatprep.subr.mxu1 %v4214_v0  ;;  %708 = vst [vmem:[#allocation3] sm:$0xff] %v4214_v0  ;;  %v327_v53 = vld [vmem:[#allocation3 + $0x9] sm:$0xff]  ;;  %v541_v61 = vld [vmem:[#allocation6 + $0x138] sm:$0xff]  ;;  %v741_v11 = vld [vmem:[#allocation6 + $0x1f0] sm:$0xff] }
  0x86   : > { %3197 = vmatpush3.msra.mxu0 %v339_v23  ;;  %3244 = vmatpush3.msra.mxu1 %v317_v30  ;;  %v328_v56 = vld [vmem:[#allocation3 + $0x11] sm:$0xff]  ;;  %v329_v59 = vld [vmem:[#allocation3 + $0x19] sm:$0xff]  ;;  %v542_v60 = vld [vmem:[#allocation6 + $0x140] sm:$0xff] }
  0x87   : > { %3198 = vmatprep.subr.mxu0 %v4214_v0  ;;  %3245 = vmatprep.subr.mxu1 %v4214_v0  ;;  %v330_v62 = vld [vmem:[#allocation3 + $0x21] sm:$0x3f]  ;;  %v538_v2 = vld [vmem:[#allocation6 + $0x120] sm:$0xff]  ;;  %v530_v8 = vld [vmem:[#allocation3 + $0x12] sm:$0xff] }
  0x88   : > { %3199 = vmatpush3.msra.mxu0 %v338_v29  ;;  %3246 = vmatpush3.msra.mxu1 %v316_v35  ;;  %v537_v3 = vld [vmem:[#allocation6 + $0x118] sm:$0xff]  ;;  %v534_v6 = vld [vmem:[#allocation6 + $0x100] sm:$0xff]  ;;  %v740_v15 = vld [vmem:[#allocation6 + $0x1e8] sm:$0xff] }
  0x89   : > { %3200 = vmatprep.subr.mxu0 %v4214_v0  ;;  %3247 = vmatprep.subr.mxu1 %v4214_v0  ;;  %v529_v7 = vld [vmem:[#allocation3 + $0xa] sm:$0xff]  ;;  %v531_v9 = vld [vmem:[#allocation3 + $0x1a] sm:$0xff]  ;;  %v532_v35 = vld [vmem:[#allocation3 + $0x22] sm:$0x3f] }
  0x8a   : > { %3201 = vmatpush3.msra.mxu0 %v337_v34  ;;  %3248 = vmatpush3.msra.mxu1 %v315_v39  ;;  %v742_v10 = vld [vmem:[#allocation6 + $0x1f8] sm:$0xff]  ;;  %v763_v16 = vld [vmem:[#allocation6 + $0x270] sm:$0xff]  ;;  %v739_v17 = vld [vmem:[#allocation6 + $0x1e0] sm:$0xff] }
  0x8b   : > { %3202 = vmatprep.subr.mxu0 %v4214_v0  ;;  %3249 = vmatprep.subr.mxu1 %v4214_v0  ;;  %v764_v14 = vld [vmem:[#allocation6 + $0x278] sm:$0xff]  ;;  %v761_v20 = vld [vmem:[#allocation6 + $0x260] sm:$0xff]  ;;  %v736_v23 = vld [vmem:[#allocation6 + $0x1c8] sm:$0xff] }
  0x8c   : > { %3203 = vmatpush3.msra.mxu0 %v336_v37  ;;  %3250 = vmatpush3.msra.mxu1 %v314_v42  ;;  %v738_v19 = vld [vmem:[#allocation6 + $0x1d8] sm:$0xff]  ;;  %v759_v24 = vld [vmem:[#allocation6 + $0x250] sm:$0xff]  ;;  %v735_v25 = vld [vmem:[#allocation6 + $0x1c0] sm:$0xff] }
  0x8d   : > { %3204 = vmatprep.subr.mxu0 %v4214_v0  ;;  %3251 = vmatprep.subr.mxu1 %v4214_v0  ;;  %v760_v22 = vld [vmem:[#allocation6 + $0x258] sm:$0xff]  ;;  %v733_v27 = vld [vmem:[#allocation6 + $0x1b0] sm:$0xff]  ;;  %v732_v28 = vld [vmem:[#allocation6 + $0x1a8] sm:$0xff] }
  0x8e   : > { %3205 = vmatpush3.msra.mxu0 %v335_v41  ;;  %3252 = vmatpush3.msra.mxu1 %v313_v44  ;;  %v734_v26 = vld [vmem:[#allocation6 + $0x1b8] sm:$0xff]  ;;  %v731_v29 = vld [vmem:[#allocation6 + $0x1a0] sm:$0xff]  ;;  %v758_v30 = vld [vmem:[#allocation6 + $0x248] sm:$0xff] }
  0x8f   : > { %3206 = vmatprep.subr.mxu0 %v4214_v0  ;;  %3253 = vmatprep.subr.mxu1 %v4214_v0  ;;  %v757_v32 = vld [vmem:[#allocation6 + $0x240] sm:$0xff]  ;;  %v756_v34 = vld [vmem:[#allocation6 + $0x238] sm:$0xff]  ;;  %v728_v36 = vld [vmem:[#allocation6 + $0x188] sm:$0xff] }
  0x90   : > { %3207 = vmatpush3.msra.mxu0 %v334_v43  ;;  %3254 = vmatpush3.msra.mxu1 %v312_v46  ;;  %v755_v37 = vld [vmem:[#allocation6 + $0x230] sm:$0xff]  ;;  %v754_v39 = vld [vmem:[#allocation6 + $0x228] sm:$0xff]  ;;  %v752_v41 = vld [vmem:[#allocation6 + $0x218] sm:$0xff] }
  0x91   : > { %3208 = vmatprep.subr.mxu0 %v4214_v0  ;;  %3255 = vmatprep.subr.mxu1 %v4214_v0  ;;  %v309_v42 = vld [vmem:[#allocation3 + $0x20] sm:$0x3f]  ;;  %v751_v43 = vld [vmem:[#allocation6 + $0x210] sm:$0xff]  ;;  %v750_v44 = vld [vmem:[#allocation6 + $0x208] sm:$0xff] }
  0x92   : > { %3209 = vmatpush3.msra.mxu0 %v333_v45  ;;  %3256 = vmatpush3.msra.mxu1 %v311_v48  ;;  %712 = vst [vmem:[#allocation3 + $0x20] sm:$0x3f] %v4214_v0  ;;  %v749_v45 = vld [vmem:[#allocation6 + $0x200] sm:$0xff] }
  0x93   : > { %3210 = vmatprep.subr.mxu0 %v4214_v0  ;;  %3257 = vmatprep.subr.mxu1 %v4214_v0 }
  0x94   : > { %3211 = vmatpush3.msra.mxu0 %v332_v47  ;;  %3258 = vmatpush3.msra.mxu1 %v310_v50 }
  0x95   : > { %3213 = vmatmul.mubr.f32.vlgmr.msra.gmra.mxu0 %v326_v38  ;;  %3274 = vmatprep.subr.mxu0 %v4214_v0  ;;  %v727_v38 = vld [vmem:[#allocation6 + $0x180] sm:$0xff] }
  0x96   : > { %3275 = vmatpush3.msra.mxu0 %v549_v49  ;;  %3260 = vmatmul.mubr.f32.vlgmr.msra.gmra.mxu1 %v4448_v18  ;;  %v762_v18 = vld [vmem:[#allocation6 + $0x268] sm:$0xff] }
  0x97   : > { %3276 = vmatprep.subr.mxu0 %v4214_v0  ;;  %3215 = vmatprep.mubr.msk.f32.mxu0 %vm4215_vm0, %v4214_v0 }
  0x98   : > { %3277 = vmatpush3.msra.mxu0 %v548_v51  ;;  %3262 = vmatprep.mubr.msk.f32.mxu1 %vm4215_vm0, %v4214_v0 }
  0x99   : > { %3278 = vmatprep.subr.mxu0 %v4214_v0  ;;  %3216 = vmatmul.mubr.f32.gmra.mxu0 %v327_v53 }
  0x9a   : > { %3279 = vmatpush3.msra.mxu0 %v547_v52  ;;  %3263 = vmatmul.mubr.f32.gmra.mxu1 %v4453_v21  ;;  %v737_v21 = vld [vmem:[#allocation6 + $0x1d0] sm:$0xff] }
  0x9b   : > { %3280 = vmatprep.subr.mxu0 %v4214_v0  ;;  %3218 = vmatprep.mubr.msk.f32.mxu0 %vm4215_vm0, %v4214_v0 }
  0x9c   : > { %3281 = vmatpush3.msra.mxu0 %v546_v54  ;;  %3265 = vmatprep.mubr.msk.f32.mxu1 %vm4215_vm0, %v4214_v0 }
  0x9d   : > { %3282 = vmatprep.subr.mxu0 %v4214_v0  ;;  %3219 = vmatmul.mubr.f32.gmra.mxu0 %v328_v56 }
  0x9e   : > { %3283 = vmatpush3.msra.mxu0 %v545_v55  ;;  %3266 = vmatmul.mubr.f32.gmra.mxu1 %v4464_v31  ;;  %v730_v31 = vld [vmem:[#allocation6 + $0x198] sm:$0xff] }
  0x9f   : > { %3284 = vmatprep.subr.mxu0 %v4214_v0  ;;  %3221 = vmatprep.mubr.msk.f32.mxu0 %vm4215_vm0, %v4214_v0 }
  0xa0   : > { %3285 = vmatpush3.msra.mxu0 %v544_v57  ;;  %3268 = vmatprep.mubr.msk.f32.mxu1 %vm4215_vm0, %v4214_v0 }
  0xa1   : > { %3286 = vmatprep.subr.mxu0 %v4214_v0  ;;  %3222 = vmatmul.mubr.f32.gmra.mxu0 %v329_v59 }
  0xa2   : > { %3287 = vmatpush3.msra.mxu0 %v543_v58  ;;  %3269 = vmatmul.mubr.f32.gmra.mxu1 %v4467_v33  ;;  %v729_v33 = vld [vmem:[#allocation6 + $0x190] sm:$0xff] }
  0xa3   : > { %3288 = vmatprep.subr.mxu0 %v4214_v0  ;;  %3224 = vmatprep.mubr.msk.f32.mxu0 %vm4215_vm0, %v4214_v0 }
  0xa4   : > { %3289 = vmatpush3.msra.mxu0 %v542_v60  ;;  %3321 = vmatprep.subr.mxu1 %v4214_v0 }
  0xa5   : > { %3290 = vmatprep.subr.mxu0 %v4214_v0  ;;  %3225 = vmatmul.mubr.f32.gmra.mxu0 %v330_v62 }
  0xa6   : > { %3291 = vmatpush3.msra.mxu0 %v541_v61  ;;  %3306 = vmatprep.mubr.msk.f32.mxu0 %vm4215_vm0, %v4214_v0 }
  0xa7   : > { %3292 = vmatprep.subr.mxu0 %v4214_v0  ;;  %3271 = vmatprep.mubr.msk.f32.mxu1 %vm4215_vm0, %v4214_v0 }
  0xa8   : > { %3293 = vmatpush3.msra.mxu0 %v540_v63  ;;  %3322 = vmatpush3.msra.mxu1 %v764_v14 }
  0xa9   : > { %3294 = vmatprep.subr.mxu0 %v4214_v0  ;;  %3323 = vmatprep.subr.mxu1 %v4214_v0 }
  0xaa   : > { %3295 = vmatpush3.msra.mxu0 %v539_v1  ;;  %3324 = vmatpush3.msra.mxu1 %v763_v16  ;;  %v676_v1 = vlaneseq }
  0xab   : > { %3296 = vmatprep.subr.mxu0 %v4214_v0  ;;  %3325 = vmatprep.subr.mxu1 %v4214_v0 }
  0xac   : > { %3297 = vmatpush3.msra.mxu0 %v538_v2  ;;  %3326 = vmatpush3.msra.mxu1 %v762_v18  ;;  %v4576_v2 = vshrl.u32 %v676_v1, 7 }
  0xad   : > { %3298 = vmatprep.subr.mxu0 %v4214_v0  ;;  %3327 = vmatprep.subr.mxu1 %v4214_v0 }
  0xae   : > { %3299 = vmatpush3.msra.mxu0 %v537_v3  ;;  %3328 = vmatpush3.msra.mxu1 %v761_v20 }
  0xaf   : > { %3300 = vmatprep.subr.mxu0 %v4214_v0  ;;  %3329 = vmatprep.subr.mxu1 %v4214_v0 }
  0xb0   : > { %3301 = vmatpush3.msra.mxu0 %v536_v4  ;;  %3330 = vmatpush3.msra.mxu1 %v760_v22  ;;  %v4579_v4 = vadd.s32 8, %v4576_v2 }
  0xb1   : > { %3302 = vmatprep.subr.mxu0 %v4214_v0  ;;  %3331 = vmatprep.subr.mxu1 %v4214_v0 }
  0xb2   : > { %3303 = vmatpush3.msra.mxu0 %v535_v5  ;;  %3332 = vmatpush3.msra.mxu1 %v759_v24 }
  0xb3   : > { %3304 = vmatprep.subr.mxu0 %v4214_v0  ;;  %3333 = vmatprep.subr.mxu1 %v4214_v0 }
  0xb4   : > { %3305 = vmatpush3.msra.mxu0 %v534_v6  ;;  %3334 = vmatpush3.msra.mxu1 %v758_v30 }
  0xb5   : > { %3307 = vmatmul.mubr.f32.vlgmr.msra.gmra.mxu0 %v4474_v40  ;;  %3368 = vmatprep.subr.mxu0 %v4214_v0  ;;  %v753_v40 = vld [vmem:[#allocation6 + $0x220] sm:$0xff] }
  0xb6   : > { %3309 = vmatprep.mubr.msk.f32.mxu0 %vm4215_vm0, %v4214_v0  ;;  %3369 = vmatpush3.msra.mxu0 %v742_v10 }
  0xb7   : > { %3370 = vmatprep.subr.mxu0 %v4214_v0  ;;  %3335 = vmatprep.subr.mxu1 %v4214_v0 }
  0xb8   : > { %3371 = vmatpush3.msra.mxu0 %v741_v11  ;;  %3336 = vmatpush3.msra.mxu1 %v757_v32 }
  0xb9   : > { %3310 = vmatmul.mubr.f32.gmra.mxu0 %v529_v7  ;;  %3372 = vmatprep.subr.mxu0 %v4214_v0 }
  0xba   : > { %3312 = vmatprep.mubr.msk.f32.mxu0 %vm4215_vm0, %v4214_v0  ;;  %3373 = vmatpush3.msra.mxu0 %v740_v15 }
  0xbb   : > { %3374 = vmatprep.subr.mxu0 %v4214_v0  ;;  %3337 = vmatprep.subr.mxu1 %v4214_v0 }
  0xbc   : > { %3375 = vmatpush3.msra.mxu0 %v739_v17  ;;  %3338 = vmatpush3.msra.mxu1 %v756_v34  ;;  %v966_v34 = vld [vmem:[#allocation6 + $0x2f8] sm:$0xff] }
  0xbd   : > { %3313 = vmatmul.mubr.f32.gmra.mxu0 %v530_v8  ;;  %3376 = vmatprep.subr.mxu0 %v4214_v0  ;;  %v2806_v8 = vld [vmem:[#allocation9] ss:$0 sm:$0xff] }
  0xbe   : > { %3315 = vmatprep.mubr.msk.f32.mxu0 %vm4215_vm0, %v4214_v0  ;;  %3377 = vmatpush3.msra.mxu0 %v738_v19  ;;  %v4583_v19 = vadd.s32 24, %v4576_v2 }
  0xbf   : > { %3378 = vmatprep.subr.mxu0 %v4214_v0  ;;  %3339 = vmatprep.subr.mxu1 %v4214_v0 }
  0xc0   : > { %3379 = vmatpush3.msra.mxu0 %v737_v21  ;;  %3340 = vmatpush3.msra.mxu1 %v755_v37 }
  0xc1   : > { %3316 = vmatmul.mubr.f32.gmra.mxu0 %v531_v9  ;;  %3380 = vmatprep.subr.mxu0 %v4214_v0  ;;  %v684_v9 = vadd.s32 4294967285, %v4579_v4 }
  0xc2   : > { %3318 = vmatprep.mubr.msk.f32.mxu0 %vm4215_vm0, %v4214_v0  ;;  %3381 = vmatpush3.msra.mxu0 %v736_v23 }
  0xc3   : > { %3382 = vmatprep.subr.mxu0 %v4214_v0  ;;  %3341 = vmatprep.subr.mxu1 %v4214_v0  ;;  %vm689_vm6 = vcmp.ge.s32.totalorder %v684_v9, 0  ;;  %v1192_v9 = vld [vmem:[#allocation6 + $0x368] sm:$0xff] }
  0xc4   : > { %3383 = vmatpush3.msra.mxu0 %v735_v25  ;;  %3342 = vmatpush3.msra.mxu1 %v754_v39 }
  0xc5   : > { %3384 = vmatprep.subr.mxu0 %v4214_v0  ;;  %3319 = vmatmul.mubr.f32.gmra.mxu0 %v532_v35 }
  0xc6   : > { %3385 = vmatpush3.msra.mxu0 %v734_v26  ;;  %3343 = vmatprep.subr.mxu1 %v4214_v0 }
  0xc7   : > { %3386 = vmatprep.subr.mxu0 %v4214_v0  ;;  %3400 = vmatprep.mubr.msk.f32.mxu0 %vm4215_vm0, %v4214_v0 }
  0xc8   : > { %3387 = vmatpush3.msra.mxu0 %v733_v27  ;;  %3344 = vmatpush3.msra.mxu1 %v753_v40  ;;  %v964_v40 = vld [vmem:[#allocation6 + $0x2e8] sm:$0xff] }
  0xc9   : > { %3388 = vmatprep.subr.mxu0 %v4214_v0  ;;  %3345 = vmatprep.subr.mxu1 %v4214_v0 }
  0xca   : > { %3389 = vmatpush3.msra.mxu0 %v732_v28  ;;  %3346 = vmatpush3.msra.mxu1 %v752_v41  ;;  %v686_v28 = vadd.s32 4294967285, %v4583_v19  ;;  %v725_v41 = vld [vmem:[#allocation3 + $0x20] sm:$0xf] }
  0xcb   : > { %3390 = vmatprep.subr.mxu0 %v4214_v0  ;;  %3347 = vmatprep.subr.mxu1 %v4214_v0 }
  0xcc   : > { %3391 = vmatpush3.msra.mxu0 %v731_v29  ;;  %3272 = vmatmul.mubr.f32.gmra.mxu1 %v309_v42  ;;  %vm696_vm10 = vcmp.lt.s32.totalorder %v686_v28, 16  ;;  %v963_v42 = vld [vmem:[#allocation6 + $0x2e0] sm:$0xff]  ;;  %v1184_v28 = vld [vmem:[#allocation6 + $0x328] sm:$0xff] }
  0xcd   : > { %3392 = vmatprep.subr.mxu0 %v4214_v0  ;;  %3348 = vmatpush3.msra.mxu1 %v751_v43  ;;  %v962_v43 = vld [vmem:[#allocation6 + $0x2d8] sm:$0xff] }
  0xce   : > { %3393 = vmatpush3.msra.mxu0 %v730_v31  ;;  %3353 = vmatprep.mubr.msk.f32.mxu1 %vm4215_vm0, %v4214_v0 }
  0xcf   : > { %3394 = vmatprep.subr.mxu0 %v4214_v0  ;;  %3349 = vmatprep.subr.mxu1 %v4214_v0 }
  0xd0   : > { %3395 = vmatpush3.msra.mxu0 %v729_v33  ;;  %3350 = vmatpush3.msra.mxu1 %v750_v44 }
  0xd1   : > { %3396 = vmatprep.subr.mxu0 %v4214_v0  ;;  %3351 = vmatprep.subr.mxu1 %v4214_v0 }
  0xd2   : > { %3397 = vmatpush3.msra.mxu0 %v728_v36  ;;  %3352 = vmatpush3.msra.mxu1 %v749_v45  ;;  %v961_v45 = vld [vmem:[#allocation6 + $0x2d0] sm:$0xff] }
  0xd3   : > { %3398 = vmatprep.subr.mxu0 %v4214_v0  ;;  %3415 = vmatprep.subr.mxu1 %v4214_v0 }
  0xd4   : > { %3399 = vmatpush3.msra.mxu0 %v727_v38  ;;  %v965_v38 = vld [vmem:[#allocation6 + $0x2f0] sm:$0xff] }
  0xd5   : > { %3401 = vmatmul.mubr.f32.vlgmr.msra.gmra.mxu0 %v4214_v0 }
  0xd6   : > { %3403 = vmatprep.mubr.msk.f32.mxu0 %vm4215_vm0, %v4214_v0 }
 0x155   : > { %v414_v46 = vpop.f32.mrf.mxu0 }
 0x156   : > { %v504_v48 = vpop.f32.mrf.mxu1  ;;  %v747_v46 = vld [vmem:[#allocation3 + $0x21] sm:$0xf] }
 0x157   : > { %v3214_v47 = vpop.f32.mrf.mxu0 }
 0x158   : > { %v3261_v49 = vpop.f32.mrf.mxu1 }
 0x159   : > { %v419_v50 = vpop.f32.mrf.mxu0  ;;  %v949_v49 = vld [vmem:[#allocation3 + $0x22] sm:$0xf] }
 0x15a   : > { %v509_v51 = vpop.f32.mrf.mxu1 }
 0x15b   : > { %v3217_v52 = vpop.f32.mrf.mxu0  ;;  %v510_v6 = vadd.f32 %v509_v51, %v419_v50  ;;  %v960_v50 = vld [vmem:[#allocation6 + $0x2c8] sm:$0xff]  ;;  %v959_v51 = vld [vmem:[#allocation6 + $0x2c0] sm:$0xff] }
 0x15c   : > { %v3264_v53 = vpop.f32.mrf.mxu1  ;;  %v958_v52 = vld [vmem:[#allocation6 + $0x2b8] sm:$0xff] }
 0x15d   : > { %v424_v54 = vpop.f32.mrf.mxu0  ;;  %v957_v53 = vld [vmem:[#allocation6 + $0x2b0] sm:$0xff] }
 0x15e   : > { %v514_v55 = vpop.f32.mrf.mxu1 }
 0x15f   : > { %v3220_v56 = vpop.f32.mrf.mxu0  ;;  %v515_v14 = vadd.f32 %v514_v55, %v424_v54  ;;  %v956_v54 = vld [vmem:[#allocation6 + $0x2a8] sm:$0xff]  ;;  %v955_v55 = vld [vmem:[#allocation6 + $0x2a0] sm:$0xff] }
 0x160   : > { %v3267_v57 = vpop.f32.mrf.mxu1  ;;  %v954_v56 = vld [vmem:[#allocation6 + $0x298] sm:$0xff] }
 0x161   : > { %v429_v58 = vpop.f32.mrf.mxu0  ;;  %v953_v57 = vld [vmem:[#allocation6 + $0x290] sm:$0xff] }
 0x162   : > { %v519_v59 = vpop.f32.mrf.mxu1 }
 0x163   : > { %v3223_v60 = vpop.f32.mrf.mxu0  ;;  %v520_v21 = vadd.f32 %v519_v59, %v429_v58  ;;  %v952_v58 = vld [vmem:[#allocation6 + $0x288] sm:$0xff]  ;;  %v951_v59 = vld [vmem:[#allocation6 + $0x280] sm:$0xff] }
 0x164   : > { %v3270_v61 = vpop.f32.mrf.mxu1 }
 0x165   : > { %v434_v62 = vpop.f32.mrf.mxu0 }
 0x167   : > { %v3226_v63 = vpop.f32.mrf.mxu0 }
 0x175   : > { %v616_v3 = vpop.f32.mrf.mxu0 }
 0x177   : > { %v3308_v5 = vpop.f32.mrf.mxu0 }
 0x179   : > { %v621_v7 = vpop.f32.mrf.mxu0 }
 0x17a   : > { %v641_v10 = vadd.f32 %v621_v7, %v510_v6  ;;  %v1194_v7 = vld [vmem:[#allocation6 + $0x378] sm:$0xff] }
 0x17b   : > { %v3311_v11 = vpop.f32.mrf.mxu0 }
 0x17c   : > { %v653_v15 = vadd.f32 %v2806_v8, %v641_v10  ;;  %v1191_v10 = vld [vmem:[#allocation6 + $0x360] sm:$0xff]  ;;  %v1190_v11 = vld [vmem:[#allocation6 + $0x358] sm:$0xff] }
 0x17d   : > { %v626_v16 = vpop.f32.mrf.mxu0 }
 0x17e   : > { %vm659_vm7 = vcmp.ge.f32.partialorder %v653_v15, 0.0  ;;  %v664_v17 = vmul.f32 0.1, %v653_v15  ;;  %v642_v18 = vadd.f32 %v626_v16, %v515_v14  ;;  %v1215_v14 = vld [vmem:[#allocation6 + $0x3f8] sm:$0xff]  ;;  %v1214_v16 = vld [vmem:[#allocation6 + $0x3f0] sm:$0xff] }
 0x17f   : > { %v3314_v20 = vpop.f32.mrf.mxu0  ;;  %3462 = vmatprep.subr.mxu0 %v1215_v14 }
 0x180   : > { %v669_v22 = vsel %vm659_vm7, %v653_v15, %v664_v17  ;;  %v654_v23 = vadd.f32 %v2806_v8, %v642_v18  ;;  %v1189_v15 = vld [vmem:[#allocation6 + $0x350] sm:$0xff]  ;;  %3463 = vmatpush3.msra.mxu0 %v1215_v14  ;;  %v1188_v17 = vld [vmem:[#allocation6 + $0x348] sm:$0xff]  ;;  %v1187_v20 = vld [vmem:[#allocation6 + $0x340] sm:$0xff] }
 0x181   : > { %v704_v24 = vsel %vm689_vm6, %v669_v22, 0.0  ;;  %v631_v25 = vpop.f32.mrf.mxu0  ;;  %4007 = vmatmul.mubr.msk.f32.gmra.mxu0 %vm689_vm6, %v669_v22  ;;  %3464 = vmatprep.subr.mxu0 %v1214_v16  ;;  %v1213_v18 = vld [vmem:[#allocation6 + $0x3e8] sm:$0xff]  ;;  %v1186_v22 = vld [vmem:[#allocation6 + $0x338] sm:$0xff] }
 0x182   : > { %709 = vst [vmem:[#allocation3 + $0x8] sm:$0xff] %v704_v24  ;;  %vm660_vm8 = vcmp.ge.f32.partialorder %v654_v23, 0.0  ;;  %v665_v26 = vmul.f32 0.1, %v654_v23  ;;  %v643_v27 = vadd.f32 %v631_v25, %v520_v21  ;;  %3406 = vmatprep.mubr.msk.f32.mxu0 %vm4215_vm0, %v4214_v0  ;;  %3465 = vmatpush3.msra.mxu0 %v1214_v16  ;;  %v1212_v21 = vld [vmem:[#allocation6 + $0x3e0] sm:$0xff]  ;;  %v1185_v24 = vld [vmem:[#allocation6 + $0x330] sm:$0xff] }
 0x183   : > { %v3317_v29 = vpop.f32.mrf.mxu0  ;;  %3466 = vmatprep.subr.mxu0 %v1213_v18  ;;  %v1081_v25 = vrot.slane %v4436_v12, 2  ;;  %v1208_v12 = vld [vmem:[#allocation6 + $0x3c0] sm:$0xff] }
 0x184   : > { %v670_v30 = vsel %vm660_vm8, %v654_v23, %v665_v26  ;;  %v655_v31 = vadd.f32 %v2806_v8, %v643_v27  ;;  %v1193_v8 = vld [vmem:[#allocation6 + $0x370] sm:$0xff]  ;;  %3467 = vmatpush3.msra.mxu0 %v1213_v18  ;;  %v1211_v23 = vld [vmem:[#allocation6 + $0x3d8] sm:$0xff]  ;;  %v1082_v26 = vrot.slane %v4439_v13, 2  ;;  %v4005_v18 = vld [vmem:[%s4369_s29 + $0x18] sm:$0xff] }
 0x185   : > { %710 = vst [vmem:[#allocation3 + $0x10] sm:$0xff] %v670_v30  ;;  %3407 = vmatmul.mubr.f32.gmra.mxu0 %v670_v30  ;;  %v636_v62 = vpop.f32.mrf.mxu0  ;;  %3468 = vmatprep.subr.mxu0 %v1212_v21  ;;  %v1210_v27 = vld [vmem:[#allocation6 + $0x3d0] sm:$0xff]  ;;  %v1209_v30 = vld [vmem:[#allocation6 + $0x3c8] sm:$0xff] }
 0x186   : > { %vm661_vm9 = vcmp.ge.f32.partialorder %v655_v31, 0.0  ;;  %v666_v32 = vmul.f32 0.1, %v655_v31  ;;  %3409 = vmatprep.mubr.msk.f32.mxu0 %vm4215_vm0, %v4214_v0  ;;  %3469 = vmatpush3.msra.mxu0 %v1212_v21  ;;  %v4640_v29 = vsel %vm1080_vm11, %v1081_v25, %v1082_v26 }
 0x187   : > { %v3320_v63 = vpop.f32.mrf.mxu0  ;;  %3470 = vmatprep.subr.mxu0 %v1211_v23 }
 0x188   : > { %v671_v33 = vsel %vm661_vm9, %v655_v31, %v666_v32  ;;  %3471 = vmatpush3.msra.mxu0 %v1211_v23  ;;  %v1183_v31 = vld [vmem:[#allocation6 + $0x320] sm:$0xff]  ;;  %v1182_v32 = vld [vmem:[#allocation6 + $0x318] sm:$0xff] }
 0x189   : > { %v706_v35 = vsel %vm696_vm10, %v671_v33, 0.0  ;;  %v743_v36 = vld [vmem:[#allocation3 + $0x1] sm:$0xff]  ;;  %4008 = vmatmul.mubr.msk.f32.gmra.mxu0 %vm696_vm10, %v671_v33  ;;  %3472 = vmatprep.subr.mxu0 %v1210_v27  ;;  %vm2629_vm10 = vcmask 1041408  }
 0x18a   : > { %v4592_v37 = vld [vmem:[#allocation3 + $0x2] sm:$0xff]  ;;  %711 = vst [vmem:[#allocation3 + $0x18] sm:$0xff] %v706_v35  ;;  %3354 = vmatmul.mubr.f32.vlgmr.msra.gmra.mxu1 %v743_v36  ;;  %3412 = vmatprep.mubr.msk.f32.mxu0 %vm4215_vm0, %v4214_v0  ;;  %v1206_v35 = vld [vmem:[#allocation6 + $0x3b0] sm:$0xff]  ;;  %v1180_v36 = vld [vmem:[#allocation6 + $0x308] sm:$0xff] }
 0x18b   : > { %1161 = vst [vmem:[#allocation3] sm:$0xff] %v4214_v0  ;;  %3416 = vmatpush3.msra.mxu1 %v966_v34  ;;  %3356 = vmatprep.mubr.msk.f32.mxu1 %vm4215_vm0, %v4214_v0  ;;  %v1207_v33 = vld [vmem:[#allocation6 + $0x3b8] sm:$0xff]  ;;  %v1181_v34 = vld [vmem:[#allocation6 + $0x310] sm:$0xff] }
 0x18c   : > { %3417 = vmatprep.subr.mxu1 %v4214_v0  ;;  %v744_v39 = vld [vmem:[#allocation3 + $0x9] sm:$0xff]  ;;  %v524_v5 = vpop.f32.mrf.mxu1  ;;  %3473 = vmatpush3.msra.mxu0 %v1210_v27 }
 0x18d   : > { %3418 = vmatpush3.msra.mxu1 %v965_v38  ;;  %3413 = vmatmul.mubr.f32.gmra.mxu0 %v725_v41  ;;  %v946_v60 = vld [vmem:[#allocation3 + $0xa] sm:$0xff]  ;;  %v1202_v41 = vld [vmem:[#allocation6 + $0x390] sm:$0xff]  ;;  %v2807_v5 = vld [vmem:[#allocation9 + $0x1] ss:$0 sm:$0xff] }
 0x18e   : > { %3419 = vmatprep.subr.mxu1 %v4214_v0  ;;  %3357 = vmatmul.mubr.f32.gmra.mxu1 %v744_v39  ;;  %v3273_v6 = vpop.f32.mrf.mxu1  ;;  %v1179_v38 = vld [vmem:[#allocation6 + $0x300] sm:$0xff] }
 0x18f   : > { %3420 = vmatpush3.msra.mxu1 %v964_v40  ;;  %3359 = vmatprep.mubr.msk.f32.mxu1 %vm4215_vm0, %v4214_v0  ;;  %v1204_v39 = vld [vmem:[#allocation6 + $0x3a0] sm:$0xff]  ;;  %v1203_v40 = vld [vmem:[#allocation6 + $0x398] sm:$0xff] }
 0x190   : > { %3421 = vmatprep.subr.mxu1 %v4214_v0  ;;  %3474 = vmatprep.subr.mxu0 %v1209_v30 }
 0x191   : > { %3422 = vmatpush3.msra.mxu1 %v963_v42  ;;  %v745_v44 = vld [vmem:[#allocation3 + $0x11] sm:$0xff]  ;;  %v746_v47 = vld [vmem:[#allocation3 + $0x19] sm:$0xff]  ;;  %3475 = vmatpush3.msra.mxu0 %v1209_v30 }
 0x192   : > { %3423 = vmatprep.subr.mxu1 %v4214_v0  ;;  %3360 = vmatmul.mubr.f32.gmra.mxu1 %v745_v44  ;;  %v948_v48 = vld [vmem:[#allocation3 + $0x1a] sm:$0xff]  ;;  %v947_v61 = vld [vmem:[#allocation3 + $0x12] sm:$0xff] }
 0x193   : > { %3424 = vmatpush3.msra.mxu1 %v962_v43  ;;  %3362 = vmatprep.mubr.msk.f32.mxu1 %vm4215_vm0, %v4214_v0  ;;  %1165 = vst [vmem:[#allocation3 + $0x20] sm:$0xf] %v4214_v0  ;;  %v1201_v42 = vld [vmem:[#allocation6 + $0x388] sm:$0xff]  ;;  %v1200_v43 = vld [vmem:[#allocation6 + $0x380] sm:$0xff]  ;;  %v4642_v44 = vld [vmem:[#allocation6 + $0x478] sm:$0xff] }
 0x194   : > { %3425 = vmatprep.subr.mxu1 %v4214_v0  ;;  %3476 = vmatprep.subr.mxu0 %v1208_v12 }
 0x195   : > { %3426 = vmatpush3.msra.mxu1 %v961_v45  ;;  %v4633_v1 = vpop.f32.mrf.mxu0  ;;  %3477 = vmatpush3.msra.mxu0 %v1208_v12 }
 0x196   : > { %3427 = vmatprep.subr.mxu1 %v4214_v0  ;;  %3363 = vmatmul.mubr.f32.gmra.mxu1 %v746_v47 }
 0x197   : > { %3428 = vmatpush3.msra.mxu1 %v960_v50  ;;  %3365 = vmatprep.mubr.msk.f32.mxu1 %vm4215_vm0, %v4214_v0  ;;  %v3402_v3 = vpop.f32.mrf.mxu0 }
 0x198   : > { %3429 = vmatprep.subr.mxu1 %v4214_v0  ;;  %3478 = vmatprep.subr.mxu0 %v1207_v33 }
 0x199   : > { %3430 = vmatpush3.msra.mxu1 %v959_v51  ;;  %3479 = vmatpush3.msra.mxu0 %v1207_v33 }
 0x19a   : > { %3431 = vmatprep.subr.mxu1 %v4214_v0  ;;  %3366 = vmatmul.mubr.f32.gmra.mxu1 %v747_v46 }
 0x19b   : > { %3432 = vmatpush3.msra.mxu1 %v958_v52  ;;  %3447 = vmatprep.mubr.msk.f32.mxu1 %vm4215_vm0, %v4214_v0 }
 0x19c   : > { %3433 = vmatprep.subr.mxu1 %v4214_v0  ;;  %3480 = vmatprep.subr.mxu0 %v1206_v35 }
 0x19d   : > { %3434 = vmatpush3.msra.mxu1 %v957_v53  ;;  %3481 = vmatpush3.msra.mxu0 %v1206_v35 }
 0x19e   : > { %3435 = vmatprep.subr.mxu1 %v4214_v0 }
 0x19f   : > { %3436 = vmatpush3.msra.mxu1 %v956_v54 }
 0x1a0   : > { %3437 = vmatprep.subr.mxu1 %v4214_v0 }
 0x1a1   : > { %3438 = vmatpush3.msra.mxu1 %v955_v55 }
 0x1a2   : > { %3439 = vmatprep.subr.mxu1 %v4214_v0 }
 0x1a3   : > { %3440 = vmatpush3.msra.mxu1 %v954_v56 }
 0x1a4   : > { %3441 = vmatprep.subr.mxu1 %v4214_v0 }
 0x1a5   : > { %3442 = vmatpush3.msra.mxu1 %v953_v57 }
 0x1a6   : > { %3443 = vmatprep.subr.mxu1 %v4214_v0 }
 0x1a7   : > { %3444 = vmatpush3.msra.mxu1 %v952_v58 }
 0x1a8   : > { %3445 = vmatprep.subr.mxu1 %v4214_v0 }
 0x1a9   : > { %3446 = vmatpush3.msra.mxu1 %v951_v59 }
 0x1aa   : > { %3448 = vmatmul.mubr.f32.vlgmr.msra.gmra.mxu1 %v4592_v37  ;;  %3500 = vmatprep.subr.mxu1 %v1194_v7  ;;  %v1205_v37 = vld [vmem:[#allocation6 + $0x3a8] sm:$0xff] }
 0x1ab   : > { %3450 = vmatprep.mubr.msk.f32.mxu1 %vm4215_vm0, %v4214_v0  ;;  %3501 = vmatpush3.msra.mxu1 %v1194_v7 }
 0x1ac   : > { %3502 = vmatprep.subr.mxu1 %v1193_v8  ;;  %3482 = vmatprep.subr.mxu0 %v1205_v37 }
 0x1ad   : > { %3503 = vmatpush3.msra.mxu1 %v1193_v8  ;;  %3483 = vmatpush3.msra.mxu0 %v1205_v37  ;;  %v4004_v8 = vld [vmem:[%s4369_s29 + $0x10] sm:$0xff] }
 0x1ae   : > { %3451 = vmatmul.mubr.f32.gmra.mxu1 %v946_v60  ;;  %3504 = vmatprep.subr.mxu1 %v1192_v9 }
 0x1af   : > { %3453 = vmatprep.mubr.msk.f32.mxu1 %vm4215_vm0, %v4214_v0  ;;  %3505 = vmatpush3.msra.mxu1 %v1192_v9  ;;  %v1084_v9 = vrot.slane %v4004_v8, 2  ;;  %v1398_v8 = vld [vmem:[#allocation6 + $0x438] sm:$0xff] }
 0x1b0   : > { %3506 = vmatprep.subr.mxu1 %v1191_v10  ;;  %3484 = vmatprep.subr.mxu0 %v1204_v39 }
 0x1b1   : > { %3507 = vmatpush3.msra.mxu1 %v1191_v10  ;;  %3485 = vmatpush3.msra.mxu0 %v1204_v39 }
 0x1b2   : > { %3454 = vmatmul.mubr.f32.gmra.mxu1 %v947_v61  ;;  %3508 = vmatprep.subr.mxu1 %v1190_v11 }
 0x1b3   : > { %3456 = vmatprep.mubr.msk.f32.mxu1 %vm4215_vm0, %v4214_v0  ;;  %3509 = vmatpush3.msra.mxu1 %v1190_v11 }
 0x1b4   : > { %3510 = vmatprep.subr.mxu1 %v1189_v15  ;;  %3486 = vmatprep.subr.mxu0 %v1203_v40 }
 0x1b5   : > { %3511 = vmatpush3.msra.mxu1 %v1189_v15  ;;  %3487 = vmatpush3.msra.mxu0 %v1203_v40  ;;  %v1137_v15 = vadd.s32 4294967286, %v4579_v4 }
 0x1b6   : > { %3457 = vmatmul.mubr.f32.gmra.mxu1 %v948_v48  ;;  %3512 = vmatprep.subr.mxu1 %v1188_v17 }
 0x1b7   : > { %3459 = vmatprep.mubr.msk.f32.mxu1 %vm4215_vm0, %v4214_v0  ;;  %3513 = vmatpush3.msra.mxu1 %v1188_v17  ;;  %vm1142_vm12 = vcmp.ge.s32.totalorder %v1137_v15, 0  ;;  %v1393_v15 = vld [vmem:[#allocation6 + $0x410] sm:$0xff] }
 0x1b8   : > { %3514 = vmatprep.subr.mxu1 %v1187_v20  ;;  %3488 = vmatprep.subr.mxu0 %v1202_v41 }
 0x1b9   : > { %3515 = vmatpush3.msra.mxu1 %v1187_v20  ;;  %3489 = vmatpush3.msra.mxu0 %v1202_v41  ;;  %v1086_v20 = vrot.slane %v4005_v18, 2 }
 0x1ba   : > { %3460 = vmatmul.mubr.f32.gmra.mxu1 %v949_v49  ;;  %3516 = vmatprep.subr.mxu1 %v1186_v22 }
 0x1bb   : > { %3532 = vmatprep.mubr.f32.mxu1 %v4214_v0  ;;  %3517 = vmatpush3.msra.mxu1 %v1186_v22 }
 0x1bc   : > { %3518 = vmatprep.subr.mxu1 %v1185_v24  ;;  %3490 = vmatprep.subr.mxu0 %v1201_v42 }
 0x1bd   : > { %3519 = vmatpush3.msra.mxu1 %v1185_v24  ;;  %3491 = vmatpush3.msra.mxu0 %v1201_v42 }
 0x1be   : > { %3520 = vmatprep.subr.mxu1 %v1184_v28  ;;  %3492 = vmatprep.subr.mxu0 %v1200_v43 }
 0x1bf   : > { %3521 = vmatpush3.msra.mxu1 %v1184_v28  ;;  %3493 = vmatpush3.msra.mxu0 %v1200_v43  ;;  %v1087_v28 = vsel %vm1080_vm11, %v1084_v9, %v1086_v20 }
 0x1c0   : > { %3522 = vmatprep.subr.mxu1 %v1183_v31  ;;  %3538 = vmatprep.subr.mxu0 %v4642_v44 }
 0x1c1   : > { %3523 = vmatpush3.msra.mxu1 %v1183_v31  ;;  %v4006_v31 = vld [vmem:[%s4369_s29 + $0x20] sm:$0xff]  ;;  %s4123_s29 = sshll.u32 %s4216_s19, 4  ;;  %s4124_s29 = int_to_ptr.vmem [resolvable:$false] %s4123_s29 }
 0x1c2   : > { %3524 = vmatprep.subr.mxu1 %v1182_v32  ;;  %s4125_s30 = scalar_lea.vmem %s4124_s29, 512  ;;  %p4126_p1 = scmp.lt.s32.totalorder %s4765_s16, %s4124_s29 }
 0x1c3   : > { %3525 = vmatpush3.msra.mxu1 %v1182_v32  ;;  %p4127_p10 = scmp.lt.s32.totalorder %s4125_s30, %s4119_s11 }
 0x1c4   : > { %3526 = vmatprep.subr.mxu1 %v1181_v34 }
 0x1c5   : > { %3527 = vmatpush3.msra.mxu1 %v1181_v34  ;;  %p4128_p2 = por %p4127_p10, %p4126_p1 }
 0x1c6   : > { %3528 = vmatprep.subr.mxu1 %v1180_v36 }
 0x1c7   : > { %3529 = vmatpush3.msra.mxu1 %v1180_v36  ;;  %p4129_p5 = pnand %p4128_p2, %p4122_p12 }
 0x1c8   : > { %3530 = vmatprep.subr.mxu1 %v1179_v38 }
 0x1c9   : > { %3531 = vmatpush3.msra.mxu1 %v1179_v38  ;;  %v1139_v38 = vadd.s32 4294967286, %v4583_v19 }
 0x1cb   : > { %vm1149_vm1 = vcmp.lt.s32.totalorder %v1139_v38, 16  ;;  %v1569_v38 = vld [vmem:[#allocation6 + $0x498] sm:$0xff] }
 0x241   : > { %v926_v45 = vpop.f32.mrf.mxu0 }
 0x243   : > { %v3405_v46 = vpop.f32.mrf.mxu0 }
 0x245   : > { %v931_v47 = vpop.f32.mrf.mxu0 }
 0x247   : > { %v3408_v48 = vpop.f32.mrf.mxu0 }
 0x249   : > { %v936_v50 = vpop.f32.mrf.mxu0 }
 0x24a   : > { %v831_v49 = vpop.f32.mrf.mxu1 }
 0x24b   : > { %v3411_v52 = vpop.f32.mrf.mxu0  ;;  %v922_v63 = vadd.f32 %v4633_v1, %v831_v49  ;;  %v1085_v1 = vsel %vm1080_vm11, %v1082_v26, %v1084_v9  ;;  %v1397_v9 = vld [vmem:[#allocation6 + $0x430] sm:$0xff] }
 0x24c   : > { %v3355_v51 = vpop.f32.mrf.mxu1 }
 0x24d   : > { %v941_v55 = vpop.f32.mrf.mxu0 }
 0x24e   : > { %v836_v53 = vpop.f32.mrf.mxu1 }
 0x24f   : > { %v3414_v57 = vpop.f32.mrf.mxu0  ;;  %v927_v10 = vadd.f32 %v926_v45, %v836_v53 }
 0x250   : > { %v3358_v54 = vpop.f32.mrf.mxu1  ;;  %v1405_v57 = vld [vmem:[#allocation6 + $0x470] sm:$0xff] }
 0x252   : > { %v841_v56 = vpop.f32.mrf.mxu1 }
 0x253   : > { %v932_v22 = vadd.f32 %v931_v47, %v841_v56 }
 0x254   : > { %v3361_v58 = vpop.f32.mrf.mxu1 }
 0x255   : > { %v1404_v58 = vld [vmem:[#allocation6 + $0x468] sm:$0xff] }
 0x256   : > { %v846_v59 = vpop.f32.mrf.mxu1 }
 0x257   : > { %v937_v4 = vadd.f32 %v936_v50, %v846_v59  ;;  %v1403_v59 = vld [vmem:[#allocation6 + $0x460] sm:$0xff] }
 0x258   : > { %v3364_v60 = vpop.f32.mrf.mxu1 }
 0x25a   : > { %v851_v61 = vpop.f32.mrf.mxu1 }
 0x25c   : > { %v3367_v62 = vpop.f32.mrf.mxu1 }
 0x26a   : > { %v1033_v3 = vpop.f32.mrf.mxu1 }
 0x26b   : > { %v1057_v6 = vadd.f32 %v1033_v3, %v922_v63  ;;  %v1402_v3 = vld [vmem:[#allocation6 + $0x458] sm:$0xff] }
 0x26c   : > { %v3449_v7 = vpop.f32.mrf.mxu1 }
 0x26d   : > { %v1070_v11 = vadd.f32 %v2807_v5, %v1057_v6  ;;  %v1400_v6 = vld [vmem:[#allocation6 + $0x448] sm:$0xff]  ;;  %v1399_v7 = vld [vmem:[#allocation6 + $0x440] sm:$0xff] }
 0x26e   : > { %v1038_v14 = vpop.f32.mrf.mxu1 }
 0x26f   : > { %v1095_v16 = vadd.f32 %v4640_v29, %v1070_v11  ;;  %v1058_v17 = vadd.f32 %v1038_v14, %v927_v10  ;;  %v1088_v29 = vrot.slane %v4006_v31, 2  ;;  %v1396_v10 = vld [vmem:[#allocation6 + $0x428] sm:$0xff]  ;;  %v1395_v11 = vld [vmem:[#allocation6 + $0x420] sm:$0xff]  ;;  %v1394_v14 = vld [vmem:[#allocation6 + $0x418] sm:$0xff] }
 0x270   : > { %v3452_v21 = vpop.f32.mrf.mxu1  ;;  %v1576_v31 = vld [vmem:[#allocation6 + $0x4d0] sm:$0xff] }
 0x271   : > { %v1071_v23 = vadd.f32 %v2807_v5, %v1058_v17  ;;  %v1900_v12 = vrot.slane %v1095_v16, 4  ;;  %v1089_v40 = vsel %vm1080_vm11, %v1086_v20, %v1088_v29  ;;  %v1392_v16 = vld [vmem:[#allocation6 + $0x408] sm:$0xff]  ;;  %v1391_v17 = vld [vmem:[#allocation6 + $0x400] sm:$0xff]  ;;  %v1602_v21 = vld [vmem:[#allocation6 + $0x578] sm:$0xff] }
 0x272   : > { %v1043_v24 = vpop.f32.mrf.mxu1  ;;  %3576 = vmatprep.subr.mxu1 %v1602_v21  ;;  %v1575_v29 = vld [vmem:[#allocation6 + $0x4c8] sm:$0xff] }
 0x273   : > { %v1096_v25 = vadd.f32 %v1085_v1, %v1071_v23  ;;  %v1059_v27 = vadd.f32 %v1043_v24, %v932_v22  ;;  %v1581_v1 = vld [vmem:[#allocation6 + $0x4f8] sm:$0xff]  ;;  %v1580_v22 = vld [vmem:[#allocation6 + $0x4f0] sm:$0xff]  ;;  %v1579_v24 = vld [vmem:[#allocation6 + $0x4e8] sm:$0xff] }
 0x274   : > { %v3455_v30 = vpop.f32.mrf.mxu1  ;;  %v1601_v23 = vld [vmem:[#allocation6 + $0x570] sm:$0xff] }
 0x275   : > { %vm1112_vm14 = vcmp.ge.f32.partialorder %v1096_v25, 0.0  ;;  %v1117_v32 = vmul.f32 0.1, %v1096_v25  ;;  %v1072_v13 = vadd.f32 %v2807_v5, %v1059_v27  ;;  %v1901_v33 = vrot.slane %v1096_v25, 4  ;;  %v1578_v27 = vld [vmem:[#allocation6 + $0x4e0] sm:$0xff]  ;;  %v1598_v30 = vld [vmem:[#allocation6 + $0x558] sm:$0xff] }
 0x276   : > { %v1048_v26 = vpop.f32.mrf.mxu1 }
 0x277   : > { %v1122_v34 = vsel %vm1112_vm14, %v1096_v25, %v1117_v32  ;;  %v1097_v35 = vadd.f32 %v1087_v28, %v1072_v13  ;;  %v1060_v36 = vadd.f32 %v1048_v26, %v937_v4  ;;  %v4656_v37 = vsel %vm1899_vm13, %v1900_v12, %v1901_v33  ;;  %v1600_v25 = vld [vmem:[#allocation6 + $0x568] sm:$0xff]  ;;  %v1599_v28 = vld [vmem:[#allocation6 + $0x560] sm:$0xff]  ;;  %v1577_v4 = vld [vmem:[#allocation6 + $0x4d8] sm:$0xff] }
 0x278   : > { %v1157_v39 = vsel %vm1142_vm12, %v1122_v34, 0.0  ;;  %v3458_v41 = vpop.f32.mrf.mxu1  ;;  %4009 = vmatmul.mubr.msk.f32.vlgmr.msra.gmra.mxu1 %vm1142_vm12, %v1122_v34  ;;  %v1574_v12 = vld [vmem:[#allocation6 + $0x4c0] sm:$0xff]  ;;  %v1573_v32 = vld [vmem:[#allocation6 + $0x4b8] sm:$0xff]  ;;  %v1572_v13 = vld [vmem:[#allocation6 + $0x4b0] sm:$0xff] }
 0x279   : > { %1162 = vst [vmem:[#allocation3 + $0x8] sm:$0xff] %v1157_v39  ;;  %vm1113_vm15 = vcmp.ge.f32.partialorder %v1097_v35, 0.0  ;;  %v1118_v42 = vmul.f32 0.1, %v1097_v35  ;;  %v1073_v43 = vadd.f32 %v2807_v5, %v1060_v36  ;;  %v1903_v45 = vrot.slane %v1097_v35, 4  ;;  %3577 = vmatpush3.msra.mxu1 %v1602_v21  ;;  %v1571_v26 = vld [vmem:[#allocation6 + $0x4a8] sm:$0xff] }
 0x27a   : > { %v1053_v46 = vpop.f32.mrf.mxu1  ;;  %3578 = vmatprep.subr.mxu1 %v1601_v23  ;;  %v1596_v34 = vld [vmem:[#allocation6 + $0x548] sm:$0xff]  ;;  %v1595_v36 = vld [vmem:[#allocation6 + $0x540] sm:$0xff]  ;;  %v1594_v39 = vld [vmem:[#allocation6 + $0x538] sm:$0xff] }
 0x27b   : > { %v1123_v47 = vsel %vm1113_vm15, %v1097_v35, %v1118_v42  ;;  %v1098_v48 = vadd.f32 %v1089_v40, %v1073_v43  ;;  %v4663_v49 = vsel %vm1899_vm13, %v1901_v33, %v1903_v45  ;;  %3579 = vmatpush3.msra.mxu1 %v1601_v23  ;;  %v1597_v33 = vld [vmem:[#allocation6 + $0x550] sm:$0xff]  ;;  %v1570_v35 = vld [vmem:[#allocation6 + $0x4a0] sm:$0xff]  ;;  %v1567_v42 = vld [vmem:[#allocation6 + $0x488] sm:$0xff] }
 0x27c   : > { %1163 = vst [vmem:[#allocation3 + $0x10] sm:$0xff] %v1123_v47  ;;  %3535 = vmatprep.mubr.f32.mxu1 %v1123_v47  ;;  %v3461_v19 = vpop.f32.mrf.mxu1  ;;  %3580 = vmatprep.subr.mxu1 %v1600_v25  ;;  %v1568_v40 = vld [vmem:[#allocation6 + $0x490] sm:$0xff]  ;;  %v1592_v43 = vld [vmem:[#allocation6 + $0x528] sm:$0xff]  ;;  %v1591_v46 = vld [vmem:[#allocation6 + $0x520] sm:$0xff] }
 0x27d   : > { %vm1114_vm2 = vcmp.ge.f32.partialorder %v1098_v48, 0.0  ;;  %v1119_v50 = vmul.f32 0.1, %v1098_v48  ;;  %v1905_v51 = vrot.slane %v1098_v48, 4  ;;  %3581 = vmatpush3.msra.mxu1 %v1600_v25  ;;  %v1593_v41 = vld [vmem:[#allocation6 + $0x530] sm:$0xff]  ;;  %v1590_v47 = vld [vmem:[#allocation6 + $0x518] sm:$0xff] }
 0x27e   : > { %3582 = vmatprep.subr.mxu1 %v1599_v28  ;;  %v1588_v19 = vld [vmem:[#allocation6 + $0x508] sm:$0xff] }
 0x27f   : > { %v1124_v52 = vsel %vm1114_vm2, %v1098_v48, %v1119_v50  ;;  %v4666_v53 = vsel %vm1899_vm13, %v1903_v45, %v1905_v51  ;;  %3583 = vmatpush3.msra.mxu1 %v1599_v28  ;;  %v1566_v45 = vld [vmem:[#allocation6 + $0x480] sm:$0xff]  ;;  %v1589_v48 = vld [vmem:[#allocation6 + $0x510] sm:$0xff]  ;;  %v1793_v51 = vld [vmem:[#allocation6 + $0x5f8] sm:$0xff] }
 0x280   : > { %v1159_v54 = vsel %vm1149_vm1, %v1124_v52, 0.0  ;;  %v1195_v55 = vld [vmem:[#allocation3 + $0x3] sm:$0xff]  ;;  %3584 = vmatprep.subr.mxu1 %v1598_v30 }
 0x281   : > { %1164 = vst [vmem:[#allocation3 + $0x18] sm:$0xff] %v1159_v54  ;;  %3494 = vmatprep.mubr.f32.mxu0 %v1195_v55  ;;  %v1386_v5 = vld [vmem:[#allocation3 + $0x6] sm:$0xff]  ;;  %3585 = vmatpush3.msra.mxu1 %v1598_v30 }
 0x282   : > { %3586 = vmatprep.subr.mxu1 %v1597_v33  ;;  %v1587_v50 = vld [vmem:[#allocation6 + $0x500] sm:$0xff] }
 0x283   : > { %v1196_v56 = vld [vmem:[#allocation3 + $0xb] sm:$0xff]  ;;  %3587 = vmatpush3.msra.mxu1 %v1597_v33 }
 0x284   : > { %3495 = vmatmul.mubr.f32.vlgmr.msra.gmra.mxu0 %v1196_v56  ;;  %v1387_v18 = vld [vmem:[#allocation3 + $0xe] sm:$0xff]  ;;  %3588 = vmatprep.subr.mxu1 %v1596_v34 }
 0x285   : > { %3539 = vmatpush3.msra.mxu0 %v4642_v44  ;;  %v1401_v44 = vld [vmem:[#allocation6 + $0x450] sm:$0xff]  ;;  %3589 = vmatpush3.msra.mxu1 %v1596_v34  ;;  %v1791_v33 = vld [vmem:[#allocation6 + $0x5e8] sm:$0xff] }
 0x286   : > { %3540 = vmatprep.subr.mxu0 %v1405_v57  ;;  %3590 = vmatprep.subr.mxu1 %v1595_v36 }
 0x287   : > { %3541 = vmatpush3.msra.mxu0 %v1405_v57  ;;  %3591 = vmatpush3.msra.mxu1 %v1595_v36  ;;  %v1788_v36 = vld [vmem:[#allocation6 + $0x5d0] sm:$0xff] }
 0x288   : > { %3542 = vmatprep.subr.mxu0 %v1404_v58  ;;  %v1197_v60 = vld [vmem:[#allocation3 + $0x13] sm:$0xff]  ;;  %v1198_v62 = vld [vmem:[#allocation3 + $0x1b] sm:$0x3f]  ;;  %3592 = vmatprep.subr.mxu1 %v1594_v39 }
 0x289   : > { %v1177_v61 = vld [vmem:[#allocation3 + $0x18] sm:$0x3f]  ;;  %3543 = vmatpush3.msra.mxu0 %v1404_v58  ;;  %3497 = vmatprep.mubr.f32.mxu0 %v1197_v60  ;;  %v1389_v20 = vld [vmem:[#allocation3 + $0x1e] sm:$0x3f] }
 0x28a   : > { %v1388_v63 = vld [vmem:[#allocation3 + $0x16] sm:$0xff]  ;;  %3536 = vmatmul.mubr.f32.gmra.mxu1 %v1177_v61  ;;  %3544 = vmatprep.subr.mxu0 %v1403_v59 }
 0x28b   : > { %1553 = vst [vmem:[#allocation3 + $0x18] sm:$0x3f] %v4214_v0  ;;  %3498 = vmatmul.mubr.f32.gmra.mxu0 %v1198_v62  ;;  %3593 = vmatpush3.msra.mxu1 %v1594_v39  ;;  %v2808_v62 = vld [vmem:[#allocation9 + $0x2] ss:$0 sm:$0xff] }
 0x28c   : > { %3545 = vmatpush3.msra.mxu0 %v1403_v59  ;;  %3570 = vmatprep.mubr.f32.mxu0 %v1386_v5  ;;  %v1786_v39 = vld [vmem:[#allocation6 + $0x5c0] sm:$0xff] }
 0x28d   : > { %3546 = vmatprep.subr.mxu0 %v1402_v3  ;;  %3594 = vmatprep.subr.mxu1 %v1593_v41 }
 0x28e   : > { %3547 = vmatpush3.msra.mxu0 %v1402_v3  ;;  %3595 = vmatpush3.msra.mxu1 %v1593_v41  ;;  %v1784_v41 = vld [vmem:[#allocation6 + $0x5b0] sm:$0xff] }
 0x28f   : > { %3548 = vmatprep.subr.mxu0 %v1401_v44  ;;  %3596 = vmatprep.subr.mxu1 %v1592_v43 }
 0x290   : > { %3549 = vmatpush3.msra.mxu0 %v1401_v44  ;;  %3597 = vmatpush3.msra.mxu1 %v1592_v43  ;;  %v1782_v43 = vld [vmem:[#allocation6 + $0x5a0] sm:$0xff] }
 0x291   : > { %3550 = vmatprep.subr.mxu0 %v1400_v6  ;;  %3598 = vmatprep.subr.mxu1 %v1591_v46 }
 0x292   : > { %3551 = vmatpush3.msra.mxu0 %v1400_v6  ;;  %3599 = vmatpush3.msra.mxu1 %v1591_v46  ;;  %v1530_v6 = vadd.s32 4294967289, %v4576_v2  ;;  %v1780_v46 = vld [vmem:[#allocation6 + $0x590] sm:$0xff] }
 0x293   : > { %3552 = vmatprep.subr.mxu0 %v1399_v7  ;;  %3600 = vmatprep.subr.mxu1 %v1590_v47 }
 0x294   : > { %3553 = vmatpush3.msra.mxu0 %v1399_v7  ;;  %3601 = vmatpush3.msra.mxu1 %v1590_v47  ;;  %v4673_v7 = vadd.s32 16, %v4576_v2  ;;  %vm1534_vm4 = vcmp.ge.s32.totalorder %v1530_v6, 0  ;;  %v1779_v47 = vld [vmem:[#allocation6 + $0x588] sm:$0xff] }
 0x295   : > { %3554 = vmatprep.subr.mxu0 %v1398_v8  ;;  %3602 = vmatprep.subr.mxu1 %v1589_v48  ;;  %v2009_v6 = vld [vmem:[#allocation6 + $0x6c8] sm:$0xff] }
 0x296   : > { %3555 = vmatpush3.msra.mxu0 %v1398_v8  ;;  %3603 = vmatpush3.msra.mxu1 %v1589_v48  ;;  %v1778_v48 = vld [vmem:[#allocation6 + $0x580] sm:$0xff] }
 0x297   : > { %3556 = vmatprep.subr.mxu0 %v1397_v9  ;;  %3604 = vmatprep.subr.mxu1 %v1588_v19 }
 0x298   : > { %3557 = vmatpush3.msra.mxu0 %v1397_v9  ;;  %3605 = vmatpush3.msra.mxu1 %v1588_v19 }
 0x299   : > { %3558 = vmatprep.subr.mxu0 %v1396_v10  ;;  %3606 = vmatprep.subr.mxu1 %v1587_v50 }
 0x29a   : > { %3559 = vmatpush3.msra.mxu0 %v1396_v10  ;;  %3607 = vmatpush3.msra.mxu1 %v1587_v50  ;;  %v2015_v50 = vld [vmem:[#allocation6 + $0x6f8] sm:$0xff] }
 0x29b   : > { %3560 = vmatprep.subr.mxu0 %v1395_v11  ;;  %3652 = vmatprep.subr.mxu1 %v1793_v51 }
 0x29c   : > { %3561 = vmatpush3.msra.mxu0 %v1395_v11 }
 0x29d   : > { %3562 = vmatprep.subr.mxu0 %v1394_v14 }
 0x29e   : > { %3563 = vmatpush3.msra.mxu0 %v1394_v14 }
 0x29f   : > { %3564 = vmatprep.subr.mxu0 %v1393_v15 }
 0x2a0   : > { %3565 = vmatpush3.msra.mxu0 %v1393_v15 }
 0x2a1   : > { %3566 = vmatprep.subr.mxu0 %v1392_v16 }
 0x2a2   : > { %3567 = vmatpush3.msra.mxu0 %v1392_v16 }
 0x2a3   : > { %3568 = vmatprep.subr.mxu0 %v1391_v17 }
 0x2a4   : > { %3569 = vmatpush3.msra.mxu0 %v1391_v17  ;;  %v1532_v17 = vadd.s32 4294967289, %v4673_v7 }
 0x2a5   : > { %3571 = vmatmul.mubr.f32.vlgmr.msra.gmra.mxu0 %v1387_v18  ;;  %3614 = vmatprep.subr.mxu0 %v1581_v1 }
 0x2a6   : > { %3573 = vmatprep.mubr.f32.mxu0 %v1388_v63  ;;  %3615 = vmatpush3.msra.mxu0 %v1581_v1  ;;  %vm1540_vm7 = vcmp.lt.s32.totalorder %v1532_v17, 16  ;;  %v2005_v17 = vld [vmem:[#allocation6 + $0x6a8] sm:$0xff] }
 0x2a7   : > { %3616 = vmatprep.subr.mxu0 %v1580_v22 }
 0x2a8   : > { %3617 = vmatpush3.msra.mxu0 %v1580_v22 }
 0x2a9   : > { %3574 = vmatmul.mubr.f32.gmra.mxu0 %v1389_v20  ;;  %3618 = vmatprep.subr.mxu0 %v1579_v24 }
 0x2aa   : > { %3619 = vmatpush3.msra.mxu0 %v1579_v24 }
 0x2ab   : > { %3620 = vmatprep.subr.mxu0 %v1578_v27 }
 0x2ac   : > { %3621 = vmatpush3.msra.mxu0 %v1578_v27  ;;  %v1564_v27 = vld [vmem:[#allocation3 + $0x18] sm:$0xf] }
 0x2ad   : > { %3622 = vmatprep.subr.mxu0 %v1577_v4 }
 0x2ae   : > { %3623 = vmatpush3.msra.mxu0 %v1577_v4 }
 0x2af   : > { %3624 = vmatprep.subr.mxu0 %v1576_v31 }
 0x2b0   : > { %3625 = vmatpush3.msra.mxu0 %v1576_v31 }
 0x2b1   : > { %3626 = vmatprep.subr.mxu0 %v1575_v29 }
 0x2b2   : > { %3627 = vmatpush3.msra.mxu0 %v1575_v29  ;;  %v1792_v29 = vld [vmem:[#allocation6 + $0x5f0] sm:$0xff] }
 0x2b3   : > { %3628 = vmatprep.subr.mxu0 %v1574_v12 }
 0x2b4   : > { %3629 = vmatpush3.msra.mxu0 %v1574_v12  ;;  %v1585_v12 = vld [vmem:[#allocation3 + $0x19] sm:$0xf] }
 0x2b5   : > { %3630 = vmatprep.subr.mxu0 %v1573_v32 }
 0x2b6   : > { %3631 = vmatpush3.msra.mxu0 %v1573_v32 }
 0x2b7   : > { %3632 = vmatprep.subr.mxu0 %v1572_v13 }
 0x2b8   : > { %3633 = vmatpush3.msra.mxu0 %v1572_v13  ;;  %v1776_v13 = vld [vmem:[#allocation3 + $0x1a] sm:$0xf] }
 0x2b9   : > { %3634 = vmatprep.subr.mxu0 %v1571_v26 }
 0x2ba   : > { %3635 = vmatpush3.msra.mxu0 %v1571_v26  ;;  %v1790_v26 = vld [vmem:[#allocation6 + $0x5e0] sm:$0xff] }
 0x2bb   : > { %3636 = vmatprep.subr.mxu0 %v1570_v35 }
 0x2bc   : > { %3637 = vmatpush3.msra.mxu0 %v1570_v35  ;;  %v1789_v35 = vld [vmem:[#allocation6 + $0x5d8] sm:$0xff] }
 0x2bd   : > { %3638 = vmatprep.subr.mxu0 %v1569_v38 }
 0x2be   : > { %3639 = vmatpush3.msra.mxu0 %v1569_v38  ;;  %v1787_v38 = vld [vmem:[#allocation6 + $0x5c8] sm:$0xff] }
 0x2bf   : > { %3640 = vmatprep.subr.mxu0 %v1568_v40 }
 0x2c0   : > { %3641 = vmatpush3.msra.mxu0 %v1568_v40  ;;  %v1785_v40 = vld [vmem:[#allocation6 + $0x5b8] sm:$0xff] }
 0x2c1   : > { %3642 = vmatprep.subr.mxu0 %v1567_v42 }
 0x2c2   : > { %3643 = vmatpush3.msra.mxu0 %v1567_v42  ;;  %v1783_v42 = vld [vmem:[#allocation6 + $0x5a8] sm:$0xff] }
 0x2c3   : > { %3644 = vmatprep.subr.mxu0 %v1566_v45 }
 0x2c4   : > { %3645 = vmatpush3.msra.mxu0 %v1566_v45  ;;  %v1781_v45 = vld [vmem:[#allocation6 + $0x598] sm:$0xff] }
 0x2c5   : > { %3690 = vmatprep.subr.mxu0 %v4214_v0 }
 0x338   : > { %v3534_v52 = vpop.f32.mrf.mxu1 }
 0x33a   : > { %v1367_v55 = vpop.f32.mrf.mxu1 }
 0x344   : > { %v3496_v54 = vpop.f32.mrf.mxu0 }
 0x345   : > { %v1373_v60 = vadd.f32 %v3534_v52, %v3496_v54  ;;  %v2014_v52 = vld [vmem:[#allocation6 + $0x6f0] sm:$0xff] }
 0x346   : > { %v1282_v56 = vpop.f32.mrf.mxu0  ;;  %v1994_v54 = vld [vmem:[#allocation6 + $0x670] sm:$0xff] }
 0x347   : > { %v1368_v63 = vadd.f32 %v1367_v55, %v1282_v56  ;;  %v1993_v55 = vld [vmem:[#allocation6 + $0x668] sm:$0xff]  ;;  %v1992_v56 = vld [vmem:[#allocation6 + $0x660] sm:$0xff] }
 0x34a   : > { %v3537_v57 = vpop.f32.mrf.mxu1 }
 0x34b   : > { %v3499_v58 = vpop.f32.mrf.mxu0  ;;  %v1991_v57 = vld [vmem:[#allocation6 + $0x658] sm:$0xff] }
 0x34c   : > { %v1377_v5 = vpop.f32.mrf.mxu1  ;;  %v2013_v58 = vld [vmem:[#allocation6 + $0x6e8] sm:$0xff] }
 0x34d   : > { %v1292_v59 = vpop.f32.mrf.mxu0 }
 0x34e   : > { %v1378_v11 = vadd.f32 %v1377_v5, %v1292_v59  ;;  %v1990_v59 = vld [vmem:[#allocation6 + $0x650] sm:$0xff] }
 0x34f   : > { %v2010_v5 = vld [vmem:[#allocation6 + $0x6d0] sm:$0xff] }
 0x365   : > { %v3572_v61 = vpop.f32.mrf.mxu0 }
 0x366   : > { %v1493_v3 = vadd.f32 %v3572_v61, %v1373_v60  ;;  %v2012_v60 = vld [vmem:[#allocation6 + $0x6e0] sm:$0xff]  ;;  %v1989_v61 = vld [vmem:[#allocation6 + $0x648] sm:$0xff] }
 0x367   : > { %v1473_v44 = vpop.f32.mrf.mxu0 }
 0x368   : > { %v1505_v8 = vadd.f32 %v2808_v62, %v1493_v3  ;;  %v1492_v9 = vadd.f32 %v1473_v44, %v1368_v63  ;;  %v1988_v63 = vld [vmem:[#allocation6 + $0x640] sm:$0xff]  ;;  %v1987_v3 = vld [vmem:[#allocation6 + $0x638] sm:$0xff]  ;;  %v1986_v44 = vld [vmem:[#allocation6 + $0x630] sm:$0xff] }
 0x369   : > { %v3575_v10 = vpop.f32.mrf.mxu0 }
 0x36a   : > { %vm1510_vm3 = vcmp.ge.f32.partialorder %v1505_v8, 0.0  ;;  %v1514_v14 = vmul.f32 0.1, %v1505_v8  ;;  %v1504_v15 = vadd.f32 %v2808_v62, %v1492_v9  ;;  %v2008_v9 = vld [vmem:[#allocation6 + $0x6c0] sm:$0xff] }
 0x36b   : > { %v1483_v16 = vpop.f32.mrf.mxu0  ;;  %v1984_v10 = vld [vmem:[#allocation6 + $0x620] sm:$0xff] }
 0x36c   : > { %v1518_v18 = vsel %vm1510_vm3, %v1505_v8, %v1514_v14  ;;  %vm1509_vm5 = vcmp.ge.f32.partialorder %v1504_v15, 0.0  ;;  %v1513_v20 = vmul.f32 0.1, %v1504_v15  ;;  %v1494_v1 = vadd.f32 %v1483_v16, %v1378_v11  ;;  %v1985_v8 = vld [vmem:[#allocation6 + $0x628] sm:$0xff]  ;;  %v2007_v11 = vld [vmem:[#allocation6 + $0x6b8] sm:$0xff]  ;;  %v1982_v16 = vld [vmem:[#allocation6 + $0x610] sm:$0xff] }
 0x36d   : > { %1551 = vst [vmem:[#allocation3 + $0x8] sm:$0xff] %v1518_v18  ;;  %v1983_v14 = vld [vmem:[#allocation6 + $0x618] sm:$0xff] }
 0x36e   : > { %v1517_v21 = vsel %vm1509_vm5, %v1504_v15, %v1513_v20  ;;  %v1506_v22 = vadd.f32 %v2808_v62, %v1494_v1  ;;  %v2011_v62 = vld [vmem:[#allocation6 + $0x6d8] sm:$0xff]  ;;  %v2006_v15 = vld [vmem:[#allocation6 + $0x6b0] sm:$0xff]  ;;  %v2004_v20 = vld [vmem:[#allocation6 + $0x6a0] sm:$0xff] }
 0x36f   : > { %v1546_v23 = vsel %vm1534_vm4, %v1517_v21, 0.0  ;;  %4010 = vmatprep.mubr.msk.f32.mxu0 %vm1534_vm4, %v1517_v21  ;;  %v1980_v1 = vld [vmem:[#allocation6 + $0x600] sm:$0xff]  ;;  %v2003_v21 = vld [vmem:[#allocation6 + $0x698] sm:$0xff] }
 0x370   : > { %1550 = vst [vmem:[#allocation3] sm:$0xff] %v1546_v23  ;;  %vm1511_vm6 = vcmp.ge.f32.partialorder %v1506_v22, 0.0  ;;  %v1515_v24 = vmul.f32 0.1, %v1506_v22  ;;  %3647 = vmatmul.mubr.f32.vlgmr.msra.gmra.mxu0 %v1518_v18  ;;  %v1981_v18 = vld [vmem:[#allocation6 + $0x608] sm:$0xff] }
 0x371   : > { %3691 = vmatpush3.msra.mxu0 %v2015_v50  ;;  %v2001_v23 = vld [vmem:[#allocation6 + $0x688] sm:$0xff] }
 0x372   : > { %v1519_v25 = vsel %vm1511_vm6, %v1506_v22, %v1515_v24  ;;  %3692 = vmatprep.subr.mxu0 %v4214_v0  ;;  %v2002_v22 = vld [vmem:[#allocation6 + $0x690] sm:$0xff]  ;;  %v2000_v24 = vld [vmem:[#allocation6 + $0x680] sm:$0xff] }
 0x373   : > { %v1548_v28 = vsel %vm1540_vm7, %v1519_v25, 0.0  ;;  %4011 = vmatprep.mubr.msk.f32.mxu0 %vm1540_vm7, %v1519_v25  ;;  %3693 = vmatpush3.msra.mxu0 %v2014_v52 }
 0x374   : > { %1552 = vst [vmem:[#allocation3 + $0x10] sm:$0xff] %v1548_v28  ;;  %3650 = vmatmul.mubr.f32.gmra.mxu0 %v1564_v27  ;;  %3694 = vmatprep.subr.mxu0 %v4214_v0 }
 0x375   : > { %3722 = vmatprep.mubr.msk.f32.mxu0 %vm4215_vm0, %v4214_v0  ;;  %3695 = vmatpush3.msra.mxu0 %v2013_v58 }
 0x376   : > { %3696 = vmatprep.subr.mxu0 %v4214_v0 }
 0x377   : > { %v1582_v4 = vld [vmem:[#allocation3 + $0x1] sm:$0xff]  ;;  %3697 = vmatpush3.msra.mxu0 %v2012_v60 }
 0x378   : > { %3608 = vmatprep.mubr.f32.mxu1 %v1582_v4  ;;  %v1773_v34 = vld [vmem:[#allocation3 + $0x2] sm:$0xff]  ;;  %3698 = vmatprep.subr.mxu0 %v4214_v0 }
 0x379   : > { %3699 = vmatpush3.msra.mxu0 %v2011_v62 }
 0x37a   : > { %3700 = vmatprep.subr.mxu0 %v4214_v0 }
 0x37b   : > { %v1583_v30 = vld [vmem:[#allocation3 + $0x9] sm:$0xff]  ;;  %v1584_v31 = vld [vmem:[#allocation3 + $0x11] sm:$0xff]  ;;  %3701 = vmatpush3.msra.mxu0 %v2010_v5 }
 0x37c   : > { %3609 = vmatmul.mubr.f32.vlgmr.msra.gmra.mxu1 %v1583_v30  ;;  %v1775_v32 = vld [vmem:[#allocation3 + $0x12] sm:$0xff]  ;;  %v1774_v19 = vld [vmem:[#allocation3 + $0xa] sm:$0xff]  ;;  %3702 = vmatprep.subr.mxu0 %v4214_v0 }
 0x37d   : > { %3653 = vmatpush3.msra.mxu1 %v1793_v51  ;;  %3611 = vmatprep.mubr.f32.mxu1 %v1584_v31  ;;  %1968 = vst [vmem:[#allocation3 + $0x18] sm:$0xf] %v4214_v0  ;;  %v1995_v51 = vld [vmem:[#allocation6 + $0x678] sm:$0xff]  ;;  %v2193_v5 = vld [vmem:[#allocation6 + $0x768] sm:$0xff] }
 0x37e   : > { %3654 = vmatprep.subr.mxu1 %v1792_v29  ;;  %3703 = vmatpush3.msra.mxu0 %v2009_v6 }
 0x37f   : > { %3655 = vmatpush3.msra.mxu1 %v1792_v29  ;;  %3704 = vmatprep.subr.mxu0 %v4214_v0 }
 0x380   : > { %3656 = vmatprep.subr.mxu1 %v1791_v33  ;;  %3612 = vmatmul.mubr.f32.gmra.mxu1 %v1585_v12 }
 0x381   : > { %3657 = vmatpush3.msra.mxu1 %v1791_v33  ;;  %3684 = vmatprep.mubr.f32.mxu1 %v1773_v34 }
 0x382   : > { %3658 = vmatprep.subr.mxu1 %v1790_v26  ;;  %3705 = vmatpush3.msra.mxu0 %v2008_v9  ;;  %v2191_v9 = vld [vmem:[#allocation6 + $0x758] sm:$0xff] }
 0x383   : > { %3659 = vmatpush3.msra.mxu1 %v1790_v26  ;;  %3706 = vmatprep.subr.mxu0 %v4214_v0 }
 0x384   : > { %3660 = vmatprep.subr.mxu1 %v1789_v35  ;;  %3707 = vmatpush3.msra.mxu0 %v2007_v11  ;;  %v2190_v11 = vld [vmem:[#allocation6 + $0x750] sm:$0xff] }
 0x385   : > { %3661 = vmatpush3.msra.mxu1 %v1789_v35  ;;  %3708 = vmatprep.subr.mxu0 %v4214_v0 }
 0x386   : > { %3662 = vmatprep.subr.mxu1 %v1788_v36  ;;  %3709 = vmatpush3.msra.mxu0 %v2006_v15  ;;  %v2188_v15 = vld [vmem:[#allocation6 + $0x740] sm:$0xff] }
 0x387   : > { %3663 = vmatpush3.msra.mxu1 %v1788_v36  ;;  %3710 = vmatprep.subr.mxu0 %v4214_v0 }
 0x388   : > { %3664 = vmatprep.subr.mxu1 %v1787_v38  ;;  %3711 = vmatpush3.msra.mxu0 %v2005_v17  ;;  %v2186_v17 = vld [vmem:[#allocation6 + $0x730] sm:$0xff] }
 0x389   : > { %3665 = vmatpush3.msra.mxu1 %v1787_v38  ;;  %3712 = vmatprep.subr.mxu0 %v4214_v0 }
 0x38a   : > { %3666 = vmatprep.subr.mxu1 %v1786_v39  ;;  %3713 = vmatpush3.msra.mxu0 %v2004_v20  ;;  %v2184_v20 = vld [vmem:[#allocation6 + $0x720] sm:$0xff] }
 0x38b   : > { %3667 = vmatpush3.msra.mxu1 %v1786_v39  ;;  %3714 = vmatprep.subr.mxu0 %v4214_v0  ;;  %v1945_v39 = vadd.s32 4294967290, %v4576_v2 }
 0x38c   : > { %3668 = vmatprep.subr.mxu1 %v1785_v40  ;;  %3715 = vmatpush3.msra.mxu0 %v2003_v21  ;;  %v2182_v21 = vld [vmem:[#allocation6 + $0x710] sm:$0xff] }
 0x38d   : > { %3669 = vmatpush3.msra.mxu1 %v1785_v40  ;;  %3716 = vmatprep.subr.mxu0 %v4214_v0  ;;  %vm1949_vm9 = vcmp.ge.s32.totalorder %v1945_v39, 0  ;;  %v2340_v39 = vld [vmem:[#allocation6 + $0x7a8] sm:$0xff] }
 0x38e   : > { %3670 = vmatprep.subr.mxu1 %v1784_v41  ;;  %3717 = vmatpush3.msra.mxu0 %v2002_v22  ;;  %v2181_v22 = vld [vmem:[#allocation6 + $0x708] sm:$0xff] }
 0x38f   : > { %3671 = vmatpush3.msra.mxu1 %v1784_v41  ;;  %3718 = vmatprep.subr.mxu0 %v4214_v0 }
 0x390   : > { %3672 = vmatprep.subr.mxu1 %v1783_v42  ;;  %3719 = vmatpush3.msra.mxu0 %v2001_v23  ;;  %v2180_v23 = vld [vmem:[#allocation6 + $0x700] sm:$0xff] }
 0x391   : > { %3673 = vmatpush3.msra.mxu1 %v1783_v42  ;;  %3720 = vmatprep.subr.mxu0 %v4214_v0 }
 0x392   : > { %3674 = vmatprep.subr.mxu1 %v1782_v43  ;;  %3721 = vmatpush3.msra.mxu0 %v2000_v24 }
 0x393   : > { %3675 = vmatpush3.msra.mxu1 %v1782_v43  ;;  %3772 = vmatprep.subr.mxu0 %v4214_v0 }
 0x394   : > { %3676 = vmatprep.subr.mxu1 %v1781_v45 }
 0x395   : > { %3677 = vmatpush3.msra.mxu1 %v1781_v45 }
 0x396   : > { %3678 = vmatprep.subr.mxu1 %v1780_v46 }
 0x397   : > { %3679 = vmatpush3.msra.mxu1 %v1780_v46 }
 0x398   : > { %3680 = vmatprep.subr.mxu1 %v1779_v47 }
 0x399   : > { %3681 = vmatpush3.msra.mxu1 %v1779_v47 }
 0x39a   : > { %3682 = vmatprep.subr.mxu1 %v1778_v48 }
 0x39b   : > { %3683 = vmatpush3.msra.mxu1 %v1778_v48 }
 0x39c   : > { %3685 = vmatmul.mubr.f32.vlgmr.msra.gmra.mxu1 %v1774_v19  ;;  %3731 = vmatprep.subr.mxu1 %v4214_v0 }
 0x39d   : > { %3687 = vmatprep.mubr.f32.mxu1 %v1775_v32  ;;  %3732 = vmatpush3.msra.mxu1 %v1995_v51  ;;  %v1947_v51 = vadd.s32 4294967290, %v4673_v7 }
 0x39e   : > { %3733 = vmatprep.subr.mxu1 %v4214_v0 }
 0x39f   : > { %3734 = vmatpush3.msra.mxu1 %v1994_v54  ;;  %vm1955_vm12 = vcmp.lt.s32.totalorder %v1947_v51, 16  ;;  %v2359_v51 = vld [vmem:[#allocation6 + $0x828] sm:$0xff] }
 0x3a0   : > { %3688 = vmatmul.mubr.f32.gmra.mxu1 %v1776_v13  ;;  %3735 = vmatprep.subr.mxu1 %v4214_v0  ;;  %v2809_v13 = vld [vmem:[#allocation9 + $0x3] ss:$0 sm:$0xff] }
 0x3a1   : > { %3763 = vmatprep.mubr.msk.f32.mxu1 %vm4215_vm0, %v4214_v0  ;;  %3736 = vmatpush3.msra.mxu1 %v1993_v55 }
 0x3a2   : > { %3737 = vmatprep.subr.mxu1 %v4214_v0 }
 0x3a3   : > { %3738 = vmatpush3.msra.mxu1 %v1992_v56 }
 0x3a4   : > { %3739 = vmatprep.subr.mxu1 %v4214_v0 }
 0x3a5   : > { %3740 = vmatpush3.msra.mxu1 %v1991_v57 }
 0x3a6   : > { %3741 = vmatprep.subr.mxu1 %v4214_v0 }
 0x3a7   : > { %3742 = vmatpush3.msra.mxu1 %v1990_v59 }
 0x3a8   : > { %3743 = vmatprep.subr.mxu1 %v4214_v0 }
 0x3a9   : > { %3744 = vmatpush3.msra.mxu1 %v1989_v61 }
 0x3aa   : > { %3745 = vmatprep.subr.mxu1 %v4214_v0 }
 0x3ab   : > { %3746 = vmatpush3.msra.mxu1 %v1988_v63 }
 0x3ac   : > { %3747 = vmatprep.subr.mxu1 %v4214_v0 }
 0x3ad   : > { %3748 = vmatpush3.msra.mxu1 %v1987_v3  ;;  %v2194_v3 = vld [vmem:[#allocation6 + $0x770] sm:$0xff] }
 0x3ae   : > { %3749 = vmatprep.subr.mxu1 %v4214_v0 }
 0x3af   : > { %3750 = vmatpush3.msra.mxu1 %v1986_v44 }
 0x3b0   : > { %3751 = vmatprep.subr.mxu1 %v4214_v0 }
 0x3b1   : > { %3752 = vmatpush3.msra.mxu1 %v1985_v8  ;;  %v2192_v8 = vld [vmem:[#allocation6 + $0x760] sm:$0xff] }
 0x3b2   : > { %3753 = vmatprep.subr.mxu1 %v4214_v0 }
 0x3b3   : > { %3754 = vmatpush3.msra.mxu1 %v1984_v10 }
 0x3b4   : > { %3755 = vmatprep.subr.mxu1 %v4214_v0 }
 0x3b5   : > { %3756 = vmatpush3.msra.mxu1 %v1983_v14  ;;  %v2189_v14 = vld [vmem:[#allocation6 + $0x748] sm:$0xff] }
 0x3b6   : > { %3757 = vmatprep.subr.mxu1 %v4214_v0 }
 0x3b7   : > { %3758 = vmatpush3.msra.mxu1 %v1982_v16  ;;  %v2187_v16 = vld [vmem:[#allocation6 + $0x738] sm:$0xff] }
 0x3b8   : > { %3759 = vmatprep.subr.mxu1 %v4214_v0 }
 0x3b9   : > { %3760 = vmatpush3.msra.mxu1 %v1981_v18  ;;  %v2185_v18 = vld [vmem:[#allocation6 + $0x728] sm:$0xff] }
 0x3ba   : > { %3761 = vmatprep.subr.mxu1 %v4214_v0 }
 0x3bb   : > { %3762 = vmatpush3.msra.mxu1 %v1980_v1  ;;  %v2183_v1 = vld [vmem:[#allocation6 + $0x718] sm:$0xff] }
 0x430   : > { %v3648_v28 = vpop.f32.mrf.mxu0 }
 0x432   : > { %v1754_v30 = vpop.f32.mrf.mxu0 }
 0x434   : > { %v3651_v12 = vpop.f32.mrf.mxu0 }
 0x435   : > { %v2367_v12 = vld [vmem:[#allocation6 + $0x868] sm:$0xff] }
 0x436   : > { %v1764_v35 = vpop.f32.mrf.mxu0 }
 0x43c   : > { %v3610_v25 = vpop.f32.mrf.mxu1 }
 0x43d   : > { %v1760_v29 = vadd.f32 %v3648_v28, %v3610_v25  ;;  %v2350_v28 = vld [vmem:[#allocation6 + $0x7f8] sm:$0xff] }
 0x43e   : > { %v1669_v27 = vpop.f32.mrf.mxu1 }
 0x43f   : > { %v1755_v33 = vadd.f32 %v1754_v30, %v1669_v27  ;;  %v2178_v27 = vld [vmem:[#allocation3 + $0x1a] sm:$0x3]  ;;  %v2369_v30 = vld [vmem:[#allocation6 + $0x878] sm:$0xff] }
 0x440   : > { %v3613_v4 = vpop.f32.mrf.mxu1  ;;  %3813 = vmatprep.subr.mxu1 %v2369_v30 }
 0x441   : > { %v2349_v4 = vld [vmem:[#allocation6 + $0x7f0] sm:$0xff] }
 0x442   : > { %v1679_v31 = vpop.f32.mrf.mxu1 }
 0x443   : > { %v1765_v43 = vadd.f32 %v1764_v35, %v1679_v31  ;;  %v2368_v31 = vld [vmem:[#allocation6 + $0x870] sm:$0xff]  ;;  %v2342_v35 = vld [vmem:[#allocation6 + $0x7b8] sm:$0xff] }
 0x45c   : > { %v3686_v32 = vpop.f32.mrf.mxu1 }
 0x45d   : > { %v1880_v26 = vadd.f32 %v3686_v32, %v1760_v29  ;;  %v2348_v29 = vld [vmem:[#allocation6 + $0x7e8] sm:$0xff]  ;;  %v2347_v32 = vld [vmem:[#allocation6 + $0x7e0] sm:$0xff] }
 0x45e   : > { %v1860_v34 = vpop.f32.mrf.mxu1 }
 0x45f   : > { %v1892_v36 = vadd.f32 %v2809_v13, %v1880_v26  ;;  %v1879_v38 = vadd.f32 %v1860_v34, %v1755_v33  ;;  %v2345_v33 = vld [vmem:[#allocation6 + $0x7d0] sm:$0xff]  ;;  %v2344_v26 = vld [vmem:[#allocation6 + $0x7c8] sm:$0xff]  ;;  %v2343_v34 = vld [vmem:[#allocation6 + $0x7c0] sm:$0xff] }
 0x460   : > { %v3689_v40 = vpop.f32.mrf.mxu1 }
 0x461   : > { %v1912_v41 = vadd.f32 %v4663_v49, %v1892_v36  ;;  %v1891_v42 = vadd.f32 %v2809_v13, %v1879_v38  ;;  %v2341_v36 = vld [vmem:[#allocation6 + $0x7b0] sm:$0xff]  ;;  %v2365_v38 = vld [vmem:[#allocation6 + $0x858] sm:$0xff] }
 0x462   : > { %v1870_v45 = vpop.f32.mrf.mxu1  ;;  %v2364_v40 = vld [vmem:[#allocation6 + $0x850] sm:$0xff] }
 0x463   : > { %vm1925_vm8 = vcmp.ge.f32.partialorder %v1912_v41, 0.0  ;;  %v1929_v46 = vmul.f32 0.1, %v1912_v41  ;;  %v1911_v47 = vadd.f32 %v4656_v37, %v1891_v42  ;;  %v1881_v48 = vadd.f32 %v1870_v45, %v1765_v43  ;;  %v2363_v42 = vld [vmem:[#allocation6 + $0x848] sm:$0xff]  ;;  %v2338_v43 = vld [vmem:[#allocation6 + $0x798] sm:$0xff]  ;;  %v2362_v45 = vld [vmem:[#allocation6 + $0x840] sm:$0xff] }
 0x464   : > { %v2631_v54 = vrot.slane %v1912_v41, 6 }
 0x465   : > { %v1933_v19 = vsel %vm1925_vm8, %v1912_v41, %v1929_v46  ;;  %vm1924_vm11 = vcmp.ge.f32.partialorder %v1911_v47, 0.0  ;;  %v1928_v50 = vmul.f32 0.1, %v1911_v47  ;;  %v1893_v52 = vadd.f32 %v2809_v13, %v1881_v48  ;;  %v2366_v13 = vld [vmem:[#allocation6 + $0x860] sm:$0xff]  ;;  %v2337_v46 = vld [vmem:[#allocation6 + $0x790] sm:$0xff]  ;;  %v2336_v48 = vld [vmem:[#allocation6 + $0x788] sm:$0xff] }
 0x466   : > { %1966 = vst [vmem:[#allocation3 + $0x8] sm:$0xff] %v1933_v19  ;;  %v2630_v55 = vrot.slane %v1911_v47, 6  ;;  %v2339_v41 = vld [vmem:[#allocation6 + $0x7a0] sm:$0xff] }
 0x467   : > { %v1932_v49 = vsel %vm1924_vm11, %v1911_v47, %v1928_v50  ;;  %v1913_v57 = vadd.f32 %v4666_v53, %v1893_v52  ;;  %v2195_v53 = vld [vmem:[#allocation6 + $0x778] sm:$0xff]  ;;  %v2335_v50 = vld [vmem:[#allocation6 + $0x780] sm:$0xff] }
 0x468   : > { %v1961_v56 = vsel %vm1949_vm9, %v1932_v49, 0.0  ;;  %v4720_v58 = vsel %vm2629_vm10, %v2630_v55, %v2631_v54  ;;  %4012 = vmatmul.mubr.msk.f32.vlgmr.msra.gmra.mxu1 %vm1949_vm9, %v1932_v49  ;;  %v2361_v47 = vld [vmem:[#allocation6 + $0x838] sm:$0xff]  ;;  %v2358_v52 = vld [vmem:[#allocation6 + $0x820] sm:$0xff]  ;;  %v2356_v55 = vld [vmem:[#allocation6 + $0x810] sm:$0xff] }
 0x469   : > { %1965 = vst [vmem:[#allocation3] sm:$0xff] %v1961_v56  ;;  %vm1926_vm13 = vcmp.ge.f32.partialorder %v1913_v57, 0.0  ;;  %v1930_v37 = vmul.f32 0.1, %v1913_v57  ;;  %3766 = vmatprep.mubr.msk.f32.mxu1 %vm4215_vm0, %v4214_v0  ;;  %v2633_v59 = vrot.slane %v1913_v57, 6  ;;  %3814 = vmatpush3.msra.mxu1 %v2369_v30  ;;  %v2355_v49 = vld [vmem:[#allocation6 + $0x808] sm:$0xff] }
 0x46a   : > { %3815 = vmatprep.subr.mxu1 %v2368_v31  ;;  %v2354_v56 = vld [vmem:[#allocation6 + $0x800] sm:$0xff] }
 0x46b   : > { %v1934_v60 = vsel %vm1926_vm13, %v1913_v57, %v1930_v37  ;;  %v4726_v61 = vsel %vm2629_vm10, %v2631_v54, %v2633_v59  ;;  %3816 = vmatpush3.msra.mxu1 %v2368_v31  ;;  %v2357_v54 = vld [vmem:[#allocation6 + $0x818] sm:$0xff] }
 0x46c   : > { %v1963_v62 = vsel %vm1955_vm12, %v1934_v60, 0.0  ;;  %3767 = vmatmul.mubr.f32.gmra.mxu1 %v1933_v19  ;;  %3817 = vmatprep.subr.mxu1 %v2367_v12  ;;  %v2360_v19 = vld [vmem:[#allocation6 + $0x830] sm:$0xff]  ;;  %v2538_v57 = vld [vmem:[#allocation6 + $0x8f8] sm:$0xff] }
 0x46d   : > { %1967 = vst [vmem:[#allocation3 + $0x10] sm:$0xff] %v1963_v62  ;;  %3769 = vmatprep.mubr.msk.f32.mxu1 %vm4215_vm0, %v4214_v0  ;;  %3818 = vmatpush3.msra.mxu1 %v2367_v12 }
 0x46e   : > { %3819 = vmatprep.subr.mxu1 %v2366_v13 }
 0x46f   : > { %3820 = vmatpush3.msra.mxu1 %v2366_v13 }
 0x470   : > { %v1996_v63 = vld [vmem:[#allocation3 + $0x5] sm:$0xff]  ;;  %3821 = vmatprep.subr.mxu1 %v2365_v38 }
 0x471   : > { %3723 = vmatmul.mubr.f32.vlgmr.msra.gmra.mxu0 %v1996_v63  ;;  %3822 = vmatpush3.msra.mxu1 %v2365_v38  ;;  %v2535_v38 = vld [vmem:[#allocation6 + $0x8e0] sm:$0xff] }
 0x472   : > { %3773 = vmatpush3.msra.mxu0 %v2195_v53  ;;  %3725 = vmatprep.mubr.msk.f32.mxu0 %vm4215_vm0, %v4214_v0 }
 0x473   : > { %3774 = vmatprep.subr.mxu0 %v4214_v0  ;;  %3823 = vmatprep.subr.mxu1 %v2364_v40 }
 0x474   : > { %3775 = vmatpush3.msra.mxu0 %v2194_v3  ;;  %v1997_v44 = vld [vmem:[#allocation3 + $0xd] sm:$0xff]  ;;  %v1998_v10 = vld [vmem:[#allocation3 + $0x15] sm:$0x3]  ;;  %3824 = vmatpush3.msra.mxu1 %v2364_v40  ;;  %v2533_v40 = vld [vmem:[#allocation6 + $0x8d0] sm:$0xff] }
 0x475   : > { %3776 = vmatprep.subr.mxu0 %v4214_v0  ;;  %v1978_v6 = vld [vmem:[#allocation3 + $0x10] sm:$0x3]  ;;  %3726 = vmatmul.mubr.f32.gmra.mxu0 %v1997_v44  ;;  %v2177_v25 = vld [vmem:[#allocation3 + $0x12] sm:$0xff] }
 0x476   : > { %3770 = vmatmul.mubr.f32.gmra.mxu1 %v1978_v6  ;;  %3777 = vmatpush3.msra.mxu0 %v2193_v5  ;;  %v2176_v24 = vld [vmem:[#allocation3 + $0xa] sm:$0xff] }
 0x477   : > { %3728 = vmatprep.mubr.msk.f32.mxu0 %vm4215_vm0, %v4214_v0  ;;  %3778 = vmatprep.subr.mxu0 %v4214_v0 }
 0x478   : > { %3779 = vmatpush3.msra.mxu0 %v2192_v8  ;;  %3825 = vmatprep.subr.mxu1 %v2363_v42 }
 0x479   : > { %3780 = vmatprep.subr.mxu0 %v4214_v0  ;;  %3729 = vmatmul.mubr.f32.gmra.mxu0 %v1998_v10 }
 0x47a   : > { %3781 = vmatpush3.msra.mxu0 %v2191_v9  ;;  %3804 = vmatprep.mubr.msk.f32.mxu0 %vm4215_vm0, %v4214_v0 }
 0x47b   : > { %3782 = vmatprep.subr.mxu0 %v4214_v0  ;;  %3826 = vmatpush3.msra.mxu1 %v2363_v42  ;;  %v2531_v42 = vld [vmem:[#allocation6 + $0x8c0] sm:$0xff] }
 0x47c   : > { %3783 = vmatpush3.msra.mxu0 %v2190_v11  ;;  %3827 = vmatprep.subr.mxu1 %v2362_v45 }
 0x47d   : > { %3784 = vmatprep.subr.mxu0 %v4214_v0  ;;  %3828 = vmatpush3.msra.mxu1 %v2362_v45  ;;  %v2529_v45 = vld [vmem:[#allocation6 + $0x8b0] sm:$0xff] }
 0x47e   : > { %3785 = vmatpush3.msra.mxu0 %v2189_v14  ;;  %3829 = vmatprep.subr.mxu1 %v2361_v47  ;;  %v2810_v14 = vld [vmem:[#allocation9 + $0x4] ss:$0 sm:$0xff] }
 0x47f   : > { %3786 = vmatprep.subr.mxu0 %v4214_v0  ;;  %3830 = vmatpush3.msra.mxu1 %v2361_v47  ;;  %v2527_v47 = vld [vmem:[#allocation6 + $0x8a0] sm:$0xff] }
 0x480   : > { %3787 = vmatpush3.msra.mxu0 %v2188_v15  ;;  %3831 = vmatprep.subr.mxu1 %v2360_v19 }
 0x481   : > { %3788 = vmatprep.subr.mxu0 %v4214_v0  ;;  %3832 = vmatpush3.msra.mxu1 %v2360_v19  ;;  %v2525_v19 = vld [vmem:[#allocation6 + $0x890] sm:$0xff] }
 0x482   : > { %3789 = vmatpush3.msra.mxu0 %v2187_v16  ;;  %3833 = vmatprep.subr.mxu1 %v2359_v51  ;;  %v2308_v16 = vadd.s32 4294967295, %v4576_v2  ;;  %v2310_v2 = vadd.s32 4294967295, %v4673_v7  ;;  %v2536_v7 = vld [vmem:[#allocation6 + $0x8e8] sm:$0xff] }
 0x483   : > { %3790 = vmatprep.subr.mxu0 %v4214_v0  ;;  %3834 = vmatpush3.msra.mxu1 %v2359_v51  ;;  %v2523_v51 = vld [vmem:[#allocation6 + $0x880] sm:$0xff] }
 0x484   : > { %3791 = vmatpush3.msra.mxu0 %v2186_v17  ;;  %3835 = vmatprep.subr.mxu1 %v2358_v52  ;;  %vm2311_vm14 = vcmp.ge.s32.totalorder %v2308_v16, 0  ;;  %vm2316_vm2 = vcmp.lt.s32.totalorder %v2310_v2, 16 }
 0x485   : > { %3792 = vmatprep.subr.mxu0 %v4214_v0  ;;  %3836 = vmatpush3.msra.mxu1 %v2358_v52 }
 0x486   : > { %3793 = vmatpush3.msra.mxu0 %v2185_v18  ;;  %3837 = vmatprep.subr.mxu1 %v2357_v54 }
 0x487   : > { %3794 = vmatprep.subr.mxu0 %v4214_v0  ;;  %3838 = vmatpush3.msra.mxu1 %v2357_v54 }
 0x488   : > { %3795 = vmatpush3.msra.mxu0 %v2184_v20  ;;  %3839 = vmatprep.subr.mxu1 %v2356_v55 }
 0x489   : > { %3796 = vmatprep.subr.mxu0 %v4214_v0  ;;  %3840 = vmatpush3.msra.mxu1 %v2356_v55 }
 0x48a   : > { %3797 = vmatpush3.msra.mxu0 %v2183_v1  ;;  %3841 = vmatprep.subr.mxu1 %v2355_v49 }
 0x48b   : > { %3798 = vmatprep.subr.mxu0 %v4214_v0  ;;  %3842 = vmatpush3.msra.mxu1 %v2355_v49 }
 0x48c   : > { %3799 = vmatpush3.msra.mxu0 %v2182_v21  ;;  %3843 = vmatprep.subr.mxu1 %v2354_v56 }
 0x48d   : > { %3800 = vmatprep.subr.mxu0 %v4214_v0  ;;  %3844 = vmatpush3.msra.mxu1 %v2354_v56 }
 0x48e   : > { %3801 = vmatpush3.msra.mxu0 %v2181_v22  ;;  %3883 = vmatprep.subr.mxu1 %v2538_v57 }
 0x48f   : > { %3802 = vmatprep.subr.mxu0 %v4214_v0 }
 0x490   : > { %3803 = vmatpush3.msra.mxu0 %v2180_v23 }
 0x491   : > { %3805 = vmatmul.mubr.f32.vlgmr.msra.gmra.mxu0 %v2176_v24  ;;  %3848 = vmatprep.subr.mxu0 %v2350_v28 }
 0x492   : > { %3807 = vmatprep.mubr.msk.f32.mxu0 %vm4215_vm0, %v4214_v0  ;;  %3849 = vmatpush3.msra.mxu0 %v2350_v28 }
 0x493   : > { %3850 = vmatprep.subr.mxu0 %v2349_v4 }
 0x494   : > { %3851 = vmatpush3.msra.mxu0 %v2349_v4 }
 0x495   : > { %3808 = vmatmul.mubr.f32.gmra.mxu0 %v2177_v25  ;;  %3852 = vmatprep.subr.mxu0 %v2348_v29 }
 0x496   : > { %3810 = vmatprep.mubr.msk.f32.mxu0 %vm4215_vm0, %v4214_v0  ;;  %3853 = vmatpush3.msra.mxu0 %v2348_v29  ;;  %v2346_v0 = vld [vmem:[#allocation6 + $0x7d8] sm:$0xff] }
 0x497   : > { %3854 = vmatprep.subr.mxu0 %v2347_v32 }
 0x498   : > { %3855 = vmatpush3.msra.mxu0 %v2347_v32 }
 0x499   : > { %3811 = vmatmul.mubr.f32.gmra.mxu0 %v2178_v27  ;;  %3856 = vmatprep.subr.mxu0 %v2346_v0 }
 0x49a   : > { %3857 = vmatpush3.msra.mxu0 %v2346_v0 }
 0x49b   : > { %3858 = vmatprep.subr.mxu0 %v2345_v33 }
 0x49c   : > { %3859 = vmatpush3.msra.mxu0 %v2345_v33 }
 0x49d   : > { %3860 = vmatprep.subr.mxu0 %v2344_v26 }
 0x49e   : > { %3861 = vmatpush3.msra.mxu0 %v2344_v26 }
 0x49f   : > { %3862 = vmatprep.subr.mxu0 %v2343_v34 }
 0x4a0   : > { %3863 = vmatpush3.msra.mxu0 %v2343_v34 }
 0x4a1   : > { %3864 = vmatprep.subr.mxu0 %v2342_v35 }
 0x4a2   : > { %3865 = vmatpush3.msra.mxu0 %v2342_v35  ;;  %v2537_v35 = vld [vmem:[#allocation6 + $0x8f0] sm:$0xff] }
 0x4a3   : > { %3866 = vmatprep.subr.mxu0 %v2341_v36 }
 0x4a4   : > { %3867 = vmatpush3.msra.mxu0 %v2341_v36 }
 0x4a5   : > { %3868 = vmatprep.subr.mxu0 %v2340_v39 }
 0x4a6   : > { %3869 = vmatpush3.msra.mxu0 %v2340_v39  ;;  %v2534_v39 = vld [vmem:[#allocation6 + $0x8d8] sm:$0xff] }
 0x4a7   : > { %3870 = vmatprep.subr.mxu0 %v2339_v41 }
 0x4a8   : > { %3871 = vmatpush3.msra.mxu0 %v2339_v41  ;;  %v2532_v41 = vld [vmem:[#allocation6 + $0x8c8] sm:$0xff] }
 0x4a9   : > { %3872 = vmatprep.subr.mxu0 %v2338_v43 }
 0x4aa   : > { %3873 = vmatpush3.msra.mxu0 %v2338_v43  ;;  %v2530_v43 = vld [vmem:[#allocation6 + $0x8b8] sm:$0xff] }
 0x4ab   : > { %3874 = vmatprep.subr.mxu0 %v2337_v46 }
 0x4ac   : > { %3875 = vmatpush3.msra.mxu0 %v2337_v46  ;;  %v2528_v46 = vld [vmem:[#allocation6 + $0x8a8] sm:$0xff] }
 0x4ad   : > { %3876 = vmatprep.subr.mxu0 %v2336_v48 }
 0x4ae   : > { %3877 = vmatpush3.msra.mxu0 %v2336_v48  ;;  %v2526_v48 = vld [vmem:[#allocation6 + $0x898] sm:$0xff] }
 0x4af   : > { %3878 = vmatprep.subr.mxu0 %v2335_v50 }
 0x4b0   : > { %3879 = vmatpush3.msra.mxu0 %v2335_v50  ;;  %v2524_v50 = vld [vmem:[#allocation6 + $0x888] sm:$0xff] }
 0x528   : > { %v2162_v37 = vpop.f32.mrf.mxu1 }
 0x52a   : > { %v3765_v59 = vpop.f32.mrf.mxu1 }
 0x52b   : > { %v2811_v59 = vld [vmem:[#allocation9 + $0x5] ss:$0 sm:$0xff] }
 0x52c   : > { %v2167_v60 = vpop.f32.mrf.mxu1 }
 0x52e   : > { %v3768_v62 = vpop.f32.mrf.mxu1 }
 0x531   : > { %v2082_v53 = vpop.f32.mrf.mxu0 }
 0x532   : > { %v2163_v10 = vadd.f32 %v2162_v37, %v2082_v53 }
 0x533   : > { %v3724_v63 = vpop.f32.mrf.mxu0 }
 0x535   : > { %v2087_v3 = vpop.f32.mrf.mxu0 }
 0x536   : > { %v2172_v5 = vpop.f32.mrf.mxu1  ;;  %v2168_v18 = vadd.f32 %v2167_v60, %v2087_v3 }
 0x537   : > { %v3727_v44 = vpop.f32.mrf.mxu0 }
 0x538   : > { %v3771_v6 = vpop.f32.mrf.mxu1 }
 0x539   : > { %v2092_v8 = vpop.f32.mrf.mxu0 }
 0x53a   : > { %v2173_v24 = vadd.f32 %v2172_v5, %v2092_v8 }
 0x53b   : > { %v3730_v9 = vpop.f32.mrf.mxu0 }
 0x551   : > { %v2262_v11 = vpop.f32.mrf.mxu0 }
 0x552   : > { %v2276_v15 = vadd.f32 %v2262_v11, %v2163_v10 }
 0x553   : > { %v3806_v17 = vpop.f32.mrf.mxu0 }
 0x554   : > { %v2287_v20 = vadd.f32 %v2810_v14, %v2276_v15 }
 0x555   : > { %v2267_v1 = vpop.f32.mrf.mxu0 }
 0x556   : > { %vm2291_vm0 = vcmp.ge.f32.partialorder %v2287_v20, 0.0  ;;  %v2294_v21 = vmul.f32 0.1, %v2287_v20  ;;  %v2277_v22 = vadd.f32 %v2267_v1, %v2168_v18 }
 0x557   : > { %v3809_v23 = vpop.f32.mrf.mxu0 }
 0x558   : > { %v2297_v25 = vsel %vm2291_vm0, %v2287_v20, %v2294_v21  ;;  %v2288_v27 = vadd.f32 %v2810_v14, %v2277_v22 }
 0x559   : > { %v2320_v28 = vsel %vm2311_vm14, %v2297_v25, 0.0  ;;  %v2272_v4 = vpop.f32.mrf.mxu0  ;;  %4013 = vmatprep.mubr.msk.f32.mxu0 %vm2311_vm14, %v2297_v25 }
 0x55a   : > { %2323 = vst [vmem:[#allocation3] sm:$0xff] %v2320_v28  ;;  %vm2292_vm15 = vcmp.ge.f32.partialorder %v2288_v27, 0.0  ;;  %v2295_v30 = vmul.f32 0.1, %v2288_v27  ;;  %v2278_v31 = vadd.f32 %v2272_v4, %v2173_v24 }
 0x55b   : > { %v3812_v29 = vpop.f32.mrf.mxu0 }
 0x55c   : > { %v2298_v12 = vsel %vm2292_vm15, %v2288_v27, %v2295_v30  ;;  %v2289_v32 = vadd.f32 %v2810_v14, %v2278_v31 }
 0x55d   : > { %2324 = vst [vmem:[#allocation3 + $0x8] sm:$0xff] %v2298_v12  ;;  %3881 = vmatmul.mubr.f32.vlgmr.msra.gmra.mxu0 %v2298_v12 }
 0x55e   : > { %vm2293_vm1 = vcmp.ge.f32.partialorder %v2289_v32, 0.0  ;;  %v2296_v13 = vmul.f32 0.1, %v2289_v32 }
 0x560   : > { %v2299_v0 = vsel %vm2293_vm1, %v2289_v32, %v2296_v13 }
 0x561   : > { %v2322_v33 = vsel %vm2316_vm2, %v2299_v0, 0.0 }
 0x562   : > { %2325 = vst [vmem:[#allocation3 + $0x10] sm:$0x3] %v2322_v33 }
 0x564   : > { %v2351_v26 = vld [vmem:[#allocation3 + $0x1] sm:$0xff] }
 0x565   : > { %3845 = vmatprep.mubr.f32.mxu1 %v2351_v26  ;;  %v2520_v36 = vld [vmem:[#allocation3 + $0x2] sm:$0xff] }
 0x569   : > { %v2352_v34 = vld [vmem:[#allocation3 + $0x9] sm:$0xff] }
 0x56a   : > { %3846 = vmatmul.mubr.f32.vlgmr.msra.gmra.mxu1 %v2352_v34  ;;  %v2521_v52 = vld [vmem:[#allocation3 + $0xa] sm:$0xff] }
 0x56b   : > { %3884 = vmatpush3.msra.mxu1 %v2538_v57  ;;  %3915 = vmatprep.mubr.f32.mxu1 %v2520_v36 }
 0x56c   : > { %3885 = vmatprep.subr.mxu1 %v2537_v35 }
 0x56d   : > { %3886 = vmatpush3.msra.mxu1 %v2537_v35 }
 0x56e   : > { %3887 = vmatprep.subr.mxu1 %v2536_v7 }
 0x56f   : > { %3888 = vmatpush3.msra.mxu1 %v2536_v7 }
 0x570   : > { %3889 = vmatprep.subr.mxu1 %v2535_v38 }
 0x571   : > { %3890 = vmatpush3.msra.mxu1 %v2535_v38 }
 0x572   : > { %3891 = vmatprep.subr.mxu1 %v2534_v39 }
 0x573   : > { %3892 = vmatpush3.msra.mxu1 %v2534_v39 }
 0x574   : > { %3893 = vmatprep.subr.mxu1 %v2533_v40 }
 0x575   : > { %3894 = vmatpush3.msra.mxu1 %v2533_v40 }
 0x576   : > { %3895 = vmatprep.subr.mxu1 %v2532_v41 }
 0x577   : > { %3896 = vmatpush3.msra.mxu1 %v2532_v41 }
 0x578   : > { %3897 = vmatprep.subr.mxu1 %v2531_v42 }
 0x579   : > { %3898 = vmatpush3.msra.mxu1 %v2531_v42 }
 0x57a   : > { %3899 = vmatprep.subr.mxu1 %v2530_v43 }
 0x57b   : > { %3900 = vmatpush3.msra.mxu1 %v2530_v43 }
 0x57c   : > { %3901 = vmatprep.subr.mxu1 %v2529_v45 }
 0x57d   : > { %3902 = vmatpush3.msra.mxu1 %v2529_v45 }
 0x57e   : > { %3903 = vmatprep.subr.mxu1 %v2528_v46 }
 0x57f   : > { %3904 = vmatpush3.msra.mxu1 %v2528_v46 }
 0x580   : > { %3905 = vmatprep.subr.mxu1 %v2527_v47 }
 0x581   : > { %3906 = vmatpush3.msra.mxu1 %v2527_v47 }
 0x582   : > { %3907 = vmatprep.subr.mxu1 %v2526_v48 }
 0x583   : > { %3908 = vmatpush3.msra.mxu1 %v2526_v48 }
 0x584   : > { %3909 = vmatprep.subr.mxu1 %v2525_v19 }
 0x585   : > { %3910 = vmatpush3.msra.mxu1 %v2525_v19 }
 0x586   : > { %3911 = vmatprep.subr.mxu1 %v2524_v50 }
 0x587   : > { %3912 = vmatpush3.msra.mxu1 %v2524_v50 }
 0x588   : > { %3913 = vmatprep.subr.mxu1 %v2523_v51 }
 0x589   : > { %3914 = vmatpush3.msra.mxu1 %v2523_v51 }
 0x58a   : > { %3916 = vmatmul.mubr.f32.vlgmr.msra.gmra.mxu1 %v2521_v52 }
 0x61d   : > { %v3882_v55 = vpop.f32.mrf.mxu0 }
 0x61f   : > { %v2511_v57 = vpop.f32.mrf.mxu0 }
 0x62a   : > { %v3847_v54 = vpop.f32.mrf.mxu1 }
 0x62b   : > { %v2517_v56 = vadd.f32 %v3882_v55, %v3847_v54 }
 0x62c   : > { %v2436_v49 = vpop.f32.mrf.mxu1 }
 0x62d   : > { %v2512_v60 = vadd.f32 %v2511_v57, %v2436_v49 }
 0x64a   : > { %v3917_v37 = vpop.f32.mrf.mxu1 }
 0x64b   : > { %v2615_v62 = vadd.f32 %v3917_v37, %v2517_v56 }
 0x64c   : > { %v2605_v53 = vpop.f32.mrf.mxu1 }
 0x64d   : > { %v2625_v63 = vadd.f32 %v2811_v59, %v2615_v62  ;;  %v2614_v3 = vadd.f32 %v2605_v53, %v2512_v60 }
 0x64f   : > { %v2638_v5 = vadd.f32 %v4726_v61, %v2625_v63  ;;  %v2624_v44 = vadd.f32 %v2811_v59, %v2614_v3 }
 0x651   : > { %2640 = vst [vmem:[%s4418_s2 + $0x8] sm:$0xff] %v2638_v5  ;;  %v2637_v6 = vadd.f32 %v4720_v58, %v2624_v44 }
 0x653   : > { %2639 = vst [vmem:[%s4418_s2] sm:$0xff] %v2637_v6 }
 0x654   : > { %4132 = shalt.err (!%p4129_p5)
}
 0x655   : > { %s4133_s4 = scalar_lea.hbm %s4763_s8, 256  ;;  %s4137_s26 = scalar_lea.hbm %s4820_s3, 512 }
 0x656   : > { %p4134_p3 = scmp.ne.s32.totalorder %s4763_s8, %s4133_s4  ;;  %p4138_p13 = scmp.lt.s32.totalorder %s4763_s8, %s4820_s3 }
 0x657   : > { %p4139_p0 = scmp.lt.s32.totalorder %s4137_s26, %s4133_s4 }
 0x658   : > { %p4135_p4 = pnand %p4134_p3, %p4842_p7 }
 0x659   : > { %p4140_p6 = por %p4139_p0, %p4138_p13 }
 0x65a   : > { %p4136_p8 = pneg %p4135_p4 }
 0x65c   : > { %p4141_p11 = pnand %p4140_p6, %p4136_p8 }
 0x65e   : > { %4144 = shalt.err (!%p4141_p11)
}
 0x65f   : > { %s4217_s18 = smov 128   ;;  %s4218_s21 = smov 8  }
 0x660   : > { %3928 = dma.vmem_to_hbm [thread:$0]  (%p4842_p7), %s4765_s16, 256, %s4763_s8, %s4772_s15, %s4217_s18, %s4217_s18, %s4218_s21  }
 0x661 PF: > { %p3945_p9 = scmp.ge.s32.totalorder %s4205_s17, 2  ;;  %s2673_s5 = sand.u32 1, %s4185_s12  }
 0x662   : > { %p4843_p12 = scmp.ne.s32.totalorder %s4832_s24, 0  ;;  %s2674_s23 = scalar_lea.sflag [#allocation8], %s2673_s5 }
 0x664   : > { %p3938_p1 = pnand %p3945_p9, %p4843_p12 }
 0x666   : > { %p3939_p10 = pneg %p3938_p1 }
 0x668   : > { %4180 = dma.done.wait (%p3939_p10), %s2674_s23, 256  }
 0x669   : > { %4182 = vsyncadd (%p3939_p10), %s2674_s23, 4294967040  ;;  %s18_s17 = sadd.s32 1, %s4205_s17   ;;  %s4844_s15 = sld [smem:[#allocation24_spill]] }
 0x66a   : > { %p15_p2 = scmp.ge.s32.totalorder %s18_s17, 4   ;;  %s4845_s16 = sld [smem:[#allocation25_spill]] }
 0x66b   : > { %s4846_s12 = smov %s4189_s13  ;;  %s4847_s13 = smov %s4193_s14 }
 0x66c   : > { %s4848_s14 = smov %s4292_s25  ;;  %17 = sbr.rel (!%p15_p2) target bundleno = 9 (0x9), region = 167 }
 0x671   :  { %2679 = vsyncpa [#allocation7], 1 }
 0x672   :  { %2681 = vsyncpa [#allocation7 + $0x1], 1 }
 0x673   :  { %2682 = vsyncpa [#allocation10], 1 }
 0x674   :  { %2683 = vsyncpa [#allocation8], 1 }
 0x675   :  { %2685 = vsyncpa [#allocation8 + $0x1], 1 }
 0x676   :  { %2686 = vsyncmov [#allocation5] }
 0x679   :  { %s2687_s22 = vpop.sfrf %2686 }
 0x67a   :  { %p2817_p7 = scmp.ne.s32.totalorder %s2687_s22, 0 }
 0x67c   :  { %2691 = shalt.err (%p2817_p7)  }
 0x67d   :  { %2693 = vsyncmov [#allocation5 + $0x1] }
 0x680   :  { %s2694_s24 = vpop.sfrf %2693 }
 0x681   :  { %p2818_p5 = scmp.ne.s32.totalorder %s2694_s24, 0 }
 0x683   :  { %2698 = shalt.err (%p2818_p5)  }

</bundles_post_ra>
